<compile_context>
chip_gen: v7x
topology: tpu7x:2x2x1
jax: 0.10.0
libtpu: 0.0.40
codegen_flags: <defaults>
</compile_context>

<pallas_src>
import jax
import jax.numpy as jnp
import numpy as np
from jax.experimental import pallas as pl
from jax.experimental.pallas import tpu as pltpu


# ---------------------------------------------------------------------------
# Pallas kernels
# ---------------------------------------------------------------------------
def _matmul_bias_relu_kernel(x_ref, w_ref, b_ref, o_ref):
    """o = relu(x @ w + b) for one N-tile.  x/w are bf16, accumulate in f32."""
    acc = jnp.dot(x_ref[...], w_ref[...], preferred_element_type=jnp.float32)
    o_ref[...] = jnp.maximum(acc + b_ref[...], 0.0).astype(o_ref.dtype)


def _conv_bn_relu_pool_kernel(p00, p01, p10, p11, w_ref, b_ref, o_ref):
    """Fused conv3x3 (+ folded BatchNorm) + ReLU + 2x2 maxpool.

    p?? : transposed im2col matrix of one pooling phase, shape (9*Cin, M)
    w   : (Cout, 9*Cin) folded conv*BN weights
    b   : (Cout, 1) folded bias
    out : (Cout, M)   (M = B*Ho*Wo, lane-dense)
    relu(max(.)) == max(relu(.)) since ReLU is monotone.
    """
    w = w_ref[...]
    b = b_ref[...]

    def phase(p_ref):
        return jnp.dot(w, p_ref[...], preferred_element_type=jnp.float32) + b

    y = jnp.maximum(jnp.maximum(phase(p00), phase(p01)),
                    jnp.maximum(phase(p10), phase(p11)))
    o_ref[...] = jnp.maximum(y, 0.0).astype(o_ref.dtype)


# ---------------------------------------------------------------------------
# Pallas wrappers
# ---------------------------------------------------------------------------
def linear_relu_pallas(x, w, b, *, tn=512):
    """relu(x @ w + b); x:(M,K) f32, w:(K,N) (f32 or bf16), b:(N,) -> (M,N) f32.

    Weights are streamed in bf16; N is padded to a multiple of 128 so the
    output store is lane-dense; the N-tile axis is "parallel" (independent
    tiles, lets v7x split the weight stream across both TensorCores).
    """
    M, K = x.shape
    Kw, N = w.shape
    assert Kw == K

    Np = ((N + 127) // 128) * 128          # lane-dense output padding
    if Np != N:
        w = jnp.pad(w, ((0, 0), (0, Np - N)))
        b = jnp.pad(b, ((0, Np - N),))

    tn = min(tn, Np)
    if Np % tn != 0:
        tn = 128                           # Np is always a multiple of 128

    xb = x.astype(jnp.bfloat16)
    wb = w.astype(jnp.bfloat16)            # no-op if already stored in bf16
    b2 = b.reshape(1, Np).astype(jnp.float32)

    out = pl.pallas_call(
        _matmul_bias_relu_kernel,
        out_shape=jax.ShapeDtypeStruct((M, Np), jnp.float32),
        grid=(Np // tn,),
        in_specs=[
            pl.BlockSpec((M, K), lambda j: (0, 0)),    # resident activations
            pl.BlockSpec((K, tn), lambda j: (0, j)),   # bf16 weight N-tile
            pl.BlockSpec((1, tn), lambda j: (0, j)),   # bias N-tile
        ],
        out_specs=pl.BlockSpec((M, tn), lambda j: (0, j)),
        compiler_params=pltpu.CompilerParams(
            dimension_semantics=("parallel",),         # independent N tiles
        ),
    )(xb, wb, b2)

    return out[:, :N] if Np != N else out


def conv_bn_relu_pool_pallas(x_nhwc, w_hwio, b):
    """Fused 3x3 conv (stride 1, pad 1) + (folded-BN) bias + ReLU + 2x2 maxpool.

    Input NHWC (B,H,W,Cin); returns (Cout, B, H//2, W//2).
    The im2col extraction is XLA glue (tiny); matmul/bias/ReLU/pool run in one
    Pallas kernel and only the pooled, lane-dense result is written to HBM.
    """
    B, H, W, Cin = x_nhwc.shape
    Cout = w_hwio.shape[-1]
    Ho, Wo = H // 2, W // 2
    M = B * Ho * Wo

    xpad = jnp.pad(x_nhwc, ((0, 0), (1, 1), (1, 1), (0, 0)))
    # taps[t=(dh*3+dw), b, i, j, cin] = xpad[b, i+dh, j+dw, cin]
    taps = jnp.stack(
        [xpad[:, dh:dh + H, dw:dw + W, :] for dh in range(3) for dw in range(3)],
        axis=0,
    )                                                   # (9, B, H, W, Cin)

    def phase(ph, pw):                                  # transposed im2col
        t = taps[:, :, ph::2, pw::2, :]                 # (9, B, Ho, Wo, Cin)
        t = jnp.transpose(t, (0, 4, 1, 2, 3))           # (9, Cin, B, Ho, Wo)
        return t.reshape(9 * Cin, M)

    phases = [phase(ph, pw) for ph in range(2) for pw in range(2)]
    wmat = jnp.transpose(w_hwio, (3, 0, 1, 2)).reshape(Cout, 9 * Cin)
    bcol = b.reshape(Cout, 1)

    out = pl.pallas_call(
        _conv_bn_relu_pool_kernel,
        out_shape=jax.ShapeDtypeStruct((Cout, M), x_nhwc.dtype),
        grid=(1,),
        in_specs=[pl.BlockSpec((9 * Cin, M), lambda i: (0, 0))] * 4 + [
            pl.BlockSpec((Cout, 9 * Cin), lambda i: (0, 0)),
            pl.BlockSpec((Cout, 1), lambda i: (0, 0)),
        ],
        out_specs=pl.BlockSpec((Cout, M), lambda i: (0, 0)),
        compiler_params=pltpu.CompilerParams(
            dimension_semantics=("arbitrary",),
        ),
    )(*phases, wmat, bcol)

    return out.reshape(Cout, B, Ho, Wo)


# ---------------------------------------------------------------------------
# Model
# ---------------------------------------------------------------------------
def _fold_bn(w_hwio, b, gamma, beta, mean, var, eps=1e-5):
    """Fold eval-mode BatchNorm into conv weights/bias (per output channel)."""
    scale = gamma / jnp.sqrt(var + eps)          # (Cout,)
    return w_hwio * scale, (b - mean) * scale + beta


def init_params(key, n_chans1):
    """PyTorch-default-style init; BN stats randomized so the BN path is tested.
    FC weights are stored in bf16 (the format they are streamed in)."""
    c2 = n_chans1 // 2

    def conv_init(k, cin, cout):
        bound = 1.0 / np.sqrt(cin * 9)
        kw, kb = jax.random.split(k)
        w = jax.random.uniform(kw, (3, 3, cin, cout), jnp.float32, -bound, bound)
        b = jax.random.uniform(kb, (cout,), jnp.float32, -bound, bound)
        return w, b

    def bn_init(k, c):
        k1, k2, k3, k4 = jax.random.split(k, 4)
        gamma = jax.random.uniform(k1, (c,), jnp.float32, 0.5, 1.5)
        beta = jax.random.uniform(k2, (c,), jnp.float32, -0.1, 0.1)
        mean = jax.random.uniform(k3, (c,), jnp.float32, -0.1, 0.1)
        var = jax.random.uniform(k4, (c,), jnp.float32, 0.5, 1.5)
        return gamma, beta, mean, var

    def lin_init(k, fin, fout):
        bound = 1.0 / np.sqrt(fin)
        kw, kb = jax.random.split(k)
        w = jax.random.uniform(kw, (fin, fout), jnp.float32, -bound, bound)
        b = jax.random.uniform(kb, (fout,), jnp.float32, -bound, bound)
        return w.astype(jnp.bfloat16), b

    k1, k2, k3, k4, k5, k6, k7 = jax.random.split(key, 7)
    w1, b1 = conv_init(k1, 3, n_chans1)
    g1, beta1, m1, v1 = bn_init(k2, n_chans1)
    w2, b2 = conv_init(k3, n_chans1, c2)
    g2, beta2, m2, v2 = bn_init(k4, c2)
    wf1, bf1 = lin_init(k5, 8 * 8 * c2, 4096)
    wf2, bf2 = lin_init(k6, 4096, 2048)
    wf3, bf3 = lin_init(k7, 2048, 100)
    return dict(w1=w1, b1=b1, g1=g1, beta1=beta1, m1=m1, v1=v1,
                w2=w2, b2=b2, g2=g2, beta2=beta2, m2=m2, v2=v2,
                wf1=wf1, bf1=bf1, wf2=wf2, bf2=bf2, wf3=wf3, bf3=bf3)


@jax.jit
def cnn_batchnorm_relu_forward(x_nchw, p):
    """Pallas implementation of CNNBatchNorm_ReLU.forward (eval-mode BN).
    x: (B, 3, 32, 32) NCHW."""
    B = x_nchw.shape[0]
    x = jnp.transpose(x_nchw, (0, 2, 3, 1))                       # NCHW -> NHWC

    w1, b1 = _fold_bn(p["w1"], p["b1"], p["g1"], p["beta1"], p["m1"], p["v1"])
    w2, b2 = _fold_bn(p["w2"], p["b2"], p["g2"], p["beta2"], p["m2"], p["v2"])

    y1 = conv_bn_relu_pool_pallas(x, w1, b1)                      # (C1, B,16,16)
    x2 = jnp.transpose(y1, (1, 2, 3, 0))                          # NHWC for conv2
    y2 = conv_bn_relu_pool_pallas(x2, w2, b2)                     # (C2, B, 8, 8)

    # torch's out.view(-1, 8*8*C2) flattens in NCHW (c-major) order:
    flat = jnp.transpose(y2, (1, 0, 2, 3)).reshape(B, -1)         # (B, C2*64)

    h = linear_relu_pallas(flat, p["wf1"], p["bf1"])
    h = linear_relu_pallas(h, p["wf2"], p["bf2"])
    h = linear_relu_pallas(h, p["wf3"], p["bf3"])                 # pads 100->128 internally
    return h


@jax.jit
def reference_forward(x_nchw, p):
    """Pure-JAX reference (XLA conv / reduce_window, eval-mode BN) for checking."""
    eps = 1e-5
    x = jnp.transpose(x_nchw, (0, 2, 3, 1))

    def conv_bn_relu(x, w, b, g, beta, mean, var):
        y = jax.lax.conv_general_dilated(
            x, w, (1, 1), "SAME",
            dimension_numbers=("NHWC", "HWIO", "NHWC")) + b
        y = (y - mean) / jnp.sqrt(var + eps) * g + beta
        return jnp.maximum(y, 0.0)

    def pool(x):
        return jax.lax.reduce_window(
            x, -jnp.inf, jax.lax.max, (1, 2, 2, 1), (1, 2, 2, 1), "VALID")

    y = pool(conv_bn_relu(x, p["w1"], p["b1"], p["g1"], p["beta1"], p["m1"], p["v1"]))
    y = pool(conv_bn_relu(y, p["w2"], p["b2"], p["g2"], p["beta2"], p["m2"], p["v2"]))
    B = y.shape[0]
    flat = jnp.transpose(y, (0, 3, 1, 2)).reshape(B, -1)
    h = jnp.maximum(flat @ p["wf1"].astype(jnp.float32) + p["bf1"], 0.0)
    h = jnp.maximum(h @ p["wf2"].astype(jnp.float32) + p["bf2"], 0.0)
    h = jnp.maximum(h @ p["wf3"].astype(jnp.float32) + p["bf3"], 0.0)
    return h


if __name__ == "__main__":
    n_chans1 = 16                       # fc1 input = 8*8*n_chans1//2 = 512
    key = jax.random.PRNGKey(0)
    kx, kp = jax.random.split(key)
    x = jax.random.normal(kx, (2, 3, 32, 32), jnp.float32)   # NCHW like PyTorch
    params = init_params(kp, n_chans1)

    out = jax.block_until_ready(cnn_batchnorm_relu_forward(x, params))
    assert out.shape == (2, 100), out.shape

    ref = jax.block_until_ready(reference_forward(x, params))
    np.testing.assert_allclose(np.asarray(out), np.asarray(ref),
                               rtol=2e-2, atol=2e-2)

    print("KERNEL_OK")
</pallas_src>

<mosaic_0001>
module attributes {stable_mosaic.version = 11 : i64} {
  func.func @_conv_bn_relu_pool_kernel(%arg0: i32, %arg1: memref<27x512xf32, #tpu.memory_space<vmem>>, %arg2: memref<27x512xf32, #tpu.memory_space<vmem>>, %arg3: memref<27x512xf32, #tpu.memory_space<vmem>>, %arg4: memref<27x512xf32, #tpu.memory_space<vmem>>, %arg5: memref<16x27xf32, #tpu.memory_space<vmem>>, %arg6: memref<16x1xf32, #tpu.memory_space<vmem>>, %arg7: memref<16x512xf32, #tpu.memory_space<vmem>>) attributes {dimension_semantics = [#tpu.dimension_semantics<arbitrary>], iteration_bounds = array<i64: 1>, scalar_prefetch = 0 : i64, scratch_operands = 0 : i64, tpu.core_type = #tpu.core_type<tc>, window_params = [{pipeline_mode = #tpu.pipeline_mode<synchronous>, transform_indices = @transform_0, window_bounds = array<i64: 27, 512>}, {pipeline_mode = #tpu.pipeline_mode<synchronous>, transform_indices = @transform_1, window_bounds = array<i64: 27, 512>}, {pipeline_mode = #tpu.pipeline_mode<synchronous>, transform_indices = @transform_2, window_bounds = array<i64: 27, 512>}, {pipeline_mode = #tpu.pipeline_mode<synchronous>, transform_indices = @transform_3, window_bounds = array<i64: 27, 512>}, {pipeline_mode = #tpu.pipeline_mode<synchronous>, transform_indices = @transform_4, window_bounds = array<i64: 16, 27>}, {pipeline_mode = #tpu.pipeline_mode<synchronous>, transform_indices = @transform_5, window_bounds = array<i64: 16, 1>}, {pipeline_mode = #tpu.pipeline_mode<synchronous>, transform_indices = @transform_6, window_bounds = array<i64: 16, 512>}]} {
    %c0 = arith.constant 0 : index
    %c0_0 = arith.constant 0 : index
    %0 = vector.load %arg5[%c0, %c0_0] : memref<16x27xf32, #tpu.memory_space<vmem>>, vector<16x27xf32>
    %c0_1 = arith.constant 0 : index
    %c0_2 = arith.constant 0 : index
    %1 = vector.load %arg6[%c0_1, %c0_2] : memref<16x1xf32, #tpu.memory_space<vmem>>, vector<16x1xf32>
    %c0_3 = arith.constant 0 : index
    %c0_4 = arith.constant 0 : index
    %2 = vector.load %arg1[%c0_3, %c0_4] : memref<27x512xf32, #tpu.memory_space<vmem>>, vector<27x512xf32>
    %cst = arith.constant dense<0.000000e+00> : vector<16x512xf32>
    %3 = tpu.matmul %0, %2, %cst {dimension_numbers = #tpu.dot_dimension_numbers<[1], [0], [0], [1], [0, 0, 1, 1], [], []>} : vector<16x27xf32>, vector<27x512xf32>, vector<16x512xf32> -> vector<16x512xf32>
    %4 = vector.broadcast %1 : vector<16x1xf32> to vector<16x512xf32>
    %5 = arith.addf %3, %4 : vector<16x512xf32>
    %c0_5 = arith.constant 0 : index
    %c0_6 = arith.constant 0 : index
    %6 = vector.load %arg2[%c0_5, %c0_6] : memref<27x512xf32, #tpu.memory_space<vmem>>, vector<27x512xf32>
    %cst_7 = arith.constant dense<0.000000e+00> : vector<16x512xf32>
    %7 = tpu.matmul %0, %6, %cst_7 {dimension_numbers = #tpu.dot_dimension_numbers<[1], [0], [0], [1], [0, 0, 1, 1], [], []>} : vector<16x27xf32>, vector<27x512xf32>, vector<16x512xf32> -> vector<16x512xf32>
    %8 = vector.broadcast %1 : vector<16x1xf32> to vector<16x512xf32>
    %9 = arith.addf %7, %8 : vector<16x512xf32>
    %10 = arith.maximumf %5, %9 : vector<16x512xf32>
    %c0_8 = arith.constant 0 : index
    %c0_9 = arith.constant 0 : index
    %11 = vector.load %arg3[%c0_8, %c0_9] : memref<27x512xf32, #tpu.memory_space<vmem>>, vector<27x512xf32>
    %cst_10 = arith.constant dense<0.000000e+00> : vector<16x512xf32>
    %12 = tpu.matmul %0, %11, %cst_10 {dimension_numbers = #tpu.dot_dimension_numbers<[1], [0], [0], [1], [0, 0, 1, 1], [], []>} : vector<16x27xf32>, vector<27x512xf32>, vector<16x512xf32> -> vector<16x512xf32>
    %13 = vector.broadcast %1 : vector<16x1xf32> to vector<16x512xf32>
    %14 = arith.addf %12, %13 : vector<16x512xf32>
    %c0_11 = arith.constant 0 : index
    %c0_12 = arith.constant 0 : index
    %15 = vector.load %arg4[%c0_11, %c0_12] : memref<27x512xf32, #tpu.memory_space<vmem>>, vector<27x512xf32>
    %cst_13 = arith.constant dense<0.000000e+00> : vector<16x512xf32>
    %16 = tpu.matmul %0, %15, %cst_13 {dimension_numbers = #tpu.dot_dimension_numbers<[1], [0], [0], [1], [0, 0, 1, 1], [], []>} : vector<16x27xf32>, vector<27x512xf32>, vector<16x512xf32> -> vector<16x512xf32>
    %17 = vector.broadcast %1 : vector<16x1xf32> to vector<16x512xf32>
    %18 = arith.addf %16, %17 : vector<16x512xf32>
    %19 = arith.maximumf %14, %18 : vector<16x512xf32>
    %20 = arith.maximumf %10, %19 : vector<16x512xf32>
    %cst_14 = arith.constant 0.000000e+00 : f32
    %21 = vector.broadcast %cst_14 : f32 to vector<16x512xf32>
    %22 = arith.maximumf %20, %21 : vector<16x512xf32>
    %c0_15 = arith.constant 0 : index
    %c0_16 = arith.constant 0 : index
    %23 = vector.load %arg7[%c0_15, %c0_16] : memref<16x512xf32, #tpu.memory_space<vmem>>, vector<16x512xf32>
    tpu.vector_store %arg7[%c0_15, %c0_16], %22 {strides = array<i32>} : memref<16x512xf32, #tpu.memory_space<vmem>>, vector<16x512xf32>,
    return
  }
  func.func @transform_0(%arg0: i32) -> (i32, i32) {
    %c0_i32 = arith.constant 0 : i32
    %c0_i32_0 = arith.constant 0 : i32
    %c0_i32_1 = arith.constant 0 : i32
    return %c0_i32, %c0_i32_0 : i32, i32
  }
  func.func @transform_1(%arg0: i32) -> (i32, i32) {
    %c0_i32 = arith.constant 0 : i32
    %c0_i32_0 = arith.constant 0 : i32
    %c0_i32_1 = arith.constant 0 : i32
    return %c0_i32, %c0_i32_0 : i32, i32
  }
  func.func @transform_2(%arg0: i32) -> (i32, i32) {
    %c0_i32 = arith.constant 0 : i32
    %c0_i32_0 = arith.constant 0 : i32
    %c0_i32_1 = arith.constant 0 : i32
    return %c0_i32, %c0_i32_0 : i32, i32
  }
  func.func @transform_3(%arg0: i32) -> (i32, i32) {
    %c0_i32 = arith.constant 0 : i32
    %c0_i32_0 = arith.constant 0 : i32
    %c0_i32_1 = arith.constant 0 : i32
    return %c0_i32, %c0_i32_0 : i32, i32
  }
  func.func @transform_4(%arg0: i32) -> (i32, i32) {
    %c0_i32 = arith.constant 0 : i32
    %c0_i32_0 = arith.constant 0 : i32
    %c0_i32_1 = arith.constant 0 : i32
    return %c0_i32, %c0_i32_0 : i32, i32
  }
  func.func @transform_5(%arg0: i32) -> (i32, i32) {
    %c0_i32 = arith.constant 0 : i32
    %c0_i32_0 = arith.constant 0 : i32
    %c0_i32_1 = arith.constant 0 : i32
    return %c0_i32, %c0_i32_0 : i32, i32
  }
  func.func @transform_6(%arg0: i32) -> (i32, i32) {
    %c0_i32 = arith.constant 0 : i32
    %c0_i32_0 = arith.constant 0 : i32
    %c0_i32_1 = arith.constant 0 : i32
    return %c0_i32, %c0_i32_0 : i32, i32
  }
}

module attributes {stable_mosaic.version = 11 : i64} {
  func.func @_conv_bn_relu_pool_kernel(%arg0: i32, %arg1: memref<144x128xf32, #tpu.memory_space<vmem>>, %arg2: memref<144x128xf32, #tpu.memory_space<vmem>>, %arg3: memref<144x128xf32, #tpu.memory_space<vmem>>, %arg4: memref<144x128xf32, #tpu.memory_space<vmem>>, %arg5: memref<8x144xf32, #tpu.memory_space<vmem>>, %arg6: memref<8x1xf32, #tpu.memory_space<vmem>>, %arg7: memref<8x128xf32, #tpu.memory_space<vmem>>) attributes {dimension_semantics = [#tpu.dimension_semantics<arbitrary>], iteration_bounds = array<i64: 1>, scalar_prefetch = 0 : i64, scratch_operands = 0 : i64, tpu.core_type = #tpu.core_type<tc>, window_params = [{pipeline_mode = #tpu.pipeline_mode<synchronous>, transform_indices = @transform_0, window_bounds = array<i64: 144, 128>}, {pipeline_mode = #tpu.pipeline_mode<synchronous>, transform_indices = @transform_1, window_bounds = array<i64: 144, 128>}, {pipeline_mode = #tpu.pipeline_mode<synchronous>, transform_indices = @transform_2, window_bounds = array<i64: 144, 128>}, {pipeline_mode = #tpu.pipeline_mode<synchronous>, transform_indices = @transform_3, window_bounds = array<i64: 144, 128>}, {pipeline_mode = #tpu.pipeline_mode<synchronous>, transform_indices = @transform_4, window_bounds = array<i64: 8, 144>}, {pipeline_mode = #tpu.pipeline_mode<synchronous>, transform_indices = @transform_5, window_bounds = array<i64: 8, 1>}, {pipeline_mode = #tpu.pipeline_mode<synchronous>, transform_indices = @transform_6, window_bounds = array<i64: 8, 128>}]} {
    %c0 = arith.constant 0 : index
    %c0_0 = arith.constant 0 : index
    %0 = vector.load %arg5[%c0, %c0_0] : memref<8x144xf32, #tpu.memory_space<vmem>>, vector<8x144xf32>
    %c0_1 = arith.constant 0 : index
    %c0_2 = arith.constant 0 : index
    %1 = vector.load %arg6[%c0_1, %c0_2] : memref<8x1xf32, #tpu.memory_space<vmem>>, vector<8x1xf32>
    %c0_3 = arith.constant 0 : index
    %c0_4 = arith.constant 0 : index
    %2 = vector.load %arg1[%c0_3, %c0_4] : memref<144x128xf32, #tpu.memory_space<vmem>>, vector<144x128xf32>
    %cst = arith.constant dense<0.000000e+00> : vector<8x128xf32>
    %3 = tpu.matmul %0, %2, %cst {dimension_numbers = #tpu.dot_dimension_numbers<[1], [0], [0], [1], [0, 0, 1, 1], [], []>} : vector<8x144xf32>, vector<144x128xf32>, vector<8x128xf32> -> vector<8x128xf32>
    %4 = vector.broadcast %1 : vector<8x1xf32> to vector<8x128xf32>
    %5 = arith.addf %3, %4 : vector<8x128xf32>
    %c0_5 = arith.constant 0 : index
    %c0_6 = arith.constant 0 : index
    %6 = vector.load %arg2[%c0_5, %c0_6] : memref<144x128xf32, #tpu.memory_space<vmem>>, vector<144x128xf32>
    %cst_7 = arith.constant dense<0.000000e+00> : vector<8x128xf32>
    %7 = tpu.matmul %0, %6, %cst_7 {dimension_numbers = #tpu.dot_dimension_numbers<[1], [0], [0], [1], [0, 0, 1, 1], [], []>} : vector<8x144xf32>, vector<144x128xf32>, vector<8x128xf32> -> vector<8x128xf32>
    %8 = vector.broadcast %1 : vector<8x1xf32> to vector<8x128xf32>
    %9 = arith.addf %7, %8 : vector<8x128xf32>
    %10 = arith.maximumf %5, %9 : vector<8x128xf32>
    %c0_8 = arith.constant 0 : index
    %c0_9 = arith.constant 0 : index
    %11 = vector.load %arg3[%c0_8, %c0_9] : memref<144x128xf32, #tpu.memory_space<vmem>>, vector<144x128xf32>
    %cst_10 = arith.constant dense<0.000000e+00> : vector<8x128xf32>
    %12 = tpu.matmul %0, %11, %cst_10 {dimension_numbers = #tpu.dot_dimension_numbers<[1], [0], [0], [1], [0, 0, 1, 1], [], []>} : vector<8x144xf32>, vector<144x128xf32>, vector<8x128xf32> -> vector<8x128xf32>
    %13 = vector.broadcast %1 : vector<8x1xf32> to vector<8x128xf32>
    %14 = arith.addf %12, %13 : vector<8x128xf32>
    %c0_11 = arith.constant 0 : index
    %c0_12 = arith.constant 0 : index
    %15 = vector.load %arg4[%c0_11, %c0_12] : memref<144x128xf32, #tpu.memory_space<vmem>>, vector<144x128xf32>
    %cst_13 = arith.constant dense<0.000000e+00> : vector<8x128xf32>
    %16 = tpu.matmul %0, %15, %cst_13 {dimension_numbers = #tpu.dot_dimension_numbers<[1], [0], [0], [1], [0, 0, 1, 1], [], []>} : vector<8x144xf32>, vector<144x128xf32>, vector<8x128xf32> -> vector<8x128xf32>
    %17 = vector.broadcast %1 : vector<8x1xf32> to vector<8x128xf32>
    %18 = arith.addf %16, %17 : vector<8x128xf32>
    %19 = arith.maximumf %14, %18 : vector<8x128xf32>
    %20 = arith.maximumf %10, %19 : vector<8x128xf32>
    %cst_14 = arith.constant 0.000000e+00 : f32
    %21 = vector.broadcast %cst_14 : f32 to vector<8x128xf32>
    %22 = arith.maximumf %20, %21 : vector<8x128xf32>
    %c0_15 = arith.constant 0 : index
    %c0_16 = arith.constant 0 : index
    %23 = vector.load %arg7[%c0_15, %c0_16] : memref<8x128xf32, #tpu.memory_space<vmem>>, vector<8x128xf32>
    tpu.vector_store %arg7[%c0_15, %c0_16], %22 {strides = array<i32>} : memref<8x128xf32, #tpu.memory_space<vmem>>, vector<8x128xf32>,
    return
  }
  func.func @transform_0(%arg0: i32) -> (i32, i32) {
    %c0_i32 = arith.constant 0 : i32
    %c0_i32_0 = arith.constant 0 : i32
    %c0_i32_1 = arith.constant 0 : i32
    return %c0_i32, %c0_i32_0 : i32, i32
  }
  func.func @transform_1(%arg0: i32) -> (i32, i32) {
    %c0_i32 = arith.constant 0 : i32
    %c0_i32_0 = arith.constant 0 : i32
    %c0_i32_1 = arith.constant 0 : i32
    return %c0_i32, %c0_i32_0 : i32, i32
  }
  func.func @transform_2(%arg0: i32) -> (i32, i32) {
    %c0_i32 = arith.constant 0 : i32
    %c0_i32_0 = arith.constant 0 : i32
    %c0_i32_1 = arith.constant 0 : i32
    return %c0_i32, %c0_i32_0 : i32, i32
  }
  func.func @transform_3(%arg0: i32) -> (i32, i32) {
    %c0_i32 = arith.constant 0 : i32
    %c0_i32_0 = arith.constant 0 : i32
    %c0_i32_1 = arith.constant 0 : i32
    return %c0_i32, %c0_i32_0 : i32, i32
  }
  func.func @transform_4(%arg0: i32) -> (i32, i32) {
    %c0_i32 = arith.constant 0 : i32
    %c0_i32_0 = arith.constant 0 : i32
    %c0_i32_1 = arith.constant 0 : i32
    return %c0_i32, %c0_i32_0 : i32, i32
  }
  func.func @transform_5(%arg0: i32) -> (i32, i32) {
    %c0_i32 = arith.constant 0 : i32
    %c0_i32_0 = arith.constant 0 : i32
    %c0_i32_1 = arith.constant 0 : i32
    return %c0_i32, %c0_i32_0 : i32, i32
  }
  func.func @transform_6(%arg0: i32) -> (i32, i32) {
    %c0_i32 = arith.constant 0 : i32
    %c0_i32_0 = arith.constant 0 : i32
    %c0_i32_1 = arith.constant 0 : i32
    return %c0_i32, %c0_i32_0 : i32, i32
  }
}

module attributes {stable_mosaic.version = 11 : i64} {
  func.func @_matmul_bias_relu_kernel(%arg0: i32, %arg1: memref<2x512xbf16, #tpu.memory_space<vmem>>, %arg2: memref<512x512xbf16, #tpu.memory_space<vmem>>, %arg3: memref<1x512xf32, #tpu.memory_space<vmem>>, %arg4: memref<2x512xf32, #tpu.memory_space<vmem>>) attributes {dimension_semantics = [#tpu.dimension_semantics<parallel>], iteration_bounds = array<i64: 8>, scalar_prefetch = 0 : i64, scratch_operands = 0 : i64, tpu.core_type = #tpu.core_type<tc>, window_params = [{pipeline_mode = #tpu.pipeline_mode<synchronous>, transform_indices = @transform_0, window_bounds = array<i64: 2, 512>}, {transform_indices = @transform_1, window_bounds = array<i64: 512, 512>}, {transform_indices = @transform_2, window_bounds = array<i64: 1, 512>}, {transform_indices = @transform_3, window_bounds = array<i64: 2, 512>}]} {
    %c0 = arith.constant 0 : index
    %c0_0 = arith.constant 0 : index
    %0 = vector.load %arg1[%c0, %c0_0] : memref<2x512xbf16, #tpu.memory_space<vmem>>, vector<2x512xbf16>
    %c0_1 = arith.constant 0 : index
    %c0_2 = arith.constant 0 : index
    %1 = vector.load %arg2[%c0_1, %c0_2] : memref<512x512xbf16, #tpu.memory_space<vmem>>, vector<512x512xbf16>
    %cst = arith.constant dense<0.000000e+00> : vector<2x512xf32>
    %2 = tpu.matmul %0, %1, %cst {dimension_numbers = #tpu.dot_dimension_numbers<[1], [0], [0], [1], [0, 0, 1, 1], [], []>} : vector<2x512xbf16>, vector<512x512xbf16>, vector<2x512xf32> -> vector<2x512xf32>
    %c0_3 = arith.constant 0 : index
    %c0_4 = arith.constant 0 : index
    %3 = vector.load %arg3[%c0_3, %c0_4] : memref<1x512xf32, #tpu.memory_space<vmem>>, vector<1x512xf32>
    %4 = vector.broadcast %3 : vector<1x512xf32> to vector<2x512xf32>
    %5 = arith.addf %2, %4 : vector<2x512xf32>
    %cst_5 = arith.constant 0.000000e+00 : f32
    %6 = vector.broadcast %cst_5 : f32 to vector<2x512xf32>
    %7 = arith.maximumf %5, %6 : vector<2x512xf32>
    %c0_6 = arith.constant 0 : index
    %c0_7 = arith.constant 0 : index
    %8 = vector.load %arg4[%c0_6, %c0_7] : memref<2x512xf32, #tpu.memory_space<vmem>>, vector<2x512xf32>
    tpu.vector_store %arg4[%c0_6, %c0_7], %7 {strides = array<i32>} : memref<2x512xf32, #tpu.memory_space<vmem>>, vector<2x512xf32>,
    return
  }
  func.func @transform_0(%arg0: i32) -> (i32, i32) {
    %c0_i32 = arith.constant 0 : i32
    %c0_i32_0 = arith.constant 0 : i32
    %c0_i32_1 = arith.constant 0 : i32
    return %c0_i32, %c0_i32_0 : i32, i32
  }
  func.func @transform_1(%arg0: i32) -> (i32, i32) {
    %c0_i32 = arith.constant 0 : i32
    %c0_i32_0 = arith.constant 0 : i32
    return %c0_i32, %arg0 : i32, i32
  }
  func.func @transform_2(%arg0: i32) -> (i32, i32) {
    %c0_i32 = arith.constant 0 : i32
    %c0_i32_0 = arith.constant 0 : i32
    return %c0_i32, %arg0 : i32, i32
  }
  func.func @transform_3(%arg0: i32) -> (i32, i32) {
    %c0_i32 = arith.constant 0 : i32
    %c0_i32_0 = arith.constant 0 : i32
    return %c0_i32, %arg0 : i32, i32
  }
}

module attributes {stable_mosaic.version = 11 : i64} {
  func.func @_matmul_bias_relu_kernel(%arg0: i32, %arg1: memref<2x4096xbf16, #tpu.memory_space<vmem>>, %arg2: memref<4096x512xbf16, #tpu.memory_space<vmem>>, %arg3: memref<1x512xf32, #tpu.memory_space<vmem>>, %arg4: memref<2x512xf32, #tpu.memory_space<vmem>>) attributes {dimension_semantics = [#tpu.dimension_semantics<parallel>], iteration_bounds = array<i64: 4>, scalar_prefetch = 0 : i64, scratch_operands = 0 : i64, tpu.core_type = #tpu.core_type<tc>, window_params = [{pipeline_mode = #tpu.pipeline_mode<synchronous>, transform_indices = @transform_0, window_bounds = array<i64: 2, 4096>}, {transform_indices = @transform_1, window_bounds = array<i64: 4096, 512>}, {transform_indices = @transform_2, window_bounds = array<i64: 1, 512>}, {transform_indices = @transform_3, window_bounds = array<i64: 2, 512>}]} {
    %c0 = arith.constant 0 : index
    %c0_0 = arith.constant 0 : index
    %0 = vector.load %arg1[%c0, %c0_0] : memref<2x4096xbf16, #tpu.memory_space<vmem>>, vector<2x4096xbf16>
    %c0_1 = arith.constant 0 : index
    %c0_2 = arith.constant 0 : index
    %1 = vector.load %arg2[%c0_1, %c0_2] : memref<4096x512xbf16, #tpu.memory_space<vmem>>, vector<4096x512xbf16>
    %cst = arith.constant dense<0.000000e+00> : vector<2x512xf32>
    %2 = tpu.matmul %0, %1, %cst {dimension_numbers = #tpu.dot_dimension_numbers<[1], [0], [0], [1], [0, 0, 1, 1], [], []>} : vector<2x4096xbf16>, vector<4096x512xbf16>, vector<2x512xf32> -> vector<2x512xf32>
    %c0_3 = arith.constant 0 : index
    %c0_4 = arith.constant 0 : index
    %3 = vector.load %arg3[%c0_3, %c0_4] : memref<1x512xf32, #tpu.memory_space<vmem>>, vector<1x512xf32>
    %4 = vector.broadcast %3 : vector<1x512xf32> to vector<2x512xf32>
    %5 = arith.addf %2, %4 : vector<2x512xf32>
    %cst_5 = arith.constant 0.000000e+00 : f32
    %6 = vector.broadcast %cst_5 : f32 to vector<2x512xf32>
    %7 = arith.maximumf %5, %6 : vector<2x512xf32>
    %c0_6 = arith.constant 0 : index
    %c0_7 = arith.constant 0 : index
    %8 = vector.load %arg4[%c0_6, %c0_7] : memref<2x512xf32, #tpu.memory_space<vmem>>, vector<2x512xf32>
    tpu.vector_store %arg4[%c0_6, %c0_7], %7 {strides = array<i32>} : memref<2x512xf32, #tpu.memory_space<vmem>>, vector<2x512xf32>,
    return
  }
  func.func @transform_0(%arg0: i32) -> (i32, i32) {
    %c0_i32 = arith.constant 0 : i32
    %c0_i32_0 = arith.constant 0 : i32
    %c0_i32_1 = arith.constant 0 : i32
    return %c0_i32, %c0_i32_0 : i32, i32
  }
  func.func @transform_1(%arg0: i32) -> (i32, i32) {
    %c0_i32 = arith.constant 0 : i32
    %c0_i32_0 = arith.constant 0 : i32
    return %c0_i32, %arg0 : i32, i32
  }
  func.func @transform_2(%arg0: i32) -> (i32, i32) {
    %c0_i32 = arith.constant 0 : i32
    %c0_i32_0 = arith.constant 0 : i32
    return %c0_i32, %arg0 : i32, i32
  }
  func.func @transform_3(%arg0: i32) -> (i32, i32) {
    %c0_i32 = arith.constant 0 : i32
    %c0_i32_0 = arith.constant 0 : i32
    return %c0_i32, %arg0 : i32, i32
  }
}

module attributes {stable_mosaic.version = 11 : i64} {
  func.func @_matmul_bias_relu_kernel(%arg0: i32, %arg1: memref<2x2048xbf16, #tpu.memory_space<vmem>>, %arg2: memref<2048x128xbf16, #tpu.memory_space<vmem>>, %arg3: memref<1x128xf32, #tpu.memory_space<vmem>>, %arg4: memref<2x128xf32, #tpu.memory_space<vmem>>) attributes {dimension_semantics = [#tpu.dimension_semantics<parallel>], iteration_bounds = array<i64: 1>, scalar_prefetch = 0 : i64, scratch_operands = 0 : i64, tpu.core_type = #tpu.core_type<tc>, window_params = [{pipeline_mode = #tpu.pipeline_mode<synchronous>, transform_indices = @transform_0, window_bounds = array<i64: 2, 2048>}, {transform_indices = @transform_1, window_bounds = array<i64: 2048, 128>}, {transform_indices = @transform_2, window_bounds = array<i64: 1, 128>}, {transform_indices = @transform_3, window_bounds = array<i64: 2, 128>}]} {
    %c0 = arith.constant 0 : index
    %c0_0 = arith.constant 0 : index
    %0 = vector.load %arg1[%c0, %c0_0] : memref<2x2048xbf16, #tpu.memory_space<vmem>>, vector<2x2048xbf16>
    %c0_1 = arith.constant 0 : index
    %c0_2 = arith.constant 0 : index
    %1 = vector.load %arg2[%c0_1, %c0_2] : memref<2048x128xbf16, #tpu.memory_space<vmem>>, vector<2048x128xbf16>
    %cst = arith.constant dense<0.000000e+00> : vector<2x128xf32>
    %2 = tpu.matmul %0, %1, %cst {dimension_numbers = #tpu.dot_dimension_numbers<[1], [0], [0], [1], [0, 0, 1, 1], [], []>} : vector<2x2048xbf16>, vector<2048x128xbf16>, vector<2x128xf32> -> vector<2x128xf32>
    %c0_3 = arith.constant 0 : index
    %c0_4 = arith.constant 0 : index
    %3 = vector.load %arg3[%c0_3, %c0_4] : memref<1x128xf32, #tpu.memory_space<vmem>>, vector<1x128xf32>
    %4 = vector.broadcast %3 : vector<1x128xf32> to vector<2x128xf32>
    %5 = arith.addf %2, %4 : vector<2x128xf32>
    %cst_5 = arith.constant 0.000000e+00 : f32
    %6 = vector.broadcast %cst_5 : f32 to vector<2x128xf32>
    %7 = arith.maximumf %5, %6 : vector<2x128xf32>
    %c0_6 = arith.constant 0 : index
    %c0_7 = arith.constant 0 : index
    %8 = vector.load %arg4[%c0_6, %c0_7] : memref<2x128xf32, #tpu.memory_space<vmem>>, vector<2x128xf32>
    tpu.vector_store %arg4[%c0_6, %c0_7], %7 {strides = array<i32>} : memref<2x128xf32, #tpu.memory_space<vmem>>, vector<2x128xf32>,
    return
  }
  func.func @transform_0(%arg0: i32) -> (i32, i32) {
    %c0_i32 = arith.constant 0 : i32
    %c0_i32_0 = arith.constant 0 : i32
    %c0_i32_1 = arith.constant 0 : i32
    return %c0_i32, %c0_i32_0 : i32, i32
  }
  func.func @transform_1(%arg0: i32) -> (i32, i32) {
    %c0_i32 = arith.constant 0 : i32
    %c0_i32_0 = arith.constant 0 : i32
    return %c0_i32, %arg0 : i32, i32
  }
  func.func @transform_2(%arg0: i32) -> (i32, i32) {
    %c0_i32 = arith.constant 0 : i32
    %c0_i32_0 = arith.constant 0 : i32
    return %c0_i32, %arg0 : i32, i32
  }
  func.func @transform_3(%arg0: i32) -> (i32, i32) {
    %c0_i32 = arith.constant 0 : i32
    %c0_i32_0 = arith.constant 0 : i32
    return %c0_i32, %arg0 : i32, i32
  }
}

</mosaic_0001>

<bundles_post_ra>
// kernel: cnn_batchnorm_relu_forward.5
= control target key start
LH: loop header
LB: loop body
LE: loop exit
PB: predicated region body
PF: predicated region fallthrough
CT: control target
= control target key end

     0   :  { %vm60_vm0 = vcmask 1042432   ;;  %v933_v3 = vmov 0.0   ;;  %v934_v8 = vmov 0   ;;  %vm935_vm1 = vmmov 1   ;;  %s1333_s0 = inlined_call_operand.vmem [shape: f32[27,512], index: 0, kind: input, shape index: {}]   ;;  %s1334_s1 = inlined_call_operand.vmem [shape: f32[27,512], index: 1, kind: input, shape index: {}]   ;;  %s1335_s4 = inlined_call_operand.vmem [shape: f32[16,27], index: 4, kind: input, shape index: {}]   ;;  %s1336_s2 = inlined_call_operand.vmem [shape: f32[27,512], index: 2, kind: input, shape index: {}]   ;;  %s1337_s3 = inlined_call_operand.vmem [shape: f32[27,512], index: 3, kind: input, shape index: {}]   ;;  %s1338_s5 = inlined_call_operand.vmem [shape: f32[16,1], index: 5, kind: input, shape index: {}]   ;;  %s1339_s6 = inlined_call_operand.vmem [shape: f32[16,512], index: 6, kind: output, shape index: {}]  }
   0x1   :  { %v28_v0 = vld [vmem:[%s1333_s0 + $0x8] sm:$0xff]  ;;  %v30_v2 = vld [vmem:[%s1333_s0 + $0x18] sm:$0xff]  ;;  %137 = vmatprep.mubr.f32.mxu0 %v933_v3  ;;  %214 = vmatprep.mubr.f32.mxu1 %v933_v3  ;;  %v27_v6 = vld [vmem:[%s1333_s0] sm:$0xff]  ;;  %vm53_vm3 = vcmask 220160  }
   0x2   :  { %v32_v1 = vld [vmem:[%s1333_s0 + $0x28] sm:$0xff]  ;;  %v34_v5 = vld [vmem:[%s1333_s0 + $0x38] sm:$0xff]  ;;  %v31_v7 = vld [vmem:[%s1333_s0 + $0x20] sm:$0xff]  ;;  %932 = vset.pattern.permute.xlu0 %v934_v8 }
   0x3   :  { %v849_v4 = vpack.c.bf16 %v32_v1, %v28_v0  ;;  %v859_v9 = vpack.c.bf16 %v34_v5, %v30_v2  ;;  %v851_v10 = vpack.c.bf16 %v31_v7, %v27_v6  ;;  %v29_v11 = vld [vmem:[%s1333_s0 + $0x10] sm:$0xff]  ;;  %v36_v13 = vld [vmem:[%s1333_s0 + $0x48] sm:$0xff]  ;;  %vm1004_vm2 = vmpackc.low %vm60_vm0, %vm935_vm1 }
   0x4   :  { %v33_v12 = vld [vmem:[%s1333_s0 + $0x30] sm:$0xff]  ;;  %v40_v15 = vld [vmem:[%s1333_s0 + $0x68] sm:$0x7]  ;;  %v38_v17 = vld [vmem:[%s1333_s0 + $0x58] sm:$0xff] }
   0x5   :  { %850 = vmatprep.subr.bf16.mxu0 %v849_v4  ;;  %v861_v14 = vpack.c.bf16 %v33_v12, %v29_v11  ;;  %860 = vmatprep.subr.bf16.mxu1 %v859_v9  ;;  %v853_v18 = vpack.c.bf16 %v40_v15, %v36_v13  ;;  %v42_v19 = vld [vmem:[%s1333_s0 + $0x78] sm:$0x7]  ;;  %v35_v20 = vld [vmem:[%s1333_s0 + $0x40] sm:$0xff]  ;;  %v37_v24 = vld [vmem:[%s1333_s0 + $0x50] sm:$0xff] }
   0x6   :  { %852 = vmatpush1.bf16.msra.mxu0 %v851_v10  ;;  %v39_v21 = vld [vmem:[%s1333_s0 + $0x60] sm:$0x7]  ;;  %v863_v22 = vpack.c.bf16 %v42_v19, %v38_v17  ;;  %v41_v25 = vld [vmem:[%s1333_s0 + $0x70] sm:$0x7]  ;;  %v228_v27 = vld [vmem:[%s1334_s1 + $0x8] sm:$0xff] }
   0x7   :  { %862 = vmatpush1.bf16.msra.mxu1 %v861_v14  ;;  %v856_v23 = vpack.c.bf16 %v39_v21, %v35_v20  ;;  %855 = vmatprep.subr.msk.bf16.mxu0 %vm1004_vm2, %v853_v18  ;;  %v866_v26 = vpack.c.bf16 %v41_v25, %v37_v24  ;;  %v232_v28 = vld [vmem:[%s1334_s1 + $0x28] sm:$0xff]  ;;  %v230_v29 = vld [vmem:[%s1334_s1 + $0x18] sm:$0xff]  ;;  %v227_v32 = vld [vmem:[%s1334_s1] sm:$0xff] }
   0x8   :  { %865 = vmatprep.subr.msk.bf16.mxu1 %vm1004_vm2, %v863_v22  ;;  %v869_v30 = vpack.c.bf16 %v232_v28, %v228_v27  ;;  %v234_v31 = vld [vmem:[%s1334_s1 + $0x38] sm:$0xff]  ;;  %v231_v33 = vld [vmem:[%s1334_s1 + $0x20] sm:$0xff]  ;;  %v229_v37 = vld [vmem:[%s1334_s1 + $0x10] sm:$0xff] }
   0x9   :  { %v1053_v34 = vld [vmem:[%s1335_s4] sm:$0xff]  ;;  %v879_v35 = vpack.c.bf16 %v234_v31, %v230_v29  ;;  %v871_v36 = vpack.c.bf16 %v231_v33, %v227_v32  ;;  %v233_v38 = vld [vmem:[%s1334_s1 + $0x30] sm:$0xff]  ;;  %v236_v40 = vld [vmem:[%s1334_s1 + $0x48] sm:$0xff] }
   0xa   :  { %858 = vmatpush1.bf16.msk.msra.mxu0 %vm1004_vm2, %v856_v23  ;;  %v881_v39 = vpack.c.bf16 %v233_v38, %v229_v37  ;;  %v240_v41 = vld [vmem:[%s1334_s1 + $0x68] sm:$0x7]  ;;  %v238_v42 = vld [vmem:[%s1334_s1 + $0x58] sm:$0xff]  ;;  %v235_v46 = vld [vmem:[%s1334_s1 + $0x40] sm:$0xff] }
   0xb   :  { %868 = vmatpush1.bf16.msk.msra.mxu1 %vm1004_vm2, %v866_v26  ;;  %870 = vmatprep.subr.bf16.mxu0 %v869_v30  ;;  %v1075_v43 = vld [vmem:[%s1335_s4 + $0x8] sm:$0xff]  ;;  %v873_v44 = vpack.c.bf16 %v240_v41, %v236_v40  ;;  %v242_v45 = vld [vmem:[%s1334_s1 + $0x78] sm:$0x7]  ;;  %v239_v47 = vld [vmem:[%s1334_s1 + $0x60] sm:$0x7] }
   0xc   :  { %880 = vmatprep.subr.bf16.mxu1 %v879_v35  ;;  %v883_v48 = vpack.c.bf16 %v242_v45, %v238_v42  ;;  %v237_v49 = vld [vmem:[%s1334_s1 + $0x50] sm:$0xff]  ;;  %v418_v51 = vld [vmem:[%s1336_s2 + $0x8] sm:$0xff]  ;;  %v876_v52 = vpack.c.bf16 %v239_v47, %v235_v46  ;;  %v420_v54 = vld [vmem:[%s1336_s2 + $0x18] sm:$0xff] }
   0xd   :  { %819 = vmatmul.mubr.msk.f32.vlgmr.msra.gmra.mrb[0].mxu0 %vm53_vm3, %v1053_v34  ;;  %v241_v50 = vld [vmem:[%s1334_s1 + $0x70] sm:$0x7]  ;;  %v422_v53 = vld [vmem:[%s1336_s2 + $0x28] sm:$0xff]  ;;  %v424_v55 = vld [vmem:[%s1336_s2 + $0x38] sm:$0xff] }
   0xe   :  { %823 = vmatmul.mubr.msk.f32.vlgmr.msra.gmra.mrb[0].mxu1 %vm53_vm3, %v1053_v34  ;;  %872 = vmatpush1.bf16.msra.mxu0 %v871_v36  ;;  %v886_v56 = vpack.c.bf16 %v241_v50, %v237_v49  ;;  %v417_v57 = vld [vmem:[%s1336_s2] sm:$0xff]  ;;  %v889_v59 = vpack.c.bf16 %v422_v53, %v418_v51  ;;  %v419_v60 = vld [vmem:[%s1336_s2 + $0x10] sm:$0xff]  ;;  %v899_v62 = vpack.c.bf16 %v424_v55, %v420_v54  ;;  %v426_v63 = vld [vmem:[%s1336_s2 + $0x48] sm:$0xff] }
   0xf   :  { %882 = vmatpush1.bf16.msra.mxu1 %v881_v39  ;;  %143 = vmatprep.mubr.f32.mxu0 %v933_v3  ;;  %v421_v58 = vld [vmem:[%s1336_s2 + $0x20] sm:$0xff]  ;;  %v423_v61 = vld [vmem:[%s1336_s2 + $0x30] sm:$0xff]  ;;  %v430_v0 = vld [vmem:[%s1336_s2 + $0x68] sm:$0x7] }
  0x10   :  { %220 = vmatprep.mubr.f32.mxu1 %v933_v3  ;;  %875 = vmatprep.subr.msk.bf16.mxu0 %vm1004_vm2, %v873_v44  ;;  %v891_v1 = vpack.c.bf16 %v421_v58, %v417_v57  ;;  %v428_v2 = vld [vmem:[%s1336_s2 + $0x58] sm:$0xff]  ;;  %v901_v5 = vpack.c.bf16 %v423_v61, %v419_v60  ;;  %v425_v6 = vld [vmem:[%s1336_s2 + $0x40] sm:$0xff]  ;;  %v893_v8 = vpack.c.bf16 %v430_v0, %v426_v63  ;;  %v427_v9 = vld [vmem:[%s1336_s2 + $0x50] sm:$0xff] }
  0x11   :  { %820 = vmatmul.mubr.msk.f32.gmra.mrb[2].mxu0 %vm53_vm3, %v1075_v43  ;;  %885 = vmatprep.subr.msk.bf16.mxu1 %vm1004_vm2, %v883_v48  ;;  %v432_v4 = vld [vmem:[%s1336_s2 + $0x78] sm:$0x7]  ;;  %v429_v7 = vld [vmem:[%s1336_s2 + $0x60] sm:$0x7]  ;;  %v431_v10 = vld [vmem:[%s1336_s2 + $0x70] sm:$0x7] }
  0x12   :  { %824 = vmatmul.mubr.msk.f32.gmra.mrb[2].mxu1 %vm53_vm3, %v1075_v43  ;;  %878 = vmatpush1.bf16.msk.msra.mxu0 %vm1004_vm2, %v876_v52  ;;  %v903_v11 = vpack.c.bf16 %v432_v4, %v428_v2  ;;  %v600_v12 = vld [vmem:[%s1337_s3 + $0x8] sm:$0xff]  ;;  %v896_v14 = vpack.c.bf16 %v429_v7, %v425_v6  ;;  %v602_v15 = vld [vmem:[%s1337_s3 + $0x18] sm:$0xff]  ;;  %v906_v18 = vpack.c.bf16 %v431_v10, %v427_v9  ;;  %v599_v19 = vld [vmem:[%s1337_s3] sm:$0xff] }
  0x13   :  { %888 = vmatpush1.bf16.msk.msra.mxu1 %vm1004_vm2, %v886_v56  ;;  %319 = vmatprep.mubr.f32.mxu0 %v933_v3  ;;  %v604_v13 = vld [vmem:[%s1337_s3 + $0x28] sm:$0xff]  ;;  %v606_v17 = vld [vmem:[%s1337_s3 + $0x38] sm:$0xff]  ;;  %v603_v20 = vld [vmem:[%s1337_s3 + $0x20] sm:$0xff] }
  0x14   :  { %396 = vmatprep.mubr.f32.mxu1 %v933_v3  ;;  %890 = vmatprep.subr.bf16.mxu0 %v889_v59  ;;  %v909_v21 = vpack.c.bf16 %v604_v13, %v600_v12  ;;  %v601_v22 = vld [vmem:[%s1337_s3 + $0x10] sm:$0xff]  ;;  %v919_v24 = vpack.c.bf16 %v606_v17, %v602_v15  ;;  %v608_v25 = vld [vmem:[%s1337_s3 + $0x48] sm:$0xff]  ;;  %v911_v27 = vpack.c.bf16 %v603_v20, %v599_v19  ;;  %v610_v28 = vld [vmem:[%s1337_s3 + $0x58] sm:$0xff] }
  0x15   :  { %827 = vmatmul.mubr.msk.f32.vlgmr.msra.gmra.mrb[4].mxu0 %vm53_vm3, %v1053_v34  ;;  %900 = vmatprep.subr.bf16.mxu1 %v899_v62  ;;  %v605_v23 = vld [vmem:[%s1337_s3 + $0x30] sm:$0xff]  ;;  %v612_v26 = vld [vmem:[%s1337_s3 + $0x68] sm:$0x7]  ;;  %v614_v29 = vld [vmem:[%s1337_s3 + $0x78] sm:$0x7] }
  0x16   :  { %831 = vmatmul.mubr.msk.f32.vlgmr.msra.gmra.mrb[4].mxu1 %vm53_vm3, %v1053_v34  ;;  %892 = vmatpush1.bf16.msra.mxu0 %v891_v1  ;;  %v921_v30 = vpack.c.bf16 %v605_v23, %v601_v22  ;;  %v607_v31 = vld [vmem:[%s1337_s3 + $0x40] sm:$0xff]  ;;  %v913_v33 = vpack.c.bf16 %v612_v26, %v608_v25  ;;  %v609_v35 = vld [vmem:[%s1337_s3 + $0x50] sm:$0xff]  ;;  %v923_v37 = vpack.c.bf16 %v614_v29, %v610_v28  ;;  %v26_v41 = vld [vmem:[%s1338_s5 + $0x8] sm:$0xff] }
  0x17   :  { %902 = vmatpush1.bf16.msra.mxu1 %v901_v5  ;;  %325 = vmatprep.mubr.f32.mxu0 %v933_v3  ;;  %v611_v32 = vld [vmem:[%s1337_s3 + $0x60] sm:$0x7]  ;;  %v613_v36 = vld [vmem:[%s1337_s3 + $0x70] sm:$0x7] }
  0x18   :  { %402 = vmatprep.mubr.f32.mxu1 %v933_v3  ;;  %895 = vmatprep.subr.msk.bf16.mxu0 %vm1004_vm2, %v893_v8  ;;  %v916_v38 = vpack.c.bf16 %v611_v32, %v607_v31  ;;  %v926_v39 = vpack.c.bf16 %v613_v36, %v609_v35  ;;  %v25_v40 = vld [vmem:[%s1338_s5] sm:$0xff] }
  0x19   :  { %828 = vmatmul.mubr.msk.f32.gmra.mrb[6].mxu0 %vm53_vm3, %v1075_v43  ;;  %905 = vmatprep.subr.msk.bf16.mxu1 %vm1004_vm2, %v903_v11 }
  0x1a   :  { %832 = vmatmul.mubr.msk.f32.gmra.mrb[6].mxu1 %vm53_vm3, %v1075_v43  ;;  %898 = vmatpush1.bf16.msk.msra.mxu0 %vm1004_vm2, %v896_v14 }
  0x1b   :  { %908 = vmatpush1.bf16.msk.msra.mxu1 %vm1004_vm2, %v906_v18  ;;  %509 = vmatprep.mubr.f32.mxu0 %v933_v3 }
  0x1c   :  { %586 = vmatprep.mubr.f32.mxu1 %v933_v3  ;;  %910 = vmatprep.subr.bf16.mxu0 %v909_v21 }
  0x1d   :  { %835 = vmatmul.mubr.msk.f32.vlgmr.msra.gmra.mrb[8].mxu0 %vm53_vm3, %v1053_v34  ;;  %920 = vmatprep.subr.bf16.mxu1 %v919_v24 }
  0x1e   :  { %839 = vmatmul.mubr.msk.f32.vlgmr.msra.gmra.mrb[8].mxu1 %vm53_vm3, %v1053_v34  ;;  %912 = vmatpush1.bf16.msra.mxu0 %v911_v27 }
  0x1f   :  { %922 = vmatpush1.bf16.msra.mxu1 %v921_v30  ;;  %515 = vmatprep.mubr.f32.mxu0 %v933_v3 }
  0x20   :  { %592 = vmatprep.mubr.f32.mxu1 %v933_v3  ;;  %915 = vmatprep.subr.msk.bf16.mxu0 %vm1004_vm2, %v913_v33 }
  0x21   :  { %836 = vmatmul.mubr.msk.f32.gmra.mrb[10].mxu0 %vm53_vm3, %v1075_v43  ;;  %925 = vmatprep.subr.msk.bf16.mxu1 %vm1004_vm2, %v923_v37 }
  0x22   :  { %840 = vmatmul.mubr.msk.f32.gmra.mrb[10].mxu1 %vm53_vm3, %v1075_v43  ;;  %918 = vmatpush1.bf16.msk.msra.mxu0 %vm1004_vm2, %v916_v38 }
  0x23   :  { %928 = vmatpush1.bf16.msk.msra.mxu1 %vm1004_vm2, %v926_v39  ;;  %691 = vmatprep.mubr.f32.mxu0 %v933_v3 }
  0x24   :  { %768 = vmatprep.mubr.f32.mxu1 %v933_v3  ;;  %45 = vperm.xlu0 %932, %v25_v40  }
  0x25   :  { %843 = vmatmul.mubr.msk.f32.vlgmr.msra.gmra.mrb[12].mxu0 %vm53_vm3, %v1053_v34 }
  0x26   :  { %847 = vmatmul.mubr.msk.f32.vlgmr.msra.gmra.mrb[12].mxu1 %vm53_vm3, %v1053_v34  ;;  %697 = vmatprep.mubr.f32.mxu0 %v933_v3 }
  0x27   :  { %774 = vmatprep.mubr.f32.mxu1 %v933_v3 }
  0x28   :  { %50 = vperm.xlu0 %932, %v26_v41  }
  0x29   :  { %844 = vmatmul.mubr.msk.f32.gmra.mrb[14].mxu0 %vm53_vm3, %v1075_v43 }
  0x2a   :  { %848 = vmatmul.mubr.msk.f32.gmra.mrb[14].mxu1 %vm53_vm3, %v1075_v43 }
  0xa3   :  { %v46_v46 = vpop.permute.xlu0 %45 }
  0xa7   :  { %v1266_v55 = vpop.permute.xlu0 %50 }
  0xe0   :  { %v139_v16 = vpop.f32.mrb[0].mxu0 }
  0xe1   :  { %v216_v42 = vpop.f32.mrb[0].mxu1  ;;  %v141_v44 = vpop.f32.mrb[1].mxu0  ;;  %v140_v51 = vadd.f32 %v139_v16, %v46_v46 }
  0xe2   :  { %v218_v45 = vpop.f32.mrb[1].mxu1  ;;  %v1264_v54 = vadd.f32 %v141_v44, %v46_v46  ;;  %v217_v56 = vadd.f32 %v216_v42, %v46_v46 }
  0xe3   :  { %v1268_v59 = vadd.f32 %v218_v45, %v46_v46 }
  0xe4   :  { %v145_v47 = vpop.f32.mrb[2].mxu0 }
  0xe5   :  { %v222_v48 = vpop.f32.mrb[2].mxu1  ;;  %v147_v49 = vpop.f32.mrb[3].mxu0  ;;  %v1273_v2 = vadd.f32 %v145_v47, %v1266_v55 }
  0xe6   :  { %v224_v34 = vpop.f32.mrb[3].mxu1  ;;  %v1279_v7 = vadd.f32 %v147_v49, %v1266_v55  ;;  %v1282_v8 = vadd.f32 %v222_v48, %v1266_v55 }
  0xe7   :  { %v1291_v12 = vadd.f32 %v224_v34, %v1266_v55 }
  0xe8   :  { %v321_v50 = vpop.f32.mrb[4].mxu0 }
  0xe9   :  { %v322_v52 = vadd.f32 %v321_v50, %v46_v46  ;;  %v398_v3 = vpop.f32.mrb[4].mxu1  ;;  %v323_v53 = vpop.f32.mrb[5].mxu0 }
  0xea   :  { %v399_v43 = vadd.f32 %v398_v3, %v46_v46  ;;  %v324_v57 = vadd.f32 %v323_v53, %v46_v46  ;;  %v400_v58 = vpop.f32.mrb[5].mxu1 }
  0xeb   :  { %v409_v60 = vmax.f32 %v140_v51, %v322_v52  ;;  %v401_v61 = vadd.f32 %v400_v58, %v46_v46 }
  0xec   :  { %v411_v62 = vmax.f32 %v217_v56, %v399_v43  ;;  %v410_v63 = vmax.f32 %v1264_v54, %v324_v57  ;;  %v327_v0 = vpop.f32.mrb[6].mxu0 }
  0xed   :  { %v412_v1 = vmax.f32 %v1268_v59, %v401_v61  ;;  %v1276_v4 = vadd.f32 %v327_v0, %v1266_v55  ;;  %v404_v5 = vpop.f32.mrb[6].mxu1  ;;  %v329_v6 = vpop.f32.mrb[7].mxu0 }
  0xee   :  { %v1285_v9 = vadd.f32 %v404_v5, %v1266_v55  ;;  %v1288_v10 = vadd.f32 %v329_v6, %v1266_v55  ;;  %v406_v11 = vpop.f32.mrb[7].mxu1 }
  0xef   :  { %v413_v13 = vmax.f32 %v1273_v2, %v1276_v4  ;;  %v407_v14 = vadd.f32 %v406_v11, %v1266_v55 }
  0xf0   :  { %v415_v15 = vmax.f32 %v1282_v8, %v1285_v9  ;;  %v414_v17 = vmax.f32 %v1279_v7, %v1288_v10  ;;  %v511_v18 = vpop.f32.mrb[8].mxu0 }
  0xf1   :  { %v416_v19 = vmax.f32 %v1291_v12, %v407_v14  ;;  %v588_v20 = vpop.f32.mrb[8].mxu1  ;;  %v513_v21 = vpop.f32.mrb[9].mxu0  ;;  %v512_v28 = vadd.f32 %v511_v18, %v46_v46 }
  0xf2   :  { %v590_v22 = vpop.f32.mrb[9].mxu1  ;;  %v589_v32 = vadd.f32 %v588_v20, %v46_v46  ;;  %v514_v33 = vadd.f32 %v513_v21, %v46_v46 }
  0xf3   :  { %v591_v38 = vadd.f32 %v590_v22, %v46_v46 }
  0xf4   :  { %v517_v23 = vpop.f32.mrb[10].mxu0 }
  0xf5   :  { %v594_v24 = vpop.f32.mrb[10].mxu1  ;;  %v519_v25 = vpop.f32.mrb[11].mxu0  ;;  %v518_v39 = vadd.f32 %v517_v23, %v1266_v55 }
  0xf6   :  { %v596_v26 = vpop.f32.mrb[11].mxu1  ;;  %v595_v16 = vadd.f32 %v594_v24, %v1266_v55  ;;  %v520_v42 = vadd.f32 %v519_v25, %v1266_v55 }
  0xf7   :  { %v597_v48 = vadd.f32 %v596_v26, %v1266_v55 }
  0xf8   :  { %v693_v27 = vpop.f32.mrb[12].mxu0 }
  0xf9   :  { %v694_v29 = vadd.f32 %v693_v27, %v46_v46  ;;  %v770_v30 = vpop.f32.mrb[12].mxu1  ;;  %v695_v31 = vpop.f32.mrb[13].mxu0 }
  0xfa   :  { %v771_v35 = vadd.f32 %v770_v30, %v46_v46  ;;  %v696_v36 = vadd.f32 %v695_v31, %v46_v46  ;;  %v772_v37 = vpop.f32.mrb[13].mxu1 }
  0xfb   :  { %v781_v40 = vmax.f32 %v512_v28, %v694_v29  ;;  %v773_v41 = vadd.f32 %v772_v37, %v46_v46 }
  0xfc   :  { %v783_v44 = vmax.f32 %v589_v32, %v771_v35  ;;  %v782_v45 = vmax.f32 %v514_v33, %v696_v36  ;;  %v699_v47 = vpop.f32.mrb[14].mxu0 }
  0xfd   :  { %v789_v49 = vmax.f32 %v409_v60, %v781_v40  ;;  %v784_v34 = vmax.f32 %v591_v38, %v773_v41  ;;  %v700_v50 = vadd.f32 %v699_v47, %v1266_v55  ;;  %v776_v51 = vpop.f32.mrb[14].mxu1  ;;  %v701_v52 = vpop.f32.mrb[15].mxu0 }
  0xfe   :  { %v791_v3 = vmax.f32 %v411_v62, %v783_v44  ;;  %v790_v53 = vmax.f32 %v410_v63, %v782_v45  ;;  %v777_v54 = vadd.f32 %v776_v51, %v1266_v55  ;;  %v702_v46 = vadd.f32 %v701_v52, %v1266_v55  ;;  %v778_v56 = vpop.f32.mrb[15].mxu1 }
  0xff   :  { %v797_v43 = vmax.f32 %v789_v49, 0.0  ;;  %v792_v57 = vmax.f32 %v412_v1, %v784_v34  ;;  %v785_v58 = vmax.f32 %v518_v39, %v700_v50  ;;  %v779_v59 = vadd.f32 %v778_v56, %v1266_v55 }
 0x100   :  { %v799_v61 = vmax.f32 %v791_v3, 0.0  ;;  %v798_v0 = vmax.f32 %v790_v53, 0.0  ;;  %v787_v60 = vmax.f32 %v595_v16, %v777_v54  ;;  %v786_v2 = vmax.f32 %v520_v42, %v702_v46 }
 0x101   :  { %805 = vst [vmem:[%s1339_s6] sm:$0xff] %v797_v43  ;;  %v800_v62 = vmax.f32 %v792_v57, 0.0  ;;  %v793_v63 = vmax.f32 %v413_v13, %v785_v58  ;;  %v788_v4 = vmax.f32 %v597_v48, %v779_v59 }
 0x102   :  { %807 = vst [vmem:[%s1339_s6 + $0x10] sm:$0xff] %v799_v61  ;;  %806 = vst [vmem:[%s1339_s6 + $0x8] sm:$0xff] %v798_v0  ;;  %v795_v55 = vmax.f32 %v415_v15, %v787_v60  ;;  %v794_v1 = vmax.f32 %v414_v17, %v786_v2 }
 0x103   :  { %808 = vst [vmem:[%s1339_s6 + $0x18] sm:$0xff] %v800_v62  ;;  %v801_v5 = vmax.f32 %v793_v63, 0.0  ;;  %v796_v6 = vmax.f32 %v416_v19, %v788_v4 }
 0x104   :  { %v803_v7 = vmax.f32 %v795_v55, 0.0  ;;  %v802_v8 = vmax.f32 %v794_v1, 0.0 }
 0x105   :  { %809 = vst [vmem:[%s1339_s6 + $0x20] sm:$0xff] %v801_v5  ;;  %v804_v9 = vmax.f32 %v796_v6, 0.0 }
 0x106   :  { %811 = vst [vmem:[%s1339_s6 + $0x30] sm:$0xff] %v803_v7  ;;  %810 = vst [vmem:[%s1339_s6 + $0x28] sm:$0xff] %v802_v8 }
 0x107   :  { %812 = vst [vmem:[%s1339_s6 + $0x38] sm:$0xff] %v804_v9 }

// kernel: cnn_batchnorm_relu_forward.6
= control target key start
LH: loop header
LB: loop body
LE: loop exit
PB: predicated region body
PF: predicated region fallthrough
CT: control target
= control target key end

     0   :  { %v511_v0 = vmov 0.0|0.0   ;;  %v512_v8 = vmov 0   ;;  %vm49_vm0 = vcmask 130048   ;;  %s828_s0 = inlined_call_operand.vmem [shape: f32[144,128], index: 0, kind: input, shape index: {}]   ;;  %s829_s1 = inlined_call_operand.vmem [shape: f32[144,128], index: 1, kind: input, shape index: {}]   ;;  %s830_s4 = inlined_call_operand.vmem [shape: f32[8,144], index: 4, kind: input, shape index: {}]   ;;  %s831_s5 = inlined_call_operand.vmem [shape: f32[8,1], index: 5, kind: input, shape index: {}]   ;;  %s832_s2 = inlined_call_operand.vmem [shape: f32[144,128], index: 2, kind: input, shape index: {}]   ;;  %s833_s3 = inlined_call_operand.vmem [shape: f32[144,128], index: 3, kind: input, shape index: {}]   ;;  %s834_s6 = inlined_call_operand.vmem [shape: f32[8,128], index: 6, kind: output, shape index: {}]  }
   0x1   :  { %400 = vmatprep.subr.bf16.mxu0 %v511_v0  ;;  %427 = vmatprep.subr.bf16.mxu1 %v511_v0  ;;  %v26_v1 = vld [vmem:[%s828_s0] sm:$0xff]  ;;  %v27_v2 = vld [vmem:[%s828_s0 + $0x8] sm:$0xff]  ;;  %v28_v6 = vld [vmem:[%s828_s0 + $0x10] sm:$0xff] }
   0x2   :  { %v123_v3 = vld [vmem:[%s829_s1] sm:$0xff]  ;;  %v401_v4 = vpack.c.bf16 %v27_v2, %v26_v1  ;;  %v124_v5 = vld [vmem:[%s829_s1 + $0x8] sm:$0xff]  ;;  %v29_v7 = vld [vmem:[%s828_s0 + $0x18] sm:$0xff]  ;;  %510 = vset.pattern.permute.xlu0 %v512_v8 }
   0x3   :  { %v428_v9 = vpack.c.bf16 %v124_v5, %v123_v3  ;;  %v125_v10 = vld [vmem:[%s829_s1 + $0x10] sm:$0xff]  ;;  %v126_v11 = vld [vmem:[%s829_s1 + $0x18] sm:$0xff]  ;;  %v404_v12 = vpack.c.bf16 %v29_v7, %v28_v6  ;;  %v30_v14 = vld [vmem:[%s828_s0 + $0x20] sm:$0xff] }
   0x4   :  { %402 = vmatpush1.bf16.msra.mxu0 %v401_v4  ;;  %v431_v13 = vpack.c.bf16 %v126_v11, %v125_v10  ;;  %v31_v15 = vld [vmem:[%s828_s0 + $0x28] sm:$0xff]  ;;  %v127_v16 = vld [vmem:[%s829_s1 + $0x20] sm:$0xff]  ;;  %v32_v20 = vld [vmem:[%s828_s0 + $0x30] sm:$0xff] }
   0x5   :  { %429 = vmatpush1.bf16.msra.mxu1 %v428_v9  ;;  %403 = vmatprep.subr.bf16.mxu0 %v511_v0  ;;  %v128_v17 = vld [vmem:[%s829_s1 + $0x28] sm:$0xff]  ;;  %v407_v18 = vpack.c.bf16 %v31_v15, %v30_v14  ;;  %v33_v21 = vld [vmem:[%s828_s0 + $0x38] sm:$0xff]  ;;  %v129_v22 = vld [vmem:[%s829_s1 + $0x30] sm:$0xff] }
   0x6   :  { %430 = vmatprep.subr.bf16.mxu1 %v511_v0  ;;  %v434_v19 = vpack.c.bf16 %v128_v17, %v127_v16  ;;  %v130_v23 = vld [vmem:[%s829_s1 + $0x38] sm:$0xff]  ;;  %v410_v24 = vpack.c.bf16 %v33_v21, %v32_v20  ;;  %v34_v26 = vld [vmem:[%s828_s0 + $0x40] sm:$0xff]  ;;  %v35_v27 = vld [vmem:[%s828_s0 + $0x48] sm:$0xff] }
   0x7   :  { %v437_v25 = vpack.c.bf16 %v130_v23, %v129_v22  ;;  %v612_v28 = vld [vmem:[%s830_s4 + $0x8] sm:$0xff]  ;;  %v131_v29 = vld [vmem:[%s829_s1 + $0x40] sm:$0xff]  ;;  %v413_v31 = vpack.c.bf16 %v35_v27, %v34_v26  ;;  %v36_v33 = vld [vmem:[%s828_s0 + $0x50] sm:$0xff] }
   0x8   :  { %405 = vmatpush1.bf16.msra.mxu0 %v404_v12  ;;  %v132_v30 = vld [vmem:[%s829_s1 + $0x48] sm:$0xff]  ;;  %396 = vmatprep.mubr.msk.f32.mxu0 %vm49_vm0, %v612_v28  ;;  %v37_v34 = vld [vmem:[%s828_s0 + $0x58] sm:$0xff]  ;;  %v133_v35 = vld [vmem:[%s829_s1 + $0x50] sm:$0xff] }
   0x9   :  { %432 = vmatpush1.bf16.msra.mxu1 %v431_v13  ;;  %406 = vmatprep.subr.bf16.mxu0 %v511_v0  ;;  %v440_v32 = vpack.c.bf16 %v132_v30, %v131_v29  ;;  %v134_v36 = vld [vmem:[%s829_s1 + $0x58] sm:$0xff]  ;;  %v416_v37 = vpack.c.bf16 %v37_v34, %v36_v33  ;;  %v38_v39 = vld [vmem:[%s828_s0 + $0x60] sm:$0xff]  ;;  %v39_v40 = vld [vmem:[%s828_s0 + $0x68] sm:$0xff] }
   0xa   :  { %433 = vmatprep.subr.bf16.mxu1 %v511_v0  ;;  %397 = vmatprep.mubr.msk.f32.mxu1 %vm49_vm0, %v612_v28  ;;  %v443_v38 = vpack.c.bf16 %v134_v36, %v133_v35  ;;  %v135_v41 = vld [vmem:[%s829_s1 + $0x60] sm:$0xff]  ;;  %v136_v42 = vld [vmem:[%s829_s1 + $0x68] sm:$0xff]  ;;  %v419_v43 = vpack.c.bf16 %v39_v40, %v38_v39  ;;  %v40_v45 = vld [vmem:[%s828_s0 + $0x70] sm:$0xff] }
   0xb   :  { %v446_v44 = vpack.c.bf16 %v136_v42, %v135_v41  ;;  %v41_v46 = vld [vmem:[%s828_s0 + $0x78] sm:$0xff]  ;;  %v25_v47 = vld [vmem:[%s831_s5] sm:$0xff]  ;;  %v137_v48 = vld [vmem:[%s829_s1 + $0x70] sm:$0xff] }
   0xc   :  { %408 = vmatpush1.bf16.msra.mxu0 %v407_v18  ;;  %v138_v49 = vld [vmem:[%s829_s1 + $0x78] sm:$0xff]  ;;  %46 = vperm.xlu0 %510, %v25_v47   ;;  %v422_v50 = vpack.c.bf16 %v41_v46, %v40_v45  ;;  %v42_v52 = vld [vmem:[%s828_s0 + $0x80] sm:$0xff]  ;;  %v43_v53 = vld [vmem:[%s828_s0 + $0x88] sm:$0xff] }
   0xd   :  { %435 = vmatpush1.bf16.msra.mxu1 %v434_v19  ;;  %409 = vmatprep.subr.bf16.mxu0 %v511_v0  ;;  %v449_v51 = vpack.c.bf16 %v138_v49, %v137_v48  ;;  %v139_v54 = vld [vmem:[%s829_s1 + $0x80] sm:$0xff]  ;;  %v140_v55 = vld [vmem:[%s829_s1 + $0x88] sm:$0xff]  ;;  %v425_v56 = vpack.c.bf16 %v43_v53, %v42_v52  ;;  %v214_v2 = vld [vmem:[%s832_s2 + $0x10] sm:$0xff] }
   0xe   :  { %436 = vmatprep.subr.bf16.mxu1 %v511_v0  ;;  %v452_v57 = vpack.c.bf16 %v140_v55, %v139_v54  ;;  %v212_v58 = vld [vmem:[%s832_s2] sm:$0xff]  ;;  %v213_v59 = vld [vmem:[%s832_s2 + $0x8] sm:$0xff]  ;;  %v215_v3 = vld [vmem:[%s832_s2 + $0x18] sm:$0xff] }
   0xf   :  { %v300_v60 = vld [vmem:[%s833_s3] sm:$0xff]  ;;  %v301_v61 = vld [vmem:[%s833_s3 + $0x8] sm:$0xff]  ;;  %v455_v63 = vpack.c.bf16 %v213_v59, %v212_v58  ;;  %v302_v4 = vld [vmem:[%s833_s3 + $0x10] sm:$0xff]  ;;  %v458_v6 = vpack.c.bf16 %v215_v3, %v214_v2 }
  0x10   :  { %411 = vmatpush1.bf16.msra.mxu0 %v410_v24  ;;  %v701_v62 = vld [vmem:[%s830_s4] sm:$0xff]  ;;  %v482_v1 = vpack.c.bf16 %v301_v61, %v300_v60  ;;  %v303_v5 = vld [vmem:[%s833_s3 + $0x18] sm:$0xff]  ;;  %v217_v9 = vld [vmem:[%s832_s2 + $0x28] sm:$0xff] }
  0x11   :  { %438 = vmatpush1.bf16.msra.mxu1 %v437_v25  ;;  %412 = vmatprep.subr.bf16.mxu0 %v511_v0  ;;  %v485_v7 = vpack.c.bf16 %v303_v5, %v302_v4  ;;  %v216_v8 = vld [vmem:[%s832_s2 + $0x20] sm:$0xff]  ;;  %v305_v11 = vld [vmem:[%s833_s3 + $0x28] sm:$0xff]  ;;  %v218_v14 = vld [vmem:[%s832_s2 + $0x30] sm:$0xff] }
  0x12   :  { %439 = vmatprep.subr.bf16.mxu1 %v511_v0  ;;  %v304_v10 = vld [vmem:[%s833_s3 + $0x20] sm:$0xff]  ;;  %v461_v12 = vpack.c.bf16 %v217_v9, %v216_v8  ;;  %v219_v15 = vld [vmem:[%s832_s2 + $0x38] sm:$0xff]  ;;  %v306_v16 = vld [vmem:[%s833_s3 + $0x30] sm:$0xff] }
  0x13   :  { %v488_v13 = vpack.c.bf16 %v305_v11, %v304_v10  ;;  %v307_v17 = vld [vmem:[%s833_s3 + $0x38] sm:$0xff]  ;;  %v464_v18 = vpack.c.bf16 %v219_v15, %v218_v14  ;;  %v220_v20 = vld [vmem:[%s832_s2 + $0x40] sm:$0xff]  ;;  %v221_v21 = vld [vmem:[%s832_s2 + $0x48] sm:$0xff] }
  0x14   :  { %414 = vmatpush1.bf16.msra.mxu0 %v413_v31  ;;  %v491_v19 = vpack.c.bf16 %v307_v17, %v306_v16  ;;  %v308_v22 = vld [vmem:[%s833_s3 + $0x40] sm:$0xff]  ;;  %v309_v23 = vld [vmem:[%s833_s3 + $0x48] sm:$0xff]  ;;  %v467_v24 = vpack.c.bf16 %v221_v21, %v220_v20  ;;  %v222_v26 = vld [vmem:[%s832_s2 + $0x50] sm:$0xff] }
  0x15   :  { %441 = vmatpush1.bf16.msra.mxu1 %v440_v32  ;;  %415 = vmatprep.subr.bf16.mxu0 %v511_v0  ;;  %v494_v25 = vpack.c.bf16 %v309_v23, %v308_v22  ;;  %v223_v27 = vld [vmem:[%s832_s2 + $0x58] sm:$0xff]  ;;  %v224_v32 = vld [vmem:[%s832_s2 + $0x60] sm:$0xff]  ;;  %v225_v33 = vld [vmem:[%s832_s2 + $0x68] sm:$0xff] }
  0x16   :  { %442 = vmatprep.subr.bf16.mxu1 %v511_v0  ;;  %v311_v29 = vld [vmem:[%s833_s3 + $0x58] sm:$0xff]  ;;  %v470_v30 = vpack.c.bf16 %v223_v27, %v222_v26  ;;  %v312_v34 = vld [vmem:[%s833_s3 + $0x60] sm:$0xff]  ;;  %v313_v35 = vld [vmem:[%s833_s3 + $0x68] sm:$0xff]  ;;  %v473_v36 = vpack.c.bf16 %v225_v33, %v224_v32 }
  0x17   :  { %v227_v39 = vld [vmem:[%s832_s2 + $0x78] sm:$0xff]  ;;  %v314_v40 = vld [vmem:[%s833_s3 + $0x70] sm:$0xff]  ;;  %v229_v45 = vld [vmem:[%s832_s2 + $0x88] sm:$0xff] }
  0x18   :  { %417 = vmatpush1.bf16.msra.mxu0 %v416_v37  ;;  %v500_v37 = vpack.c.bf16 %v313_v35, %v312_v34  ;;  %v315_v41 = vld [vmem:[%s833_s3 + $0x78] sm:$0xff]  ;;  %v316_v46 = vld [vmem:[%s833_s3 + $0x80] sm:$0xff]  ;;  %v317_v47 = vld [vmem:[%s833_s3 + $0x88] sm:$0xff] }
  0x19   :  { %444 = vmatpush1.bf16.msra.mxu1 %v443_v38  ;;  %418 = vmatprep.subr.bf16.mxu0 %v511_v0  ;;  %v226_v38 = vld [vmem:[%s832_s2 + $0x70] sm:$0xff]  ;;  %v506_v49 = vpack.c.bf16 %v317_v47, %v316_v46 }
  0x1a   :  { %445 = vmatprep.subr.bf16.mxu1 %v511_v0  ;;  %v476_v42 = vpack.c.bf16 %v227_v39, %v226_v38 }
  0x1c   :  { %420 = vmatpush1.bf16.msra.mxu0 %v419_v43  ;;  %v503_v43 = vpack.c.bf16 %v315_v41, %v314_v40 }
  0x1d   :  { %447 = vmatpush1.bf16.msra.mxu1 %v446_v44  ;;  %421 = vmatprep.subr.bf16.mxu0 %v511_v0  ;;  %v228_v44 = vld [vmem:[%s832_s2 + $0x80] sm:$0xff] }
  0x1e   :  { %448 = vmatprep.subr.bf16.mxu1 %v511_v0  ;;  %v479_v48 = vpack.c.bf16 %v229_v45, %v228_v44 }
  0x20   :  { %423 = vmatpush1.bf16.msra.mxu0 %v422_v50 }
  0x21   :  { %450 = vmatpush1.bf16.msra.mxu1 %v449_v51  ;;  %424 = vmatprep.subr.bf16.mxu0 %v511_v0 }
  0x22   :  { %451 = vmatprep.subr.bf16.mxu1 %v511_v0 }
  0x24   :  { %426 = vmatpush1.bf16.msra.mxu0 %v425_v56 }
  0x25   :  { %453 = vmatpush1.bf16.msra.mxu1 %v452_v57  ;;  %454 = vmatprep.subr.bf16.mxu0 %v511_v0 }
  0x26   :  { %481 = vmatprep.subr.bf16.mxu1 %v511_v0 }
  0x27   :  { %118 = vmatmul.mubr.f32.vlgmr.msra.gmra.mrb[0].mxu0 %v701_v62 }
  0x28   :  { %206 = vmatmul.mubr.f32.vlgmr.msra.gmra.mrb[0].mxu1 %v701_v62  ;;  %456 = vmatpush1.bf16.msra.mxu0 %v455_v63 }
  0x29   :  { %483 = vmatpush1.bf16.msra.mxu1 %v482_v1  ;;  %457 = vmatprep.subr.bf16.mxu0 %v511_v0 }
  0x2a   :  { %484 = vmatprep.subr.bf16.mxu1 %v511_v0  ;;  %398 = vmatprep.mubr.msk.f32.mxu0 %vm49_vm0, %v612_v28 }
  0x2b   :  { %399 = vmatprep.mubr.msk.f32.mxu1 %vm49_vm0, %v612_v28  ;;  %v310_v28 = vld [vmem:[%s833_s3 + $0x50] sm:$0xff] }
  0x2c   :  { %459 = vmatpush1.bf16.msra.mxu0 %v458_v6  ;;  %v497_v31 = vpack.c.bf16 %v311_v29, %v310_v28 }
  0x2d   :  { %486 = vmatpush1.bf16.msra.mxu1 %v485_v7  ;;  %460 = vmatprep.subr.bf16.mxu0 %v511_v0 }
  0x2e   :  { %487 = vmatprep.subr.bf16.mxu1 %v511_v0 }
  0x30   :  { %462 = vmatpush1.bf16.msra.mxu0 %v461_v12 }
  0x31   :  { %489 = vmatpush1.bf16.msra.mxu1 %v488_v13  ;;  %463 = vmatprep.subr.bf16.mxu0 %v511_v0 }
  0x32   :  { %490 = vmatprep.subr.bf16.mxu1 %v511_v0 }
  0x34   :  { %465 = vmatpush1.bf16.msra.mxu0 %v464_v18 }
  0x35   :  { %492 = vmatpush1.bf16.msra.mxu1 %v491_v19  ;;  %466 = vmatprep.subr.bf16.mxu0 %v511_v0 }
  0x36   :  { %493 = vmatprep.subr.bf16.mxu1 %v511_v0 }
  0x38   :  { %468 = vmatpush1.bf16.msra.mxu0 %v467_v24 }
  0x39   :  { %495 = vmatpush1.bf16.msra.mxu1 %v494_v25  ;;  %469 = vmatprep.subr.bf16.mxu0 %v511_v0 }
  0x3a   :  { %496 = vmatprep.subr.bf16.mxu1 %v511_v0 }
  0x3c   :  { %471 = vmatpush1.bf16.msra.mxu0 %v470_v30 }
  0x3d   :  { %498 = vmatpush1.bf16.msra.mxu1 %v497_v31  ;;  %472 = vmatprep.subr.bf16.mxu0 %v511_v0 }
  0x3e   :  { %499 = vmatprep.subr.bf16.mxu1 %v511_v0 }
  0x40   :  { %474 = vmatpush1.bf16.msra.mxu0 %v473_v36 }
  0x41   :  { %501 = vmatpush1.bf16.msra.mxu1 %v500_v37  ;;  %475 = vmatprep.subr.bf16.mxu0 %v511_v0 }
  0x42   :  { %502 = vmatprep.subr.bf16.mxu1 %v511_v0 }
  0x44   :  { %477 = vmatpush1.bf16.msra.mxu0 %v476_v42 }
  0x45   :  { %504 = vmatpush1.bf16.msra.mxu1 %v503_v43  ;;  %478 = vmatprep.subr.bf16.mxu0 %v511_v0 }
  0x46   :  { %505 = vmatprep.subr.bf16.mxu1 %v511_v0 }
  0x48   :  { %480 = vmatpush1.bf16.msra.mxu0 %v479_v48 }
  0x49   :  { %507 = vmatpush1.bf16.msra.mxu1 %v506_v49 }
  0x4b   :  { %295 = vmatmul.mubr.f32.vlgmr.msra.gmra.mrb[2].mxu0 %v701_v62 }
  0x4c   :  { %383 = vmatmul.mubr.f32.vlgmr.msra.gmra.mrb[2].mxu1 %v701_v62 }
  0x8b   :  { %v47_v50 = vpop.permute.xlu0 %46 }
  0xfa   :  { %v119_v51 = vpop.f32.mrb[0].mxu0 }
  0xfb   :  { %v207_v52 = vpop.f32.mrb[0].mxu1  ;;  %v120_v53 = vadd.f32 %v119_v51, %v47_v50  ;;  %v121_v54 = vpop.f32.mrb[1].mxu0 }
  0xfc   :  { %v208_v55 = vadd.f32 %v207_v52, %v47_v50  ;;  %v209_v56 = vpop.f32.mrb[1].mxu1 }
  0xfe   :  { %v211_v57 = vmax.f32 %v120_v53, %v208_v55 }
 0x11e   :  { %v296_v58 = vpop.f32.mrb[2].mxu0 }
 0x11f   :  { %v297_v59 = vadd.f32 %v296_v58, %v47_v50  ;;  %v384_v60 = vpop.f32.mrb[2].mxu1  ;;  %v298_v61 = vpop.f32.mrb[3].mxu0 }
 0x120   :  { %v385_v63 = vadd.f32 %v384_v60, %v47_v50  ;;  %v386_v0 = vpop.f32.mrb[3].mxu1 }
 0x122   :  { %v388_v1 = vmax.f32 %v297_v59, %v385_v63 }
 0x124   :  { %v389_v2 = vmax.f32 %v211_v57, %v388_v1 }
 0x126   :  { %v390_v3 = vmax.f32 %v389_v2, 0.0 }
 0x128   :  { %391 = vst [vmem:[%s834_s6] sm:$0xff] %v390_v3 }

// kernel: cnn_batchnorm_relu_forward.7
= control target key start
LH: loop header
LB: loop body
LE: loop exit
PB: predicated region body
PF: predicated region fallthrough
CT: control target
= control target key end

     0   :  { %s1968_s12 = smov 0   ;;  %s1970_s13 = smov 0   ;;  %s2449_s0 = inlined_call_operand.vmem [shape: bf16[2,512], index: 0, kind: input, shape index: {}]   ;;  %s2450_s1 = inlined_call_operand.vmem [shape: bf16[512,4096], index: 1, kind: input, shape index: {}]   ;;  %s2451_s2 = inlined_call_operand.vmem [shape: f32[1,4096], index: 2, kind: input, shape index: {}]   ;;  %s2452_s3 = inlined_call_operand.vmem [shape: f32[2,4096], index: 3, kind: output, shape index: {}]  }
   0x1   :  { %s1972_s14 = smov 0  }
   0x2 LB: > { %s1548_s15 = sadd.s32 4294967295, %s1944_s14   ;;  %s1985_s16 = sadd.s32 1, %s1944_s14   ;;  %s1944_s14 = sphi %s1972_s14, %s2455_s14   ;;  %s1940_s13 = sphi %s1970_s13, %s2454_s13   ;;  %s1936_s12 = sphi %s1968_s12, %s2453_s12  }
   0x3   : > { %s38_s17 = ssub.s32 %s1944_s14, %s1985_s16  ;;  %s41_s18 = sadd.s32 1, %s1940_s13 }
   0x4   : > { %p39_p0 = scmp.eq.s32.totalorder %s38_s17, 0  ;;  %p48_p1 = scmp.ne.s32.totalorder %s1940_s13, %s1936_s12 }
   0x5   : > { %p49_p2 = scmp.eq.s32.totalorder %s1944_s14, 0  ;;  %p1551_p4 = scmp.ge.s32.totalorder %s1944_s14, 8 }
   0x6   : > { %s1994_s19 = scalar_select %p39_p0, %s1940_s13, %s41_s18  }
   0x7   : > { %p50_p3 = por %p49_p2, %p48_p1  ;;  %129 = sbr.rel (%p1551_p4) target bundleno = 82 (0x52), region = 20 }
   0xe   : > { %132 = sbr.rel (!%p50_p3) target bundleno = 82 (0x52), region = 24  ;;  %s134_s20 = sand.u32 (%p50_p3), 1, %s1940_s13  }
   0xf   : > { %s1691_s21 = sshll.u32 (%p50_p3), %s1944_s14, 4  ;;  %s1552_s22 = sshll.u32 (%p50_p3), %s134_s20, 10 }
  0x10   : > { %s2002_s25 = scalar_lea.vmem (%p50_p3), %s2450_s1, %s1691_s21  ;;  %s2007_s26 = scalar_lea.vmem (%p50_p3), [#allocation2], %s1552_s22 }
  0x11   : > { %v152_v0 = vld [vmem:[%s2002_s25] sm:$0xff] (%p50_p3)  ;;  %v154_v1 = vld [vmem:[%s2002_s25 + $0x8] sm:$0xff] (%p50_p3) }
  0x12   : > { %v156_v2 = vld [vmem:[%s2002_s25 + $0x80] sm:$0xff] (%p50_p3)  ;;  %153 = vst [vmem:[%s2007_s26] sm:$0xff] (%p50_p3), %v152_v0  ;;  %155 = vst [vmem:[%s2007_s26 + $0x8] sm:$0xff] (%p50_p3), %v154_v1  ;;  %v158_v3 = vld [vmem:[%s2002_s25 + $0x88] sm:$0xff] (%p50_p3) }
  0x13   : > { %157 = vst [vmem:[%s2007_s26 + $0x10] sm:$0xff] (%p50_p3), %v156_v2  ;;  %v160_v4 = vld [vmem:[%s2002_s25 + $0x100] sm:$0xff] (%p50_p3)  ;;  %v162_v5 = vld [vmem:[%s2002_s25 + $0x108] sm:$0xff] (%p50_p3)  ;;  %159 = vst [vmem:[%s2007_s26 + $0x18] sm:$0xff] (%p50_p3), %v158_v3 }
  0x14   : > { %161 = vst [vmem:[%s2007_s26 + $0x20] sm:$0xff] (%p50_p3), %v160_v4  ;;  %163 = vst [vmem:[%s2007_s26 + $0x28] sm:$0xff] (%p50_p3), %v162_v5  ;;  %v164_v6 = vld [vmem:[%s2002_s25 + $0x180] sm:$0xff] (%p50_p3)  ;;  %v166_v7 = vld [vmem:[%s2002_s25 + $0x188] sm:$0xff] (%p50_p3) }
  0x15   : > { %v168_v8 = vld [vmem:[%s2002_s25 + $0x200] sm:$0xff]  ;;  %165 = vst [vmem:[%s2007_s26 + $0x30] sm:$0xff] %v164_v6  ;;  %167 = vst [vmem:[%s2007_s26 + $0x38] sm:$0xff] %v166_v7  ;;  %v170_v9 = vld [vmem:[%s2002_s25 + $0x208] sm:$0xff] }
  0x16   : > { %169 = vst [vmem:[%s2007_s26 + $0x40] sm:$0xff] %v168_v8  ;;  %v172_v10 = vld [vmem:[%s2002_s25 + $0x280] sm:$0xff]  ;;  %v174_v11 = vld [vmem:[%s2002_s25 + $0x288] sm:$0xff]  ;;  %171 = vst [vmem:[%s2007_s26 + $0x48] sm:$0xff] %v170_v9 }
  0x17   : > { %173 = vst [vmem:[%s2007_s26 + $0x50] sm:$0xff] %v172_v10  ;;  %175 = vst [vmem:[%s2007_s26 + $0x58] sm:$0xff] %v174_v11  ;;  %v176_v12 = vld [vmem:[%s2002_s25 + $0x300] sm:$0xff]  ;;  %v178_v13 = vld [vmem:[%s2002_s25 + $0x308] sm:$0xff] }
  0x18   : > { %v180_v14 = vld [vmem:[%s2002_s25 + $0x380] sm:$0xff]  ;;  %177 = vst [vmem:[%s2007_s26 + $0x60] sm:$0xff] %v176_v12  ;;  %179 = vst [vmem:[%s2007_s26 + $0x68] sm:$0xff] %v178_v13  ;;  %v182_v15 = vld [vmem:[%s2002_s25 + $0x388] sm:$0xff] }
  0x19   : > { %181 = vst [vmem:[%s2007_s26 + $0x70] sm:$0xff] %v180_v14  ;;  %v184_v16 = vld [vmem:[%s2002_s25 + $0x400] sm:$0xff]  ;;  %v186_v17 = vld [vmem:[%s2002_s25 + $0x408] sm:$0xff]  ;;  %183 = vst [vmem:[%s2007_s26 + $0x78] sm:$0xff] %v182_v15 }
  0x1a   : > { %185 = vst [vmem:[%s2007_s26 + $0x80] sm:$0xff] %v184_v16  ;;  %187 = vst [vmem:[%s2007_s26 + $0x88] sm:$0xff] %v186_v17  ;;  %v188_v18 = vld [vmem:[%s2002_s25 + $0x480] sm:$0xff]  ;;  %v190_v19 = vld [vmem:[%s2002_s25 + $0x488] sm:$0xff] }
  0x1b   : > { %v192_v20 = vld [vmem:[%s2002_s25 + $0x500] sm:$0xff]  ;;  %189 = vst [vmem:[%s2007_s26 + $0x90] sm:$0xff] %v188_v18  ;;  %191 = vst [vmem:[%s2007_s26 + $0x98] sm:$0xff] %v190_v19  ;;  %v194_v21 = vld [vmem:[%s2002_s25 + $0x508] sm:$0xff] }
  0x1c   : > { %193 = vst [vmem:[%s2007_s26 + $0xa0] sm:$0xff] %v192_v20  ;;  %v196_v22 = vld [vmem:[%s2002_s25 + $0x580] sm:$0xff]  ;;  %v198_v23 = vld [vmem:[%s2002_s25 + $0x588] sm:$0xff]  ;;  %195 = vst [vmem:[%s2007_s26 + $0xa8] sm:$0xff] %v194_v21 }
  0x1d   : > { %197 = vst [vmem:[%s2007_s26 + $0xb0] sm:$0xff] %v196_v22  ;;  %199 = vst [vmem:[%s2007_s26 + $0xb8] sm:$0xff] %v198_v23  ;;  %v200_v24 = vld [vmem:[%s2002_s25 + $0x600] sm:$0xff]  ;;  %v202_v25 = vld [vmem:[%s2002_s25 + $0x608] sm:$0xff] }
  0x1e   : > { %v204_v26 = vld [vmem:[%s2002_s25 + $0x680] sm:$0xff]  ;;  %201 = vst [vmem:[%s2007_s26 + $0xc0] sm:$0xff] %v200_v24  ;;  %203 = vst [vmem:[%s2007_s26 + $0xc8] sm:$0xff] %v202_v25  ;;  %v206_v27 = vld [vmem:[%s2002_s25 + $0x688] sm:$0xff] }
  0x1f   : > { %205 = vst [vmem:[%s2007_s26 + $0xd0] sm:$0xff] %v204_v26  ;;  %v208_v28 = vld [vmem:[%s2002_s25 + $0x700] sm:$0xff]  ;;  %v210_v29 = vld [vmem:[%s2002_s25 + $0x708] sm:$0xff]  ;;  %207 = vst [vmem:[%s2007_s26 + $0xd8] sm:$0xff] %v206_v27 }
  0x20   : > { %209 = vst [vmem:[%s2007_s26 + $0xe0] sm:$0xff] %v208_v28  ;;  %211 = vst [vmem:[%s2007_s26 + $0xe8] sm:$0xff] %v210_v29  ;;  %v212_v30 = vld [vmem:[%s2002_s25 + $0x780] sm:$0xff]  ;;  %v214_v31 = vld [vmem:[%s2002_s25 + $0x788] sm:$0xff] }
  0x21   : > { %v216_v32 = vld [vmem:[%s2002_s25 + $0x800] sm:$0xff]  ;;  %213 = vst [vmem:[%s2007_s26 + $0xf0] sm:$0xff] %v212_v30  ;;  %215 = vst [vmem:[%s2007_s26 + $0xf8] sm:$0xff] %v214_v31  ;;  %v218_v33 = vld [vmem:[%s2002_s25 + $0x808] sm:$0xff] }
  0x22   : > { %217 = vst [vmem:[%s2007_s26 + $0x100] sm:$0xff] %v216_v32  ;;  %v220_v34 = vld [vmem:[%s2002_s25 + $0x880] sm:$0xff]  ;;  %v222_v35 = vld [vmem:[%s2002_s25 + $0x888] sm:$0xff]  ;;  %219 = vst [vmem:[%s2007_s26 + $0x108] sm:$0xff] %v218_v33 }
  0x23   : > { %221 = vst [vmem:[%s2007_s26 + $0x110] sm:$0xff] %v220_v34  ;;  %223 = vst [vmem:[%s2007_s26 + $0x118] sm:$0xff] %v222_v35  ;;  %v224_v36 = vld [vmem:[%s2002_s25 + $0x900] sm:$0xff]  ;;  %v226_v37 = vld [vmem:[%s2002_s25 + $0x908] sm:$0xff] }
  0x24   : > { %v228_v38 = vld [vmem:[%s2002_s25 + $0x980] sm:$0xff]  ;;  %225 = vst [vmem:[%s2007_s26 + $0x120] sm:$0xff] %v224_v36  ;;  %227 = vst [vmem:[%s2007_s26 + $0x128] sm:$0xff] %v226_v37  ;;  %v230_v39 = vld [vmem:[%s2002_s25 + $0x988] sm:$0xff] }
  0x25   : > { %229 = vst [vmem:[%s2007_s26 + $0x130] sm:$0xff] %v228_v38  ;;  %v232_v40 = vld [vmem:[%s2002_s25 + $0xa00] sm:$0xff]  ;;  %v234_v41 = vld [vmem:[%s2002_s25 + $0xa08] sm:$0xff]  ;;  %231 = vst [vmem:[%s2007_s26 + $0x138] sm:$0xff] %v230_v39 }
  0x26   : > { %233 = vst [vmem:[%s2007_s26 + $0x140] sm:$0xff] %v232_v40  ;;  %235 = vst [vmem:[%s2007_s26 + $0x148] sm:$0xff] %v234_v41  ;;  %v236_v42 = vld [vmem:[%s2002_s25 + $0xa80] sm:$0xff]  ;;  %v238_v43 = vld [vmem:[%s2002_s25 + $0xa88] sm:$0xff] }
  0x27   : > { %v240_v44 = vld [vmem:[%s2002_s25 + $0xb00] sm:$0xff]  ;;  %237 = vst [vmem:[%s2007_s26 + $0x150] sm:$0xff] %v236_v42  ;;  %239 = vst [vmem:[%s2007_s26 + $0x158] sm:$0xff] %v238_v43  ;;  %v242_v45 = vld [vmem:[%s2002_s25 + $0xb08] sm:$0xff] }
  0x28   : > { %241 = vst [vmem:[%s2007_s26 + $0x160] sm:$0xff] %v240_v44  ;;  %v244_v46 = vld [vmem:[%s2002_s25 + $0xb80] sm:$0xff]  ;;  %v246_v47 = vld [vmem:[%s2002_s25 + $0xb88] sm:$0xff]  ;;  %243 = vst [vmem:[%s2007_s26 + $0x168] sm:$0xff] %v242_v45 }
  0x29   : > { %245 = vst [vmem:[%s2007_s26 + $0x170] sm:$0xff] %v244_v46  ;;  %247 = vst [vmem:[%s2007_s26 + $0x178] sm:$0xff] %v246_v47  ;;  %v248_v48 = vld [vmem:[%s2002_s25 + $0xc00] sm:$0xff]  ;;  %v250_v49 = vld [vmem:[%s2002_s25 + $0xc08] sm:$0xff] }
  0x2a   : > { %v252_v50 = vld [vmem:[%s2002_s25 + $0xc80] sm:$0xff]  ;;  %249 = vst [vmem:[%s2007_s26 + $0x180] sm:$0xff] %v248_v48  ;;  %251 = vst [vmem:[%s2007_s26 + $0x188] sm:$0xff] %v250_v49  ;;  %v254_v51 = vld [vmem:[%s2002_s25 + $0xc88] sm:$0xff] }
  0x2b   : > { %253 = vst [vmem:[%s2007_s26 + $0x190] sm:$0xff] %v252_v50  ;;  %v256_v52 = vld [vmem:[%s2002_s25 + $0xd00] sm:$0xff]  ;;  %v258_v53 = vld [vmem:[%s2002_s25 + $0xd08] sm:$0xff]  ;;  %255 = vst [vmem:[%s2007_s26 + $0x198] sm:$0xff] %v254_v51 }
  0x2c   : > { %257 = vst [vmem:[%s2007_s26 + $0x1a0] sm:$0xff] %v256_v52  ;;  %259 = vst [vmem:[%s2007_s26 + $0x1a8] sm:$0xff] %v258_v53  ;;  %v260_v54 = vld [vmem:[%s2002_s25 + $0xd80] sm:$0xff]  ;;  %v262_v55 = vld [vmem:[%s2002_s25 + $0xd88] sm:$0xff] }
  0x2d   : > { %v264_v56 = vld [vmem:[%s2002_s25 + $0xe00] sm:$0xff]  ;;  %261 = vst [vmem:[%s2007_s26 + $0x1b0] sm:$0xff] %v260_v54  ;;  %263 = vst [vmem:[%s2007_s26 + $0x1b8] sm:$0xff] %v262_v55  ;;  %v266_v57 = vld [vmem:[%s2002_s25 + $0xe08] sm:$0xff] }
  0x2e   : > { %265 = vst [vmem:[%s2007_s26 + $0x1c0] sm:$0xff] %v264_v56  ;;  %v268_v58 = vld [vmem:[%s2002_s25 + $0xe80] sm:$0xff]  ;;  %v270_v59 = vld [vmem:[%s2002_s25 + $0xe88] sm:$0xff]  ;;  %267 = vst [vmem:[%s2007_s26 + $0x1c8] sm:$0xff] %v266_v57 }
  0x2f   : > { %269 = vst [vmem:[%s2007_s26 + $0x1d0] sm:$0xff] %v268_v58  ;;  %271 = vst [vmem:[%s2007_s26 + $0x1d8] sm:$0xff] %v270_v59  ;;  %v272_v60 = vld [vmem:[%s2002_s25 + $0xf00] sm:$0xff]  ;;  %v274_v61 = vld [vmem:[%s2002_s25 + $0xf08] sm:$0xff] }
  0x30   : > { %v276_v62 = vld [vmem:[%s2002_s25 + $0xf80] sm:$0xff]  ;;  %273 = vst [vmem:[%s2007_s26 + $0x1e0] sm:$0xff] %v272_v60  ;;  %275 = vst [vmem:[%s2007_s26 + $0x1e8] sm:$0xff] %v274_v61  ;;  %v278_v63 = vld [vmem:[%s2002_s25 + $0xf88] sm:$0xff] }
  0x31   : > { %277 = vst [vmem:[%s2007_s26 + $0x1f0] sm:$0xff] %v276_v62  ;;  %v280_v0 = vld [vmem:[%s2002_s25 + $0x1000] sm:$0xff]  ;;  %v282_v1 = vld [vmem:[%s2002_s25 + $0x1008] sm:$0xff]  ;;  %279 = vst [vmem:[%s2007_s26 + $0x1f8] sm:$0xff] %v278_v63 }
  0x32   : > { %281 = vst [vmem:[%s2007_s26 + $0x200] sm:$0xff] %v280_v0  ;;  %283 = vst [vmem:[%s2007_s26 + $0x208] sm:$0xff] %v282_v1  ;;  %v284_v2 = vld [vmem:[%s2002_s25 + $0x1080] sm:$0xff]  ;;  %v286_v3 = vld [vmem:[%s2002_s25 + $0x1088] sm:$0xff] }
  0x33   : > { %v288_v4 = vld [vmem:[%s2002_s25 + $0x1100] sm:$0xff]  ;;  %285 = vst [vmem:[%s2007_s26 + $0x210] sm:$0xff] %v284_v2  ;;  %287 = vst [vmem:[%s2007_s26 + $0x218] sm:$0xff] %v286_v3  ;;  %v290_v5 = vld [vmem:[%s2002_s25 + $0x1108] sm:$0xff] }
  0x34   : > { %289 = vst [vmem:[%s2007_s26 + $0x220] sm:$0xff] %v288_v4  ;;  %v292_v6 = vld [vmem:[%s2002_s25 + $0x1180] sm:$0xff]  ;;  %v294_v7 = vld [vmem:[%s2002_s25 + $0x1188] sm:$0xff]  ;;  %291 = vst [vmem:[%s2007_s26 + $0x228] sm:$0xff] %v290_v5 }
  0x35   : > { %293 = vst [vmem:[%s2007_s26 + $0x230] sm:$0xff] %v292_v6  ;;  %295 = vst [vmem:[%s2007_s26 + $0x238] sm:$0xff] %v294_v7  ;;  %v296_v8 = vld [vmem:[%s2002_s25 + $0x1200] sm:$0xff]  ;;  %v298_v9 = vld [vmem:[%s2002_s25 + $0x1208] sm:$0xff] }
  0x36   : > { %v300_v10 = vld [vmem:[%s2002_s25 + $0x1280] sm:$0xff]  ;;  %297 = vst [vmem:[%s2007_s26 + $0x240] sm:$0xff] %v296_v8  ;;  %299 = vst [vmem:[%s2007_s26 + $0x248] sm:$0xff] %v298_v9  ;;  %v302_v11 = vld [vmem:[%s2002_s25 + $0x1288] sm:$0xff] }
  0x37   : > { %301 = vst [vmem:[%s2007_s26 + $0x250] sm:$0xff] %v300_v10  ;;  %v304_v12 = vld [vmem:[%s2002_s25 + $0x1300] sm:$0xff]  ;;  %v306_v13 = vld [vmem:[%s2002_s25 + $0x1308] sm:$0xff]  ;;  %303 = vst [vmem:[%s2007_s26 + $0x258] sm:$0xff] %v302_v11 }
  0x38   : > { %305 = vst [vmem:[%s2007_s26 + $0x260] sm:$0xff] %v304_v12  ;;  %307 = vst [vmem:[%s2007_s26 + $0x268] sm:$0xff] %v306_v13  ;;  %v308_v14 = vld [vmem:[%s2002_s25 + $0x1380] sm:$0xff]  ;;  %v310_v15 = vld [vmem:[%s2002_s25 + $0x1388] sm:$0xff] }
  0x39   : > { %v312_v16 = vld [vmem:[%s2002_s25 + $0x1400] sm:$0xff]  ;;  %309 = vst [vmem:[%s2007_s26 + $0x270] sm:$0xff] %v308_v14  ;;  %311 = vst [vmem:[%s2007_s26 + $0x278] sm:$0xff] %v310_v15  ;;  %v314_v17 = vld [vmem:[%s2002_s25 + $0x1408] sm:$0xff] }
  0x3a   : > { %313 = vst [vmem:[%s2007_s26 + $0x280] sm:$0xff] %v312_v16  ;;  %v316_v18 = vld [vmem:[%s2002_s25 + $0x1480] sm:$0xff]  ;;  %v318_v19 = vld [vmem:[%s2002_s25 + $0x1488] sm:$0xff]  ;;  %315 = vst [vmem:[%s2007_s26 + $0x288] sm:$0xff] %v314_v17 }
  0x3b   : > { %317 = vst [vmem:[%s2007_s26 + $0x290] sm:$0xff] %v316_v18  ;;  %319 = vst [vmem:[%s2007_s26 + $0x298] sm:$0xff] %v318_v19  ;;  %v320_v20 = vld [vmem:[%s2002_s25 + $0x1500] sm:$0xff]  ;;  %v322_v21 = vld [vmem:[%s2002_s25 + $0x1508] sm:$0xff] }
  0x3c   : > { %v324_v22 = vld [vmem:[%s2002_s25 + $0x1580] sm:$0xff]  ;;  %321 = vst [vmem:[%s2007_s26 + $0x2a0] sm:$0xff] %v320_v20  ;;  %323 = vst [vmem:[%s2007_s26 + $0x2a8] sm:$0xff] %v322_v21  ;;  %v326_v23 = vld [vmem:[%s2002_s25 + $0x1588] sm:$0xff] }
  0x3d   : > { %325 = vst [vmem:[%s2007_s26 + $0x2b0] sm:$0xff] %v324_v22  ;;  %v328_v24 = vld [vmem:[%s2002_s25 + $0x1600] sm:$0xff]  ;;  %v330_v25 = vld [vmem:[%s2002_s25 + $0x1608] sm:$0xff]  ;;  %327 = vst [vmem:[%s2007_s26 + $0x2b8] sm:$0xff] %v326_v23 }
  0x3e   : > { %329 = vst [vmem:[%s2007_s26 + $0x2c0] sm:$0xff] %v328_v24  ;;  %331 = vst [vmem:[%s2007_s26 + $0x2c8] sm:$0xff] %v330_v25  ;;  %v332_v26 = vld [vmem:[%s2002_s25 + $0x1680] sm:$0xff]  ;;  %v334_v27 = vld [vmem:[%s2002_s25 + $0x1688] sm:$0xff] }
  0x3f   : > { %v336_v28 = vld [vmem:[%s2002_s25 + $0x1700] sm:$0xff]  ;;  %333 = vst [vmem:[%s2007_s26 + $0x2d0] sm:$0xff] %v332_v26  ;;  %335 = vst [vmem:[%s2007_s26 + $0x2d8] sm:$0xff] %v334_v27  ;;  %v338_v29 = vld [vmem:[%s2002_s25 + $0x1708] sm:$0xff] }
  0x40   : > { %337 = vst [vmem:[%s2007_s26 + $0x2e0] sm:$0xff] %v336_v28  ;;  %v340_v30 = vld [vmem:[%s2002_s25 + $0x1780] sm:$0xff]  ;;  %v342_v31 = vld [vmem:[%s2002_s25 + $0x1788] sm:$0xff]  ;;  %339 = vst [vmem:[%s2007_s26 + $0x2e8] sm:$0xff] %v338_v29 }
  0x41   : > { %341 = vst [vmem:[%s2007_s26 + $0x2f0] sm:$0xff] %v340_v30  ;;  %343 = vst [vmem:[%s2007_s26 + $0x2f8] sm:$0xff] %v342_v31  ;;  %v344_v32 = vld [vmem:[%s2002_s25 + $0x1800] sm:$0xff]  ;;  %v346_v33 = vld [vmem:[%s2002_s25 + $0x1808] sm:$0xff] }
  0x42   : > { %v348_v34 = vld [vmem:[%s2002_s25 + $0x1880] sm:$0xff]  ;;  %345 = vst [vmem:[%s2007_s26 + $0x300] sm:$0xff] %v344_v32  ;;  %347 = vst [vmem:[%s2007_s26 + $0x308] sm:$0xff] %v346_v33  ;;  %v350_v35 = vld [vmem:[%s2002_s25 + $0x1888] sm:$0xff] }
  0x43   : > { %349 = vst [vmem:[%s2007_s26 + $0x310] sm:$0xff] %v348_v34  ;;  %v352_v36 = vld [vmem:[%s2002_s25 + $0x1900] sm:$0xff]  ;;  %v354_v37 = vld [vmem:[%s2002_s25 + $0x1908] sm:$0xff]  ;;  %351 = vst [vmem:[%s2007_s26 + $0x318] sm:$0xff] %v350_v35 }
  0x44   : > { %353 = vst [vmem:[%s2007_s26 + $0x320] sm:$0xff] %v352_v36  ;;  %355 = vst [vmem:[%s2007_s26 + $0x328] sm:$0xff] %v354_v37  ;;  %v356_v38 = vld [vmem:[%s2002_s25 + $0x1980] sm:$0xff]  ;;  %v358_v39 = vld [vmem:[%s2002_s25 + $0x1988] sm:$0xff] }
  0x45   : > { %v360_v40 = vld [vmem:[%s2002_s25 + $0x1a00] sm:$0xff]  ;;  %357 = vst [vmem:[%s2007_s26 + $0x330] sm:$0xff] %v356_v38  ;;  %359 = vst [vmem:[%s2007_s26 + $0x338] sm:$0xff] %v358_v39  ;;  %v362_v41 = vld [vmem:[%s2002_s25 + $0x1a08] sm:$0xff] }
  0x46   : > { %361 = vst [vmem:[%s2007_s26 + $0x340] sm:$0xff] %v360_v40  ;;  %v364_v42 = vld [vmem:[%s2002_s25 + $0x1a80] sm:$0xff]  ;;  %v366_v43 = vld [vmem:[%s2002_s25 + $0x1a88] sm:$0xff]  ;;  %363 = vst [vmem:[%s2007_s26 + $0x348] sm:$0xff] %v362_v41 }
  0x47   : > { %365 = vst [vmem:[%s2007_s26 + $0x350] sm:$0xff] %v364_v42  ;;  %367 = vst [vmem:[%s2007_s26 + $0x358] sm:$0xff] %v366_v43  ;;  %v368_v44 = vld [vmem:[%s2002_s25 + $0x1b00] sm:$0xff]  ;;  %v370_v45 = vld [vmem:[%s2002_s25 + $0x1b08] sm:$0xff] }
  0x48   : > { %v372_v46 = vld [vmem:[%s2002_s25 + $0x1b80] sm:$0xff]  ;;  %369 = vst [vmem:[%s2007_s26 + $0x360] sm:$0xff] %v368_v44  ;;  %371 = vst [vmem:[%s2007_s26 + $0x368] sm:$0xff] %v370_v45  ;;  %v374_v47 = vld [vmem:[%s2002_s25 + $0x1b88] sm:$0xff] }
  0x49   : > { %373 = vst [vmem:[%s2007_s26 + $0x370] sm:$0xff] %v372_v46  ;;  %v376_v48 = vld [vmem:[%s2002_s25 + $0x1c00] sm:$0xff]  ;;  %v378_v49 = vld [vmem:[%s2002_s25 + $0x1c08] sm:$0xff]  ;;  %375 = vst [vmem:[%s2007_s26 + $0x378] sm:$0xff] %v374_v47 }
  0x4a   : > { %377 = vst [vmem:[%s2007_s26 + $0x380] sm:$0xff] %v376_v48  ;;  %379 = vst [vmem:[%s2007_s26 + $0x388] sm:$0xff] %v378_v49  ;;  %v380_v50 = vld [vmem:[%s2002_s25 + $0x1c80] sm:$0xff]  ;;  %v382_v51 = vld [vmem:[%s2002_s25 + $0x1c88] sm:$0xff] }
  0x4b   : > { %v384_v52 = vld [vmem:[%s2002_s25 + $0x1d00] sm:$0xff]  ;;  %381 = vst [vmem:[%s2007_s26 + $0x390] sm:$0xff] %v380_v50  ;;  %383 = vst [vmem:[%s2007_s26 + $0x398] sm:$0xff] %v382_v51  ;;  %v386_v53 = vld [vmem:[%s2002_s25 + $0x1d08] sm:$0xff] }
  0x4c   : > { %385 = vst [vmem:[%s2007_s26 + $0x3a0] sm:$0xff] %v384_v52  ;;  %v388_v54 = vld [vmem:[%s2002_s25 + $0x1d80] sm:$0xff]  ;;  %v390_v55 = vld [vmem:[%s2002_s25 + $0x1d88] sm:$0xff]  ;;  %387 = vst [vmem:[%s2007_s26 + $0x3a8] sm:$0xff] %v386_v53 }
  0x4d   : > { %389 = vst [vmem:[%s2007_s26 + $0x3b0] sm:$0xff] %v388_v54  ;;  %391 = vst [vmem:[%s2007_s26 + $0x3b8] sm:$0xff] %v390_v55  ;;  %v392_v56 = vld [vmem:[%s2002_s25 + $0x1e00] sm:$0xff]  ;;  %v394_v57 = vld [vmem:[%s2002_s25 + $0x1e08] sm:$0xff] }
  0x4e   : > { %v396_v58 = vld [vmem:[%s2002_s25 + $0x1e80] sm:$0xff]  ;;  %393 = vst [vmem:[%s2007_s26 + $0x3c0] sm:$0xff] %v392_v56  ;;  %395 = vst [vmem:[%s2007_s26 + $0x3c8] sm:$0xff] %v394_v57  ;;  %v398_v59 = vld [vmem:[%s2002_s25 + $0x1e88] sm:$0xff] }
  0x4f   : > { %397 = vst [vmem:[%s2007_s26 + $0x3d0] sm:$0xff] %v396_v58  ;;  %v400_v60 = vld [vmem:[%s2002_s25 + $0x1f00] sm:$0xff]  ;;  %v402_v61 = vld [vmem:[%s2002_s25 + $0x1f08] sm:$0xff]  ;;  %399 = vst [vmem:[%s2007_s26 + $0x3d8] sm:$0xff] %v398_v59 }
  0x50   : > { %401 = vst [vmem:[%s2007_s26 + $0x3e0] sm:$0xff] %v400_v60  ;;  %403 = vst [vmem:[%s2007_s26 + $0x3e8] sm:$0xff] %v402_v61  ;;  %v404_v62 = vld [vmem:[%s2002_s25 + $0x1f80] sm:$0xff]  ;;  %v406_v63 = vld [vmem:[%s2002_s25 + $0x1f88] sm:$0xff] }
  0x51   : > { %405 = vst [vmem:[%s2007_s26 + $0x3f0] sm:$0xff] %v404_v62  ;;  %407 = vst [vmem:[%s2007_s26 + $0x3f8] sm:$0xff] %v406_v63 }
  0x52 PF: > { %p1555_p5 = scmp.ge.s32.totalorder %s1944_s14, 1  ;;  %p420_p6 = scmp.lt.s32.totalorder %s1944_s14, 9 }
  0x54   : > { %p421_p7 = pnand %p1555_p5, %p420_p6 }
  0x55   : > { %s427_s27 = sand.u32 (!%p421_p7), 1, %s1936_s12   ;;  %v2268_v0 = vld.sshfl [vmem:[%s2449_s0] sm:$0x33 pattern:$0x75316420] (!%p421_p7)  ;;  %v597_v1 = vlaneseq (!%p421_p7)  ;;  %s1557_s5 = sshll.u32 (!%p421_p7), %s1548_s15, 2 }
  0x56   : > { %424 = sbr.rel (%p421_p7) target bundleno = 441 (0x1b9), region = 51  ;;  %s1556_s30 = sshll.u32 (!%p421_p7), %s427_s27, 10  ;;  %v1946_v3 = vmov (!%p421_p7), 1966171168   ;;  %v625_v7 = vcombine.high (!%p421_p7), %v2268_v0, %v2268_v0 }
  0x57   : > { %v2270_v2 = vshrl.u32 (!%p421_p7), %v597_v1, 7  ;;  %v627_v4 = vunpack.c.l.s4 (!%p421_p7), %v1946_v3  ;;  %s2272_s4 = scalar_lea.vmem (!%p421_p7), [#allocation2], %s1556_s30  ;;  %p456_p8 = scmp.lt.s32.totalorder (!%p421_p7), %s1557_s5, 31 }
  0x58   : > { %v1730_v5 = vld [vmem:[%s2272_s4 + $0x4] ss:$16 sps:$4 sm:$0xff] (!%p421_p7)   ;;  %v1732_v6 = vld [vmem:[%s2272_s4 + $0xc] ss:$16 sps:$4 sm:$0xff] (!%p421_p7)   ;;  %v1734_v9 = vld [vmem:[%s2272_s4] ss:$16 sps:$4 sm:$0xff] (!%p421_p7)  }
  0x59   : > { %v628_v8 = vunpack.c.0.s8 (!%p421_p7), %v627_v4  ;;  %1286 = vmatprep.subr.bf16.mxu0 (!%p421_p7), %v1730_v5  ;;  %v1735_v10 = vld [vmem:[%s2272_s4 + $0x8] ss:$16 sps:$4 sm:$0xff] (!%p421_p7)   ;;  %1368 = vmatprep.subr.bf16.mxu1 (!%p421_p7), %v1732_v6  ;;  %v1736_v11 = vld [vmem:[%s2272_s4 + $0x24] ss:$16 sps:$4 sm:$0xff] (!%p421_p7)   ;;  %v1738_v13 = vld [vmem:[%s2272_s4 + $0x2c] ss:$16 sps:$4 sm:$0xff] (!%p421_p7)  }
  0x5a   : > { %1287 = vmatpush1.bf16.msra.mxu0 (!%p421_p7), %v1734_v9  ;;  %1369 = vmatpush1.bf16.msra.mxu1 (!%p421_p7), %v1735_v10  ;;  %v1740_v14 = vld [vmem:[%s2272_s4 + $0x20] ss:$16 sps:$4 sm:$0xff] (!%p421_p7)   ;;  %v1741_v15 = vld [vmem:[%s2272_s4 + $0x28] ss:$16 sps:$4 sm:$0xff] (!%p421_p7)   ;;  %v1742_v17 = vld [vmem:[%s2272_s4 + $0x44] ss:$16 sps:$4 sm:$0xff] (!%p421_p7)  }
  0x5b   : > { %v2282_v12 = vsub.s32 (!%p421_p7), %v628_v8, %v2270_v2  ;;  %1288 = vmatprep.subr.bf16.mxu0 (!%p421_p7), %v1736_v11  ;;  %1370 = vmatprep.subr.bf16.mxu1 (!%p421_p7), %v1738_v13  ;;  %v1744_v18 = vld [vmem:[%s2272_s4 + $0x4c] ss:$16 sps:$4 sm:$0xff] (!%p421_p7)   ;;  %v1746_v19 = vld [vmem:[%s2272_s4 + $0x40] ss:$16 sps:$4 sm:$0xff] (!%p421_p7)   ;;  %v1747_v20 = vld [vmem:[%s2272_s4 + $0x48] ss:$16 sps:$4 sm:$0xff] (!%p421_p7)  }
  0x5c   : > { %v1748_v21 = vld [vmem:[%s2272_s4 + $0x64] ss:$16 sps:$4 sm:$0xff] (!%p421_p7)   ;;  %v1750_v22 = vld [vmem:[%s2272_s4 + $0x6c] ss:$16 sps:$4 sm:$0xff] (!%p421_p7)   ;;  %v1752_v23 = vld [vmem:[%s2272_s4 + $0x60] ss:$16 sps:$4 sm:$0xff] (!%p421_p7)  }
  0x5d   : > { %v2288_v16 = vrot.slane %v625_v7, %v2282_v12  ;;  %v1753_v24 = vld [vmem:[%s2272_s4 + $0x68] ss:$16 sps:$4 sm:$0xff]   ;;  %v1754_v25 = vld [vmem:[%s2272_s4 + $0x84] ss:$16 sps:$4 sm:$0xff]   ;;  %v1756_v26 = vld [vmem:[%s2272_s4 + $0x8c] ss:$16 sps:$4 sm:$0xff]  }
  0x5e   : > { %1289 = vmatpush1.bf16.msra.mxu0 %v1740_v14  ;;  %1371 = vmatpush1.bf16.msra.mxu1 %v1741_v15  ;;  %v1758_v27 = vld [vmem:[%s2272_s4 + $0x80] ss:$16 sps:$4 sm:$0xff]   ;;  %v1759_v28 = vld [vmem:[%s2272_s4 + $0x88] ss:$16 sps:$4 sm:$0xff]   ;;  %v1760_v29 = vld [vmem:[%s2272_s4 + $0xa4] ss:$16 sps:$4 sm:$0xff]  }
  0x5f   : > { %1318 = vmatprep.mubr.bf16.mxu0 %v2288_v16  ;;  %1400 = vmatprep.mubr.bf16.mxu1 %v2288_v16  ;;  %v1762_v30 = vld [vmem:[%s2272_s4 + $0xac] ss:$16 sps:$4 sm:$0xff]   ;;  %v1764_v31 = vld [vmem:[%s2272_s4 + $0xa0] ss:$16 sps:$4 sm:$0xff]   ;;  %v1765_v32 = vld [vmem:[%s2272_s4 + $0xa8] ss:$16 sps:$4 sm:$0xff]  }
  0x60   : > { %1290 = vmatprep.subr.bf16.mxu0 %v1742_v17  ;;  %1372 = vmatprep.subr.bf16.mxu1 %v1744_v18  ;;  %v1766_v33 = vld [vmem:[%s2272_s4 + $0xc4] ss:$16 sps:$4 sm:$0xff]   ;;  %v1768_v34 = vld [vmem:[%s2272_s4 + $0xcc] ss:$16 sps:$4 sm:$0xff]   ;;  %v1770_v35 = vld [vmem:[%s2272_s4 + $0xc0] ss:$16 sps:$4 sm:$0xff]   ;;  %v2354_v17 = vrot.slane %v2268_v0, %v2282_v12 }
  0x61   : > { %v1771_v36 = vld [vmem:[%s2272_s4 + $0xc8] ss:$16 sps:$4 sm:$0xff]   ;;  %v1772_v37 = vld [vmem:[%s2272_s4 + $0xe4] ss:$16 sps:$4 sm:$0xff]   ;;  %v1774_v38 = vld [vmem:[%s2272_s4 + $0xec] ss:$16 sps:$4 sm:$0xff]  }
  0x62   : > { %1291 = vmatpush1.bf16.msra.mxu0 %v1746_v19  ;;  %1373 = vmatpush1.bf16.msra.mxu1 %v1747_v20  ;;  %v1776_v39 = vld [vmem:[%s2272_s4 + $0xe0] ss:$16 sps:$4 sm:$0xff]   ;;  %v1777_v40 = vld [vmem:[%s2272_s4 + $0xe8] ss:$16 sps:$4 sm:$0xff]   ;;  %v1778_v41 = vld [vmem:[%s2272_s4 + $0x104] ss:$16 sps:$4 sm:$0xff]   ;;  %v641_v20 = vcombine.high %v2288_v16, %v2288_v16 }
  0x63   : > { %1292 = vmatprep.subr.bf16.mxu0 %v1748_v21  ;;  %1374 = vmatprep.subr.bf16.mxu1 %v1750_v22  ;;  %v1780_v42 = vld [vmem:[%s2272_s4 + $0x10c] ss:$16 sps:$4 sm:$0xff]   ;;  %v1782_v43 = vld [vmem:[%s2272_s4 + $0x100] ss:$16 sps:$4 sm:$0xff]   ;;  %v1783_v44 = vld [vmem:[%s2272_s4 + $0x108] ss:$16 sps:$4 sm:$0xff]  }
  0x64   : > { %v1784_v45 = vld [vmem:[%s2272_s4 + $0x124] ss:$16 sps:$4 sm:$0xff]   ;;  %v1786_v46 = vld [vmem:[%s2272_s4 + $0x12c] ss:$16 sps:$4 sm:$0xff]   ;;  %v1788_v47 = vld [vmem:[%s2272_s4 + $0x120] ss:$16 sps:$4 sm:$0xff]  }
  0x65   : > { %v1789_v48 = vld [vmem:[%s2272_s4 + $0x128] ss:$16 sps:$4 sm:$0xff]   ;;  %v1790_v49 = vld [vmem:[%s2272_s4 + $0x144] ss:$16 sps:$4 sm:$0xff]   ;;  %v1792_v50 = vld [vmem:[%s2272_s4 + $0x14c] ss:$16 sps:$4 sm:$0xff]  }
  0x66   : > { %1293 = vmatpush1.bf16.msra.mxu0 %v1752_v23  ;;  %1375 = vmatpush1.bf16.msra.mxu1 %v1753_v24  ;;  %v1794_v51 = vld [vmem:[%s2272_s4 + $0x140] ss:$16 sps:$4 sm:$0xff]   ;;  %v1795_v52 = vld [vmem:[%s2272_s4 + $0x148] ss:$16 sps:$4 sm:$0xff]   ;;  %v1796_v53 = vld [vmem:[%s2272_s4 + $0x164] ss:$16 sps:$4 sm:$0xff]  }
  0x67   : > { %1294 = vmatprep.subr.bf16.mxu0 %v1754_v25  ;;  %1376 = vmatprep.subr.bf16.mxu1 %v1756_v26  ;;  %v1798_v54 = vld [vmem:[%s2272_s4 + $0x16c] ss:$16 sps:$4 sm:$0xff]   ;;  %v1800_v55 = vld [vmem:[%s2272_s4 + $0x160] ss:$16 sps:$4 sm:$0xff]   ;;  %v1801_v56 = vld [vmem:[%s2272_s4 + $0x168] ss:$16 sps:$4 sm:$0xff]  }
  0x68   : > { %v1802_v57 = vld [vmem:[%s2272_s4 + $0x184] ss:$16 sps:$4 sm:$0xff]   ;;  %v1804_v58 = vld [vmem:[%s2272_s4 + $0x18c] ss:$16 sps:$4 sm:$0xff]   ;;  %v1806_v59 = vld [vmem:[%s2272_s4 + $0x180] ss:$16 sps:$4 sm:$0xff]  }
  0x69   : > { %v1807_v60 = vld [vmem:[%s2272_s4 + $0x188] ss:$16 sps:$4 sm:$0xff]   ;;  %v1808_v61 = vld [vmem:[%s2272_s4 + $0x1a4] ss:$16 sps:$4 sm:$0xff]   ;;  %v1810_v62 = vld [vmem:[%s2272_s4 + $0x1ac] ss:$16 sps:$4 sm:$0xff]  }
  0x6a   : > { %1295 = vmatpush1.bf16.msra.mxu0 %v1758_v27  ;;  %1377 = vmatpush1.bf16.msra.mxu1 %v1759_v28  ;;  %v1812_v63 = vld [vmem:[%s2272_s4 + $0x1a0] ss:$16 sps:$4 sm:$0xff]   ;;  %v1813_v1 = vld [vmem:[%s2272_s4 + $0x1a8] ss:$16 sps:$4 sm:$0xff]   ;;  %v1814_v3 = vld [vmem:[%s2272_s4 + $0x1c4] ss:$16 sps:$4 sm:$0xff]  }
  0x6b   : > { %1296 = vmatprep.subr.bf16.mxu0 %v1760_v29  ;;  %1378 = vmatprep.subr.bf16.mxu1 %v1762_v30  ;;  %v1816_v4 = vld [vmem:[%s2272_s4 + $0x1cc] ss:$16 sps:$4 sm:$0xff]   ;;  %v1818_v5 = vld [vmem:[%s2272_s4 + $0x1c0] ss:$16 sps:$4 sm:$0xff]   ;;  %v1819_v6 = vld [vmem:[%s2272_s4 + $0x1c8] ss:$16 sps:$4 sm:$0xff]  }
  0x6c   : > { %v1820_v7 = vld [vmem:[%s2272_s4 + $0x1e4] ss:$16 sps:$4 sm:$0xff]   ;;  %v1822_v8 = vld [vmem:[%s2272_s4 + $0x1ec] ss:$16 sps:$4 sm:$0xff]   ;;  %v1824_v9 = vld [vmem:[%s2272_s4 + $0x1e0] ss:$16 sps:$4 sm:$0xff]  }
  0x6d   : > { %v1825_v10 = vld [vmem:[%s2272_s4 + $0x1e8] ss:$16 sps:$4 sm:$0xff]   ;;  %v1828_v11 = vld [vmem:[%s2272_s4 + $0x204] ss:$16 sps:$4 sm:$0xff]   ;;  %v1831_v13 = vld [vmem:[%s2272_s4 + $0x20c] ss:$16 sps:$4 sm:$0xff]  }
  0x6e   : > { %1297 = vmatpush1.bf16.msra.mxu0 %v1764_v31  ;;  %1379 = vmatpush1.bf16.msra.mxu1 %v1765_v32  ;;  %v1826_v14 = vld [vmem:[%s2272_s4 + $0x200] ss:$16 sps:$4 sm:$0xff]   ;;  %v1829_v15 = vld [vmem:[%s2272_s4 + $0x208] ss:$16 sps:$4 sm:$0xff]   ;;  %v1834_v18 = vld [vmem:[%s2272_s4 + $0x224] ss:$16 sps:$4 sm:$0xff]  }
  0x6f   : > { %1298 = vmatprep.subr.bf16.mxu0 %v1766_v33  ;;  %1380 = vmatprep.subr.bf16.mxu1 %v1768_v34  ;;  %v1837_v19 = vld [vmem:[%s2272_s4 + $0x22c] ss:$16 sps:$4 sm:$0xff]   ;;  %v1832_v21 = vld [vmem:[%s2272_s4 + $0x220] ss:$16 sps:$4 sm:$0xff]   ;;  %v1835_v0 = vld [vmem:[%s2272_s4 + $0x228] ss:$16 sps:$4 sm:$0xff]  }
  0x70   : > { %v1840_v12 = vld [vmem:[%s2272_s4 + $0x244] ss:$16 sps:$4 sm:$0xff]   ;;  %v1843_v22 = vld [vmem:[%s2272_s4 + $0x24c] ss:$16 sps:$4 sm:$0xff]   ;;  %v1838_v16 = vld [vmem:[%s2272_s4 + $0x240] ss:$16 sps:$4 sm:$0xff]  }
  0x71   : > { %v1841_v23 = vld [vmem:[%s2272_s4 + $0x248] ss:$16 sps:$4 sm:$0xff]   ;;  %v1846_v24 = vld [vmem:[%s2272_s4 + $0x264] ss:$16 sps:$4 sm:$0xff]   ;;  %v1849_v25 = vld [vmem:[%s2272_s4 + $0x26c] ss:$16 sps:$4 sm:$0xff]  }
  0x72   : > { %1299 = vmatpush1.bf16.msra.mxu0 %v1770_v35  ;;  %1381 = vmatpush1.bf16.msra.mxu1 %v1771_v36  ;;  %v1844_v26 = vld [vmem:[%s2272_s4 + $0x260] ss:$16 sps:$4 sm:$0xff]   ;;  %v1847_v27 = vld [vmem:[%s2272_s4 + $0x268] ss:$16 sps:$4 sm:$0xff]   ;;  %v1852_v28 = vld [vmem:[%s2272_s4 + $0x284] ss:$16 sps:$4 sm:$0xff]  }
  0x73   : > { %1300 = vmatprep.subr.bf16.mxu0 %v1772_v37  ;;  %1382 = vmatprep.subr.bf16.mxu1 %v1774_v38  ;;  %v1855_v29 = vld [vmem:[%s2272_s4 + $0x28c] ss:$16 sps:$4 sm:$0xff]   ;;  %v1850_v30 = vld [vmem:[%s2272_s4 + $0x280] ss:$16 sps:$4 sm:$0xff]   ;;  %v1853_v31 = vld [vmem:[%s2272_s4 + $0x288] ss:$16 sps:$4 sm:$0xff]  }
  0x74   : > { %v1858_v32 = vld [vmem:[%s2272_s4 + $0x2a4] ss:$16 sps:$4 sm:$0xff]   ;;  %v1861_v33 = vld [vmem:[%s2272_s4 + $0x2ac] ss:$16 sps:$4 sm:$0xff]   ;;  %v1856_v34 = vld [vmem:[%s2272_s4 + $0x2a0] ss:$16 sps:$4 sm:$0xff]  }
  0x75   : > { %v1859_v35 = vld [vmem:[%s2272_s4 + $0x2a8] ss:$16 sps:$4 sm:$0xff]   ;;  %v1864_v36 = vld [vmem:[%s2272_s4 + $0x2c4] ss:$16 sps:$4 sm:$0xff]   ;;  %v1867_v37 = vld [vmem:[%s2272_s4 + $0x2cc] ss:$16 sps:$4 sm:$0xff]  }
  0x76   : > { %1301 = vmatpush1.bf16.msra.mxu0 %v1776_v39  ;;  %1383 = vmatpush1.bf16.msra.mxu1 %v1777_v40  ;;  %v1862_v38 = vld [vmem:[%s2272_s4 + $0x2c0] ss:$16 sps:$4 sm:$0xff]   ;;  %v1865_v39 = vld [vmem:[%s2272_s4 + $0x2c8] ss:$16 sps:$4 sm:$0xff]   ;;  %v1870_v40 = vld [vmem:[%s2272_s4 + $0x2e4] ss:$16 sps:$4 sm:$0xff]  }
  0x77   : > { %1302 = vmatprep.subr.bf16.mxu0 %v1778_v41  ;;  %1384 = vmatprep.subr.bf16.mxu1 %v1780_v42  ;;  %v1873_v41 = vld [vmem:[%s2272_s4 + $0x2ec] ss:$16 sps:$4 sm:$0xff]   ;;  %v1868_v42 = vld [vmem:[%s2272_s4 + $0x2e0] ss:$16 sps:$4 sm:$0xff]   ;;  %s2457_s5 = smov (!%p456_p8, %s1557_s5), 31 }
  0x78   : > { %s458_s8 = scalar_lea.vmem %s2451_s2, %s2457_s5  ;;  %s1559_s9 = sshll.u32 %s2457_s5, 1 }
  0x79   : > { %s464_s12 = scalar_lea.vmem %s2452_s3, %s1559_s9 }
  0x7a   : > { %1303 = vmatpush1.bf16.msra.mxu0 %v1782_v43  ;;  %1385 = vmatpush1.bf16.msra.mxu1 %v1783_v44  ;;  %v1871_v43 = vld [vmem:[%s2272_s4 + $0x2e8] ss:$16 sps:$4 sm:$0xff]   ;;  %v1876_v44 = vld [vmem:[%s2272_s4 + $0x304] ss:$16 sps:$4 sm:$0xff]  }
  0x7b   : > { %1304 = vmatprep.subr.bf16.mxu0 %v1784_v45  ;;  %1386 = vmatprep.subr.bf16.mxu1 %v1786_v46  ;;  %v1879_v45 = vld [vmem:[%s2272_s4 + $0x30c] ss:$16 sps:$4 sm:$0xff]   ;;  %v1874_v46 = vld [vmem:[%s2272_s4 + $0x300] ss:$16 sps:$4 sm:$0xff]  }
  0x7e   : > { %1305 = vmatpush1.bf16.msra.mxu0 %v1788_v47  ;;  %1387 = vmatpush1.bf16.msra.mxu1 %v1789_v48  ;;  %v1877_v47 = vld [vmem:[%s2272_s4 + $0x308] ss:$16 sps:$4 sm:$0xff]   ;;  %v1882_v48 = vld [vmem:[%s2272_s4 + $0x324] ss:$16 sps:$4 sm:$0xff]  }
  0x7f   : > { %1306 = vmatprep.subr.bf16.mxu0 %v1790_v49  ;;  %1388 = vmatprep.subr.bf16.mxu1 %v1792_v50  ;;  %v1885_v49 = vld [vmem:[%s2272_s4 + $0x32c] ss:$16 sps:$4 sm:$0xff]   ;;  %v1880_v50 = vld [vmem:[%s2272_s4 + $0x320] ss:$16 sps:$4 sm:$0xff]  }
  0x82   : > { %1307 = vmatpush1.bf16.msra.mxu0 %v1794_v51  ;;  %1389 = vmatpush1.bf16.msra.mxu1 %v1795_v52  ;;  %v1883_v51 = vld [vmem:[%s2272_s4 + $0x328] ss:$16 sps:$4 sm:$0xff]   ;;  %v1888_v52 = vld [vmem:[%s2272_s4 + $0x344] ss:$16 sps:$4 sm:$0xff]  }
  0x83   : > { %1308 = vmatprep.subr.bf16.mxu0 %v1796_v53  ;;  %1390 = vmatprep.subr.bf16.mxu1 %v1798_v54  ;;  %v1891_v53 = vld [vmem:[%s2272_s4 + $0x34c] ss:$16 sps:$4 sm:$0xff]   ;;  %v1886_v54 = vld [vmem:[%s2272_s4 + $0x340] ss:$16 sps:$4 sm:$0xff]  }
  0x86   : > { %1309 = vmatpush1.bf16.msra.mxu0 %v1800_v55  ;;  %1391 = vmatpush1.bf16.msra.mxu1 %v1801_v56  ;;  %v1889_v55 = vld [vmem:[%s2272_s4 + $0x348] ss:$16 sps:$4 sm:$0xff]   ;;  %v1894_v56 = vld [vmem:[%s2272_s4 + $0x364] ss:$16 sps:$4 sm:$0xff]  }
  0x87   : > { %1310 = vmatprep.subr.bf16.mxu0 %v1802_v57  ;;  %1392 = vmatprep.subr.bf16.mxu1 %v1804_v58  ;;  %v1897_v57 = vld [vmem:[%s2272_s4 + $0x36c] ss:$16 sps:$4 sm:$0xff]   ;;  %v1892_v58 = vld [vmem:[%s2272_s4 + $0x360] ss:$16 sps:$4 sm:$0xff]  }
  0x8a   : > { %1311 = vmatpush1.bf16.msra.mxu0 %v1806_v59  ;;  %1393 = vmatpush1.bf16.msra.mxu1 %v1807_v60  ;;  %v1895_v59 = vld [vmem:[%s2272_s4 + $0x368] ss:$16 sps:$4 sm:$0xff]   ;;  %v1900_v60 = vld [vmem:[%s2272_s4 + $0x384] ss:$16 sps:$4 sm:$0xff]  }
  0x8b   : > { %1312 = vmatprep.subr.bf16.mxu0 %v1808_v61  ;;  %1394 = vmatprep.subr.bf16.mxu1 %v1810_v62  ;;  %v1903_v61 = vld [vmem:[%s2272_s4 + $0x38c] ss:$16 sps:$4 sm:$0xff]   ;;  %v1898_v62 = vld [vmem:[%s2272_s4 + $0x380] ss:$16 sps:$4 sm:$0xff]  }
  0x8e   : > { %1313 = vmatpush1.bf16.msra.mxu0 %v1812_v63  ;;  %1395 = vmatpush1.bf16.msra.mxu1 %v1813_v1  ;;  %v1901_v63 = vld [vmem:[%s2272_s4 + $0x388] ss:$16 sps:$4 sm:$0xff]   ;;  %v1906_v1 = vld [vmem:[%s2272_s4 + $0x3a4] ss:$16 sps:$4 sm:$0xff]  }
  0x8f   : > { %1314 = vmatprep.subr.bf16.mxu0 %v1814_v3  ;;  %1396 = vmatprep.subr.bf16.mxu1 %v1816_v4  ;;  %v1909_v3 = vld [vmem:[%s2272_s4 + $0x3ac] ss:$16 sps:$4 sm:$0xff]   ;;  %v1904_v4 = vld [vmem:[%s2272_s4 + $0x3a0] ss:$16 sps:$4 sm:$0xff]  }
  0x92   : > { %1315 = vmatpush1.bf16.msra.mxu0 %v1818_v5  ;;  %1397 = vmatpush1.bf16.msra.mxu1 %v1819_v6  ;;  %v1907_v5 = vld [vmem:[%s2272_s4 + $0x3a8] ss:$16 sps:$4 sm:$0xff]   ;;  %v1912_v6 = vld [vmem:[%s2272_s4 + $0x3c4] ss:$16 sps:$4 sm:$0xff]  }
  0x93   : > { %1316 = vmatprep.subr.bf16.mxu0 %v1820_v7  ;;  %1398 = vmatprep.subr.bf16.mxu1 %v1822_v8  ;;  %v1915_v7 = vld [vmem:[%s2272_s4 + $0x3cc] ss:$16 sps:$4 sm:$0xff]   ;;  %v1910_v8 = vld [vmem:[%s2272_s4 + $0x3c0] ss:$16 sps:$4 sm:$0xff]  }
  0x96   : > { %1317 = vmatpush1.bf16.msra.mxu0 %v1824_v9  ;;  %1399 = vmatpush1.bf16.msra.mxu1 %v1825_v10  ;;  %v1913_v9 = vld [vmem:[%s2272_s4 + $0x3c8] ss:$16 sps:$4 sm:$0xff]   ;;  %v1918_v10 = vld [vmem:[%s2272_s4 + $0x3e4] ss:$16 sps:$4 sm:$0xff]  }
  0x97   : > { %1327 = vmatprep.subr.bf16.mxu0 %v1828_v11  ;;  %1409 = vmatprep.subr.bf16.mxu1 %v1831_v13  ;;  %v1921_v11 = vld [vmem:[%s2272_s4 + $0x3ec] ss:$16 sps:$4 sm:$0xff]   ;;  %v1916_v13 = vld [vmem:[%s2272_s4 + $0x3e0] ss:$16 sps:$4 sm:$0xff]  }
  0x99   : > { %1319 = vmatmul.mubr.bf16.vlgmr.msra.gmra.mrb[0].mxu0 %v2354_v17  ;;  %1401 = vmatmul.mubr.bf16.vlgmr.msra.gmra.mrb[0].mxu1 %v2354_v17 }
  0x9a   : > { %1328 = vmatpush1.bf16.msra.mxu0 %v1826_v14  ;;  %1410 = vmatpush1.bf16.msra.mxu1 %v1829_v15  ;;  %v1919_v14 = vld [vmem:[%s2272_s4 + $0x3e8] ss:$16 sps:$4 sm:$0xff]   ;;  %v640_v15 = vcombine.high %v2354_v17, %v2354_v17  ;;  %v603_v17 = vsub.s32 1, %v2270_v2 }
  0x9b   : > { %1329 = vmatprep.subr.bf16.mxu0 %v1834_v18  ;;  %1411 = vmatprep.subr.bf16.mxu1 %v1837_v19  ;;  %v599_v18 = vsub.s32 0, %v2270_v2  ;;  %v607_v19 = vsub.s32 2, %v2270_v2 }
  0x9c   : > { %1359 = vmatprep.mubr.bf16.mxu0 %v641_v20  ;;  %1441 = vmatprep.mubr.bf16.mxu1 %v641_v20  ;;  %v595_v20 = vld [vmem:[%s458_s8] sm:$0xf] }
  0x9e   : > { %1330 = vmatpush1.bf16.msra.mxu0 %v1832_v21  ;;  %1412 = vmatpush1.bf16.msra.mxu1 %v1835_v0  ;;  %v611_v21 = vsub.s32 3, %v2270_v2  ;;  %v1947_v0 = vmov 1983009808  }
  0x9f   : > { %1331 = vmatprep.subr.bf16.mxu0 %v1840_v12  ;;  %1413 = vmatprep.subr.bf16.mxu1 %v1843_v22  ;;  %v1461_v12 = vunpack.c.l.s4 %v1947_v0  ;;  %v600_v22 = vrot.slane %v595_v20, %v599_v18 }
  0xa2   : > { %1332 = vmatpush1.bf16.msra.mxu0 %v1838_v16  ;;  %1414 = vmatpush1.bf16.msra.mxu1 %v1841_v23  ;;  %v608_v16 = vrot.slane %v595_v20, %v607_v19  ;;  %v604_v23 = vrot.slane %v595_v20, %v603_v17 }
  0xa3   : > { %1333 = vmatprep.subr.bf16.mxu0 %v1846_v24  ;;  %1415 = vmatprep.subr.bf16.mxu1 %v1849_v25  ;;  %v612_v24 = vrot.slane %v595_v20, %v611_v21 }
  0xa6   : > { %1334 = vmatpush1.bf16.msra.mxu0 %v1844_v26  ;;  %1416 = vmatpush1.bf16.msra.mxu1 %v1847_v27  ;;  %v1462_v27 = vunpack.c.0.s8 %v1461_v12 }
  0xa7   : > { %1335 = vmatprep.subr.bf16.mxu0 %v1852_v28  ;;  %1417 = vmatprep.subr.bf16.mxu1 %v1855_v29 }
  0xaa   : > { %1336 = vmatpush1.bf16.msra.mxu0 %v1850_v30  ;;  %1418 = vmatpush1.bf16.msra.mxu1 %v1853_v31 }
  0xab   : > { %1337 = vmatprep.subr.bf16.mxu0 %v1858_v32  ;;  %1419 = vmatprep.subr.bf16.mxu1 %v1861_v33 }
  0xae   : > { %1338 = vmatpush1.bf16.msra.mxu0 %v1856_v34  ;;  %1420 = vmatpush1.bf16.msra.mxu1 %v1859_v35 }
  0xaf   : > { %1339 = vmatprep.subr.bf16.mxu0 %v1864_v36  ;;  %1421 = vmatprep.subr.bf16.mxu1 %v1867_v37 }
  0xb2   : > { %1340 = vmatpush1.bf16.msra.mxu0 %v1862_v38  ;;  %1422 = vmatpush1.bf16.msra.mxu1 %v1865_v39 }
  0xb3   : > { %1341 = vmatprep.subr.bf16.mxu0 %v1870_v40  ;;  %1423 = vmatprep.subr.bf16.mxu1 %v1873_v41  ;;  %v1465_v41 = vsub.s32 %v1462_v27, %v2270_v2 }
  0xb6   : > { %1342 = vmatpush1.bf16.msra.mxu0 %v1868_v42  ;;  %1424 = vmatpush1.bf16.msra.mxu1 %v1871_v43 }
  0xb7   : > { %1343 = vmatprep.subr.bf16.mxu0 %v1876_v44  ;;  %1425 = vmatprep.subr.bf16.mxu1 %v1879_v45 }
  0xba   : > { %1344 = vmatpush1.bf16.msra.mxu0 %v1874_v46  ;;  %1426 = vmatpush1.bf16.msra.mxu1 %v1877_v47 }
  0xbb   : > { %1345 = vmatprep.subr.bf16.mxu0 %v1882_v48  ;;  %1427 = vmatprep.subr.bf16.mxu1 %v1885_v49 }
  0xbe   : > { %1346 = vmatpush1.bf16.msra.mxu0 %v1880_v50  ;;  %1428 = vmatpush1.bf16.msra.mxu1 %v1883_v51 }
  0xbf   : > { %1347 = vmatprep.subr.bf16.mxu0 %v1888_v52  ;;  %1429 = vmatprep.subr.bf16.mxu1 %v1891_v53 }
  0xc2   : > { %1348 = vmatpush1.bf16.msra.mxu0 %v1886_v54  ;;  %1430 = vmatpush1.bf16.msra.mxu1 %v1889_v55 }
  0xc3   : > { %1349 = vmatprep.subr.bf16.mxu0 %v1894_v56  ;;  %1431 = vmatprep.subr.bf16.mxu1 %v1897_v57 }
  0xc6   : > { %1350 = vmatpush1.bf16.msra.mxu0 %v1892_v58  ;;  %1432 = vmatpush1.bf16.msra.mxu1 %v1895_v59 }
  0xc7   : > { %1351 = vmatprep.subr.bf16.mxu0 %v1900_v60  ;;  %1433 = vmatprep.subr.bf16.mxu1 %v1903_v61 }
  0xca   : > { %1352 = vmatpush1.bf16.msra.mxu0 %v1898_v62  ;;  %1434 = vmatpush1.bf16.msra.mxu1 %v1901_v63 }
  0xcb   : > { %1353 = vmatprep.subr.bf16.mxu0 %v1906_v1  ;;  %1435 = vmatprep.subr.bf16.mxu1 %v1909_v3 }
  0xce   : > { %1354 = vmatpush1.bf16.msra.mxu0 %v1904_v4  ;;  %1436 = vmatpush1.bf16.msra.mxu1 %v1907_v5 }
  0xcf   : > { %1355 = vmatprep.subr.bf16.mxu0 %v1912_v6  ;;  %1437 = vmatprep.subr.bf16.mxu1 %v1915_v7 }
  0xd2   : > { %1356 = vmatpush1.bf16.msra.mxu0 %v1910_v8  ;;  %1438 = vmatpush1.bf16.msra.mxu1 %v1913_v9 }
  0xd3   : > { %1357 = vmatprep.subr.bf16.mxu0 %v1918_v10  ;;  %1439 = vmatprep.subr.bf16.mxu1 %v1921_v11 }
  0xd6   : > { %1358 = vmatpush1.bf16.msra.mxu0 %v1916_v13  ;;  %1440 = vmatpush1.bf16.msra.mxu1 %v1919_v14 }
  0xd9   : > { %1360 = vmatmul.mubr.bf16.vlgmr.msra.gmra.mrb[0].mxu0 %v640_v15  ;;  %1442 = vmatmul.mubr.bf16.vlgmr.msra.gmra.mrb[0].mxu1 %v640_v15 }
 0x1ac   : > { %v1361_v25 = vpop.f32.mrb[0].mxu0  ;;  %v1443_v26 = vpop.f32.mrb[0].mxu1 }
 0x1ad   : > { %v1692_v28 = vadd.f32 %v1361_v25, %v600_v22  ;;  %v1694_v29 = vadd.f32 %v1443_v26, %v608_v16  ;;  %v1363_v30 = vpop.f32.mrb[1].mxu0  ;;  %v1445_v31 = vpop.f32.mrb[1].mxu1 }
 0x1ae   : > { %v1693_v32 = vadd.f32 %v1363_v30, %v604_v23  ;;  %v1695_v33 = vadd.f32 %v1445_v31, %v612_v24  ;;  %v1365_v34 = vpop.f32.mrb[2].mxu0  ;;  %v1447_v35 = vpop.f32.mrb[2].mxu1 }
 0x1af   : > { %v1450_v36 = vmax.f32 %v1692_v28, 0.0  ;;  %v1452_v37 = vmax.f32 %v1694_v29, 0.0  ;;  %v1366_v38 = vpop.f32.mrb[3].mxu0  ;;  %v1448_v39 = vpop.f32.mrb[3].mxu1 }
 0x1b0   : > { %v1451_v40 = vmax.f32 %v1693_v32, 0.0  ;;  %v1453_v42 = vmax.f32 %v1695_v33, 0.0 }
 0x1b2   : > { %v1458_v43 = vcombine.low %v1450_v36, %v1451_v40  ;;  %v1459_v44 = vcombine.low %v1452_v37, %v1453_v42 }
 0x1b4   : > { %v1466_v45 = vrot.slane %v1458_v43, %v1465_v41  ;;  %v1473_v46 = vrot.slane %v1459_v44, %v1465_v41 }
 0x1b6   : > { %v1474_v47 = vcombine.low %v1466_v45, %v1473_v46 }
 0x1b8   : > { %1476 = vst [vmem:[%s464_s12] sm:$0xff] %v1474_v47 }
 0x1b9 PF: > { %p10_p9 = scmp.ge.s32.totalorder %s1985_s16, 10   ;;  %s2453_s12 = smov %s1940_s13 }
 0x1ba   : > { %s2454_s13 = smov %s1994_s19  ;;  %s2455_s14 = smov %s1985_s16 }
 0x1bb   :  { %12 = sbr.rel (!%p10_p9) target bundleno = 2 (0x2), region = 93 }

// kernel: cnn_batchnorm_relu_forward.9
= control target key start
LH: loop header
LB: loop body
LE: loop exit
PB: predicated region body
PF: predicated region fallthrough
CT: control target
= control target key end

     0   :  { %v287_v28 = vlaneseq  ;;  %v1962_v36 = vmov 1966171168   ;;  %s2413_s0 = inlined_call_operand.vmem [shape: bf16[2,2048], index: 0, kind: input, shape index: {}]   ;;  %s2414_s1 = inlined_call_operand.vmem [shape: bf16[2048,128], index: 1, kind: input, shape index: {}]   ;;  %s2415_s2 = inlined_call_operand.vmem [shape: f32[1,128], index: 2, kind: input, shape index: {}]   ;;  %s2416_s3 = inlined_call_operand.hbm [shape: f32[2,128], index: 3, kind: output, shape index: {}]  }
   0x1   :  { %v1808_v0 = vld [vmem:[%s2414_s1 + $0x40] sm:$0xff]   ;;  %v1812_v4 = vld [vmem:[%s2414_s1 + $0x48] sm:$0xff]   ;;  %v1816_v8 = vld [vmem:[%s2414_s1 + $0x50] sm:$0xff]   ;;  %v285_v37 = vunpack.c.l.s4 %v1962_v36 }
   0x2   :  { %v1809_v1 = vld [vmem:[%s2414_s1 + $0xc0] sm:$0xff]   ;;  %1630 = vmatprep.subr.bf16.mxu0 %v1808_v0  ;;  %v1813_v5 = vld [vmem:[%s2414_s1 + $0xc8] sm:$0xff]   ;;  %v1817_v9 = vld [vmem:[%s2414_s1 + $0xd0] sm:$0xff]   ;;  %v288_v33 = vshrl.u32 %v287_v28, 7 }
   0x3   :  { %v1810_v2 = vld [vmem:[%s2414_s1] sm:$0xff]   ;;  %1652 = vmatprep.subr.bf16.mxu1 %v1809_v1  ;;  %v1814_v6 = vld [vmem:[%s2414_s1 + $0x8] sm:$0xff]   ;;  %v1818_v10 = vld [vmem:[%s2414_s1 + $0x10] sm:$0xff]   ;;  %v286_v40 = vunpack.c.0.s8 %v285_v37 }
   0x4   :  { %v1811_v3 = vld [vmem:[%s2414_s1 + $0x80] sm:$0xff]   ;;  %1631 = vmatpush3.bf16.msra.mxu0 %v1810_v2  ;;  %v1815_v7 = vld [vmem:[%s2414_s1 + $0x88] sm:$0xff]   ;;  %v1819_v11 = vld [vmem:[%s2414_s1 + $0x90] sm:$0xff]  }
   0x5   :  { %1653 = vmatpush3.bf16.msra.mxu1 %v1811_v3  ;;  %1632 = vmatprep.subr.bf16.mxu0 %v1812_v4  ;;  %v1820_v12 = vld [vmem:[%s2414_s1 + $0x58] sm:$0xff]   ;;  %v1824_v16 = vld [vmem:[%s2414_s1 + $0x60] sm:$0xff]   ;;  %v1828_v20 = vld [vmem:[%s2414_s1 + $0x68] sm:$0xff]   ;;  %v2089_v41 = vsub.s32 %v286_v40, %v288_v33 }
   0x6   :  { %1654 = vmatprep.subr.bf16.mxu1 %v1813_v5  ;;  %v1821_v13 = vld [vmem:[%s2414_s1 + $0xd8] sm:$0xff]   ;;  %v1825_v17 = vld [vmem:[%s2414_s1 + $0xe0] sm:$0xff]   ;;  %v1829_v21 = vld [vmem:[%s2414_s1 + $0xe8] sm:$0xff]  }
   0x7   :  { %v1822_v14 = vld [vmem:[%s2414_s1 + $0x18] sm:$0xff]   ;;  %v1826_v18 = vld [vmem:[%s2414_s1 + $0x20] sm:$0xff]   ;;  %v1830_v22 = vld [vmem:[%s2414_s1 + $0x28] sm:$0xff]  }
   0x8   :  { %1633 = vmatpush3.bf16.msra.mxu0 %v1814_v6  ;;  %v1823_v15 = vld [vmem:[%s2414_s1 + $0x98] sm:$0xff]   ;;  %v1827_v19 = vld [vmem:[%s2414_s1 + $0xa0] sm:$0xff]   ;;  %v1831_v23 = vld [vmem:[%s2414_s1 + $0xa8] sm:$0xff]  }
   0x9   :  { %1655 = vmatpush3.bf16.msra.mxu1 %v1815_v7  ;;  %1634 = vmatprep.subr.bf16.mxu0 %v1816_v8  ;;  %v1832_v24 = vld [vmem:[%s2414_s1 + $0x70] sm:$0xff]   ;;  %v1836_v29 = vld [vmem:[%s2414_s1 + $0x78] sm:$0xff]   ;;  %v16_v34 = vld [vmem:[%s2413_s0] sm:$0xff] }
   0xa   :  { %1656 = vmatprep.subr.bf16.mxu1 %v1817_v9  ;;  %v1833_v25 = vld [vmem:[%s2414_s1 + $0xf0] sm:$0xff]   ;;  %v1837_v30 = vld [vmem:[%s2414_s1 + $0xf8] sm:$0xff]   ;;  %v1841_v35 = vld [vmem:[%s2414_s1 + $0x140] sm:$0xff]   ;;  %v283_v39 = vcombine.high %v16_v34, %v16_v34  ;;  %v290_v42 = vrot.slane %v16_v34, %v2089_v41 }
   0xb   :  { %v1834_v26 = vld [vmem:[%s2414_s1 + $0x30] sm:$0xff]   ;;  %v1838_v31 = vld [vmem:[%s2414_s1 + $0x38] sm:$0xff]   ;;  %v1842_v38 = vld [vmem:[%s2414_s1 + $0x1c0] sm:$0xff]  }
   0xc   :  { %1635 = vmatpush3.bf16.msra.mxu0 %v1818_v10  ;;  %v1835_v27 = vld [vmem:[%s2414_s1 + $0xb0] sm:$0xff]   ;;  %v1839_v32 = vld [vmem:[%s2414_s1 + $0xb8] sm:$0xff]   ;;  %v2093_v43 = vrot.slane %v283_v39, %v2089_v41  ;;  %v298_v44 = vcombine.high %v290_v42, %v290_v42  ;;  %v306_v45 = vrot.slane %v290_v42, %v2089_v41  ;;  %v1843_v48 = vld [vmem:[%s2414_s1 + $0x100] sm:$0xff]  }
   0xd   :  { %1657 = vmatpush3.bf16.msra.mxu1 %v1819_v11  ;;  %1636 = vmatprep.subr.bf16.mxu0 %v1820_v12  ;;  %v1845_v51 = vld [vmem:[%s2414_s1 + $0x148] sm:$0xff]   ;;  %v1844_v53 = vld [vmem:[%s2414_s1 + $0x180] sm:$0xff]   ;;  %v1849_v57 = vld [vmem:[%s2414_s1 + $0x150] sm:$0xff]  }
   0xe   :  { %1658 = vmatprep.subr.bf16.mxu1 %v1821_v13  ;;  %v299_v46 = vcombine.high %v2093_v43, %v2093_v43  ;;  %v320_v47 = vrot.slane %v298_v44, %v2089_v41  ;;  %v328_v50 = vcombine.high %v306_v45, %v306_v45  ;;  %v1846_v54 = vld [vmem:[%s2414_s1 + $0x1c8] sm:$0xff]   ;;  %v1850_v59 = vld [vmem:[%s2414_s1 + $0x1d0] sm:$0xff]   ;;  %v1853_v61 = vld [vmem:[%s2414_s1 + $0x158] sm:$0xff]  }
   0xf   :  { %v1847_v56 = vld [vmem:[%s2414_s1 + $0x108] sm:$0xff]   ;;  %v1851_v60 = vld [vmem:[%s2414_s1 + $0x110] sm:$0xff]   ;;  %v1854_v63 = vld [vmem:[%s2414_s1 + $0x1d8] sm:$0xff]  }
  0x10   :  { %1637 = vmatpush3.bf16.msra.mxu0 %v1822_v14  ;;  %v327_v49 = vrot.slane %v299_v46, %v2089_v41  ;;  %1197 = vmatprep.mubr.bf16.mxu0 %v320_v47  ;;  %v330_v52 = vcombine.high %v320_v47, %v320_v47  ;;  %v1848_v58 = vld [vmem:[%s2414_s1 + $0x188] sm:$0xff]   ;;  %v1852_v62 = vld [vmem:[%s2414_s1 + $0x190] sm:$0xff]   ;;  %v1855_v0 = vld [vmem:[%s2414_s1 + $0x118] sm:$0xff]  }
  0x11   :  { %1659 = vmatpush3.bf16.msra.mxu1 %v1823_v15  ;;  %1638 = vmatprep.subr.bf16.mxu0 %v1824_v16  ;;  %v1857_v1 = vld [vmem:[%s2414_s1 + $0x160] sm:$0xff]   ;;  %v1856_v2 = vld [vmem:[%s2414_s1 + $0x198] sm:$0xff]   ;;  %v1861_v5 = vld [vmem:[%s2414_s1 + $0x168] sm:$0xff]  }
  0x12   :  { %1660 = vmatprep.subr.bf16.mxu1 %v1825_v17  ;;  %v331_v55 = vcombine.high %v327_v49, %v327_v49  ;;  %1237 = vmatprep.mubr.bf16.mxu1 %v330_v52  ;;  %v1858_v3 = vld [vmem:[%s2414_s1 + $0x1e0] sm:$0xff]   ;;  %v1862_v7 = vld [vmem:[%s2414_s1 + $0x1e8] sm:$0xff]   ;;  %v1865_v9 = vld [vmem:[%s2414_s1 + $0x170] sm:$0xff]   ;;  %v313_v17 = vrot.slane %v2093_v43, %v2089_v41 }
  0x13   :  { %v1859_v4 = vld [vmem:[%s2414_s1 + $0x120] sm:$0xff]   ;;  %v1863_v8 = vld [vmem:[%s2414_s1 + $0x128] sm:$0xff]   ;;  %v1866_v11 = vld [vmem:[%s2414_s1 + $0x1f0] sm:$0xff]  }
  0x14   :  { %1639 = vmatpush3.bf16.msra.mxu0 %v1826_v18  ;;  %v1860_v6 = vld [vmem:[%s2414_s1 + $0x1a0] sm:$0xff]   ;;  %v1864_v10 = vld [vmem:[%s2414_s1 + $0x1a8] sm:$0xff]   ;;  %v1867_v12 = vld [vmem:[%s2414_s1 + $0x130] sm:$0xff]  }
  0x15   :  { %1661 = vmatpush3.bf16.msra.mxu1 %v1827_v19  ;;  %1640 = vmatprep.subr.bf16.mxu0 %v1828_v20  ;;  %v1869_v13 = vld [vmem:[%s2414_s1 + $0x178] sm:$0xff]   ;;  %v1868_v14 = vld [vmem:[%s2414_s1 + $0x1b0] sm:$0xff]   ;;  %v1873_v18 = vld [vmem:[%s2414_s1 + $0x240] sm:$0xff]  }
  0x16   :  { %1662 = vmatprep.subr.bf16.mxu1 %v1829_v21  ;;  %v1870_v15 = vld [vmem:[%s2414_s1 + $0x1f8] sm:$0xff]   ;;  %v1874_v20 = vld [vmem:[%s2414_s1 + $0x2c0] sm:$0xff]   ;;  %v1880_v28 = vld [vmem:[%s2414_s1 + $0x288] sm:$0xff]  }
  0x17   :  { %v1871_v16 = vld [vmem:[%s2414_s1 + $0x138] sm:$0xff]   ;;  %v1875_v21 = vld [vmem:[%s2414_s1 + $0x200] sm:$0xff]   ;;  %v1893_v39 = vld [vmem:[%s2414_s1 + $0x268] sm:$0xff]  }
  0x18   :  { %1641 = vmatpush3.bf16.msra.mxu0 %v1830_v22  ;;  %v1872_v19 = vld [vmem:[%s2414_s1 + $0x1b8] sm:$0xff]   ;;  %v329_v22 = vcombine.high %v313_v17, %v313_v17  ;;  %v1890_v37 = vld [vmem:[%s2414_s1 + $0x2e0] sm:$0xff]   ;;  %v1894_v42 = vld [vmem:[%s2414_s1 + $0x2e8] sm:$0xff]  }
  0x19   :  { %1663 = vmatpush3.bf16.msra.mxu1 %v1831_v23  ;;  %1642 = vmatprep.subr.bf16.mxu0 %v1832_v24  ;;  %v1877_v23 = vld [vmem:[%s2414_s1 + $0x248] sm:$0xff]   ;;  %v1876_v24 = vld [vmem:[%s2414_s1 + $0x280] sm:$0xff]   ;;  %v1886_v33 = vld [vmem:[%s2414_s1 + $0x2d8] sm:$0xff]  }
  0x1a   :  { %1664 = vmatprep.subr.bf16.mxu1 %v1833_v25  ;;  %v1878_v25 = vld [vmem:[%s2414_s1 + $0x2c8] sm:$0xff]   ;;  %v1887_v34 = vld [vmem:[%s2414_s1 + $0x218] sm:$0xff]   ;;  %v1892_v40 = vld [vmem:[%s2414_s1 + $0x2a0] sm:$0xff]  }
  0x1b   :  { %v1888_v36 = vld [vmem:[%s2414_s1 + $0x298] sm:$0xff]   ;;  %v1895_v43 = vld [vmem:[%s2414_s1 + $0x228] sm:$0xff]   ;;  %v1897_v44 = vld [vmem:[%s2414_s1 + $0x270] sm:$0xff]  }
  0x1c   :  { %1643 = vmatpush3.bf16.msra.mxu0 %v1834_v26  ;;  %v1879_v26 = vld [vmem:[%s2414_s1 + $0x208] sm:$0xff]  }
  0x1d   :  { %1665 = vmatpush3.bf16.msra.mxu1 %v1835_v27  ;;  %1644 = vmatprep.subr.bf16.mxu0 %v1836_v29  ;;  %v1881_v27 = vld [vmem:[%s2414_s1 + $0x250] sm:$0xff]   ;;  %v1896_v46 = vld [vmem:[%s2414_s1 + $0x2a8] sm:$0xff]  }
  0x1e   :  { %1666 = vmatprep.subr.bf16.mxu1 %v1837_v30  ;;  %v1882_v29 = vld [vmem:[%s2414_s1 + $0x2d0] sm:$0xff]  }
  0x1f   :  { %v1883_v30 = vld [vmem:[%s2414_s1 + $0x210] sm:$0xff]  }
  0x20   :  { %1645 = vmatpush3.bf16.msra.mxu0 %v1838_v31  ;;  %v1885_v31 = vld [vmem:[%s2414_s1 + $0x258] sm:$0xff]  }
  0x21   :  { %1667 = vmatpush3.bf16.msra.mxu1 %v1839_v32  ;;  %1674 = vmatprep.subr.bf16.mxu0 %v1841_v35  ;;  %v1884_v32 = vld [vmem:[%s2414_s1 + $0x290] sm:$0xff]   ;;  %v1889_v35 = vld [vmem:[%s2414_s1 + $0x260] sm:$0xff]  }
  0x22   :  { %1696 = vmatprep.subr.bf16.mxu1 %v1842_v38  ;;  %v1891_v38 = vld [vmem:[%s2414_s1 + $0x220] sm:$0xff]  }
  0x23   :  { %1198 = vmatmul.mubr.bf16.vlgmr.msra.gmra.mrb[0].mxu0 %v306_v45  ;;  %v17_v45 = vld [vmem:[%s2413_s0 + $0x8] sm:$0xff] }
  0x24   :  { %1675 = vmatpush3.bf16.msra.mxu0 %v1843_v48  ;;  %1238 = vmatmul.mubr.bf16.vlgmr.msra.gmra.mrb[0].mxu1 %v328_v50  ;;  %v339_v47 = vrot.slane %v17_v45, %v2089_v41  ;;  %v332_v48 = vcombine.high %v17_v45, %v17_v45  ;;  %v1899_v50 = vld [vmem:[%s2414_s1 + $0x230] sm:$0xff]  }
  0x25   :  { %1676 = vmatprep.subr.bf16.mxu0 %v1845_v51  ;;  %1697 = vmatpush3.bf16.msra.mxu1 %v1844_v53  ;;  %v1901_v53 = vld [vmem:[%s2414_s1 + $0x278] sm:$0xff]  }
  0x26   :  { %1277 = vmatprep.mubr.bf16.mxu0 %v327_v49  ;;  %1698 = vmatprep.subr.bf16.mxu1 %v1846_v54  ;;  %v1898_v49 = vld [vmem:[%s2414_s1 + $0x2f0] sm:$0xff]   ;;  %v347_v51 = vcombine.high %v339_v47, %v339_v47  ;;  %v2278_v52 = vrot.slane %v332_v48, %v2089_v41 }
  0x27   :  { %1317 = vmatprep.mubr.bf16.mxu1 %v331_v55  ;;  %v1900_v54 = vld [vmem:[%s2414_s1 + $0x2b0] sm:$0xff]  }
  0x28   :  { %1677 = vmatpush3.bf16.msra.mxu0 %v1847_v56  ;;  %v369_v55 = vrot.slane %v347_v51, %v2089_v41  ;;  %v348_v56 = vcombine.high %v2278_v52, %v2278_v52 }
  0x29   :  { %1678 = vmatprep.subr.bf16.mxu0 %v1849_v57  ;;  %1699 = vmatpush3.bf16.msra.mxu1 %v1848_v58  ;;  %v1902_v57 = vld [vmem:[%s2414_s1 + $0x2f8] sm:$0xff]  }
  0x2a   :  { %1700 = vmatprep.subr.bf16.mxu1 %v1850_v59  ;;  %v1903_v58 = vld [vmem:[%s2414_s1 + $0x238] sm:$0xff]   ;;  %v379_v59 = vcombine.high %v369_v55, %v369_v55 }
  0x2c   :  { %1679 = vmatpush3.bf16.msra.mxu0 %v1851_v60  ;;  %v355_v60 = vrot.slane %v339_v47, %v2089_v41 }
  0x2d   :  { %1680 = vmatprep.subr.bf16.mxu0 %v1853_v61  ;;  %1701 = vmatpush3.bf16.msra.mxu1 %v1852_v62  ;;  %v1905_v61 = vld [vmem:[%s2414_s1 + $0x340] sm:$0xff]   ;;  %v1904_v62 = vld [vmem:[%s2414_s1 + $0x2b8] sm:$0xff]  }
  0x2e   :  { %1702 = vmatprep.subr.bf16.mxu1 %v1854_v63  ;;  %v376_v63 = vrot.slane %v348_v56, %v2089_v41 }
  0x30   :  { %1681 = vmatpush3.bf16.msra.mxu0 %v1855_v0  ;;  %v1906_v0 = vld [vmem:[%s2414_s1 + $0x3c0] sm:$0xff]  }
  0x31   :  { %1682 = vmatprep.subr.bf16.mxu0 %v1857_v1  ;;  %1703 = vmatpush3.bf16.msra.mxu1 %v1856_v2  ;;  %v1907_v1 = vld [vmem:[%s2414_s1 + $0x300] sm:$0xff]   ;;  %v377_v2 = vcombine.high %v355_v60, %v355_v60 }
  0x32   :  { %1704 = vmatprep.subr.bf16.mxu1 %v1858_v3  ;;  %v1909_v3 = vld [vmem:[%s2414_s1 + $0x348] sm:$0xff]  }
  0x34   :  { %1683 = vmatpush3.bf16.msra.mxu0 %v1859_v4  ;;  %v1908_v4 = vld [vmem:[%s2414_s1 + $0x380] sm:$0xff]  }
  0x35   :  { %1684 = vmatprep.subr.bf16.mxu0 %v1861_v5  ;;  %1705 = vmatpush3.bf16.msra.mxu1 %v1860_v6  ;;  %v380_v5 = vcombine.high %v376_v63, %v376_v63  ;;  %v1910_v6 = vld [vmem:[%s2414_s1 + $0x3c8] sm:$0xff]  }
  0x36   :  { %1706 = vmatprep.subr.bf16.mxu1 %v1862_v7  ;;  %v1911_v7 = vld [vmem:[%s2414_s1 + $0x308] sm:$0xff]  }
  0x38   :  { %1685 = vmatpush3.bf16.msra.mxu0 %v1863_v8  ;;  %v1913_v8 = vld [vmem:[%s2414_s1 + $0x350] sm:$0xff]  }
  0x39   :  { %1686 = vmatprep.subr.bf16.mxu0 %v1865_v9  ;;  %1707 = vmatpush3.bf16.msra.mxu1 %v1864_v10  ;;  %v1912_v9 = vld [vmem:[%s2414_s1 + $0x388] sm:$0xff]   ;;  %v1914_v10 = vld [vmem:[%s2414_s1 + $0x3d0] sm:$0xff]  }
  0x3a   :  { %1708 = vmatprep.subr.bf16.mxu1 %v1866_v11  ;;  %v1915_v11 = vld [vmem:[%s2414_s1 + $0x310] sm:$0xff]  }
  0x3c   :  { %1687 = vmatpush3.bf16.msra.mxu0 %v1867_v12  ;;  %v1917_v12 = vld [vmem:[%s2414_s1 + $0x358] sm:$0xff]  }
  0x3d   :  { %1688 = vmatprep.subr.bf16.mxu0 %v1869_v13  ;;  %1709 = vmatpush3.bf16.msra.mxu1 %v1868_v14  ;;  %v1916_v13 = vld [vmem:[%s2414_s1 + $0x390] sm:$0xff]   ;;  %v1918_v14 = vld [vmem:[%s2414_s1 + $0x3d8] sm:$0xff]  }
  0x3e   :  { %1710 = vmatprep.subr.bf16.mxu1 %v1870_v15  ;;  %v1919_v15 = vld [vmem:[%s2414_s1 + $0x318] sm:$0xff]  }
  0x40   :  { %1689 = vmatpush3.bf16.msra.mxu0 %v1871_v16  ;;  %v1921_v16 = vld [vmem:[%s2414_s1 + $0x360] sm:$0xff]  }
  0x41   :  { %1718 = vmatprep.subr.bf16.mxu0 %v1873_v18  ;;  %1711 = vmatpush3.bf16.msra.mxu1 %v1872_v19  ;;  %v1922_v18 = vld [vmem:[%s2414_s1 + $0x3e0] sm:$0xff]  }
  0x42   :  { %1740 = vmatprep.subr.bf16.mxu1 %v1874_v20  ;;  %v1923_v19 = vld [vmem:[%s2414_s1 + $0x320] sm:$0xff]   ;;  %v1925_v20 = vld [vmem:[%s2414_s1 + $0x368] sm:$0xff]  }
  0x43   :  { %1278 = vmatmul.mubr.bf16.vlgmr.msra.gmra.mrb[4].mxu0 %v313_v17  ;;  %v1920_v17 = vld [vmem:[%s2414_s1 + $0x398] sm:$0xff]  }
  0x44   :  { %1719 = vmatpush3.bf16.msra.mxu0 %v1875_v21  ;;  %1318 = vmatmul.mubr.bf16.vlgmr.msra.gmra.mrb[4].mxu1 %v329_v22  ;;  %v1924_v21 = vld [vmem:[%s2414_s1 + $0x3a0] sm:$0xff]   ;;  %v1926_v22 = vld [vmem:[%s2414_s1 + $0x3e8] sm:$0xff]  }
  0x45   :  { %1720 = vmatprep.subr.bf16.mxu0 %v1877_v23  ;;  %1741 = vmatpush3.bf16.msra.mxu1 %v1876_v24  ;;  %v1927_v23 = vld [vmem:[%s2414_s1 + $0x328] sm:$0xff]   ;;  %v1929_v24 = vld [vmem:[%s2414_s1 + $0x370] sm:$0xff]  }
  0x46   :  { %1742 = vmatprep.subr.bf16.mxu1 %v1878_v25  ;;  %1357 = vmatprep.mubr.bf16.mxu0 %v369_v55 }
  0x47   :  { %1397 = vmatprep.mubr.bf16.mxu1 %v379_v59 }
  0x48   :  { %1721 = vmatpush3.bf16.msra.mxu0 %v1879_v26 }
  0x49   :  { %1722 = vmatprep.subr.bf16.mxu0 %v1881_v27  ;;  %1743 = vmatpush3.bf16.msra.mxu1 %v1880_v28 }
  0x4a   :  { %1744 = vmatprep.subr.bf16.mxu1 %v1882_v29 }
  0x4c   :  { %1723 = vmatpush3.bf16.msra.mxu0 %v1883_v30 }
  0x4d   :  { %1724 = vmatprep.subr.bf16.mxu0 %v1885_v31  ;;  %1745 = vmatpush3.bf16.msra.mxu1 %v1884_v32 }
  0x4e   :  { %1746 = vmatprep.subr.bf16.mxu1 %v1886_v33 }
  0x50   :  { %1725 = vmatpush3.bf16.msra.mxu0 %v1887_v34 }
  0x51   :  { %1726 = vmatprep.subr.bf16.mxu0 %v1889_v35  ;;  %1747 = vmatpush3.bf16.msra.mxu1 %v1888_v36 }
  0x52   :  { %1748 = vmatprep.subr.bf16.mxu1 %v1890_v37 }
  0x54   :  { %1727 = vmatpush3.bf16.msra.mxu0 %v1891_v38 }
  0x55   :  { %1728 = vmatprep.subr.bf16.mxu0 %v1893_v39  ;;  %1749 = vmatpush3.bf16.msra.mxu1 %v1892_v40 }
  0x56   :  { %1750 = vmatprep.subr.bf16.mxu1 %v1894_v42 }
  0x58   :  { %1729 = vmatpush3.bf16.msra.mxu0 %v1895_v43 }
  0x59   :  { %1730 = vmatprep.subr.bf16.mxu0 %v1897_v44  ;;  %1751 = vmatpush3.bf16.msra.mxu1 %v1896_v46 }
  0x5a   :  { %1752 = vmatprep.subr.bf16.mxu1 %v1898_v49 }
  0x5c   :  { %1731 = vmatpush3.bf16.msra.mxu0 %v1899_v50 }
  0x5d   :  { %1732 = vmatprep.subr.bf16.mxu0 %v1901_v53  ;;  %1753 = vmatpush3.bf16.msra.mxu1 %v1900_v54 }
  0x5e   :  { %1754 = vmatprep.subr.bf16.mxu1 %v1902_v57 }
  0x60   :  { %1733 = vmatpush3.bf16.msra.mxu0 %v1903_v58 }
  0x61   :  { %1762 = vmatprep.subr.bf16.mxu0 %v1905_v61  ;;  %1755 = vmatpush3.bf16.msra.mxu1 %v1904_v62 }
  0x62   :  { %1784 = vmatprep.subr.bf16.mxu1 %v1906_v0 }
  0x63   :  { %1358 = vmatmul.mubr.bf16.vlgmr.msra.gmra.mrb[8].mxu0 %v355_v60 }
  0x64   :  { %1763 = vmatpush3.bf16.msra.mxu0 %v1907_v1  ;;  %1437 = vmatprep.mubr.bf16.mxu0 %v376_v63 }
  0x65   :  { %1398 = vmatmul.mubr.bf16.vlgmr.msra.gmra.mrb[8].mxu1 %v377_v2  ;;  %1764 = vmatprep.subr.bf16.mxu0 %v1909_v3 }
  0x66   :  { %1785 = vmatpush3.bf16.msra.mxu1 %v1908_v4  ;;  %1477 = vmatprep.mubr.bf16.mxu1 %v380_v5 }
  0x67   :  { %1786 = vmatprep.subr.bf16.mxu1 %v1910_v6 }
  0x68   :  { %1765 = vmatpush3.bf16.msra.mxu0 %v1911_v7 }
  0x69   :  { %1766 = vmatprep.subr.bf16.mxu0 %v1913_v8 }
  0x6a   :  { %1787 = vmatpush3.bf16.msra.mxu1 %v1912_v9 }
  0x6b   :  { %1788 = vmatprep.subr.bf16.mxu1 %v1914_v10 }
  0x6c   :  { %1767 = vmatpush3.bf16.msra.mxu0 %v1915_v11 }
  0x6d   :  { %1768 = vmatprep.subr.bf16.mxu0 %v1917_v12 }
  0x6e   :  { %1789 = vmatpush3.bf16.msra.mxu1 %v1916_v13 }
  0x6f   :  { %1790 = vmatprep.subr.bf16.mxu1 %v1918_v14 }
  0x70   :  { %1769 = vmatpush3.bf16.msra.mxu0 %v1919_v15 }
  0x71   :  { %1770 = vmatprep.subr.bf16.mxu0 %v1921_v16 }
  0x72   :  { %1791 = vmatpush3.bf16.msra.mxu1 %v1920_v17 }
  0x73   :  { %1792 = vmatprep.subr.bf16.mxu1 %v1922_v18 }
  0x74   :  { %1771 = vmatpush3.bf16.msra.mxu0 %v1923_v19 }
  0x75   :  { %1772 = vmatprep.subr.bf16.mxu0 %v1925_v20 }
  0x76   :  { %8 = vsyncpa [#allocation3], 0  ;;  %1793 = vmatpush3.bf16.msra.mxu1 %v1924_v21  ;;  %v1928_v25 = vld [vmem:[%s2414_s1 + $0x3a8] sm:$0xff]   ;;  %v1930_v26 = vld [vmem:[%s2414_s1 + $0x3f0] sm:$0xff]   ;;  %v362_v32 = vrot.slane %v2278_v52, %v2089_v41 }
  0x77   :  { %1794 = vmatprep.subr.bf16.mxu1 %v1926_v22  ;;  %v1931_v27 = vld [vmem:[%s2414_s1 + $0x330] sm:$0xff]   ;;  %v1933_v28 = vld [vmem:[%s2414_s1 + $0x378] sm:$0xff]   ;;  %v1501_v36 = vld [vmem:[%s2415_s2] ss:$0 sm:$0xff] }
  0x78   :  { %1773 = vmatpush3.bf16.msra.mxu0 %v1927_v23  ;;  %v1932_v29 = vld [vmem:[%s2414_s1 + $0x3b0] sm:$0xff]   ;;  %v1934_v30 = vld [vmem:[%s2414_s1 + $0x3f8] sm:$0xff]   ;;  %v378_v34 = vcombine.high %v362_v32, %v362_v32 }
  0x79   :  { %1774 = vmatprep.subr.bf16.mxu0 %v1929_v24  ;;  %v1935_v31 = vld [vmem:[%s2414_s1 + $0x338] sm:$0xff]  }
  0x7a   :  { %1795 = vmatpush3.bf16.msra.mxu1 %v1928_v25  ;;  %v1936_v33 = vld [vmem:[%s2414_s1 + $0x3b8] sm:$0xff]   ;;  %s1963_s1 = smov [#allocation2]  }
  0x7b   :  { %1796 = vmatprep.subr.bf16.mxu1 %v1930_v26  ;;  %s1493_s2 = sshll.u32 %s1963_s1, 4  ;;  %s1494_s2 = int_to_ptr.vmem [resolvable:$true] %s1493_s2 }
  0x7c   :  { %1775 = vmatpush3.bf16.msra.mxu0 %v1931_v27  ;;  %s1938_s28 = scalar_lea.vmem %s1494_s2, 32  ;;  %p1943_p1 = scmp.lt.s32.totalorder %s1494_s2, %s1494_s2 }
  0x7d   :  { %1776 = vmatprep.subr.bf16.mxu0 %v1933_v28  ;;  %p1939_p0 = scmp.ne.s32.totalorder %s1494_s2, %s1938_s28  ;;  %p1944_p2 = scmp.lt.s32.totalorder %s1938_s28, %s1938_s28 }
  0x7e   :  { %1797 = vmatpush3.bf16.msra.mxu1 %v1932_v29 }
  0x7f   :  { %1798 = vmatprep.subr.bf16.mxu1 %v1934_v30  ;;  %p1945_p3 = por %p1944_p2, %p1943_p1 }
  0x80   :  { %1777 = vmatpush3.bf16.msra.mxu0 %v1935_v31 }
  0x81   :  { %p1946_p4 = pnand %p1945_p3, %p1939_p0 }
  0x82   :  { %1799 = vmatpush3.bf16.msra.mxu1 %v1936_v33 }
  0x83   :  { %1438 = vmatmul.mubr.bf16.vlgmr.msra.gmra.mrb[12].mxu0 %v362_v32 }
  0x85   :  { %1478 = vmatmul.mubr.bf16.vlgmr.msra.gmra.mrb[12].mxu1 %v378_v34 }
  0xf6   :  { %v1646_v35 = vpop.f32.mrb[0].mxu0 }
  0xf7   :  { %v1647_v37 = vpop.f32.mrb[1].mxu0  ;;  %v1668_v38 = vpop.f32.mrb[0].mxu1 }
  0xf8   :  { %v1648_v39 = vadd.f32 %v1647_v37, %v1646_v35  ;;  %v1649_v41 = vpop.f32.mrb[2].mxu0  ;;  %v1669_v40 = vpop.f32.mrb[1].mxu1 }
  0xf9   :  { %v1650_v42 = vpop.f32.mrb[3].mxu0  ;;  %v1670_v44 = vadd.f32 %v1669_v40, %v1668_v38  ;;  %v1671_v45 = vpop.f32.mrb[2].mxu1 }
  0xfa   :  { %v1200_v43 = vadd.f32 %v1648_v39, %v1501_v36  ;;  %v1672_v46 = vpop.f32.mrb[3].mxu1 }
  0xfc   :  { %v1240_v47 = vadd.f32 %v1670_v44, %v1200_v43 }
 0x116   :  { %v1690_v48 = vpop.f32.mrb[4].mxu0 }
 0x117   :  { %v1691_v49 = vpop.f32.mrb[5].mxu0  ;;  %v1712_v50 = vpop.f32.mrb[4].mxu1 }
 0x118   :  { %v1692_v51 = vadd.f32 %v1691_v49, %v1690_v48  ;;  %v1693_v52 = vpop.f32.mrb[6].mxu0  ;;  %v1713_v53 = vpop.f32.mrb[5].mxu1 }
 0x119   :  { %v1694_v54 = vpop.f32.mrb[7].mxu0  ;;  %v1714_v56 = vadd.f32 %v1713_v53, %v1712_v50  ;;  %v1715_v57 = vpop.f32.mrb[6].mxu1 }
 0x11a   :  { %v1280_v55 = vadd.f32 %v1692_v51, %v1240_v47  ;;  %v1716_v58 = vpop.f32.mrb[7].mxu1 }
 0x11c   :  { %v1320_v59 = vadd.f32 %v1714_v56, %v1280_v55 }
 0x136   :  { %v1734_v60 = vpop.f32.mrb[8].mxu0 }
 0x137   :  { %v1735_v61 = vpop.f32.mrb[9].mxu0 }
 0x138   :  { %v1756_v62 = vpop.f32.mrb[8].mxu1  ;;  %v1736_v63 = vadd.f32 %v1735_v61, %v1734_v60  ;;  %v1737_v0 = vpop.f32.mrb[10].mxu0 }
 0x139   :  { %v1757_v1 = vpop.f32.mrb[9].mxu1  ;;  %v1738_v2 = vpop.f32.mrb[11].mxu0 }
 0x13a   :  { %v1360_v3 = vadd.f32 %v1736_v63, %v1320_v59  ;;  %v1758_v4 = vadd.f32 %v1757_v1, %v1756_v62  ;;  %v1759_v5 = vpop.f32.mrb[10].mxu1 }
 0x13b   :  { %v1760_v6 = vpop.f32.mrb[11].mxu1 }
 0x13c   :  { %v1400_v7 = vadd.f32 %v1758_v4, %v1360_v3 }
 0x156   :  { %v1778_v8 = vpop.f32.mrb[12].mxu0 }
 0x157   :  { %v1779_v9 = vpop.f32.mrb[13].mxu0 }
 0x158   :  { %v1800_v10 = vpop.f32.mrb[12].mxu1  ;;  %v1780_v11 = vadd.f32 %v1779_v9, %v1778_v8  ;;  %v1781_v12 = vpop.f32.mrb[14].mxu0 }
 0x159   :  { %v1801_v13 = vpop.f32.mrb[13].mxu1  ;;  %v1782_v14 = vpop.f32.mrb[15].mxu0 }
 0x15a   :  { %v1440_v15 = vadd.f32 %v1780_v11, %v1400_v7  ;;  %v1802_v16 = vadd.f32 %v1801_v13, %v1800_v10  ;;  %v1803_v17 = vpop.f32.mrb[14].mxu1 }
 0x15b   :  { %v1804_v18 = vpop.f32.mrb[15].mxu1 }
 0x15c   :  { %v1480_v19 = vadd.f32 %v1802_v16, %v1440_v15 }
 0x15e   :  { %v1485_v20 = vmax.f32 %v1480_v19, 0.0 }
 0x160   :  { %1486 = vst [vmem:[#allocation2] sm:$0x3] %v1485_v20 }
 0x161   :  { %1949 = shalt.err (!%p1946_p4)
}
 0x162   :  { %s1950_s4 = scalar_lea.hbm %s2416_s3, 32 }
 0x163   :  { %p1951_p5 = scmp.ne.s32.totalorder %s2416_s3, %s1950_s4  ;;  %p1954_p6 = scmp.lt.u32.totalorder %s1950_s4, %s2416_s3 }
 0x165   :  { %p1956_p7 = pnand %p1954_p6, %p1951_p5 }
 0x167   :  { %1959 = shalt.err (!%p1956_p7)
}
 0x168   :  { %1496 = dma.vmem_to_hbm [thread:$0]  %s1494_s2, 32, %s2416_s3, [#allocation3]  }
 0x169   :  { %1960 = dma.done.wait [#allocation3], 32  }
 0x16a   :  { %1961 = vsyncadd [#allocation3], 4294967264 }
 0x16b   :  { %1500 = vsyncpa [#allocation3], 1 }

// kernel: cnn_batchnorm_relu_forward.8
= control target key start
LH: loop header
LB: loop body
LE: loop exit
PB: predicated region body
PF: predicated region fallthrough
CT: control target
= control target key end

     0   :  { %s13994_s12 = smov 0   ;;  %s13996_s13 = smov 0   ;;  %s16353_s0 = inlined_call_operand.vmem [shape: bf16[2,4096], index: 0, kind: input, shape index: {}]   ;;  %s16354_s1 = inlined_call_operand.vmem [shape: bf16[4096,2048], index: 1, kind: input, shape index: {}]   ;;  %s16355_s2 = inlined_call_operand.vmem [shape: f32[1,2048], index: 2, kind: input, shape index: {}]   ;;  %s16356_s3 = inlined_call_operand.vmem [shape: f32[2,2048], index: 3, kind: output, shape index: {}]  }
   0x1   :  { %s13998_s14 = smov 0  }
   0x2 LB: > { %s11151_s15 = sadd.s32 4294967295, %s13954_s14   ;;  %s14011_s16 = sadd.s32 1, %s13954_s14   ;;  %s13954_s14 = sphi %s13998_s14, %s16364_s14   ;;  %s13950_s13 = sphi %s13996_s13, %s16363_s13   ;;  %s13946_s12 = sphi %s13994_s12, %s16362_s12  }
   0x3   : > { %s38_s17 = ssub.s32 %s13954_s14, %s14011_s16  ;;  %s41_s18 = sadd.s32 1, %s13950_s13 }
   0x4   : > { %p39_p0 = scmp.eq.s32.totalorder %s38_s17, 0  ;;  %p48_p1 = scmp.ne.s32.totalorder %s13950_s13, %s13946_s12 }
   0x5   : > { %p49_p2 = scmp.eq.s32.totalorder %s13954_s14, 0  ;;  %p11154_p4 = scmp.ge.s32.totalorder %s13954_s14, 4 }
   0x6   : > { %s14020_s19 = scalar_select %p39_p0, %s13950_s13, %s41_s18  }
   0x7   : > { %p50_p3 = por %p49_p2, %p48_p1  ;;  %129 = sbr.rel (%p11154_p4) target bundleno = 534 (0x216), region = 20 }
   0xe   : > { %132 = sbr.rel (!%p50_p3) target bundleno = 534 (0x216), region = 24  ;;  %s134_s20 = sand.u32 (%p50_p3), 1, %s13950_s13  }
   0xf   : > { %s12191_s21 = sshll.u32 (%p50_p3), %s13954_s14, 4  ;;  %s14025_s22 = sshll.u32 (%p50_p3), %s134_s20, 13 }
  0x10   : > { %s14030_s25 = scalar_lea.vmem (%p50_p3), %s16354_s1, %s12191_s21   ;;  %s136_s26 = scalar_lea.vmem (%p50_p3), [#allocation2], %s14025_s22  }
  0x11   : > { %s16357_s27 = smov (%p50_p3), %s136_s26  ;;  %s16358_s28 = smov (%p50_p3), %s14030_s25 }
  0x12   : > { %s14040_s29 = smov (%p50_p3), 0   ;;  %s14042_s30 = smov (%p50_p3), 0  }
  0x15 LB: >> { %v155_v0 = vld [vmem:[%s13962_s28] sm:$0xff]  ;;  %s1179_s4 = sadd.s32 1, %s13966_s29  ;;  %s151_s30 = sadd.s32 1, %s13970_s30   ;;  %s13970_s30 = sphi %s14042_s30, %s151_s30   ;;  %s13966_s29 = sphi %s14040_s29, %s16361_s29   ;;  %s13962_s28 = sphi %s16358_s28, %s16360_s28   ;;  %s13958_s27 = sphi %s16357_s27, %s16359_s27  }
  0x16   : >> { %v157_v1 = vld [vmem:[%s13962_s28 + $0x40] sm:$0xff]  ;;  %156 = vst [vmem:[%s13958_s27] sm:$0xff] %v155_v0  ;;  %p1180_p5 = scmp.ge.s32.totalorder %s1179_s4, 2  ;;  %p148_p6 = scmp.ge.s32.totalorder %s151_s30, 2  }
  0x17   : >> { %v159_v2 = vld [vmem:[%s13962_s28 + $0x80] sm:$0xff]  ;;  %158 = vst [vmem:[%s13958_s27 + $0x10] sm:$0xff] %v157_v1 }
  0x18   : >> { %160 = vst [vmem:[%s13958_s27 + $0x20] sm:$0xff] %v159_v2  ;;  %v161_v3 = vld [vmem:[%s13962_s28 + $0xc0] sm:$0xff]  ;;  %s16366_s4 = smov (%p1180_p5, %s1179_s4), 0 }
  0x19   : >> { %v163_v4 = vld [vmem:[%s13962_s28 + $0x100] sm:$0xff]  ;;  %162 = vst [vmem:[%s13958_s27 + $0x30] sm:$0xff] %v161_v3  ;;  %s11158_s5 = sshll.u32 %s16366_s4, 3  ;;  %s16361_s29 = smov %s16366_s4 }
  0x1a   : >> { %v165_v5 = vld [vmem:[%s13962_s28 + $0x140] sm:$0xff]  ;;  %164 = vst [vmem:[%s13958_s27 + $0x40] sm:$0xff] %v163_v4  ;;  %s14322_s6 = scalar_lea.vmem %s14030_s25, %s11158_s5   ;;  %s14326_s7 = scalar_lea.vmem %s136_s26, %s11158_s5 [#allocation2]  }
  0x1b   : >> { %166 = vst [vmem:[%s13958_s27 + $0x50] sm:$0xff] %v165_v5  ;;  %v167_v6 = vld [vmem:[%s13962_s28 + $0x180] sm:$0xff] }
  0x1c   : >> { %v169_v7 = vld [vmem:[%s13962_s28 + $0x1c0] sm:$0xff]  ;;  %168 = vst [vmem:[%s13958_s27 + $0x60] sm:$0xff] %v167_v6 }
  0x1d   : >> { %v171_v8 = vld [vmem:[%s13962_s28 + $0x200] sm:$0xff]  ;;  %170 = vst [vmem:[%s13958_s27 + $0x70] sm:$0xff] %v169_v7 }
  0x1e   : >> { %172 = vst [vmem:[%s13958_s27 + $0x80] sm:$0xff] %v171_v8  ;;  %v173_v9 = vld [vmem:[%s13962_s28 + $0x240] sm:$0xff] }
  0x1f   : >> { %v175_v10 = vld [vmem:[%s13962_s28 + $0x280] sm:$0xff]  ;;  %174 = vst [vmem:[%s13958_s27 + $0x90] sm:$0xff] %v173_v9 }
  0x20   : >> { %v177_v11 = vld [vmem:[%s13962_s28 + $0x2c0] sm:$0xff]  ;;  %176 = vst [vmem:[%s13958_s27 + $0xa0] sm:$0xff] %v175_v10 }
  0x21   : >> { %178 = vst [vmem:[%s13958_s27 + $0xb0] sm:$0xff] %v177_v11  ;;  %v179_v12 = vld [vmem:[%s13962_s28 + $0x300] sm:$0xff] }
  0x22   : >> { %v181_v13 = vld [vmem:[%s13962_s28 + $0x340] sm:$0xff]  ;;  %180 = vst [vmem:[%s13958_s27 + $0xc0] sm:$0xff] %v179_v12 }
  0x23   : >> { %v183_v14 = vld [vmem:[%s13962_s28 + $0x380] sm:$0xff]  ;;  %182 = vst [vmem:[%s13958_s27 + $0xd0] sm:$0xff] %v181_v13 }
  0x24   : >> { %184 = vst [vmem:[%s13958_s27 + $0xe0] sm:$0xff] %v183_v14  ;;  %v185_v15 = vld [vmem:[%s13962_s28 + $0x3c0] sm:$0xff] }
  0x25   : >> { %v187_v16 = vld [vmem:[%s13962_s28 + $0x400] sm:$0xff]  ;;  %186 = vst [vmem:[%s13958_s27 + $0xf0] sm:$0xff] %v185_v15 }
  0x26   : >> { %v189_v17 = vld [vmem:[%s13962_s28 + $0x440] sm:$0xff]  ;;  %188 = vst [vmem:[%s13958_s27 + $0x100] sm:$0xff] %v187_v16 }
  0x27   : >> { %190 = vst [vmem:[%s13958_s27 + $0x110] sm:$0xff] %v189_v17  ;;  %v191_v18 = vld [vmem:[%s13962_s28 + $0x480] sm:$0xff] }
  0x28   : >> { %v193_v19 = vld [vmem:[%s13962_s28 + $0x4c0] sm:$0xff]  ;;  %192 = vst [vmem:[%s13958_s27 + $0x120] sm:$0xff] %v191_v18 }
  0x29   : >> { %v195_v20 = vld [vmem:[%s13962_s28 + $0x500] sm:$0xff]  ;;  %194 = vst [vmem:[%s13958_s27 + $0x130] sm:$0xff] %v193_v19 }
  0x2a   : >> { %196 = vst [vmem:[%s13958_s27 + $0x140] sm:$0xff] %v195_v20  ;;  %v197_v21 = vld [vmem:[%s13962_s28 + $0x540] sm:$0xff] }
  0x2b   : >> { %v199_v22 = vld [vmem:[%s13962_s28 + $0x580] sm:$0xff]  ;;  %198 = vst [vmem:[%s13958_s27 + $0x150] sm:$0xff] %v197_v21 }
  0x2c   : >> { %v201_v23 = vld [vmem:[%s13962_s28 + $0x5c0] sm:$0xff]  ;;  %200 = vst [vmem:[%s13958_s27 + $0x160] sm:$0xff] %v199_v22 }
  0x2d   : >> { %202 = vst [vmem:[%s13958_s27 + $0x170] sm:$0xff] %v201_v23  ;;  %v203_v24 = vld [vmem:[%s13962_s28 + $0x600] sm:$0xff] }
  0x2e   : >> { %v205_v25 = vld [vmem:[%s13962_s28 + $0x640] sm:$0xff]  ;;  %204 = vst [vmem:[%s13958_s27 + $0x180] sm:$0xff] %v203_v24 }
  0x2f   : >> { %v207_v26 = vld [vmem:[%s13962_s28 + $0x680] sm:$0xff]  ;;  %206 = vst [vmem:[%s13958_s27 + $0x190] sm:$0xff] %v205_v25 }
  0x30   : >> { %208 = vst [vmem:[%s13958_s27 + $0x1a0] sm:$0xff] %v207_v26  ;;  %v209_v27 = vld [vmem:[%s13962_s28 + $0x6c0] sm:$0xff] }
  0x31   : >> { %v211_v28 = vld [vmem:[%s13962_s28 + $0x700] sm:$0xff]  ;;  %210 = vst [vmem:[%s13958_s27 + $0x1b0] sm:$0xff] %v209_v27 }
  0x32   : >> { %v213_v29 = vld [vmem:[%s13962_s28 + $0x740] sm:$0xff]  ;;  %212 = vst [vmem:[%s13958_s27 + $0x1c0] sm:$0xff] %v211_v28 }
  0x33   : >> { %214 = vst [vmem:[%s13958_s27 + $0x1d0] sm:$0xff] %v213_v29  ;;  %v215_v30 = vld [vmem:[%s13962_s28 + $0x780] sm:$0xff] }
  0x34   : >> { %v217_v31 = vld [vmem:[%s13962_s28 + $0x7c0] sm:$0xff]  ;;  %216 = vst [vmem:[%s13958_s27 + $0x1e0] sm:$0xff] %v215_v30 }
  0x35   : >> { %v219_v32 = vld [vmem:[%s13962_s28 + $0x800] sm:$0xff]  ;;  %218 = vst [vmem:[%s13958_s27 + $0x1f0] sm:$0xff] %v217_v31 }
  0x36   : >> { %220 = vst [vmem:[%s13958_s27 + $0x200] sm:$0xff] %v219_v32  ;;  %v221_v33 = vld [vmem:[%s13962_s28 + $0x840] sm:$0xff] }
  0x37   : >> { %v223_v34 = vld [vmem:[%s13962_s28 + $0x880] sm:$0xff]  ;;  %222 = vst [vmem:[%s13958_s27 + $0x210] sm:$0xff] %v221_v33 }
  0x38   : >> { %v225_v35 = vld [vmem:[%s13962_s28 + $0x8c0] sm:$0xff]  ;;  %224 = vst [vmem:[%s13958_s27 + $0x220] sm:$0xff] %v223_v34 }
  0x39   : >> { %226 = vst [vmem:[%s13958_s27 + $0x230] sm:$0xff] %v225_v35  ;;  %v227_v36 = vld [vmem:[%s13962_s28 + $0x900] sm:$0xff] }
  0x3a   : >> { %v229_v37 = vld [vmem:[%s13962_s28 + $0x940] sm:$0xff]  ;;  %228 = vst [vmem:[%s13958_s27 + $0x240] sm:$0xff] %v227_v36 }
  0x3b   : >> { %v231_v38 = vld [vmem:[%s13962_s28 + $0x980] sm:$0xff]  ;;  %230 = vst [vmem:[%s13958_s27 + $0x250] sm:$0xff] %v229_v37 }
  0x3c   : >> { %232 = vst [vmem:[%s13958_s27 + $0x260] sm:$0xff] %v231_v38  ;;  %v233_v39 = vld [vmem:[%s13962_s28 + $0x9c0] sm:$0xff] }
  0x3d   : >> { %v235_v40 = vld [vmem:[%s13962_s28 + $0xa00] sm:$0xff]  ;;  %234 = vst [vmem:[%s13958_s27 + $0x270] sm:$0xff] %v233_v39 }
  0x3e   : >> { %v237_v41 = vld [vmem:[%s13962_s28 + $0xa40] sm:$0xff]  ;;  %236 = vst [vmem:[%s13958_s27 + $0x280] sm:$0xff] %v235_v40 }
  0x3f   : >> { %238 = vst [vmem:[%s13958_s27 + $0x290] sm:$0xff] %v237_v41  ;;  %v239_v42 = vld [vmem:[%s13962_s28 + $0xa80] sm:$0xff] }
  0x40   : >> { %v241_v43 = vld [vmem:[%s13962_s28 + $0xac0] sm:$0xff]  ;;  %240 = vst [vmem:[%s13958_s27 + $0x2a0] sm:$0xff] %v239_v42 }
  0x41   : >> { %v243_v44 = vld [vmem:[%s13962_s28 + $0xb00] sm:$0xff]  ;;  %242 = vst [vmem:[%s13958_s27 + $0x2b0] sm:$0xff] %v241_v43 }
  0x42   : >> { %244 = vst [vmem:[%s13958_s27 + $0x2c0] sm:$0xff] %v243_v44  ;;  %v245_v45 = vld [vmem:[%s13962_s28 + $0xb40] sm:$0xff] }
  0x43   : >> { %v247_v46 = vld [vmem:[%s13962_s28 + $0xb80] sm:$0xff]  ;;  %246 = vst [vmem:[%s13958_s27 + $0x2d0] sm:$0xff] %v245_v45 }
  0x44   : >> { %v249_v47 = vld [vmem:[%s13962_s28 + $0xbc0] sm:$0xff]  ;;  %248 = vst [vmem:[%s13958_s27 + $0x2e0] sm:$0xff] %v247_v46 }
  0x45   : >> { %250 = vst [vmem:[%s13958_s27 + $0x2f0] sm:$0xff] %v249_v47  ;;  %v251_v48 = vld [vmem:[%s13962_s28 + $0xc00] sm:$0xff] }
  0x46   : >> { %v253_v49 = vld [vmem:[%s13962_s28 + $0xc40] sm:$0xff]  ;;  %252 = vst [vmem:[%s13958_s27 + $0x300] sm:$0xff] %v251_v48 }
  0x47   : >> { %v255_v50 = vld [vmem:[%s13962_s28 + $0xc80] sm:$0xff]  ;;  %254 = vst [vmem:[%s13958_s27 + $0x310] sm:$0xff] %v253_v49 }
  0x48   : >> { %256 = vst [vmem:[%s13958_s27 + $0x320] sm:$0xff] %v255_v50  ;;  %v257_v51 = vld [vmem:[%s13962_s28 + $0xcc0] sm:$0xff] }
  0x49   : >> { %v259_v52 = vld [vmem:[%s13962_s28 + $0xd00] sm:$0xff]  ;;  %258 = vst [vmem:[%s13958_s27 + $0x330] sm:$0xff] %v257_v51 }
  0x4a   : >> { %v261_v53 = vld [vmem:[%s13962_s28 + $0xd40] sm:$0xff]  ;;  %260 = vst [vmem:[%s13958_s27 + $0x340] sm:$0xff] %v259_v52 }
  0x4b   : >> { %262 = vst [vmem:[%s13958_s27 + $0x350] sm:$0xff] %v261_v53  ;;  %v263_v54 = vld [vmem:[%s13962_s28 + $0xd80] sm:$0xff] }
  0x4c   : >> { %v265_v55 = vld [vmem:[%s13962_s28 + $0xdc0] sm:$0xff]  ;;  %264 = vst [vmem:[%s13958_s27 + $0x360] sm:$0xff] %v263_v54 }
  0x4d   : >> { %v267_v56 = vld [vmem:[%s13962_s28 + $0xe00] sm:$0xff]  ;;  %266 = vst [vmem:[%s13958_s27 + $0x370] sm:$0xff] %v265_v55 }
  0x4e   : >> { %268 = vst [vmem:[%s13958_s27 + $0x380] sm:$0xff] %v267_v56  ;;  %v269_v57 = vld [vmem:[%s13962_s28 + $0xe40] sm:$0xff] }
  0x4f   : >> { %v271_v58 = vld [vmem:[%s13962_s28 + $0xe80] sm:$0xff]  ;;  %270 = vst [vmem:[%s13958_s27 + $0x390] sm:$0xff] %v269_v57 }
  0x50   : >> { %v273_v59 = vld [vmem:[%s13962_s28 + $0xec0] sm:$0xff]  ;;  %272 = vst [vmem:[%s13958_s27 + $0x3a0] sm:$0xff] %v271_v58 }
  0x51   : >> { %274 = vst [vmem:[%s13958_s27 + $0x3b0] sm:$0xff] %v273_v59  ;;  %v275_v60 = vld [vmem:[%s13962_s28 + $0xf00] sm:$0xff] }
  0x52   : >> { %v277_v61 = vld [vmem:[%s13962_s28 + $0xf40] sm:$0xff]  ;;  %276 = vst [vmem:[%s13958_s27 + $0x3c0] sm:$0xff] %v275_v60 }
  0x53   : >> { %v279_v62 = vld [vmem:[%s13962_s28 + $0xf80] sm:$0xff]  ;;  %278 = vst [vmem:[%s13958_s27 + $0x3d0] sm:$0xff] %v277_v61 }
  0x54   : >> { %280 = vst [vmem:[%s13958_s27 + $0x3e0] sm:$0xff] %v279_v62  ;;  %v281_v63 = vld [vmem:[%s13962_s28 + $0xfc0] sm:$0xff] }
  0x55   : >> { %v283_v0 = vld [vmem:[%s13962_s28 + $0x1000] sm:$0xff]  ;;  %282 = vst [vmem:[%s13958_s27 + $0x3f0] sm:$0xff] %v281_v63 }
  0x56   : >> { %v285_v1 = vld [vmem:[%s13962_s28 + $0x1040] sm:$0xff]  ;;  %284 = vst [vmem:[%s13958_s27 + $0x400] sm:$0xff] %v283_v0 }
  0x57   : >> { %286 = vst [vmem:[%s13958_s27 + $0x410] sm:$0xff] %v285_v1  ;;  %v287_v2 = vld [vmem:[%s13962_s28 + $0x1080] sm:$0xff] }
  0x58   : >> { %v289_v3 = vld [vmem:[%s13962_s28 + $0x10c0] sm:$0xff]  ;;  %288 = vst [vmem:[%s13958_s27 + $0x420] sm:$0xff] %v287_v2 }
  0x59   : >> { %v291_v4 = vld [vmem:[%s13962_s28 + $0x1100] sm:$0xff]  ;;  %290 = vst [vmem:[%s13958_s27 + $0x430] sm:$0xff] %v289_v3 }
  0x5a   : >> { %292 = vst [vmem:[%s13958_s27 + $0x440] sm:$0xff] %v291_v4  ;;  %v293_v5 = vld [vmem:[%s13962_s28 + $0x1140] sm:$0xff] }
  0x5b   : >> { %v295_v6 = vld [vmem:[%s13962_s28 + $0x1180] sm:$0xff]  ;;  %294 = vst [vmem:[%s13958_s27 + $0x450] sm:$0xff] %v293_v5 }
  0x5c   : >> { %v297_v7 = vld [vmem:[%s13962_s28 + $0x11c0] sm:$0xff]  ;;  %296 = vst [vmem:[%s13958_s27 + $0x460] sm:$0xff] %v295_v6 }
  0x5d   : >> { %298 = vst [vmem:[%s13958_s27 + $0x470] sm:$0xff] %v297_v7  ;;  %v299_v8 = vld [vmem:[%s13962_s28 + $0x1200] sm:$0xff] }
  0x5e   : >> { %v301_v9 = vld [vmem:[%s13962_s28 + $0x1240] sm:$0xff]  ;;  %300 = vst [vmem:[%s13958_s27 + $0x480] sm:$0xff] %v299_v8 }
  0x5f   : >> { %v303_v10 = vld [vmem:[%s13962_s28 + $0x1280] sm:$0xff]  ;;  %302 = vst [vmem:[%s13958_s27 + $0x490] sm:$0xff] %v301_v9 }
  0x60   : >> { %304 = vst [vmem:[%s13958_s27 + $0x4a0] sm:$0xff] %v303_v10  ;;  %v305_v11 = vld [vmem:[%s13962_s28 + $0x12c0] sm:$0xff] }
  0x61   : >> { %v307_v12 = vld [vmem:[%s13962_s28 + $0x1300] sm:$0xff]  ;;  %306 = vst [vmem:[%s13958_s27 + $0x4b0] sm:$0xff] %v305_v11 }
  0x62   : >> { %v309_v13 = vld [vmem:[%s13962_s28 + $0x1340] sm:$0xff]  ;;  %308 = vst [vmem:[%s13958_s27 + $0x4c0] sm:$0xff] %v307_v12 }
  0x63   : >> { %310 = vst [vmem:[%s13958_s27 + $0x4d0] sm:$0xff] %v309_v13  ;;  %v311_v14 = vld [vmem:[%s13962_s28 + $0x1380] sm:$0xff] }
  0x64   : >> { %v313_v15 = vld [vmem:[%s13962_s28 + $0x13c0] sm:$0xff]  ;;  %312 = vst [vmem:[%s13958_s27 + $0x4e0] sm:$0xff] %v311_v14 }
  0x65   : >> { %v315_v16 = vld [vmem:[%s13962_s28 + $0x1400] sm:$0xff]  ;;  %314 = vst [vmem:[%s13958_s27 + $0x4f0] sm:$0xff] %v313_v15 }
  0x66   : >> { %316 = vst [vmem:[%s13958_s27 + $0x500] sm:$0xff] %v315_v16  ;;  %v317_v17 = vld [vmem:[%s13962_s28 + $0x1440] sm:$0xff] }
  0x67   : >> { %v319_v18 = vld [vmem:[%s13962_s28 + $0x1480] sm:$0xff]  ;;  %318 = vst [vmem:[%s13958_s27 + $0x510] sm:$0xff] %v317_v17 }
  0x68   : >> { %v321_v19 = vld [vmem:[%s13962_s28 + $0x14c0] sm:$0xff]  ;;  %320 = vst [vmem:[%s13958_s27 + $0x520] sm:$0xff] %v319_v18 }
  0x69   : >> { %322 = vst [vmem:[%s13958_s27 + $0x530] sm:$0xff] %v321_v19  ;;  %v323_v20 = vld [vmem:[%s13962_s28 + $0x1500] sm:$0xff] }
  0x6a   : >> { %v325_v21 = vld [vmem:[%s13962_s28 + $0x1540] sm:$0xff]  ;;  %324 = vst [vmem:[%s13958_s27 + $0x540] sm:$0xff] %v323_v20 }
  0x6b   : >> { %v327_v22 = vld [vmem:[%s13962_s28 + $0x1580] sm:$0xff]  ;;  %326 = vst [vmem:[%s13958_s27 + $0x550] sm:$0xff] %v325_v21 }
  0x6c   : >> { %328 = vst [vmem:[%s13958_s27 + $0x560] sm:$0xff] %v327_v22  ;;  %v329_v23 = vld [vmem:[%s13962_s28 + $0x15c0] sm:$0xff] }
  0x6d   : >> { %v331_v24 = vld [vmem:[%s13962_s28 + $0x1600] sm:$0xff]  ;;  %330 = vst [vmem:[%s13958_s27 + $0x570] sm:$0xff] %v329_v23 }
  0x6e   : >> { %v333_v25 = vld [vmem:[%s13962_s28 + $0x1640] sm:$0xff]  ;;  %332 = vst [vmem:[%s13958_s27 + $0x580] sm:$0xff] %v331_v24 }
  0x6f   : >> { %334 = vst [vmem:[%s13958_s27 + $0x590] sm:$0xff] %v333_v25  ;;  %v335_v26 = vld [vmem:[%s13962_s28 + $0x1680] sm:$0xff] }
  0x70   : >> { %v337_v27 = vld [vmem:[%s13962_s28 + $0x16c0] sm:$0xff]  ;;  %336 = vst [vmem:[%s13958_s27 + $0x5a0] sm:$0xff] %v335_v26 }
  0x71   : >> { %v339_v28 = vld [vmem:[%s13962_s28 + $0x1700] sm:$0xff]  ;;  %338 = vst [vmem:[%s13958_s27 + $0x5b0] sm:$0xff] %v337_v27 }
  0x72   : >> { %340 = vst [vmem:[%s13958_s27 + $0x5c0] sm:$0xff] %v339_v28  ;;  %v341_v29 = vld [vmem:[%s13962_s28 + $0x1740] sm:$0xff] }
  0x73   : >> { %v343_v30 = vld [vmem:[%s13962_s28 + $0x1780] sm:$0xff]  ;;  %342 = vst [vmem:[%s13958_s27 + $0x5d0] sm:$0xff] %v341_v29 }
  0x74   : >> { %v345_v31 = vld [vmem:[%s13962_s28 + $0x17c0] sm:$0xff]  ;;  %344 = vst [vmem:[%s13958_s27 + $0x5e0] sm:$0xff] %v343_v30 }
  0x75   : >> { %346 = vst [vmem:[%s13958_s27 + $0x5f0] sm:$0xff] %v345_v31  ;;  %v347_v32 = vld [vmem:[%s13962_s28 + $0x1800] sm:$0xff] }
  0x76   : >> { %v349_v33 = vld [vmem:[%s13962_s28 + $0x1840] sm:$0xff]  ;;  %348 = vst [vmem:[%s13958_s27 + $0x600] sm:$0xff] %v347_v32 }
  0x77   : >> { %v351_v34 = vld [vmem:[%s13962_s28 + $0x1880] sm:$0xff]  ;;  %350 = vst [vmem:[%s13958_s27 + $0x610] sm:$0xff] %v349_v33 }
  0x78   : >> { %352 = vst [vmem:[%s13958_s27 + $0x620] sm:$0xff] %v351_v34  ;;  %v353_v35 = vld [vmem:[%s13962_s28 + $0x18c0] sm:$0xff] }
  0x79   : >> { %v355_v36 = vld [vmem:[%s13962_s28 + $0x1900] sm:$0xff]  ;;  %354 = vst [vmem:[%s13958_s27 + $0x630] sm:$0xff] %v353_v35 }
  0x7a   : >> { %v357_v37 = vld [vmem:[%s13962_s28 + $0x1940] sm:$0xff]  ;;  %356 = vst [vmem:[%s13958_s27 + $0x640] sm:$0xff] %v355_v36 }
  0x7b   : >> { %358 = vst [vmem:[%s13958_s27 + $0x650] sm:$0xff] %v357_v37  ;;  %v359_v38 = vld [vmem:[%s13962_s28 + $0x1980] sm:$0xff] }
  0x7c   : >> { %v361_v39 = vld [vmem:[%s13962_s28 + $0x19c0] sm:$0xff]  ;;  %360 = vst [vmem:[%s13958_s27 + $0x660] sm:$0xff] %v359_v38 }
  0x7d   : >> { %v363_v40 = vld [vmem:[%s13962_s28 + $0x1a00] sm:$0xff]  ;;  %362 = vst [vmem:[%s13958_s27 + $0x670] sm:$0xff] %v361_v39 }
  0x7e   : >> { %364 = vst [vmem:[%s13958_s27 + $0x680] sm:$0xff] %v363_v40  ;;  %v365_v41 = vld [vmem:[%s13962_s28 + $0x1a40] sm:$0xff] }
  0x7f   : >> { %v367_v42 = vld [vmem:[%s13962_s28 + $0x1a80] sm:$0xff]  ;;  %366 = vst [vmem:[%s13958_s27 + $0x690] sm:$0xff] %v365_v41 }
  0x80   : >> { %v369_v43 = vld [vmem:[%s13962_s28 + $0x1ac0] sm:$0xff]  ;;  %368 = vst [vmem:[%s13958_s27 + $0x6a0] sm:$0xff] %v367_v42 }
  0x81   : >> { %370 = vst [vmem:[%s13958_s27 + $0x6b0] sm:$0xff] %v369_v43  ;;  %v371_v44 = vld [vmem:[%s13962_s28 + $0x1b00] sm:$0xff] }
  0x82   : >> { %v373_v45 = vld [vmem:[%s13962_s28 + $0x1b40] sm:$0xff]  ;;  %372 = vst [vmem:[%s13958_s27 + $0x6c0] sm:$0xff] %v371_v44 }
  0x83   : >> { %v375_v46 = vld [vmem:[%s13962_s28 + $0x1b80] sm:$0xff]  ;;  %374 = vst [vmem:[%s13958_s27 + $0x6d0] sm:$0xff] %v373_v45 }
  0x84   : >> { %376 = vst [vmem:[%s13958_s27 + $0x6e0] sm:$0xff] %v375_v46  ;;  %v377_v47 = vld [vmem:[%s13962_s28 + $0x1bc0] sm:$0xff] }
  0x85   : >> { %v379_v48 = vld [vmem:[%s13962_s28 + $0x1c00] sm:$0xff]  ;;  %378 = vst [vmem:[%s13958_s27 + $0x6f0] sm:$0xff] %v377_v47 }
  0x86   : >> { %v381_v49 = vld [vmem:[%s13962_s28 + $0x1c40] sm:$0xff]  ;;  %380 = vst [vmem:[%s13958_s27 + $0x700] sm:$0xff] %v379_v48 }
  0x87   : >> { %382 = vst [vmem:[%s13958_s27 + $0x710] sm:$0xff] %v381_v49  ;;  %v383_v50 = vld [vmem:[%s13962_s28 + $0x1c80] sm:$0xff] }
  0x88   : >> { %v385_v51 = vld [vmem:[%s13962_s28 + $0x1cc0] sm:$0xff]  ;;  %384 = vst [vmem:[%s13958_s27 + $0x720] sm:$0xff] %v383_v50 }
  0x89   : >> { %v387_v52 = vld [vmem:[%s13962_s28 + $0x1d00] sm:$0xff]  ;;  %386 = vst [vmem:[%s13958_s27 + $0x730] sm:$0xff] %v385_v51 }
  0x8a   : >> { %388 = vst [vmem:[%s13958_s27 + $0x740] sm:$0xff] %v387_v52  ;;  %v389_v53 = vld [vmem:[%s13962_s28 + $0x1d40] sm:$0xff] }
  0x8b   : >> { %v391_v54 = vld [vmem:[%s13962_s28 + $0x1d80] sm:$0xff]  ;;  %390 = vst [vmem:[%s13958_s27 + $0x750] sm:$0xff] %v389_v53 }
  0x8c   : >> { %v393_v55 = vld [vmem:[%s13962_s28 + $0x1dc0] sm:$0xff]  ;;  %392 = vst [vmem:[%s13958_s27 + $0x760] sm:$0xff] %v391_v54 }
  0x8d   : >> { %394 = vst [vmem:[%s13958_s27 + $0x770] sm:$0xff] %v393_v55  ;;  %v395_v56 = vld [vmem:[%s13962_s28 + $0x1e00] sm:$0xff] }
  0x8e   : >> { %v397_v57 = vld [vmem:[%s13962_s28 + $0x1e40] sm:$0xff]  ;;  %396 = vst [vmem:[%s13958_s27 + $0x780] sm:$0xff] %v395_v56 }
  0x8f   : >> { %v399_v58 = vld [vmem:[%s13962_s28 + $0x1e80] sm:$0xff]  ;;  %398 = vst [vmem:[%s13958_s27 + $0x790] sm:$0xff] %v397_v57 }
  0x90   : >> { %400 = vst [vmem:[%s13958_s27 + $0x7a0] sm:$0xff] %v399_v58  ;;  %v401_v59 = vld [vmem:[%s13962_s28 + $0x1ec0] sm:$0xff] }
  0x91   : >> { %v403_v60 = vld [vmem:[%s13962_s28 + $0x1f00] sm:$0xff]  ;;  %402 = vst [vmem:[%s13958_s27 + $0x7b0] sm:$0xff] %v401_v59 }
  0x92   : >> { %v405_v61 = vld [vmem:[%s13962_s28 + $0x1f40] sm:$0xff]  ;;  %404 = vst [vmem:[%s13958_s27 + $0x7c0] sm:$0xff] %v403_v60 }
  0x93   : >> { %406 = vst [vmem:[%s13958_s27 + $0x7d0] sm:$0xff] %v405_v61  ;;  %v407_v62 = vld [vmem:[%s13962_s28 + $0x1f80] sm:$0xff] }
  0x94   : >> { %v409_v63 = vld [vmem:[%s13962_s28 + $0x1fc0] sm:$0xff]  ;;  %408 = vst [vmem:[%s13958_s27 + $0x7e0] sm:$0xff] %v407_v62 }
  0x95   : >> { %v411_v0 = vld [vmem:[%s13962_s28 + $0x2000] sm:$0xff]  ;;  %410 = vst [vmem:[%s13958_s27 + $0x7f0] sm:$0xff] %v409_v63 }
  0x96   : >> { %412 = vst [vmem:[%s13958_s27 + $0x800] sm:$0xff] %v411_v0  ;;  %v413_v1 = vld [vmem:[%s13962_s28 + $0x2040] sm:$0xff] }
  0x97   : >> { %v415_v2 = vld [vmem:[%s13962_s28 + $0x2080] sm:$0xff]  ;;  %414 = vst [vmem:[%s13958_s27 + $0x810] sm:$0xff] %v413_v1 }
  0x98   : >> { %v417_v3 = vld [vmem:[%s13962_s28 + $0x20c0] sm:$0xff]  ;;  %416 = vst [vmem:[%s13958_s27 + $0x820] sm:$0xff] %v415_v2 }
  0x99   : >> { %418 = vst [vmem:[%s13958_s27 + $0x830] sm:$0xff] %v417_v3  ;;  %v419_v4 = vld [vmem:[%s13962_s28 + $0x2100] sm:$0xff] }
  0x9a   : >> { %v421_v5 = vld [vmem:[%s13962_s28 + $0x2140] sm:$0xff]  ;;  %420 = vst [vmem:[%s13958_s27 + $0x840] sm:$0xff] %v419_v4 }
  0x9b   : >> { %v423_v6 = vld [vmem:[%s13962_s28 + $0x2180] sm:$0xff]  ;;  %422 = vst [vmem:[%s13958_s27 + $0x850] sm:$0xff] %v421_v5 }
  0x9c   : >> { %424 = vst [vmem:[%s13958_s27 + $0x860] sm:$0xff] %v423_v6  ;;  %v425_v7 = vld [vmem:[%s13962_s28 + $0x21c0] sm:$0xff] }
  0x9d   : >> { %v427_v8 = vld [vmem:[%s13962_s28 + $0x2200] sm:$0xff]  ;;  %426 = vst [vmem:[%s13958_s27 + $0x870] sm:$0xff] %v425_v7 }
  0x9e   : >> { %v429_v9 = vld [vmem:[%s13962_s28 + $0x2240] sm:$0xff]  ;;  %428 = vst [vmem:[%s13958_s27 + $0x880] sm:$0xff] %v427_v8 }
  0x9f   : >> { %430 = vst [vmem:[%s13958_s27 + $0x890] sm:$0xff] %v429_v9  ;;  %v431_v10 = vld [vmem:[%s13962_s28 + $0x2280] sm:$0xff] }
  0xa0   : >> { %v433_v11 = vld [vmem:[%s13962_s28 + $0x22c0] sm:$0xff]  ;;  %432 = vst [vmem:[%s13958_s27 + $0x8a0] sm:$0xff] %v431_v10 }
  0xa1   : >> { %v435_v12 = vld [vmem:[%s13962_s28 + $0x2300] sm:$0xff]  ;;  %434 = vst [vmem:[%s13958_s27 + $0x8b0] sm:$0xff] %v433_v11 }
  0xa2   : >> { %436 = vst [vmem:[%s13958_s27 + $0x8c0] sm:$0xff] %v435_v12  ;;  %v437_v13 = vld [vmem:[%s13962_s28 + $0x2340] sm:$0xff] }
  0xa3   : >> { %v439_v14 = vld [vmem:[%s13962_s28 + $0x2380] sm:$0xff]  ;;  %438 = vst [vmem:[%s13958_s27 + $0x8d0] sm:$0xff] %v437_v13 }
  0xa4   : >> { %v441_v15 = vld [vmem:[%s13962_s28 + $0x23c0] sm:$0xff]  ;;  %440 = vst [vmem:[%s13958_s27 + $0x8e0] sm:$0xff] %v439_v14 }
  0xa5   : >> { %442 = vst [vmem:[%s13958_s27 + $0x8f0] sm:$0xff] %v441_v15  ;;  %v443_v16 = vld [vmem:[%s13962_s28 + $0x2400] sm:$0xff] }
  0xa6   : >> { %v445_v17 = vld [vmem:[%s13962_s28 + $0x2440] sm:$0xff]  ;;  %444 = vst [vmem:[%s13958_s27 + $0x900] sm:$0xff] %v443_v16 }
  0xa7   : >> { %v447_v18 = vld [vmem:[%s13962_s28 + $0x2480] sm:$0xff]  ;;  %446 = vst [vmem:[%s13958_s27 + $0x910] sm:$0xff] %v445_v17 }
  0xa8   : >> { %448 = vst [vmem:[%s13958_s27 + $0x920] sm:$0xff] %v447_v18  ;;  %v449_v19 = vld [vmem:[%s13962_s28 + $0x24c0] sm:$0xff] }
  0xa9   : >> { %v451_v20 = vld [vmem:[%s13962_s28 + $0x2500] sm:$0xff]  ;;  %450 = vst [vmem:[%s13958_s27 + $0x930] sm:$0xff] %v449_v19 }
  0xaa   : >> { %v453_v21 = vld [vmem:[%s13962_s28 + $0x2540] sm:$0xff]  ;;  %452 = vst [vmem:[%s13958_s27 + $0x940] sm:$0xff] %v451_v20 }
  0xab   : >> { %454 = vst [vmem:[%s13958_s27 + $0x950] sm:$0xff] %v453_v21  ;;  %v455_v22 = vld [vmem:[%s13962_s28 + $0x2580] sm:$0xff] }
  0xac   : >> { %v457_v23 = vld [vmem:[%s13962_s28 + $0x25c0] sm:$0xff]  ;;  %456 = vst [vmem:[%s13958_s27 + $0x960] sm:$0xff] %v455_v22 }
  0xad   : >> { %v459_v24 = vld [vmem:[%s13962_s28 + $0x2600] sm:$0xff]  ;;  %458 = vst [vmem:[%s13958_s27 + $0x970] sm:$0xff] %v457_v23 }
  0xae   : >> { %460 = vst [vmem:[%s13958_s27 + $0x980] sm:$0xff] %v459_v24  ;;  %v461_v25 = vld [vmem:[%s13962_s28 + $0x2640] sm:$0xff] }
  0xaf   : >> { %v463_v26 = vld [vmem:[%s13962_s28 + $0x2680] sm:$0xff]  ;;  %462 = vst [vmem:[%s13958_s27 + $0x990] sm:$0xff] %v461_v25 }
  0xb0   : >> { %v465_v27 = vld [vmem:[%s13962_s28 + $0x26c0] sm:$0xff]  ;;  %464 = vst [vmem:[%s13958_s27 + $0x9a0] sm:$0xff] %v463_v26 }
  0xb1   : >> { %466 = vst [vmem:[%s13958_s27 + $0x9b0] sm:$0xff] %v465_v27  ;;  %v467_v28 = vld [vmem:[%s13962_s28 + $0x2700] sm:$0xff] }
  0xb2   : >> { %v469_v29 = vld [vmem:[%s13962_s28 + $0x2740] sm:$0xff]  ;;  %468 = vst [vmem:[%s13958_s27 + $0x9c0] sm:$0xff] %v467_v28 }
  0xb3   : >> { %v471_v30 = vld [vmem:[%s13962_s28 + $0x2780] sm:$0xff]  ;;  %470 = vst [vmem:[%s13958_s27 + $0x9d0] sm:$0xff] %v469_v29 }
  0xb4   : >> { %472 = vst [vmem:[%s13958_s27 + $0x9e0] sm:$0xff] %v471_v30  ;;  %v473_v31 = vld [vmem:[%s13962_s28 + $0x27c0] sm:$0xff] }
  0xb5   : >> { %v475_v32 = vld [vmem:[%s13962_s28 + $0x2800] sm:$0xff]  ;;  %474 = vst [vmem:[%s13958_s27 + $0x9f0] sm:$0xff] %v473_v31 }
  0xb6   : >> { %v477_v33 = vld [vmem:[%s13962_s28 + $0x2840] sm:$0xff]  ;;  %476 = vst [vmem:[%s13958_s27 + $0xa00] sm:$0xff] %v475_v32 }
  0xb7   : >> { %478 = vst [vmem:[%s13958_s27 + $0xa10] sm:$0xff] %v477_v33  ;;  %v479_v34 = vld [vmem:[%s13962_s28 + $0x2880] sm:$0xff] }
  0xb8   : >> { %v481_v35 = vld [vmem:[%s13962_s28 + $0x28c0] sm:$0xff]  ;;  %480 = vst [vmem:[%s13958_s27 + $0xa20] sm:$0xff] %v479_v34 }
  0xb9   : >> { %v483_v36 = vld [vmem:[%s13962_s28 + $0x2900] sm:$0xff]  ;;  %482 = vst [vmem:[%s13958_s27 + $0xa30] sm:$0xff] %v481_v35 }
  0xba   : >> { %484 = vst [vmem:[%s13958_s27 + $0xa40] sm:$0xff] %v483_v36  ;;  %v485_v37 = vld [vmem:[%s13962_s28 + $0x2940] sm:$0xff] }
  0xbb   : >> { %v487_v38 = vld [vmem:[%s13962_s28 + $0x2980] sm:$0xff]  ;;  %486 = vst [vmem:[%s13958_s27 + $0xa50] sm:$0xff] %v485_v37 }
  0xbc   : >> { %v489_v39 = vld [vmem:[%s13962_s28 + $0x29c0] sm:$0xff]  ;;  %488 = vst [vmem:[%s13958_s27 + $0xa60] sm:$0xff] %v487_v38 }
  0xbd   : >> { %490 = vst [vmem:[%s13958_s27 + $0xa70] sm:$0xff] %v489_v39  ;;  %v491_v40 = vld [vmem:[%s13962_s28 + $0x2a00] sm:$0xff] }
  0xbe   : >> { %v493_v41 = vld [vmem:[%s13962_s28 + $0x2a40] sm:$0xff]  ;;  %492 = vst [vmem:[%s13958_s27 + $0xa80] sm:$0xff] %v491_v40 }
  0xbf   : >> { %v495_v42 = vld [vmem:[%s13962_s28 + $0x2a80] sm:$0xff]  ;;  %494 = vst [vmem:[%s13958_s27 + $0xa90] sm:$0xff] %v493_v41 }
  0xc0   : >> { %496 = vst [vmem:[%s13958_s27 + $0xaa0] sm:$0xff] %v495_v42  ;;  %v497_v43 = vld [vmem:[%s13962_s28 + $0x2ac0] sm:$0xff] }
  0xc1   : >> { %v499_v44 = vld [vmem:[%s13962_s28 + $0x2b00] sm:$0xff]  ;;  %498 = vst [vmem:[%s13958_s27 + $0xab0] sm:$0xff] %v497_v43 }
  0xc2   : >> { %v501_v45 = vld [vmem:[%s13962_s28 + $0x2b40] sm:$0xff]  ;;  %500 = vst [vmem:[%s13958_s27 + $0xac0] sm:$0xff] %v499_v44 }
  0xc3   : >> { %502 = vst [vmem:[%s13958_s27 + $0xad0] sm:$0xff] %v501_v45  ;;  %v503_v46 = vld [vmem:[%s13962_s28 + $0x2b80] sm:$0xff] }
  0xc4   : >> { %v505_v47 = vld [vmem:[%s13962_s28 + $0x2bc0] sm:$0xff]  ;;  %504 = vst [vmem:[%s13958_s27 + $0xae0] sm:$0xff] %v503_v46 }
  0xc5   : >> { %v507_v48 = vld [vmem:[%s13962_s28 + $0x2c00] sm:$0xff]  ;;  %506 = vst [vmem:[%s13958_s27 + $0xaf0] sm:$0xff] %v505_v47 }
  0xc6   : >> { %508 = vst [vmem:[%s13958_s27 + $0xb00] sm:$0xff] %v507_v48  ;;  %v509_v49 = vld [vmem:[%s13962_s28 + $0x2c40] sm:$0xff] }
  0xc7   : >> { %v511_v50 = vld [vmem:[%s13962_s28 + $0x2c80] sm:$0xff]  ;;  %510 = vst [vmem:[%s13958_s27 + $0xb10] sm:$0xff] %v509_v49 }
  0xc8   : >> { %v513_v51 = vld [vmem:[%s13962_s28 + $0x2cc0] sm:$0xff]  ;;  %512 = vst [vmem:[%s13958_s27 + $0xb20] sm:$0xff] %v511_v50 }
  0xc9   : >> { %514 = vst [vmem:[%s13958_s27 + $0xb30] sm:$0xff] %v513_v51  ;;  %v515_v52 = vld [vmem:[%s13962_s28 + $0x2d00] sm:$0xff] }
  0xca   : >> { %v517_v53 = vld [vmem:[%s13962_s28 + $0x2d40] sm:$0xff]  ;;  %516 = vst [vmem:[%s13958_s27 + $0xb40] sm:$0xff] %v515_v52 }
  0xcb   : >> { %v519_v54 = vld [vmem:[%s13962_s28 + $0x2d80] sm:$0xff]  ;;  %518 = vst [vmem:[%s13958_s27 + $0xb50] sm:$0xff] %v517_v53 }
  0xcc   : >> { %520 = vst [vmem:[%s13958_s27 + $0xb60] sm:$0xff] %v519_v54  ;;  %v521_v55 = vld [vmem:[%s13962_s28 + $0x2dc0] sm:$0xff] }
  0xcd   : >> { %v523_v56 = vld [vmem:[%s13962_s28 + $0x2e00] sm:$0xff]  ;;  %522 = vst [vmem:[%s13958_s27 + $0xb70] sm:$0xff] %v521_v55 }
  0xce   : >> { %v525_v57 = vld [vmem:[%s13962_s28 + $0x2e40] sm:$0xff]  ;;  %524 = vst [vmem:[%s13958_s27 + $0xb80] sm:$0xff] %v523_v56 }
  0xcf   : >> { %526 = vst [vmem:[%s13958_s27 + $0xb90] sm:$0xff] %v525_v57  ;;  %v527_v58 = vld [vmem:[%s13962_s28 + $0x2e80] sm:$0xff] }
  0xd0   : >> { %v529_v59 = vld [vmem:[%s13962_s28 + $0x2ec0] sm:$0xff]  ;;  %528 = vst [vmem:[%s13958_s27 + $0xba0] sm:$0xff] %v527_v58 }
  0xd1   : >> { %v531_v60 = vld [vmem:[%s13962_s28 + $0x2f00] sm:$0xff]  ;;  %530 = vst [vmem:[%s13958_s27 + $0xbb0] sm:$0xff] %v529_v59 }
  0xd2   : >> { %532 = vst [vmem:[%s13958_s27 + $0xbc0] sm:$0xff] %v531_v60  ;;  %v533_v61 = vld [vmem:[%s13962_s28 + $0x2f40] sm:$0xff] }
  0xd3   : >> { %v535_v62 = vld [vmem:[%s13962_s28 + $0x2f80] sm:$0xff]  ;;  %534 = vst [vmem:[%s13958_s27 + $0xbd0] sm:$0xff] %v533_v61 }
  0xd4   : >> { %v537_v63 = vld [vmem:[%s13962_s28 + $0x2fc0] sm:$0xff]  ;;  %536 = vst [vmem:[%s13958_s27 + $0xbe0] sm:$0xff] %v535_v62 }
  0xd5   : >> { %538 = vst [vmem:[%s13958_s27 + $0xbf0] sm:$0xff] %v537_v63  ;;  %v539_v0 = vld [vmem:[%s13962_s28 + $0x3000] sm:$0xff] }
  0xd6   : >> { %v541_v1 = vld [vmem:[%s13962_s28 + $0x3040] sm:$0xff]  ;;  %540 = vst [vmem:[%s13958_s27 + $0xc00] sm:$0xff] %v539_v0 }
  0xd7   : >> { %v543_v2 = vld [vmem:[%s13962_s28 + $0x3080] sm:$0xff]  ;;  %542 = vst [vmem:[%s13958_s27 + $0xc10] sm:$0xff] %v541_v1 }
  0xd8   : >> { %544 = vst [vmem:[%s13958_s27 + $0xc20] sm:$0xff] %v543_v2  ;;  %v545_v3 = vld [vmem:[%s13962_s28 + $0x30c0] sm:$0xff] }
  0xd9   : >> { %v547_v4 = vld [vmem:[%s13962_s28 + $0x3100] sm:$0xff]  ;;  %546 = vst [vmem:[%s13958_s27 + $0xc30] sm:$0xff] %v545_v3 }
  0xda   : >> { %v549_v5 = vld [vmem:[%s13962_s28 + $0x3140] sm:$0xff]  ;;  %548 = vst [vmem:[%s13958_s27 + $0xc40] sm:$0xff] %v547_v4 }
  0xdb   : >> { %550 = vst [vmem:[%s13958_s27 + $0xc50] sm:$0xff] %v549_v5  ;;  %v551_v6 = vld [vmem:[%s13962_s28 + $0x3180] sm:$0xff] }
  0xdc   : >> { %v553_v7 = vld [vmem:[%s13962_s28 + $0x31c0] sm:$0xff]  ;;  %552 = vst [vmem:[%s13958_s27 + $0xc60] sm:$0xff] %v551_v6 }
  0xdd   : >> { %v555_v8 = vld [vmem:[%s13962_s28 + $0x3200] sm:$0xff]  ;;  %554 = vst [vmem:[%s13958_s27 + $0xc70] sm:$0xff] %v553_v7 }
  0xde   : >> { %556 = vst [vmem:[%s13958_s27 + $0xc80] sm:$0xff] %v555_v8  ;;  %v557_v9 = vld [vmem:[%s13962_s28 + $0x3240] sm:$0xff] }
  0xdf   : >> { %v559_v10 = vld [vmem:[%s13962_s28 + $0x3280] sm:$0xff]  ;;  %558 = vst [vmem:[%s13958_s27 + $0xc90] sm:$0xff] %v557_v9 }
  0xe0   : >> { %v561_v11 = vld [vmem:[%s13962_s28 + $0x32c0] sm:$0xff]  ;;  %560 = vst [vmem:[%s13958_s27 + $0xca0] sm:$0xff] %v559_v10 }
  0xe1   : >> { %562 = vst [vmem:[%s13958_s27 + $0xcb0] sm:$0xff] %v561_v11  ;;  %v563_v12 = vld [vmem:[%s13962_s28 + $0x3300] sm:$0xff] }
  0xe2   : >> { %v565_v13 = vld [vmem:[%s13962_s28 + $0x3340] sm:$0xff]  ;;  %564 = vst [vmem:[%s13958_s27 + $0xcc0] sm:$0xff] %v563_v12 }
  0xe3   : >> { %v567_v14 = vld [vmem:[%s13962_s28 + $0x3380] sm:$0xff]  ;;  %566 = vst [vmem:[%s13958_s27 + $0xcd0] sm:$0xff] %v565_v13 }
  0xe4   : >> { %568 = vst [vmem:[%s13958_s27 + $0xce0] sm:$0xff] %v567_v14  ;;  %v569_v15 = vld [vmem:[%s13962_s28 + $0x33c0] sm:$0xff] }
  0xe5   : >> { %v571_v16 = vld [vmem:[%s13962_s28 + $0x3400] sm:$0xff]  ;;  %570 = vst [vmem:[%s13958_s27 + $0xcf0] sm:$0xff] %v569_v15 }
  0xe6   : >> { %v573_v17 = vld [vmem:[%s13962_s28 + $0x3440] sm:$0xff]  ;;  %572 = vst [vmem:[%s13958_s27 + $0xd00] sm:$0xff] %v571_v16 }
  0xe7   : >> { %574 = vst [vmem:[%s13958_s27 + $0xd10] sm:$0xff] %v573_v17  ;;  %v575_v18 = vld [vmem:[%s13962_s28 + $0x3480] sm:$0xff] }
  0xe8   : >> { %v577_v19 = vld [vmem:[%s13962_s28 + $0x34c0] sm:$0xff]  ;;  %576 = vst [vmem:[%s13958_s27 + $0xd20] sm:$0xff] %v575_v18 }
  0xe9   : >> { %v579_v20 = vld [vmem:[%s13962_s28 + $0x3500] sm:$0xff]  ;;  %578 = vst [vmem:[%s13958_s27 + $0xd30] sm:$0xff] %v577_v19 }
  0xea   : >> { %580 = vst [vmem:[%s13958_s27 + $0xd40] sm:$0xff] %v579_v20  ;;  %v581_v21 = vld [vmem:[%s13962_s28 + $0x3540] sm:$0xff] }
  0xeb   : >> { %v583_v22 = vld [vmem:[%s13962_s28 + $0x3580] sm:$0xff]  ;;  %582 = vst [vmem:[%s13958_s27 + $0xd50] sm:$0xff] %v581_v21 }
  0xec   : >> { %v585_v23 = vld [vmem:[%s13962_s28 + $0x35c0] sm:$0xff]  ;;  %584 = vst [vmem:[%s13958_s27 + $0xd60] sm:$0xff] %v583_v22 }
  0xed   : >> { %586 = vst [vmem:[%s13958_s27 + $0xd70] sm:$0xff] %v585_v23  ;;  %v587_v24 = vld [vmem:[%s13962_s28 + $0x3600] sm:$0xff] }
  0xee   : >> { %v589_v25 = vld [vmem:[%s13962_s28 + $0x3640] sm:$0xff]  ;;  %588 = vst [vmem:[%s13958_s27 + $0xd80] sm:$0xff] %v587_v24 }
  0xef   : >> { %v591_v26 = vld [vmem:[%s13962_s28 + $0x3680] sm:$0xff]  ;;  %590 = vst [vmem:[%s13958_s27 + $0xd90] sm:$0xff] %v589_v25 }
  0xf0   : >> { %592 = vst [vmem:[%s13958_s27 + $0xda0] sm:$0xff] %v591_v26  ;;  %v593_v27 = vld [vmem:[%s13962_s28 + $0x36c0] sm:$0xff] }
  0xf1   : >> { %v595_v28 = vld [vmem:[%s13962_s28 + $0x3700] sm:$0xff]  ;;  %594 = vst [vmem:[%s13958_s27 + $0xdb0] sm:$0xff] %v593_v27 }
  0xf2   : >> { %v597_v29 = vld [vmem:[%s13962_s28 + $0x3740] sm:$0xff]  ;;  %596 = vst [vmem:[%s13958_s27 + $0xdc0] sm:$0xff] %v595_v28 }
  0xf3   : >> { %598 = vst [vmem:[%s13958_s27 + $0xdd0] sm:$0xff] %v597_v29  ;;  %v599_v30 = vld [vmem:[%s13962_s28 + $0x3780] sm:$0xff] }
  0xf4   : >> { %v601_v31 = vld [vmem:[%s13962_s28 + $0x37c0] sm:$0xff]  ;;  %600 = vst [vmem:[%s13958_s27 + $0xde0] sm:$0xff] %v599_v30 }
  0xf5   : >> { %v603_v32 = vld [vmem:[%s13962_s28 + $0x3800] sm:$0xff]  ;;  %602 = vst [vmem:[%s13958_s27 + $0xdf0] sm:$0xff] %v601_v31 }
  0xf6   : >> { %604 = vst [vmem:[%s13958_s27 + $0xe00] sm:$0xff] %v603_v32  ;;  %v605_v33 = vld [vmem:[%s13962_s28 + $0x3840] sm:$0xff] }
  0xf7   : >> { %v607_v34 = vld [vmem:[%s13962_s28 + $0x3880] sm:$0xff]  ;;  %606 = vst [vmem:[%s13958_s27 + $0xe10] sm:$0xff] %v605_v33 }
  0xf8   : >> { %v609_v35 = vld [vmem:[%s13962_s28 + $0x38c0] sm:$0xff]  ;;  %608 = vst [vmem:[%s13958_s27 + $0xe20] sm:$0xff] %v607_v34 }
  0xf9   : >> { %610 = vst [vmem:[%s13958_s27 + $0xe30] sm:$0xff] %v609_v35  ;;  %v611_v36 = vld [vmem:[%s13962_s28 + $0x3900] sm:$0xff] }
  0xfa   : >> { %v613_v37 = vld [vmem:[%s13962_s28 + $0x3940] sm:$0xff]  ;;  %612 = vst [vmem:[%s13958_s27 + $0xe40] sm:$0xff] %v611_v36 }
  0xfb   : >> { %v615_v38 = vld [vmem:[%s13962_s28 + $0x3980] sm:$0xff]  ;;  %614 = vst [vmem:[%s13958_s27 + $0xe50] sm:$0xff] %v613_v37 }
  0xfc   : >> { %616 = vst [vmem:[%s13958_s27 + $0xe60] sm:$0xff] %v615_v38  ;;  %v617_v39 = vld [vmem:[%s13962_s28 + $0x39c0] sm:$0xff] }
  0xfd   : >> { %v619_v40 = vld [vmem:[%s13962_s28 + $0x3a00] sm:$0xff]  ;;  %618 = vst [vmem:[%s13958_s27 + $0xe70] sm:$0xff] %v617_v39 }
  0xfe   : >> { %v621_v41 = vld [vmem:[%s13962_s28 + $0x3a40] sm:$0xff]  ;;  %620 = vst [vmem:[%s13958_s27 + $0xe80] sm:$0xff] %v619_v40 }
  0xff   : >> { %622 = vst [vmem:[%s13958_s27 + $0xe90] sm:$0xff] %v621_v41  ;;  %v623_v42 = vld [vmem:[%s13962_s28 + $0x3a80] sm:$0xff] }
 0x100   : >> { %v625_v43 = vld [vmem:[%s13962_s28 + $0x3ac0] sm:$0xff]  ;;  %624 = vst [vmem:[%s13958_s27 + $0xea0] sm:$0xff] %v623_v42 }
 0x101   : >> { %v627_v44 = vld [vmem:[%s13962_s28 + $0x3b00] sm:$0xff]  ;;  %626 = vst [vmem:[%s13958_s27 + $0xeb0] sm:$0xff] %v625_v43 }
 0x102   : >> { %628 = vst [vmem:[%s13958_s27 + $0xec0] sm:$0xff] %v627_v44  ;;  %v629_v45 = vld [vmem:[%s13962_s28 + $0x3b40] sm:$0xff] }
 0x103   : >> { %v631_v46 = vld [vmem:[%s13962_s28 + $0x3b80] sm:$0xff]  ;;  %630 = vst [vmem:[%s13958_s27 + $0xed0] sm:$0xff] %v629_v45 }
 0x104   : >> { %v633_v47 = vld [vmem:[%s13962_s28 + $0x3bc0] sm:$0xff]  ;;  %632 = vst [vmem:[%s13958_s27 + $0xee0] sm:$0xff] %v631_v46 }
 0x105   : >> { %634 = vst [vmem:[%s13958_s27 + $0xef0] sm:$0xff] %v633_v47  ;;  %v635_v48 = vld [vmem:[%s13962_s28 + $0x3c00] sm:$0xff] }
 0x106   : >> { %v637_v49 = vld [vmem:[%s13962_s28 + $0x3c40] sm:$0xff]  ;;  %636 = vst [vmem:[%s13958_s27 + $0xf00] sm:$0xff] %v635_v48 }
 0x107   : >> { %v639_v50 = vld [vmem:[%s13962_s28 + $0x3c80] sm:$0xff]  ;;  %638 = vst [vmem:[%s13958_s27 + $0xf10] sm:$0xff] %v637_v49 }
 0x108   : >> { %640 = vst [vmem:[%s13958_s27 + $0xf20] sm:$0xff] %v639_v50  ;;  %v641_v51 = vld [vmem:[%s13962_s28 + $0x3cc0] sm:$0xff] }
 0x109   : >> { %v643_v52 = vld [vmem:[%s13962_s28 + $0x3d00] sm:$0xff]  ;;  %642 = vst [vmem:[%s13958_s27 + $0xf30] sm:$0xff] %v641_v51 }
 0x10a   : >> { %v645_v53 = vld [vmem:[%s13962_s28 + $0x3d40] sm:$0xff]  ;;  %644 = vst [vmem:[%s13958_s27 + $0xf40] sm:$0xff] %v643_v52 }
 0x10b   : >> { %646 = vst [vmem:[%s13958_s27 + $0xf50] sm:$0xff] %v645_v53  ;;  %v647_v54 = vld [vmem:[%s13962_s28 + $0x3d80] sm:$0xff] }
 0x10c   : >> { %v649_v55 = vld [vmem:[%s13962_s28 + $0x3dc0] sm:$0xff]  ;;  %648 = vst [vmem:[%s13958_s27 + $0xf60] sm:$0xff] %v647_v54 }
 0x10d   : >> { %v651_v56 = vld [vmem:[%s13962_s28 + $0x3e00] sm:$0xff]  ;;  %650 = vst [vmem:[%s13958_s27 + $0xf70] sm:$0xff] %v649_v55 }
 0x10e   : >> { %652 = vst [vmem:[%s13958_s27 + $0xf80] sm:$0xff] %v651_v56  ;;  %v653_v57 = vld [vmem:[%s13962_s28 + $0x3e40] sm:$0xff] }
 0x10f   : >> { %v655_v58 = vld [vmem:[%s13962_s28 + $0x3e80] sm:$0xff]  ;;  %654 = vst [vmem:[%s13958_s27 + $0xf90] sm:$0xff] %v653_v57 }
 0x110   : >> { %v657_v59 = vld [vmem:[%s13962_s28 + $0x3ec0] sm:$0xff]  ;;  %656 = vst [vmem:[%s13958_s27 + $0xfa0] sm:$0xff] %v655_v58 }
 0x111   : >> { %658 = vst [vmem:[%s13958_s27 + $0xfb0] sm:$0xff] %v657_v59  ;;  %v659_v60 = vld [vmem:[%s13962_s28 + $0x3f00] sm:$0xff] }
 0x112   : >> { %v661_v61 = vld [vmem:[%s13962_s28 + $0x3f40] sm:$0xff]  ;;  %660 = vst [vmem:[%s13958_s27 + $0xfc0] sm:$0xff] %v659_v60 }
 0x113   : >> { %v663_v62 = vld [vmem:[%s13962_s28 + $0x3f80] sm:$0xff]  ;;  %662 = vst [vmem:[%s13958_s27 + $0xfd0] sm:$0xff] %v661_v61 }
 0x114   : >> { %664 = vst [vmem:[%s13958_s27 + $0xfe0] sm:$0xff] %v663_v62  ;;  %v665_v63 = vld [vmem:[%s13962_s28 + $0x3fc0] sm:$0xff] }
 0x115   : >> { %v667_v0 = vld [vmem:[%s13962_s28 + $0x4000] sm:$0xff]  ;;  %666 = vst [vmem:[%s13958_s27 + $0xff0] sm:$0xff] %v665_v63 }
 0x116   : >> { %v669_v1 = vld [vmem:[%s13962_s28 + $0x4040] sm:$0xff]  ;;  %668 = vst [vmem:[%s13958_s27 + $0x1000] sm:$0xff] %v667_v0 }
 0x117   : >> { %670 = vst [vmem:[%s13958_s27 + $0x1010] sm:$0xff] %v669_v1  ;;  %v671_v2 = vld [vmem:[%s13962_s28 + $0x4080] sm:$0xff] }
 0x118   : >> { %v673_v3 = vld [vmem:[%s13962_s28 + $0x40c0] sm:$0xff]  ;;  %672 = vst [vmem:[%s13958_s27 + $0x1020] sm:$0xff] %v671_v2 }
 0x119   : >> { %v675_v4 = vld [vmem:[%s13962_s28 + $0x4100] sm:$0xff]  ;;  %674 = vst [vmem:[%s13958_s27 + $0x1030] sm:$0xff] %v673_v3 }
 0x11a   : >> { %676 = vst [vmem:[%s13958_s27 + $0x1040] sm:$0xff] %v675_v4  ;;  %v677_v5 = vld [vmem:[%s13962_s28 + $0x4140] sm:$0xff] }
 0x11b   : >> { %v679_v6 = vld [vmem:[%s13962_s28 + $0x4180] sm:$0xff]  ;;  %678 = vst [vmem:[%s13958_s27 + $0x1050] sm:$0xff] %v677_v5 }
 0x11c   : >> { %v681_v7 = vld [vmem:[%s13962_s28 + $0x41c0] sm:$0xff]  ;;  %680 = vst [vmem:[%s13958_s27 + $0x1060] sm:$0xff] %v679_v6 }
 0x11d   : >> { %682 = vst [vmem:[%s13958_s27 + $0x1070] sm:$0xff] %v681_v7  ;;  %v683_v8 = vld [vmem:[%s13962_s28 + $0x4200] sm:$0xff] }
 0x11e   : >> { %v685_v9 = vld [vmem:[%s13962_s28 + $0x4240] sm:$0xff]  ;;  %684 = vst [vmem:[%s13958_s27 + $0x1080] sm:$0xff] %v683_v8 }
 0x11f   : >> { %v687_v10 = vld [vmem:[%s13962_s28 + $0x4280] sm:$0xff]  ;;  %686 = vst [vmem:[%s13958_s27 + $0x1090] sm:$0xff] %v685_v9 }
 0x120   : >> { %688 = vst [vmem:[%s13958_s27 + $0x10a0] sm:$0xff] %v687_v10  ;;  %v689_v11 = vld [vmem:[%s13962_s28 + $0x42c0] sm:$0xff] }
 0x121   : >> { %v691_v12 = vld [vmem:[%s13962_s28 + $0x4300] sm:$0xff]  ;;  %690 = vst [vmem:[%s13958_s27 + $0x10b0] sm:$0xff] %v689_v11 }
 0x122   : >> { %v693_v13 = vld [vmem:[%s13962_s28 + $0x4340] sm:$0xff]  ;;  %692 = vst [vmem:[%s13958_s27 + $0x10c0] sm:$0xff] %v691_v12 }
 0x123   : >> { %694 = vst [vmem:[%s13958_s27 + $0x10d0] sm:$0xff] %v693_v13  ;;  %v695_v14 = vld [vmem:[%s13962_s28 + $0x4380] sm:$0xff] }
 0x124   : >> { %v697_v15 = vld [vmem:[%s13962_s28 + $0x43c0] sm:$0xff]  ;;  %696 = vst [vmem:[%s13958_s27 + $0x10e0] sm:$0xff] %v695_v14 }
 0x125   : >> { %v699_v16 = vld [vmem:[%s13962_s28 + $0x4400] sm:$0xff]  ;;  %698 = vst [vmem:[%s13958_s27 + $0x10f0] sm:$0xff] %v697_v15 }
 0x126   : >> { %700 = vst [vmem:[%s13958_s27 + $0x1100] sm:$0xff] %v699_v16  ;;  %v701_v17 = vld [vmem:[%s13962_s28 + $0x4440] sm:$0xff] }
 0x127   : >> { %v703_v18 = vld [vmem:[%s13962_s28 + $0x4480] sm:$0xff]  ;;  %702 = vst [vmem:[%s13958_s27 + $0x1110] sm:$0xff] %v701_v17 }
 0x128   : >> { %v705_v19 = vld [vmem:[%s13962_s28 + $0x44c0] sm:$0xff]  ;;  %704 = vst [vmem:[%s13958_s27 + $0x1120] sm:$0xff] %v703_v18 }
 0x129   : >> { %706 = vst [vmem:[%s13958_s27 + $0x1130] sm:$0xff] %v705_v19  ;;  %v707_v20 = vld [vmem:[%s13962_s28 + $0x4500] sm:$0xff] }
 0x12a   : >> { %v709_v21 = vld [vmem:[%s13962_s28 + $0x4540] sm:$0xff]  ;;  %708 = vst [vmem:[%s13958_s27 + $0x1140] sm:$0xff] %v707_v20 }
 0x12b   : >> { %v711_v22 = vld [vmem:[%s13962_s28 + $0x4580] sm:$0xff]  ;;  %710 = vst [vmem:[%s13958_s27 + $0x1150] sm:$0xff] %v709_v21 }
 0x12c   : >> { %712 = vst [vmem:[%s13958_s27 + $0x1160] sm:$0xff] %v711_v22  ;;  %v713_v23 = vld [vmem:[%s13962_s28 + $0x45c0] sm:$0xff] }
 0x12d   : >> { %v715_v24 = vld [vmem:[%s13962_s28 + $0x4600] sm:$0xff]  ;;  %714 = vst [vmem:[%s13958_s27 + $0x1170] sm:$0xff] %v713_v23 }
 0x12e   : >> { %v717_v25 = vld [vmem:[%s13962_s28 + $0x4640] sm:$0xff]  ;;  %716 = vst [vmem:[%s13958_s27 + $0x1180] sm:$0xff] %v715_v24 }
 0x12f   : >> { %718 = vst [vmem:[%s13958_s27 + $0x1190] sm:$0xff] %v717_v25  ;;  %v719_v26 = vld [vmem:[%s13962_s28 + $0x4680] sm:$0xff] }
 0x130   : >> { %v721_v27 = vld [vmem:[%s13962_s28 + $0x46c0] sm:$0xff]  ;;  %720 = vst [vmem:[%s13958_s27 + $0x11a0] sm:$0xff] %v719_v26 }
 0x131   : >> { %v723_v28 = vld [vmem:[%s13962_s28 + $0x4700] sm:$0xff]  ;;  %722 = vst [vmem:[%s13958_s27 + $0x11b0] sm:$0xff] %v721_v27 }
 0x132   : >> { %724 = vst [vmem:[%s13958_s27 + $0x11c0] sm:$0xff] %v723_v28  ;;  %v725_v29 = vld [vmem:[%s13962_s28 + $0x4740] sm:$0xff] }
 0x133   : >> { %v727_v30 = vld [vmem:[%s13962_s28 + $0x4780] sm:$0xff]  ;;  %726 = vst [vmem:[%s13958_s27 + $0x11d0] sm:$0xff] %v725_v29 }
 0x134   : >> { %v729_v31 = vld [vmem:[%s13962_s28 + $0x47c0] sm:$0xff]  ;;  %728 = vst [vmem:[%s13958_s27 + $0x11e0] sm:$0xff] %v727_v30 }
 0x135   : >> { %730 = vst [vmem:[%s13958_s27 + $0x11f0] sm:$0xff] %v729_v31  ;;  %v731_v32 = vld [vmem:[%s13962_s28 + $0x4800] sm:$0xff] }
 0x136   : >> { %v733_v33 = vld [vmem:[%s13962_s28 + $0x4840] sm:$0xff]  ;;  %732 = vst [vmem:[%s13958_s27 + $0x1200] sm:$0xff] %v731_v32 }
 0x137   : >> { %v735_v34 = vld [vmem:[%s13962_s28 + $0x4880] sm:$0xff]  ;;  %734 = vst [vmem:[%s13958_s27 + $0x1210] sm:$0xff] %v733_v33 }
 0x138   : >> { %736 = vst [vmem:[%s13958_s27 + $0x1220] sm:$0xff] %v735_v34  ;;  %v737_v35 = vld [vmem:[%s13962_s28 + $0x48c0] sm:$0xff] }
 0x139   : >> { %v739_v36 = vld [vmem:[%s13962_s28 + $0x4900] sm:$0xff]  ;;  %738 = vst [vmem:[%s13958_s27 + $0x1230] sm:$0xff] %v737_v35 }
 0x13a   : >> { %v741_v37 = vld [vmem:[%s13962_s28 + $0x4940] sm:$0xff]  ;;  %740 = vst [vmem:[%s13958_s27 + $0x1240] sm:$0xff] %v739_v36 }
 0x13b   : >> { %742 = vst [vmem:[%s13958_s27 + $0x1250] sm:$0xff] %v741_v37  ;;  %v743_v38 = vld [vmem:[%s13962_s28 + $0x4980] sm:$0xff] }
 0x13c   : >> { %v745_v39 = vld [vmem:[%s13962_s28 + $0x49c0] sm:$0xff]  ;;  %744 = vst [vmem:[%s13958_s27 + $0x1260] sm:$0xff] %v743_v38 }
 0x13d   : >> { %v747_v40 = vld [vmem:[%s13962_s28 + $0x4a00] sm:$0xff]  ;;  %746 = vst [vmem:[%s13958_s27 + $0x1270] sm:$0xff] %v745_v39 }
 0x13e   : >> { %748 = vst [vmem:[%s13958_s27 + $0x1280] sm:$0xff] %v747_v40  ;;  %v749_v41 = vld [vmem:[%s13962_s28 + $0x4a40] sm:$0xff] }
 0x13f   : >> { %v751_v42 = vld [vmem:[%s13962_s28 + $0x4a80] sm:$0xff]  ;;  %750 = vst [vmem:[%s13958_s27 + $0x1290] sm:$0xff] %v749_v41 }
 0x140   : >> { %v753_v43 = vld [vmem:[%s13962_s28 + $0x4ac0] sm:$0xff]  ;;  %752 = vst [vmem:[%s13958_s27 + $0x12a0] sm:$0xff] %v751_v42 }
 0x141   : >> { %754 = vst [vmem:[%s13958_s27 + $0x12b0] sm:$0xff] %v753_v43  ;;  %v755_v44 = vld [vmem:[%s13962_s28 + $0x4b00] sm:$0xff] }
 0x142   : >> { %v757_v45 = vld [vmem:[%s13962_s28 + $0x4b40] sm:$0xff]  ;;  %756 = vst [vmem:[%s13958_s27 + $0x12c0] sm:$0xff] %v755_v44 }
 0x143   : >> { %v759_v46 = vld [vmem:[%s13962_s28 + $0x4b80] sm:$0xff]  ;;  %758 = vst [vmem:[%s13958_s27 + $0x12d0] sm:$0xff] %v757_v45 }
 0x144   : >> { %760 = vst [vmem:[%s13958_s27 + $0x12e0] sm:$0xff] %v759_v46  ;;  %v761_v47 = vld [vmem:[%s13962_s28 + $0x4bc0] sm:$0xff] }
 0x145   : >> { %v763_v48 = vld [vmem:[%s13962_s28 + $0x4c00] sm:$0xff]  ;;  %762 = vst [vmem:[%s13958_s27 + $0x12f0] sm:$0xff] %v761_v47 }
 0x146   : >> { %v765_v49 = vld [vmem:[%s13962_s28 + $0x4c40] sm:$0xff]  ;;  %764 = vst [vmem:[%s13958_s27 + $0x1300] sm:$0xff] %v763_v48 }
 0x147   : >> { %766 = vst [vmem:[%s13958_s27 + $0x1310] sm:$0xff] %v765_v49  ;;  %v767_v50 = vld [vmem:[%s13962_s28 + $0x4c80] sm:$0xff] }
 0x148   : >> { %v769_v51 = vld [vmem:[%s13962_s28 + $0x4cc0] sm:$0xff]  ;;  %768 = vst [vmem:[%s13958_s27 + $0x1320] sm:$0xff] %v767_v50 }
 0x149   : >> { %v771_v52 = vld [vmem:[%s13962_s28 + $0x4d00] sm:$0xff]  ;;  %770 = vst [vmem:[%s13958_s27 + $0x1330] sm:$0xff] %v769_v51 }
 0x14a   : >> { %772 = vst [vmem:[%s13958_s27 + $0x1340] sm:$0xff] %v771_v52  ;;  %v773_v53 = vld [vmem:[%s13962_s28 + $0x4d40] sm:$0xff] }
 0x14b   : >> { %v775_v54 = vld [vmem:[%s13962_s28 + $0x4d80] sm:$0xff]  ;;  %774 = vst [vmem:[%s13958_s27 + $0x1350] sm:$0xff] %v773_v53 }
 0x14c   : >> { %v777_v55 = vld [vmem:[%s13962_s28 + $0x4dc0] sm:$0xff]  ;;  %776 = vst [vmem:[%s13958_s27 + $0x1360] sm:$0xff] %v775_v54 }
 0x14d   : >> { %778 = vst [vmem:[%s13958_s27 + $0x1370] sm:$0xff] %v777_v55  ;;  %v779_v56 = vld [vmem:[%s13962_s28 + $0x4e00] sm:$0xff] }
 0x14e   : >> { %v781_v57 = vld [vmem:[%s13962_s28 + $0x4e40] sm:$0xff]  ;;  %780 = vst [vmem:[%s13958_s27 + $0x1380] sm:$0xff] %v779_v56 }
 0x14f   : >> { %v783_v58 = vld [vmem:[%s13962_s28 + $0x4e80] sm:$0xff]  ;;  %782 = vst [vmem:[%s13958_s27 + $0x1390] sm:$0xff] %v781_v57 }
 0x150   : >> { %784 = vst [vmem:[%s13958_s27 + $0x13a0] sm:$0xff] %v783_v58  ;;  %v785_v59 = vld [vmem:[%s13962_s28 + $0x4ec0] sm:$0xff] }
 0x151   : >> { %v787_v60 = vld [vmem:[%s13962_s28 + $0x4f00] sm:$0xff]  ;;  %786 = vst [vmem:[%s13958_s27 + $0x13b0] sm:$0xff] %v785_v59 }
 0x152   : >> { %v789_v61 = vld [vmem:[%s13962_s28 + $0x4f40] sm:$0xff]  ;;  %788 = vst [vmem:[%s13958_s27 + $0x13c0] sm:$0xff] %v787_v60 }
 0x153   : >> { %790 = vst [vmem:[%s13958_s27 + $0x13d0] sm:$0xff] %v789_v61  ;;  %v791_v62 = vld [vmem:[%s13962_s28 + $0x4f80] sm:$0xff] }
 0x154   : >> { %v793_v63 = vld [vmem:[%s13962_s28 + $0x4fc0] sm:$0xff]  ;;  %792 = vst [vmem:[%s13958_s27 + $0x13e0] sm:$0xff] %v791_v62 }
 0x155   : >> { %v795_v0 = vld [vmem:[%s13962_s28 + $0x5000] sm:$0xff]  ;;  %794 = vst [vmem:[%s13958_s27 + $0x13f0] sm:$0xff] %v793_v63 }
 0x156   : >> { %796 = vst [vmem:[%s13958_s27 + $0x1400] sm:$0xff] %v795_v0  ;;  %v797_v1 = vld [vmem:[%s13962_s28 + $0x5040] sm:$0xff] }
 0x157   : >> { %v799_v2 = vld [vmem:[%s13962_s28 + $0x5080] sm:$0xff]  ;;  %798 = vst [vmem:[%s13958_s27 + $0x1410] sm:$0xff] %v797_v1 }
 0x158   : >> { %v801_v3 = vld [vmem:[%s13962_s28 + $0x50c0] sm:$0xff]  ;;  %800 = vst [vmem:[%s13958_s27 + $0x1420] sm:$0xff] %v799_v2 }
 0x159   : >> { %802 = vst [vmem:[%s13958_s27 + $0x1430] sm:$0xff] %v801_v3  ;;  %v803_v4 = vld [vmem:[%s13962_s28 + $0x5100] sm:$0xff] }
 0x15a   : >> { %v805_v5 = vld [vmem:[%s13962_s28 + $0x5140] sm:$0xff]  ;;  %804 = vst [vmem:[%s13958_s27 + $0x1440] sm:$0xff] %v803_v4 }
 0x15b   : >> { %v807_v6 = vld [vmem:[%s13962_s28 + $0x5180] sm:$0xff]  ;;  %806 = vst [vmem:[%s13958_s27 + $0x1450] sm:$0xff] %v805_v5 }
 0x15c   : >> { %808 = vst [vmem:[%s13958_s27 + $0x1460] sm:$0xff] %v807_v6  ;;  %v809_v7 = vld [vmem:[%s13962_s28 + $0x51c0] sm:$0xff] }
 0x15d   : >> { %v811_v8 = vld [vmem:[%s13962_s28 + $0x5200] sm:$0xff]  ;;  %810 = vst [vmem:[%s13958_s27 + $0x1470] sm:$0xff] %v809_v7 }
 0x15e   : >> { %v813_v9 = vld [vmem:[%s13962_s28 + $0x5240] sm:$0xff]  ;;  %812 = vst [vmem:[%s13958_s27 + $0x1480] sm:$0xff] %v811_v8 }
 0x15f   : >> { %814 = vst [vmem:[%s13958_s27 + $0x1490] sm:$0xff] %v813_v9  ;;  %v815_v10 = vld [vmem:[%s13962_s28 + $0x5280] sm:$0xff] }
 0x160   : >> { %v817_v11 = vld [vmem:[%s13962_s28 + $0x52c0] sm:$0xff]  ;;  %816 = vst [vmem:[%s13958_s27 + $0x14a0] sm:$0xff] %v815_v10 }
 0x161   : >> { %v819_v12 = vld [vmem:[%s13962_s28 + $0x5300] sm:$0xff]  ;;  %818 = vst [vmem:[%s13958_s27 + $0x14b0] sm:$0xff] %v817_v11 }
 0x162   : >> { %820 = vst [vmem:[%s13958_s27 + $0x14c0] sm:$0xff] %v819_v12  ;;  %v821_v13 = vld [vmem:[%s13962_s28 + $0x5340] sm:$0xff] }
 0x163   : >> { %v823_v14 = vld [vmem:[%s13962_s28 + $0x5380] sm:$0xff]  ;;  %822 = vst [vmem:[%s13958_s27 + $0x14d0] sm:$0xff] %v821_v13 }
 0x164   : >> { %v825_v15 = vld [vmem:[%s13962_s28 + $0x53c0] sm:$0xff]  ;;  %824 = vst [vmem:[%s13958_s27 + $0x14e0] sm:$0xff] %v823_v14 }
 0x165   : >> { %826 = vst [vmem:[%s13958_s27 + $0x14f0] sm:$0xff] %v825_v15  ;;  %v827_v16 = vld [vmem:[%s13962_s28 + $0x5400] sm:$0xff] }
 0x166   : >> { %v829_v17 = vld [vmem:[%s13962_s28 + $0x5440] sm:$0xff]  ;;  %828 = vst [vmem:[%s13958_s27 + $0x1500] sm:$0xff] %v827_v16 }
 0x167   : >> { %v831_v18 = vld [vmem:[%s13962_s28 + $0x5480] sm:$0xff]  ;;  %830 = vst [vmem:[%s13958_s27 + $0x1510] sm:$0xff] %v829_v17 }
 0x168   : >> { %832 = vst [vmem:[%s13958_s27 + $0x1520] sm:$0xff] %v831_v18  ;;  %v833_v19 = vld [vmem:[%s13962_s28 + $0x54c0] sm:$0xff] }
 0x169   : >> { %v835_v20 = vld [vmem:[%s13962_s28 + $0x5500] sm:$0xff]  ;;  %834 = vst [vmem:[%s13958_s27 + $0x1530] sm:$0xff] %v833_v19 }
 0x16a   : >> { %v837_v21 = vld [vmem:[%s13962_s28 + $0x5540] sm:$0xff]  ;;  %836 = vst [vmem:[%s13958_s27 + $0x1540] sm:$0xff] %v835_v20 }
 0x16b   : >> { %838 = vst [vmem:[%s13958_s27 + $0x1550] sm:$0xff] %v837_v21  ;;  %v839_v22 = vld [vmem:[%s13962_s28 + $0x5580] sm:$0xff] }
 0x16c   : >> { %v841_v23 = vld [vmem:[%s13962_s28 + $0x55c0] sm:$0xff]  ;;  %840 = vst [vmem:[%s13958_s27 + $0x1560] sm:$0xff] %v839_v22 }
 0x16d   : >> { %v843_v24 = vld [vmem:[%s13962_s28 + $0x5600] sm:$0xff]  ;;  %842 = vst [vmem:[%s13958_s27 + $0x1570] sm:$0xff] %v841_v23 }
 0x16e   : >> { %844 = vst [vmem:[%s13958_s27 + $0x1580] sm:$0xff] %v843_v24  ;;  %v845_v25 = vld [vmem:[%s13962_s28 + $0x5640] sm:$0xff] }
 0x16f   : >> { %v847_v26 = vld [vmem:[%s13962_s28 + $0x5680] sm:$0xff]  ;;  %846 = vst [vmem:[%s13958_s27 + $0x1590] sm:$0xff] %v845_v25 }
 0x170   : >> { %v849_v27 = vld [vmem:[%s13962_s28 + $0x56c0] sm:$0xff]  ;;  %848 = vst [vmem:[%s13958_s27 + $0x15a0] sm:$0xff] %v847_v26 }
 0x171   : >> { %850 = vst [vmem:[%s13958_s27 + $0x15b0] sm:$0xff] %v849_v27  ;;  %v851_v28 = vld [vmem:[%s13962_s28 + $0x5700] sm:$0xff] }
 0x172   : >> { %v853_v29 = vld [vmem:[%s13962_s28 + $0x5740] sm:$0xff]  ;;  %852 = vst [vmem:[%s13958_s27 + $0x15c0] sm:$0xff] %v851_v28 }
 0x173   : >> { %v855_v30 = vld [vmem:[%s13962_s28 + $0x5780] sm:$0xff]  ;;  %854 = vst [vmem:[%s13958_s27 + $0x15d0] sm:$0xff] %v853_v29 }
 0x174   : >> { %856 = vst [vmem:[%s13958_s27 + $0x15e0] sm:$0xff] %v855_v30  ;;  %v857_v31 = vld [vmem:[%s13962_s28 + $0x57c0] sm:$0xff] }
 0x175   : >> { %v859_v32 = vld [vmem:[%s13962_s28 + $0x5800] sm:$0xff]  ;;  %858 = vst [vmem:[%s13958_s27 + $0x15f0] sm:$0xff] %v857_v31 }
 0x176   : >> { %v861_v33 = vld [vmem:[%s13962_s28 + $0x5840] sm:$0xff]  ;;  %860 = vst [vmem:[%s13958_s27 + $0x1600] sm:$0xff] %v859_v32 }
 0x177   : >> { %862 = vst [vmem:[%s13958_s27 + $0x1610] sm:$0xff] %v861_v33  ;;  %v863_v34 = vld [vmem:[%s13962_s28 + $0x5880] sm:$0xff] }
 0x178   : >> { %v865_v35 = vld [vmem:[%s13962_s28 + $0x58c0] sm:$0xff]  ;;  %864 = vst [vmem:[%s13958_s27 + $0x1620] sm:$0xff] %v863_v34 }
 0x179   : >> { %v867_v36 = vld [vmem:[%s13962_s28 + $0x5900] sm:$0xff]  ;;  %866 = vst [vmem:[%s13958_s27 + $0x1630] sm:$0xff] %v865_v35 }
 0x17a   : >> { %868 = vst [vmem:[%s13958_s27 + $0x1640] sm:$0xff] %v867_v36  ;;  %v869_v37 = vld [vmem:[%s13962_s28 + $0x5940] sm:$0xff] }
 0x17b   : >> { %v871_v38 = vld [vmem:[%s13962_s28 + $0x5980] sm:$0xff]  ;;  %870 = vst [vmem:[%s13958_s27 + $0x1650] sm:$0xff] %v869_v37 }
 0x17c   : >> { %v873_v39 = vld [vmem:[%s13962_s28 + $0x59c0] sm:$0xff]  ;;  %872 = vst [vmem:[%s13958_s27 + $0x1660] sm:$0xff] %v871_v38 }
 0x17d   : >> { %874 = vst [vmem:[%s13958_s27 + $0x1670] sm:$0xff] %v873_v39  ;;  %v875_v40 = vld [vmem:[%s13962_s28 + $0x5a00] sm:$0xff] }
 0x17e   : >> { %v877_v41 = vld [vmem:[%s13962_s28 + $0x5a40] sm:$0xff]  ;;  %876 = vst [vmem:[%s13958_s27 + $0x1680] sm:$0xff] %v875_v40 }
 0x17f   : >> { %v879_v42 = vld [vmem:[%s13962_s28 + $0x5a80] sm:$0xff]  ;;  %878 = vst [vmem:[%s13958_s27 + $0x1690] sm:$0xff] %v877_v41 }
 0x180   : >> { %880 = vst [vmem:[%s13958_s27 + $0x16a0] sm:$0xff] %v879_v42  ;;  %v881_v43 = vld [vmem:[%s13962_s28 + $0x5ac0] sm:$0xff] }
 0x181   : >> { %v883_v44 = vld [vmem:[%s13962_s28 + $0x5b00] sm:$0xff]  ;;  %882 = vst [vmem:[%s13958_s27 + $0x16b0] sm:$0xff] %v881_v43 }
 0x182   : >> { %v885_v45 = vld [vmem:[%s13962_s28 + $0x5b40] sm:$0xff]  ;;  %884 = vst [vmem:[%s13958_s27 + $0x16c0] sm:$0xff] %v883_v44 }
 0x183   : >> { %886 = vst [vmem:[%s13958_s27 + $0x16d0] sm:$0xff] %v885_v45  ;;  %v887_v46 = vld [vmem:[%s13962_s28 + $0x5b80] sm:$0xff] }
 0x184   : >> { %v889_v47 = vld [vmem:[%s13962_s28 + $0x5bc0] sm:$0xff]  ;;  %888 = vst [vmem:[%s13958_s27 + $0x16e0] sm:$0xff] %v887_v46 }
 0x185   : >> { %v891_v48 = vld [vmem:[%s13962_s28 + $0x5c00] sm:$0xff]  ;;  %890 = vst [vmem:[%s13958_s27 + $0x16f0] sm:$0xff] %v889_v47 }
 0x186   : >> { %892 = vst [vmem:[%s13958_s27 + $0x1700] sm:$0xff] %v891_v48  ;;  %v893_v49 = vld [vmem:[%s13962_s28 + $0x5c40] sm:$0xff] }
 0x187   : >> { %v895_v50 = vld [vmem:[%s13962_s28 + $0x5c80] sm:$0xff]  ;;  %894 = vst [vmem:[%s13958_s27 + $0x1710] sm:$0xff] %v893_v49 }
 0x188   : >> { %v897_v51 = vld [vmem:[%s13962_s28 + $0x5cc0] sm:$0xff]  ;;  %896 = vst [vmem:[%s13958_s27 + $0x1720] sm:$0xff] %v895_v50 }
 0x189   : >> { %898 = vst [vmem:[%s13958_s27 + $0x1730] sm:$0xff] %v897_v51  ;;  %v899_v52 = vld [vmem:[%s13962_s28 + $0x5d00] sm:$0xff] }
 0x18a   : >> { %v901_v53 = vld [vmem:[%s13962_s28 + $0x5d40] sm:$0xff]  ;;  %900 = vst [vmem:[%s13958_s27 + $0x1740] sm:$0xff] %v899_v52 }
 0x18b   : >> { %v903_v54 = vld [vmem:[%s13962_s28 + $0x5d80] sm:$0xff]  ;;  %902 = vst [vmem:[%s13958_s27 + $0x1750] sm:$0xff] %v901_v53 }
 0x18c   : >> { %904 = vst [vmem:[%s13958_s27 + $0x1760] sm:$0xff] %v903_v54  ;;  %v905_v55 = vld [vmem:[%s13962_s28 + $0x5dc0] sm:$0xff] }
 0x18d   : >> { %v907_v56 = vld [vmem:[%s13962_s28 + $0x5e00] sm:$0xff]  ;;  %906 = vst [vmem:[%s13958_s27 + $0x1770] sm:$0xff] %v905_v55 }
 0x18e   : >> { %v909_v57 = vld [vmem:[%s13962_s28 + $0x5e40] sm:$0xff]  ;;  %908 = vst [vmem:[%s13958_s27 + $0x1780] sm:$0xff] %v907_v56 }
 0x18f   : >> { %910 = vst [vmem:[%s13958_s27 + $0x1790] sm:$0xff] %v909_v57  ;;  %v911_v58 = vld [vmem:[%s13962_s28 + $0x5e80] sm:$0xff] }
 0x190   : >> { %v913_v59 = vld [vmem:[%s13962_s28 + $0x5ec0] sm:$0xff]  ;;  %912 = vst [vmem:[%s13958_s27 + $0x17a0] sm:$0xff] %v911_v58 }
 0x191   : >> { %v915_v60 = vld [vmem:[%s13962_s28 + $0x5f00] sm:$0xff]  ;;  %914 = vst [vmem:[%s13958_s27 + $0x17b0] sm:$0xff] %v913_v59 }
 0x192   : >> { %916 = vst [vmem:[%s13958_s27 + $0x17c0] sm:$0xff] %v915_v60  ;;  %v917_v61 = vld [vmem:[%s13962_s28 + $0x5f40] sm:$0xff] }
 0x193   : >> { %v919_v62 = vld [vmem:[%s13962_s28 + $0x5f80] sm:$0xff]  ;;  %918 = vst [vmem:[%s13958_s27 + $0x17d0] sm:$0xff] %v917_v61 }
 0x194   : >> { %v921_v63 = vld [vmem:[%s13962_s28 + $0x5fc0] sm:$0xff]  ;;  %920 = vst [vmem:[%s13958_s27 + $0x17e0] sm:$0xff] %v919_v62 }
 0x195   : >> { %922 = vst [vmem:[%s13958_s27 + $0x17f0] sm:$0xff] %v921_v63  ;;  %v923_v0 = vld [vmem:[%s13962_s28 + $0x6000] sm:$0xff] }
 0x196   : >> { %v925_v1 = vld [vmem:[%s13962_s28 + $0x6040] sm:$0xff]  ;;  %924 = vst [vmem:[%s13958_s27 + $0x1800] sm:$0xff] %v923_v0 }
 0x197   : >> { %v927_v2 = vld [vmem:[%s13962_s28 + $0x6080] sm:$0xff]  ;;  %926 = vst [vmem:[%s13958_s27 + $0x1810] sm:$0xff] %v925_v1 }
 0x198   : >> { %928 = vst [vmem:[%s13958_s27 + $0x1820] sm:$0xff] %v927_v2  ;;  %v929_v3 = vld [vmem:[%s13962_s28 + $0x60c0] sm:$0xff] }
 0x199   : >> { %v931_v4 = vld [vmem:[%s13962_s28 + $0x6100] sm:$0xff]  ;;  %930 = vst [vmem:[%s13958_s27 + $0x1830] sm:$0xff] %v929_v3 }
 0x19a   : >> { %v933_v5 = vld [vmem:[%s13962_s28 + $0x6140] sm:$0xff]  ;;  %932 = vst [vmem:[%s13958_s27 + $0x1840] sm:$0xff] %v931_v4 }
 0x19b   : >> { %934 = vst [vmem:[%s13958_s27 + $0x1850] sm:$0xff] %v933_v5  ;;  %v935_v6 = vld [vmem:[%s13962_s28 + $0x6180] sm:$0xff] }
 0x19c   : >> { %v937_v7 = vld [vmem:[%s13962_s28 + $0x61c0] sm:$0xff]  ;;  %936 = vst [vmem:[%s13958_s27 + $0x1860] sm:$0xff] %v935_v6 }
 0x19d   : >> { %v939_v8 = vld [vmem:[%s13962_s28 + $0x6200] sm:$0xff]  ;;  %938 = vst [vmem:[%s13958_s27 + $0x1870] sm:$0xff] %v937_v7 }
 0x19e   : >> { %940 = vst [vmem:[%s13958_s27 + $0x1880] sm:$0xff] %v939_v8  ;;  %v941_v9 = vld [vmem:[%s13962_s28 + $0x6240] sm:$0xff] }
 0x19f   : >> { %v943_v10 = vld [vmem:[%s13962_s28 + $0x6280] sm:$0xff]  ;;  %942 = vst [vmem:[%s13958_s27 + $0x1890] sm:$0xff] %v941_v9 }
 0x1a0   : >> { %v945_v11 = vld [vmem:[%s13962_s28 + $0x62c0] sm:$0xff]  ;;  %944 = vst [vmem:[%s13958_s27 + $0x18a0] sm:$0xff] %v943_v10 }
 0x1a1   : >> { %946 = vst [vmem:[%s13958_s27 + $0x18b0] sm:$0xff] %v945_v11  ;;  %v947_v12 = vld [vmem:[%s13962_s28 + $0x6300] sm:$0xff] }
 0x1a2   : >> { %v949_v13 = vld [vmem:[%s13962_s28 + $0x6340] sm:$0xff]  ;;  %948 = vst [vmem:[%s13958_s27 + $0x18c0] sm:$0xff] %v947_v12 }
 0x1a3   : >> { %v951_v14 = vld [vmem:[%s13962_s28 + $0x6380] sm:$0xff]  ;;  %950 = vst [vmem:[%s13958_s27 + $0x18d0] sm:$0xff] %v949_v13 }
 0x1a4   : >> { %952 = vst [vmem:[%s13958_s27 + $0x18e0] sm:$0xff] %v951_v14  ;;  %v953_v15 = vld [vmem:[%s13962_s28 + $0x63c0] sm:$0xff] }
 0x1a5   : >> { %v955_v16 = vld [vmem:[%s13962_s28 + $0x6400] sm:$0xff]  ;;  %954 = vst [vmem:[%s13958_s27 + $0x18f0] sm:$0xff] %v953_v15 }
 0x1a6   : >> { %v957_v17 = vld [vmem:[%s13962_s28 + $0x6440] sm:$0xff]  ;;  %956 = vst [vmem:[%s13958_s27 + $0x1900] sm:$0xff] %v955_v16 }
 0x1a7   : >> { %958 = vst [vmem:[%s13958_s27 + $0x1910] sm:$0xff] %v957_v17  ;;  %v959_v18 = vld [vmem:[%s13962_s28 + $0x6480] sm:$0xff] }
 0x1a8   : >> { %v961_v19 = vld [vmem:[%s13962_s28 + $0x64c0] sm:$0xff]  ;;  %960 = vst [vmem:[%s13958_s27 + $0x1920] sm:$0xff] %v959_v18 }
 0x1a9   : >> { %v963_v20 = vld [vmem:[%s13962_s28 + $0x6500] sm:$0xff]  ;;  %962 = vst [vmem:[%s13958_s27 + $0x1930] sm:$0xff] %v961_v19 }
 0x1aa   : >> { %964 = vst [vmem:[%s13958_s27 + $0x1940] sm:$0xff] %v963_v20  ;;  %v965_v21 = vld [vmem:[%s13962_s28 + $0x6540] sm:$0xff] }
 0x1ab   : >> { %v967_v22 = vld [vmem:[%s13962_s28 + $0x6580] sm:$0xff]  ;;  %966 = vst [vmem:[%s13958_s27 + $0x1950] sm:$0xff] %v965_v21 }
 0x1ac   : >> { %v969_v23 = vld [vmem:[%s13962_s28 + $0x65c0] sm:$0xff]  ;;  %968 = vst [vmem:[%s13958_s27 + $0x1960] sm:$0xff] %v967_v22 }
 0x1ad   : >> { %970 = vst [vmem:[%s13958_s27 + $0x1970] sm:$0xff] %v969_v23  ;;  %v971_v24 = vld [vmem:[%s13962_s28 + $0x6600] sm:$0xff] }
 0x1ae   : >> { %v973_v25 = vld [vmem:[%s13962_s28 + $0x6640] sm:$0xff]  ;;  %972 = vst [vmem:[%s13958_s27 + $0x1980] sm:$0xff] %v971_v24 }
 0x1af   : >> { %v975_v26 = vld [vmem:[%s13962_s28 + $0x6680] sm:$0xff]  ;;  %974 = vst [vmem:[%s13958_s27 + $0x1990] sm:$0xff] %v973_v25 }
 0x1b0   : >> { %976 = vst [vmem:[%s13958_s27 + $0x19a0] sm:$0xff] %v975_v26  ;;  %v977_v27 = vld [vmem:[%s13962_s28 + $0x66c0] sm:$0xff] }
 0x1b1   : >> { %v979_v28 = vld [vmem:[%s13962_s28 + $0x6700] sm:$0xff]  ;;  %978 = vst [vmem:[%s13958_s27 + $0x19b0] sm:$0xff] %v977_v27 }
 0x1b2   : >> { %v981_v29 = vld [vmem:[%s13962_s28 + $0x6740] sm:$0xff]  ;;  %980 = vst [vmem:[%s13958_s27 + $0x19c0] sm:$0xff] %v979_v28 }
 0x1b3   : >> { %982 = vst [vmem:[%s13958_s27 + $0x19d0] sm:$0xff] %v981_v29  ;;  %v983_v30 = vld [vmem:[%s13962_s28 + $0x6780] sm:$0xff] }
 0x1b4   : >> { %v985_v31 = vld [vmem:[%s13962_s28 + $0x67c0] sm:$0xff]  ;;  %984 = vst [vmem:[%s13958_s27 + $0x19e0] sm:$0xff] %v983_v30 }
 0x1b5   : >> { %v987_v32 = vld [vmem:[%s13962_s28 + $0x6800] sm:$0xff]  ;;  %986 = vst [vmem:[%s13958_s27 + $0x19f0] sm:$0xff] %v985_v31 }
 0x1b6   : >> { %988 = vst [vmem:[%s13958_s27 + $0x1a00] sm:$0xff] %v987_v32  ;;  %v989_v33 = vld [vmem:[%s13962_s28 + $0x6840] sm:$0xff] }
 0x1b7   : >> { %v991_v34 = vld [vmem:[%s13962_s28 + $0x6880] sm:$0xff]  ;;  %990 = vst [vmem:[%s13958_s27 + $0x1a10] sm:$0xff] %v989_v33 }
 0x1b8   : >> { %v993_v35 = vld [vmem:[%s13962_s28 + $0x68c0] sm:$0xff]  ;;  %992 = vst [vmem:[%s13958_s27 + $0x1a20] sm:$0xff] %v991_v34 }
 0x1b9   : >> { %994 = vst [vmem:[%s13958_s27 + $0x1a30] sm:$0xff] %v993_v35  ;;  %v995_v36 = vld [vmem:[%s13962_s28 + $0x6900] sm:$0xff] }
 0x1ba   : >> { %v997_v37 = vld [vmem:[%s13962_s28 + $0x6940] sm:$0xff]  ;;  %996 = vst [vmem:[%s13958_s27 + $0x1a40] sm:$0xff] %v995_v36 }
 0x1bb   : >> { %v999_v38 = vld [vmem:[%s13962_s28 + $0x6980] sm:$0xff]  ;;  %998 = vst [vmem:[%s13958_s27 + $0x1a50] sm:$0xff] %v997_v37 }
 0x1bc   : >> { %1000 = vst [vmem:[%s13958_s27 + $0x1a60] sm:$0xff] %v999_v38  ;;  %v1001_v39 = vld [vmem:[%s13962_s28 + $0x69c0] sm:$0xff] }
 0x1bd   : >> { %v1003_v40 = vld [vmem:[%s13962_s28 + $0x6a00] sm:$0xff]  ;;  %1002 = vst [vmem:[%s13958_s27 + $0x1a70] sm:$0xff] %v1001_v39 }
 0x1be   : >> { %v1005_v41 = vld [vmem:[%s13962_s28 + $0x6a40] sm:$0xff]  ;;  %1004 = vst [vmem:[%s13958_s27 + $0x1a80] sm:$0xff] %v1003_v40 }
 0x1bf   : >> { %1006 = vst [vmem:[%s13958_s27 + $0x1a90] sm:$0xff] %v1005_v41  ;;  %v1007_v42 = vld [vmem:[%s13962_s28 + $0x6a80] sm:$0xff] }
 0x1c0   : >> { %v1009_v43 = vld [vmem:[%s13962_s28 + $0x6ac0] sm:$0xff]  ;;  %1008 = vst [vmem:[%s13958_s27 + $0x1aa0] sm:$0xff] %v1007_v42 }
 0x1c1   : >> { %v1011_v44 = vld [vmem:[%s13962_s28 + $0x6b00] sm:$0xff]  ;;  %1010 = vst [vmem:[%s13958_s27 + $0x1ab0] sm:$0xff] %v1009_v43 }
 0x1c2   : >> { %1012 = vst [vmem:[%s13958_s27 + $0x1ac0] sm:$0xff] %v1011_v44  ;;  %v1013_v45 = vld [vmem:[%s13962_s28 + $0x6b40] sm:$0xff] }
 0x1c3   : >> { %v1015_v46 = vld [vmem:[%s13962_s28 + $0x6b80] sm:$0xff]  ;;  %1014 = vst [vmem:[%s13958_s27 + $0x1ad0] sm:$0xff] %v1013_v45 }
 0x1c4   : >> { %v1017_v47 = vld [vmem:[%s13962_s28 + $0x6bc0] sm:$0xff]  ;;  %1016 = vst [vmem:[%s13958_s27 + $0x1ae0] sm:$0xff] %v1015_v46 }
 0x1c5   : >> { %1018 = vst [vmem:[%s13958_s27 + $0x1af0] sm:$0xff] %v1017_v47  ;;  %v1019_v48 = vld [vmem:[%s13962_s28 + $0x6c00] sm:$0xff] }
 0x1c6   : >> { %v1021_v49 = vld [vmem:[%s13962_s28 + $0x6c40] sm:$0xff]  ;;  %1020 = vst [vmem:[%s13958_s27 + $0x1b00] sm:$0xff] %v1019_v48 }
 0x1c7   : >> { %v1023_v50 = vld [vmem:[%s13962_s28 + $0x6c80] sm:$0xff]  ;;  %1022 = vst [vmem:[%s13958_s27 + $0x1b10] sm:$0xff] %v1021_v49 }
 0x1c8   : >> { %1024 = vst [vmem:[%s13958_s27 + $0x1b20] sm:$0xff] %v1023_v50  ;;  %v1025_v51 = vld [vmem:[%s13962_s28 + $0x6cc0] sm:$0xff] }
 0x1c9   : >> { %v1027_v52 = vld [vmem:[%s13962_s28 + $0x6d00] sm:$0xff]  ;;  %1026 = vst [vmem:[%s13958_s27 + $0x1b30] sm:$0xff] %v1025_v51 }
 0x1ca   : >> { %v1029_v53 = vld [vmem:[%s13962_s28 + $0x6d40] sm:$0xff]  ;;  %1028 = vst [vmem:[%s13958_s27 + $0x1b40] sm:$0xff] %v1027_v52 }
 0x1cb   : >> { %1030 = vst [vmem:[%s13958_s27 + $0x1b50] sm:$0xff] %v1029_v53  ;;  %v1031_v54 = vld [vmem:[%s13962_s28 + $0x6d80] sm:$0xff] }
 0x1cc   : >> { %v1033_v55 = vld [vmem:[%s13962_s28 + $0x6dc0] sm:$0xff]  ;;  %1032 = vst [vmem:[%s13958_s27 + $0x1b60] sm:$0xff] %v1031_v54 }
 0x1cd   : >> { %v1035_v56 = vld [vmem:[%s13962_s28 + $0x6e00] sm:$0xff]  ;;  %1034 = vst [vmem:[%s13958_s27 + $0x1b70] sm:$0xff] %v1033_v55 }
 0x1ce   : >> { %1036 = vst [vmem:[%s13958_s27 + $0x1b80] sm:$0xff] %v1035_v56  ;;  %v1037_v57 = vld [vmem:[%s13962_s28 + $0x6e40] sm:$0xff] }
 0x1cf   : >> { %v1039_v58 = vld [vmem:[%s13962_s28 + $0x6e80] sm:$0xff]  ;;  %1038 = vst [vmem:[%s13958_s27 + $0x1b90] sm:$0xff] %v1037_v57 }
 0x1d0   : >> { %v1041_v59 = vld [vmem:[%s13962_s28 + $0x6ec0] sm:$0xff]  ;;  %1040 = vst [vmem:[%s13958_s27 + $0x1ba0] sm:$0xff] %v1039_v58 }
 0x1d1   : >> { %1042 = vst [vmem:[%s13958_s27 + $0x1bb0] sm:$0xff] %v1041_v59  ;;  %v1043_v60 = vld [vmem:[%s13962_s28 + $0x6f00] sm:$0xff] }
 0x1d2   : >> { %v1045_v61 = vld [vmem:[%s13962_s28 + $0x6f40] sm:$0xff]  ;;  %1044 = vst [vmem:[%s13958_s27 + $0x1bc0] sm:$0xff] %v1043_v60 }
 0x1d3   : >> { %v1047_v62 = vld [vmem:[%s13962_s28 + $0x6f80] sm:$0xff]  ;;  %1046 = vst [vmem:[%s13958_s27 + $0x1bd0] sm:$0xff] %v1045_v61 }
 0x1d4   : >> { %1048 = vst [vmem:[%s13958_s27 + $0x1be0] sm:$0xff] %v1047_v62  ;;  %v1049_v63 = vld [vmem:[%s13962_s28 + $0x6fc0] sm:$0xff] }
 0x1d5   : >> { %v1051_v0 = vld [vmem:[%s13962_s28 + $0x7000] sm:$0xff]  ;;  %1050 = vst [vmem:[%s13958_s27 + $0x1bf0] sm:$0xff] %v1049_v63 }
 0x1d6   : >> { %v1053_v1 = vld [vmem:[%s13962_s28 + $0x7040] sm:$0xff]  ;;  %1052 = vst [vmem:[%s13958_s27 + $0x1c00] sm:$0xff] %v1051_v0 }
 0x1d7   : >> { %1054 = vst [vmem:[%s13958_s27 + $0x1c10] sm:$0xff] %v1053_v1  ;;  %v1055_v2 = vld [vmem:[%s13962_s28 + $0x7080] sm:$0xff] }
 0x1d8   : >> { %v1057_v3 = vld [vmem:[%s13962_s28 + $0x70c0] sm:$0xff]  ;;  %1056 = vst [vmem:[%s13958_s27 + $0x1c20] sm:$0xff] %v1055_v2 }
 0x1d9   : >> { %v1059_v4 = vld [vmem:[%s13962_s28 + $0x7100] sm:$0xff]  ;;  %1058 = vst [vmem:[%s13958_s27 + $0x1c30] sm:$0xff] %v1057_v3 }
 0x1da   : >> { %1060 = vst [vmem:[%s13958_s27 + $0x1c40] sm:$0xff] %v1059_v4  ;;  %v1061_v5 = vld [vmem:[%s13962_s28 + $0x7140] sm:$0xff] }
 0x1db   : >> { %v1063_v6 = vld [vmem:[%s13962_s28 + $0x7180] sm:$0xff]  ;;  %1062 = vst [vmem:[%s13958_s27 + $0x1c50] sm:$0xff] %v1061_v5 }
 0x1dc   : >> { %v1065_v7 = vld [vmem:[%s13962_s28 + $0x71c0] sm:$0xff]  ;;  %1064 = vst [vmem:[%s13958_s27 + $0x1c60] sm:$0xff] %v1063_v6 }
 0x1dd   : >> { %1066 = vst [vmem:[%s13958_s27 + $0x1c70] sm:$0xff] %v1065_v7  ;;  %v1067_v8 = vld [vmem:[%s13962_s28 + $0x7200] sm:$0xff] }
 0x1de   : >> { %v1069_v9 = vld [vmem:[%s13962_s28 + $0x7240] sm:$0xff]  ;;  %1068 = vst [vmem:[%s13958_s27 + $0x1c80] sm:$0xff] %v1067_v8 }
 0x1df   : >> { %v1071_v10 = vld [vmem:[%s13962_s28 + $0x7280] sm:$0xff]  ;;  %1070 = vst [vmem:[%s13958_s27 + $0x1c90] sm:$0xff] %v1069_v9 }
 0x1e0   : >> { %1072 = vst [vmem:[%s13958_s27 + $0x1ca0] sm:$0xff] %v1071_v10  ;;  %v1073_v11 = vld [vmem:[%s13962_s28 + $0x72c0] sm:$0xff] }
 0x1e1   : >> { %v1075_v12 = vld [vmem:[%s13962_s28 + $0x7300] sm:$0xff]  ;;  %1074 = vst [vmem:[%s13958_s27 + $0x1cb0] sm:$0xff] %v1073_v11 }
 0x1e2   : >> { %v1077_v13 = vld [vmem:[%s13962_s28 + $0x7340] sm:$0xff]  ;;  %1076 = vst [vmem:[%s13958_s27 + $0x1cc0] sm:$0xff] %v1075_v12 }
 0x1e3   : >> { %1078 = vst [vmem:[%s13958_s27 + $0x1cd0] sm:$0xff] %v1077_v13  ;;  %v1079_v14 = vld [vmem:[%s13962_s28 + $0x7380] sm:$0xff] }
 0x1e4   : >> { %v1081_v15 = vld [vmem:[%s13962_s28 + $0x73c0] sm:$0xff]  ;;  %1080 = vst [vmem:[%s13958_s27 + $0x1ce0] sm:$0xff] %v1079_v14 }
 0x1e5   : >> { %v1083_v16 = vld [vmem:[%s13962_s28 + $0x7400] sm:$0xff]  ;;  %1082 = vst [vmem:[%s13958_s27 + $0x1cf0] sm:$0xff] %v1081_v15 }
 0x1e6   : >> { %1084 = vst [vmem:[%s13958_s27 + $0x1d00] sm:$0xff] %v1083_v16  ;;  %v1085_v17 = vld [vmem:[%s13962_s28 + $0x7440] sm:$0xff] }
 0x1e7   : >> { %v1087_v18 = vld [vmem:[%s13962_s28 + $0x7480] sm:$0xff]  ;;  %1086 = vst [vmem:[%s13958_s27 + $0x1d10] sm:$0xff] %v1085_v17 }
 0x1e8   : >> { %v1089_v19 = vld [vmem:[%s13962_s28 + $0x74c0] sm:$0xff]  ;;  %1088 = vst [vmem:[%s13958_s27 + $0x1d20] sm:$0xff] %v1087_v18 }
 0x1e9   : >> { %1090 = vst [vmem:[%s13958_s27 + $0x1d30] sm:$0xff] %v1089_v19  ;;  %v1091_v20 = vld [vmem:[%s13962_s28 + $0x7500] sm:$0xff] }
 0x1ea   : >> { %v1093_v21 = vld [vmem:[%s13962_s28 + $0x7540] sm:$0xff]  ;;  %1092 = vst [vmem:[%s13958_s27 + $0x1d40] sm:$0xff] %v1091_v20 }
 0x1eb   : >> { %v1095_v22 = vld [vmem:[%s13962_s28 + $0x7580] sm:$0xff]  ;;  %1094 = vst [vmem:[%s13958_s27 + $0x1d50] sm:$0xff] %v1093_v21 }
 0x1ec   : >> { %1096 = vst [vmem:[%s13958_s27 + $0x1d60] sm:$0xff] %v1095_v22  ;;  %v1097_v23 = vld [vmem:[%s13962_s28 + $0x75c0] sm:$0xff] }
 0x1ed   : >> { %v1099_v24 = vld [vmem:[%s13962_s28 + $0x7600] sm:$0xff]  ;;  %1098 = vst [vmem:[%s13958_s27 + $0x1d70] sm:$0xff] %v1097_v23 }
 0x1ee   : >> { %v1101_v25 = vld [vmem:[%s13962_s28 + $0x7640] sm:$0xff]  ;;  %1100 = vst [vmem:[%s13958_s27 + $0x1d80] sm:$0xff] %v1099_v24 }
 0x1ef   : >> { %1102 = vst [vmem:[%s13958_s27 + $0x1d90] sm:$0xff] %v1101_v25  ;;  %v1103_v26 = vld [vmem:[%s13962_s28 + $0x7680] sm:$0xff] }
 0x1f0   : >> { %v1105_v27 = vld [vmem:[%s13962_s28 + $0x76c0] sm:$0xff]  ;;  %1104 = vst [vmem:[%s13958_s27 + $0x1da0] sm:$0xff] %v1103_v26 }
 0x1f1   : >> { %v1107_v28 = vld [vmem:[%s13962_s28 + $0x7700] sm:$0xff]  ;;  %1106 = vst [vmem:[%s13958_s27 + $0x1db0] sm:$0xff] %v1105_v27 }
 0x1f2   : >> { %1108 = vst [vmem:[%s13958_s27 + $0x1dc0] sm:$0xff] %v1107_v28  ;;  %v1109_v29 = vld [vmem:[%s13962_s28 + $0x7740] sm:$0xff] }
 0x1f3   : >> { %v1111_v30 = vld [vmem:[%s13962_s28 + $0x7780] sm:$0xff]  ;;  %1110 = vst [vmem:[%s13958_s27 + $0x1dd0] sm:$0xff] %v1109_v29 }
 0x1f4   : >> { %v1113_v31 = vld [vmem:[%s13962_s28 + $0x77c0] sm:$0xff]  ;;  %1112 = vst [vmem:[%s13958_s27 + $0x1de0] sm:$0xff] %v1111_v30 }
 0x1f5   : >> { %1114 = vst [vmem:[%s13958_s27 + $0x1df0] sm:$0xff] %v1113_v31  ;;  %v1115_v32 = vld [vmem:[%s13962_s28 + $0x7800] sm:$0xff] }
 0x1f6   : >> { %v1117_v33 = vld [vmem:[%s13962_s28 + $0x7840] sm:$0xff]  ;;  %1116 = vst [vmem:[%s13958_s27 + $0x1e00] sm:$0xff] %v1115_v32 }
 0x1f7   : >> { %v1119_v34 = vld [vmem:[%s13962_s28 + $0x7880] sm:$0xff]  ;;  %1118 = vst [vmem:[%s13958_s27 + $0x1e10] sm:$0xff] %v1117_v33 }
 0x1f8   : >> { %1120 = vst [vmem:[%s13958_s27 + $0x1e20] sm:$0xff] %v1119_v34  ;;  %v1121_v35 = vld [vmem:[%s13962_s28 + $0x78c0] sm:$0xff] }
 0x1f9   : >> { %v1123_v36 = vld [vmem:[%s13962_s28 + $0x7900] sm:$0xff]  ;;  %1122 = vst [vmem:[%s13958_s27 + $0x1e30] sm:$0xff] %v1121_v35 }
 0x1fa   : >> { %v1125_v37 = vld [vmem:[%s13962_s28 + $0x7940] sm:$0xff]  ;;  %1124 = vst [vmem:[%s13958_s27 + $0x1e40] sm:$0xff] %v1123_v36 }
 0x1fb   : >> { %1126 = vst [vmem:[%s13958_s27 + $0x1e50] sm:$0xff] %v1125_v37  ;;  %v1127_v38 = vld [vmem:[%s13962_s28 + $0x7980] sm:$0xff] }
 0x1fc   : >> { %v1129_v39 = vld [vmem:[%s13962_s28 + $0x79c0] sm:$0xff]  ;;  %1128 = vst [vmem:[%s13958_s27 + $0x1e60] sm:$0xff] %v1127_v38 }
 0x1fd   : >> { %v1131_v40 = vld [vmem:[%s13962_s28 + $0x7a00] sm:$0xff]  ;;  %1130 = vst [vmem:[%s13958_s27 + $0x1e70] sm:$0xff] %v1129_v39 }
 0x1fe   : >> { %1132 = vst [vmem:[%s13958_s27 + $0x1e80] sm:$0xff] %v1131_v40  ;;  %v1133_v41 = vld [vmem:[%s13962_s28 + $0x7a40] sm:$0xff] }
 0x1ff   : >> { %v1135_v42 = vld [vmem:[%s13962_s28 + $0x7a80] sm:$0xff]  ;;  %1134 = vst [vmem:[%s13958_s27 + $0x1e90] sm:$0xff] %v1133_v41 }
 0x200   : >> { %v1137_v43 = vld [vmem:[%s13962_s28 + $0x7ac0] sm:$0xff]  ;;  %1136 = vst [vmem:[%s13958_s27 + $0x1ea0] sm:$0xff] %v1135_v42 }
 0x201   : >> { %1138 = vst [vmem:[%s13958_s27 + $0x1eb0] sm:$0xff] %v1137_v43  ;;  %v1139_v44 = vld [vmem:[%s13962_s28 + $0x7b00] sm:$0xff] }
 0x202   : >> { %v1141_v45 = vld [vmem:[%s13962_s28 + $0x7b40] sm:$0xff]  ;;  %1140 = vst [vmem:[%s13958_s27 + $0x1ec0] sm:$0xff] %v1139_v44 }
 0x203   : >> { %v1143_v46 = vld [vmem:[%s13962_s28 + $0x7b80] sm:$0xff]  ;;  %1142 = vst [vmem:[%s13958_s27 + $0x1ed0] sm:$0xff] %v1141_v45 }
 0x204   : >> { %1144 = vst [vmem:[%s13958_s27 + $0x1ee0] sm:$0xff] %v1143_v46  ;;  %v1145_v47 = vld [vmem:[%s13962_s28 + $0x7bc0] sm:$0xff] }
 0x205   : >> { %v1147_v48 = vld [vmem:[%s13962_s28 + $0x7c00] sm:$0xff]  ;;  %1146 = vst [vmem:[%s13958_s27 + $0x1ef0] sm:$0xff] %v1145_v47 }
 0x206   : >> { %v1149_v49 = vld [vmem:[%s13962_s28 + $0x7c40] sm:$0xff]  ;;  %1148 = vst [vmem:[%s13958_s27 + $0x1f00] sm:$0xff] %v1147_v48 }
 0x207   : >> { %1150 = vst [vmem:[%s13958_s27 + $0x1f10] sm:$0xff] %v1149_v49  ;;  %v1151_v50 = vld [vmem:[%s13962_s28 + $0x7c80] sm:$0xff] }
 0x208   : >> { %v1153_v51 = vld [vmem:[%s13962_s28 + $0x7cc0] sm:$0xff]  ;;  %1152 = vst [vmem:[%s13958_s27 + $0x1f20] sm:$0xff] %v1151_v50 }
 0x209   : >> { %v1155_v52 = vld [vmem:[%s13962_s28 + $0x7d00] sm:$0xff]  ;;  %1154 = vst [vmem:[%s13958_s27 + $0x1f30] sm:$0xff] %v1153_v51 }
 0x20a   : >> { %1156 = vst [vmem:[%s13958_s27 + $0x1f40] sm:$0xff] %v1155_v52  ;;  %v1157_v53 = vld [vmem:[%s13962_s28 + $0x7d40] sm:$0xff] }
 0x20b   : >> { %v1159_v54 = vld [vmem:[%s13962_s28 + $0x7d80] sm:$0xff]  ;;  %1158 = vst [vmem:[%s13958_s27 + $0x1f50] sm:$0xff] %v1157_v53 }
 0x20c   : >> { %v1161_v55 = vld [vmem:[%s13962_s28 + $0x7dc0] sm:$0xff]  ;;  %1160 = vst [vmem:[%s13958_s27 + $0x1f60] sm:$0xff] %v1159_v54 }
 0x20d   : >> { %1162 = vst [vmem:[%s13958_s27 + $0x1f70] sm:$0xff] %v1161_v55  ;;  %v1163_v56 = vld [vmem:[%s13962_s28 + $0x7e00] sm:$0xff] }
 0x20e   : >> { %v1165_v57 = vld [vmem:[%s13962_s28 + $0x7e40] sm:$0xff]  ;;  %1164 = vst [vmem:[%s13958_s27 + $0x1f80] sm:$0xff] %v1163_v56 }
 0x20f   : >> { %v1167_v58 = vld [vmem:[%s13962_s28 + $0x7e80] sm:$0xff]  ;;  %1166 = vst [vmem:[%s13958_s27 + $0x1f90] sm:$0xff] %v1165_v57  ;;  %150 = sbr.rel (!%p148_p6) target bundleno = 21 (0x15), region = 109 }
 0x210   : >> { %1168 = vst [vmem:[%s13958_s27 + $0x1fa0] sm:$0xff] %v1167_v58  ;;  %v1169_v59 = vld [vmem:[%s13962_s28 + $0x7ec0] sm:$0xff] }
 0x211   : >> { %v1171_v60 = vld [vmem:[%s13962_s28 + $0x7f00] sm:$0xff]  ;;  %1170 = vst [vmem:[%s13958_s27 + $0x1fb0] sm:$0xff] %v1169_v59 }
 0x212   : >> { %v1173_v61 = vld [vmem:[%s13962_s28 + $0x7f40] sm:$0xff]  ;;  %1172 = vst [vmem:[%s13958_s27 + $0x1fc0] sm:$0xff] %v1171_v60 }
 0x213   : >> { %1174 = vst [vmem:[%s13958_s27 + $0x1fd0] sm:$0xff] %v1173_v61  ;;  %v1175_v62 = vld [vmem:[%s13962_s28 + $0x7f80] sm:$0xff] }
 0x214   : >> { %v1177_v63 = vld [vmem:[%s13962_s28 + $0x7fc0] sm:$0xff]  ;;  %1176 = vst [vmem:[%s13958_s27 + $0x1fe0] sm:$0xff] %v1175_v62  ;;  %s16360_s28 = smov %s14322_s6 }
 0x215   : >> { %1178 = vst [vmem:[%s13958_s27 + $0x1ff0] sm:$0xff] %v1177_v63  ;;  %s16359_s27 = smov %s14326_s7 }
 0x216 PF: > { %p11160_p7 = scmp.ge.s32.totalorder %s13954_s14, 1  ;;  %p3275_p8 = scmp.lt.s32.totalorder %s13954_s14, 5 }
 0x218   : > { %p3276_p9 = pnand %p11160_p7, %p3275_p8 }
 0x219   : > { %s3282_s8 = sand.u32 (!%p3276_p9), 1, %s13946_s12   ;;  %v4351_v0 = vlaneseq (!%p3276_p9)  ;;  %v13972_v1 = vmov (!%p3276_p9), 1966171168   ;;  %v15109_v3 = vld [vmem:[%s16353_s0] sm:$0xff] (!%p3276_p9)  ;;  %s11162_s26 = sshll.u32 (!%p3276_p9), %s11151_s15, 2 }
 0x21a   : > { %3279 = sbr.rel (%p3276_p9) target bundleno = 1790 (0x6fe), region = 65  ;;  %s11161_s9 = sshll.u32 (!%p3276_p9), %s3282_s8, 13  ;;  %v4377_v2 = vunpack.c.l.s4 (!%p3276_p9), %v13972_v1 }
 0x21b   : > { %v15111_v4 = vshrl.u32 (!%p3276_p9), %v4351_v0, 7  ;;  %s15113_s17 = scalar_lea.vmem (!%p3276_p9), [#allocation2], %s11161_s9  ;;  %p3311_p10 = scmp.lt.s32.totalorder (!%p3276_p9), %s11162_s26, 15 }
 0x21c   : > { %v12374_v5 = vld [vmem:[%s15113_s17 + $0x4] ss:$16 sps:$4 sm:$0xff] (!%p3276_p9)   ;;  %v4378_v6 = vunpack.c.0.s8 (!%p3276_p9), %v4377_v2  ;;  %v12376_v7 = vld [vmem:[%s15113_s17 + $0xc] ss:$16 sps:$4 sm:$0xff] (!%p3276_p9)   ;;  %v12378_v8 = vld [vmem:[%s15113_s17] ss:$16 sps:$4 sm:$0xff] (!%p3276_p9)  }
 0x21d   : > { %9723 = vmatprep.subr.bf16.mxu0 (!%p3276_p9), %v12374_v5  ;;  %v12379_v9 = vld [vmem:[%s15113_s17 + $0x8] ss:$16 sps:$4 sm:$0xff] (!%p3276_p9)   ;;  %10379 = vmatprep.subr.bf16.mxu1 (!%p3276_p9), %v12376_v7  ;;  %v12380_v11 = vld [vmem:[%s15113_s17 + $0x24] ss:$16 sps:$4 sm:$0xff] (!%p3276_p9)   ;;  %v12382_v12 = vld [vmem:[%s15113_s17 + $0x2c] ss:$16 sps:$4 sm:$0xff] (!%p3276_p9)  }
 0x21e   : > { %v15120_v10 = vsub.s32 (!%p3276_p9), %v4378_v6, %v15111_v4  ;;  %9724 = vmatpush1.bf16.msra.mxu0 (!%p3276_p9), %v12378_v8  ;;  %10380 = vmatpush1.bf16.msra.mxu1 (!%p3276_p9), %v12379_v9  ;;  %v12384_v13 = vld [vmem:[%s15113_s17 + $0x20] ss:$16 sps:$4 sm:$0xff] (!%p3276_p9)   ;;  %v12385_v15 = vld [vmem:[%s15113_s17 + $0x28] ss:$16 sps:$4 sm:$0xff] (!%p3276_p9)   ;;  %v12386_v16 = vld [vmem:[%s15113_s17 + $0x44] ss:$16 sps:$4 sm:$0xff] (!%p3276_p9)  }
 0x21f   : > { %9725 = vmatprep.subr.bf16.mxu0 (!%p3276_p9), %v12380_v11  ;;  %10381 = vmatprep.subr.bf16.mxu1 (!%p3276_p9), %v12382_v12  ;;  %v12388_v18 = vld [vmem:[%s15113_s17 + $0x4c] ss:$16 sps:$4 sm:$0xff] (!%p3276_p9)   ;;  %v12390_v19 = vld [vmem:[%s15113_s17 + $0x40] ss:$16 sps:$4 sm:$0xff] (!%p3276_p9)   ;;  %v12391_v20 = vld [vmem:[%s15113_s17 + $0x48] ss:$16 sps:$4 sm:$0xff] (!%p3276_p9)  }
 0x220   : > { %v15127_v14 = vrot.slane (!%p3276_p9), %v15109_v3, %v15120_v10  ;;  %v12392_v21 = vld [vmem:[%s15113_s17 + $0x64] ss:$16 sps:$4 sm:$0xff] (!%p3276_p9)   ;;  %v12394_v23 = vld [vmem:[%s15113_s17 + $0x6c] ss:$16 sps:$4 sm:$0xff] (!%p3276_p9)   ;;  %v12396_v24 = vld [vmem:[%s15113_s17 + $0x60] ss:$16 sps:$4 sm:$0xff] (!%p3276_p9)  }
 0x221   : > { %v12397_v25 = vld [vmem:[%s15113_s17 + $0x68] ss:$16 sps:$4 sm:$0xff]   ;;  %v12398_v26 = vld [vmem:[%s15113_s17 + $0x84] ss:$16 sps:$4 sm:$0xff]   ;;  %v12400_v27 = vld [vmem:[%s15113_s17 + $0x8c] ss:$16 sps:$4 sm:$0xff]  }
 0x222   : > { %v4390_v17 = vcombine.high %v15127_v14, %v15127_v14  ;;  %9726 = vmatpush1.bf16.msra.mxu0 %v12384_v13  ;;  %10382 = vmatpush1.bf16.msra.mxu1 %v12385_v15  ;;  %v12402_v28 = vld [vmem:[%s15113_s17 + $0x80] ss:$16 sps:$4 sm:$0xff]   ;;  %v12403_v29 = vld [vmem:[%s15113_s17 + $0x88] ss:$16 sps:$4 sm:$0xff]   ;;  %v12404_v30 = vld [vmem:[%s15113_s17 + $0xa4] ss:$16 sps:$4 sm:$0xff]  }
 0x223   : > { %9727 = vmatprep.subr.bf16.mxu0 %v12386_v16  ;;  %10383 = vmatprep.subr.bf16.mxu1 %v12388_v18  ;;  %v12406_v31 = vld [vmem:[%s15113_s17 + $0xac] ss:$16 sps:$4 sm:$0xff]   ;;  %v12408_v32 = vld [vmem:[%s15113_s17 + $0xa0] ss:$16 sps:$4 sm:$0xff]   ;;  %v12409_v33 = vld [vmem:[%s15113_s17 + $0xa8] ss:$16 sps:$4 sm:$0xff]   ;;  %v15199_v18 = vrot.slane %v15127_v14, %v15120_v10 }
 0x224   : > { %v15138_v22 = vrot.slane %v4390_v17, %v15120_v10  ;;  %v12410_v34 = vld [vmem:[%s15113_s17 + $0xc4] ss:$16 sps:$4 sm:$0xff]   ;;  %v12412_v35 = vld [vmem:[%s15113_s17 + $0xcc] ss:$16 sps:$4 sm:$0xff]   ;;  %v12414_v36 = vld [vmem:[%s15113_s17 + $0xc0] ss:$16 sps:$4 sm:$0xff]  }
 0x225   : > { %v12415_v37 = vld [vmem:[%s15113_s17 + $0xc8] ss:$16 sps:$4 sm:$0xff]   ;;  %v12416_v38 = vld [vmem:[%s15113_s17 + $0xe4] ss:$16 sps:$4 sm:$0xff]   ;;  %v12418_v39 = vld [vmem:[%s15113_s17 + $0xec] ss:$16 sps:$4 sm:$0xff]  }
 0x226   : > { %9755 = vmatprep.mubr.bf16.mxu0 %v15138_v22  ;;  %10411 = vmatprep.mubr.bf16.mxu1 %v15138_v22  ;;  %v12420_v40 = vld [vmem:[%s15113_s17 + $0xe0] ss:$16 sps:$4 sm:$0xff]   ;;  %v12421_v41 = vld [vmem:[%s15113_s17 + $0xe8] ss:$16 sps:$4 sm:$0xff]   ;;  %v12422_v42 = vld [vmem:[%s15113_s17 + $0x104] ss:$16 sps:$4 sm:$0xff]  }
 0x227   : > { %9728 = vmatpush1.bf16.msra.mxu0 %v12390_v19  ;;  %10384 = vmatpush1.bf16.msra.mxu1 %v12391_v20  ;;  %v12424_v43 = vld [vmem:[%s15113_s17 + $0x10c] ss:$16 sps:$4 sm:$0xff]   ;;  %v12426_v44 = vld [vmem:[%s15113_s17 + $0x100] ss:$16 sps:$4 sm:$0xff]   ;;  %v12427_v45 = vld [vmem:[%s15113_s17 + $0x108] ss:$16 sps:$4 sm:$0xff]  }
 0x228   : > { %9729 = vmatprep.subr.bf16.mxu0 %v12392_v21  ;;  %10385 = vmatprep.subr.bf16.mxu1 %v12394_v23  ;;  %v12428_v46 = vld [vmem:[%s15113_s17 + $0x124] ss:$16 sps:$4 sm:$0xff]   ;;  %v12430_v47 = vld [vmem:[%s15113_s17 + $0x12c] ss:$16 sps:$4 sm:$0xff]   ;;  %v12432_v48 = vld [vmem:[%s15113_s17 + $0x120] ss:$16 sps:$4 sm:$0xff]   ;;  %v4422_v21 = vcombine.high %v15138_v22, %v15138_v22 }
 0x229   : > { %v12433_v49 = vld [vmem:[%s15113_s17 + $0x128] ss:$16 sps:$4 sm:$0xff]   ;;  %v12434_v50 = vld [vmem:[%s15113_s17 + $0x144] ss:$16 sps:$4 sm:$0xff]   ;;  %v12436_v51 = vld [vmem:[%s15113_s17 + $0x14c] ss:$16 sps:$4 sm:$0xff]  }
 0x22a   : > { %v12438_v52 = vld [vmem:[%s15113_s17 + $0x140] ss:$16 sps:$4 sm:$0xff]   ;;  %v12439_v53 = vld [vmem:[%s15113_s17 + $0x148] ss:$16 sps:$4 sm:$0xff]   ;;  %v12440_v54 = vld [vmem:[%s15113_s17 + $0x164] ss:$16 sps:$4 sm:$0xff]  }
 0x22b   : > { %9730 = vmatpush1.bf16.msra.mxu0 %v12396_v24  ;;  %10386 = vmatpush1.bf16.msra.mxu1 %v12397_v25  ;;  %v12442_v55 = vld [vmem:[%s15113_s17 + $0x16c] ss:$16 sps:$4 sm:$0xff]   ;;  %v12444_v56 = vld [vmem:[%s15113_s17 + $0x160] ss:$16 sps:$4 sm:$0xff]   ;;  %v12445_v57 = vld [vmem:[%s15113_s17 + $0x168] ss:$16 sps:$4 sm:$0xff]  }
 0x22c   : > { %9731 = vmatprep.subr.bf16.mxu0 %v12398_v26  ;;  %10387 = vmatprep.subr.bf16.mxu1 %v12400_v27  ;;  %v12446_v58 = vld [vmem:[%s15113_s17 + $0x184] ss:$16 sps:$4 sm:$0xff]   ;;  %v12448_v59 = vld [vmem:[%s15113_s17 + $0x18c] ss:$16 sps:$4 sm:$0xff]   ;;  %v12450_v60 = vld [vmem:[%s15113_s17 + $0x180] ss:$16 sps:$4 sm:$0xff]  }
 0x22d   : > { %v12451_v61 = vld [vmem:[%s15113_s17 + $0x188] ss:$16 sps:$4 sm:$0xff]   ;;  %v12452_v62 = vld [vmem:[%s15113_s17 + $0x1a4] ss:$16 sps:$4 sm:$0xff]   ;;  %v12454_v63 = vld [vmem:[%s15113_s17 + $0x1ac] ss:$16 sps:$4 sm:$0xff]  }
 0x22e   : > { %v12456_v0 = vld [vmem:[%s15113_s17 + $0x1a0] ss:$16 sps:$4 sm:$0xff]   ;;  %v12457_v1 = vld [vmem:[%s15113_s17 + $0x1a8] ss:$16 sps:$4 sm:$0xff]   ;;  %v12458_v2 = vld [vmem:[%s15113_s17 + $0x1c4] ss:$16 sps:$4 sm:$0xff]  }
 0x22f   : > { %9732 = vmatpush1.bf16.msra.mxu0 %v12402_v28  ;;  %10388 = vmatpush1.bf16.msra.mxu1 %v12403_v29  ;;  %v12460_v5 = vld [vmem:[%s15113_s17 + $0x1cc] ss:$16 sps:$4 sm:$0xff]   ;;  %v12462_v6 = vld [vmem:[%s15113_s17 + $0x1c0] ss:$16 sps:$4 sm:$0xff]   ;;  %v12463_v7 = vld [vmem:[%s15113_s17 + $0x1c8] ss:$16 sps:$4 sm:$0xff]  }
 0x230   : > { %9733 = vmatprep.subr.bf16.mxu0 %v12404_v30  ;;  %10389 = vmatprep.subr.bf16.mxu1 %v12406_v31  ;;  %v12464_v8 = vld [vmem:[%s15113_s17 + $0x1e4] ss:$16 sps:$4 sm:$0xff]   ;;  %v12466_v9 = vld [vmem:[%s15113_s17 + $0x1ec] ss:$16 sps:$4 sm:$0xff]   ;;  %v12468_v11 = vld [vmem:[%s15113_s17 + $0x1e0] ss:$16 sps:$4 sm:$0xff]  }
 0x231   : > { %v12469_v12 = vld [vmem:[%s15113_s17 + $0x1e8] ss:$16 sps:$4 sm:$0xff]   ;;  %v12472_v13 = vld [vmem:[%s15113_s17 + $0x204] ss:$16 sps:$4 sm:$0xff]   ;;  %v12475_v15 = vld [vmem:[%s15113_s17 + $0x20c] ss:$16 sps:$4 sm:$0xff]  }
 0x232   : > { %v12470_v16 = vld [vmem:[%s15113_s17 + $0x200] ss:$16 sps:$4 sm:$0xff]   ;;  %v12473_v17 = vld [vmem:[%s15113_s17 + $0x208] ss:$16 sps:$4 sm:$0xff]   ;;  %v12478_v19 = vld [vmem:[%s15113_s17 + $0x224] ss:$16 sps:$4 sm:$0xff]  }
 0x233   : > { %9734 = vmatpush1.bf16.msra.mxu0 %v12408_v32  ;;  %10390 = vmatpush1.bf16.msra.mxu1 %v12409_v33  ;;  %v12481_v20 = vld [vmem:[%s15113_s17 + $0x22c] ss:$16 sps:$4 sm:$0xff]   ;;  %v12476_v23 = vld [vmem:[%s15113_s17 + $0x220] ss:$16 sps:$4 sm:$0xff]   ;;  %v12479_v14 = vld [vmem:[%s15113_s17 + $0x228] ss:$16 sps:$4 sm:$0xff]  }
 0x234   : > { %9735 = vmatprep.subr.bf16.mxu0 %v12410_v34  ;;  %10391 = vmatprep.subr.bf16.mxu1 %v12412_v35  ;;  %v12484_v24 = vld [vmem:[%s15113_s17 + $0x244] ss:$16 sps:$4 sm:$0xff]   ;;  %v12487_v25 = vld [vmem:[%s15113_s17 + $0x24c] ss:$16 sps:$4 sm:$0xff]   ;;  %v12482_v22 = vld [vmem:[%s15113_s17 + $0x240] ss:$16 sps:$4 sm:$0xff]  }
 0x235   : > { %v12485_v26 = vld [vmem:[%s15113_s17 + $0x248] ss:$16 sps:$4 sm:$0xff]   ;;  %v12490_v27 = vld [vmem:[%s15113_s17 + $0x264] ss:$16 sps:$4 sm:$0xff]   ;;  %v12493_v28 = vld [vmem:[%s15113_s17 + $0x26c] ss:$16 sps:$4 sm:$0xff]  }
 0x236   : > { %v12488_v29 = vld [vmem:[%s15113_s17 + $0x260] ss:$16 sps:$4 sm:$0xff]   ;;  %v12491_v30 = vld [vmem:[%s15113_s17 + $0x268] ss:$16 sps:$4 sm:$0xff]   ;;  %v12496_v31 = vld [vmem:[%s15113_s17 + $0x284] ss:$16 sps:$4 sm:$0xff]  }
 0x237   : > { %9736 = vmatpush1.bf16.msra.mxu0 %v12414_v36  ;;  %10392 = vmatpush1.bf16.msra.mxu1 %v12415_v37  ;;  %v12499_v32 = vld [vmem:[%s15113_s17 + $0x28c] ss:$16 sps:$4 sm:$0xff]   ;;  %v12494_v33 = vld [vmem:[%s15113_s17 + $0x280] ss:$16 sps:$4 sm:$0xff]   ;;  %v12497_v34 = vld [vmem:[%s15113_s17 + $0x288] ss:$16 sps:$4 sm:$0xff]  }
 0x238   : > { %9737 = vmatprep.subr.bf16.mxu0 %v12416_v38  ;;  %10393 = vmatprep.subr.bf16.mxu1 %v12418_v39  ;;  %v12502_v35 = vld [vmem:[%s15113_s17 + $0x2a4] ss:$16 sps:$4 sm:$0xff]   ;;  %v12505_v36 = vld [vmem:[%s15113_s17 + $0x2ac] ss:$16 sps:$4 sm:$0xff]   ;;  %v12500_v37 = vld [vmem:[%s15113_s17 + $0x2a0] ss:$16 sps:$4 sm:$0xff]  }
 0x239   : > { %v12503_v38 = vld [vmem:[%s15113_s17 + $0x2a8] ss:$16 sps:$4 sm:$0xff]   ;;  %v12508_v39 = vld [vmem:[%s15113_s17 + $0x2c4] ss:$16 sps:$4 sm:$0xff]   ;;  %s16368_s26 = smov (!%p3311_p10, %s11162_s26), 15 }
 0x23a   : > { %s3313_s29 = scalar_lea.vmem %s16355_s2, %s16368_s26  ;;  %s11164_s14 = sshll.u32 %s16368_s26, 1 }
 0x23b   : > { %9738 = vmatpush1.bf16.msra.mxu0 %v12420_v40  ;;  %10394 = vmatpush1.bf16.msra.mxu1 %v12421_v41  ;;  %v12511_v40 = vld [vmem:[%s15113_s17 + $0x2cc] ss:$16 sps:$4 sm:$0xff]   ;;  %v12506_v41 = vld [vmem:[%s15113_s17 + $0x2c0] ss:$16 sps:$4 sm:$0xff]   ;;  %s3319_s4 = scalar_lea.vmem %s16356_s3, %s11164_s14 }
 0x23c   : > { %9739 = vmatprep.subr.bf16.mxu0 %v12422_v42  ;;  %10395 = vmatprep.subr.bf16.mxu1 %v12424_v43  ;;  %v12509_v42 = vld [vmem:[%s15113_s17 + $0x2c8] ss:$16 sps:$4 sm:$0xff]   ;;  %v12514_v43 = vld [vmem:[%s15113_s17 + $0x2e4] ss:$16 sps:$4 sm:$0xff]  }
 0x23f   : > { %9740 = vmatpush1.bf16.msra.mxu0 %v12426_v44  ;;  %10396 = vmatpush1.bf16.msra.mxu1 %v12427_v45  ;;  %v12517_v44 = vld [vmem:[%s15113_s17 + $0x2ec] ss:$16 sps:$4 sm:$0xff]   ;;  %v12512_v45 = vld [vmem:[%s15113_s17 + $0x2e0] ss:$16 sps:$4 sm:$0xff]  }
 0x240   : > { %9741 = vmatprep.subr.bf16.mxu0 %v12428_v46  ;;  %10397 = vmatprep.subr.bf16.mxu1 %v12430_v47  ;;  %v12515_v46 = vld [vmem:[%s15113_s17 + $0x2e8] ss:$16 sps:$4 sm:$0xff]   ;;  %v12520_v47 = vld [vmem:[%s15113_s17 + $0x304] ss:$16 sps:$4 sm:$0xff]  }
 0x243   : > { %9742 = vmatpush1.bf16.msra.mxu0 %v12432_v48  ;;  %10398 = vmatpush1.bf16.msra.mxu1 %v12433_v49  ;;  %v12523_v48 = vld [vmem:[%s15113_s17 + $0x30c] ss:$16 sps:$4 sm:$0xff]   ;;  %v12518_v49 = vld [vmem:[%s15113_s17 + $0x300] ss:$16 sps:$4 sm:$0xff]  }
 0x244   : > { %9743 = vmatprep.subr.bf16.mxu0 %v12434_v50  ;;  %10399 = vmatprep.subr.bf16.mxu1 %v12436_v51  ;;  %v12521_v50 = vld [vmem:[%s15113_s17 + $0x308] ss:$16 sps:$4 sm:$0xff]   ;;  %v12526_v51 = vld [vmem:[%s15113_s17 + $0x324] ss:$16 sps:$4 sm:$0xff]  }
 0x247   : > { %9744 = vmatpush1.bf16.msra.mxu0 %v12438_v52  ;;  %10400 = vmatpush1.bf16.msra.mxu1 %v12439_v53  ;;  %v12529_v52 = vld [vmem:[%s15113_s17 + $0x32c] ss:$16 sps:$4 sm:$0xff]   ;;  %v12524_v53 = vld [vmem:[%s15113_s17 + $0x320] ss:$16 sps:$4 sm:$0xff]  }
 0x248   : > { %9745 = vmatprep.subr.bf16.mxu0 %v12440_v54  ;;  %10401 = vmatprep.subr.bf16.mxu1 %v12442_v55  ;;  %v12527_v54 = vld [vmem:[%s15113_s17 + $0x328] ss:$16 sps:$4 sm:$0xff]   ;;  %v12532_v55 = vld [vmem:[%s15113_s17 + $0x344] ss:$16 sps:$4 sm:$0xff]  }
 0x24b   : > { %9746 = vmatpush1.bf16.msra.mxu0 %v12444_v56  ;;  %10402 = vmatpush1.bf16.msra.mxu1 %v12445_v57  ;;  %v12535_v56 = vld [vmem:[%s15113_s17 + $0x34c] ss:$16 sps:$4 sm:$0xff]   ;;  %v12530_v57 = vld [vmem:[%s15113_s17 + $0x340] ss:$16 sps:$4 sm:$0xff]  }
 0x24c   : > { %9747 = vmatprep.subr.bf16.mxu0 %v12446_v58  ;;  %10403 = vmatprep.subr.bf16.mxu1 %v12448_v59  ;;  %v12533_v58 = vld [vmem:[%s15113_s17 + $0x348] ss:$16 sps:$4 sm:$0xff]   ;;  %v12538_v59 = vld [vmem:[%s15113_s17 + $0x364] ss:$16 sps:$4 sm:$0xff]  }
 0x24f   : > { %9748 = vmatpush1.bf16.msra.mxu0 %v12450_v60  ;;  %10404 = vmatpush1.bf16.msra.mxu1 %v12451_v61  ;;  %v12541_v60 = vld [vmem:[%s15113_s17 + $0x36c] ss:$16 sps:$4 sm:$0xff]   ;;  %v12536_v61 = vld [vmem:[%s15113_s17 + $0x360] ss:$16 sps:$4 sm:$0xff]  }
 0x250   : > { %9749 = vmatprep.subr.bf16.mxu0 %v12452_v62  ;;  %10405 = vmatprep.subr.bf16.mxu1 %v12454_v63  ;;  %v12539_v62 = vld [vmem:[%s15113_s17 + $0x368] ss:$16 sps:$4 sm:$0xff]   ;;  %v12544_v63 = vld [vmem:[%s15113_s17 + $0x384] ss:$16 sps:$4 sm:$0xff]  }
 0x253   : > { %9750 = vmatpush1.bf16.msra.mxu0 %v12456_v0  ;;  %10406 = vmatpush1.bf16.msra.mxu1 %v12457_v1  ;;  %v12547_v0 = vld [vmem:[%s15113_s17 + $0x38c] ss:$16 sps:$4 sm:$0xff]   ;;  %v12542_v1 = vld [vmem:[%s15113_s17 + $0x380] ss:$16 sps:$4 sm:$0xff]  }
 0x254   : > { %9751 = vmatprep.subr.bf16.mxu0 %v12458_v2  ;;  %10407 = vmatprep.subr.bf16.mxu1 %v12460_v5  ;;  %v12545_v2 = vld [vmem:[%s15113_s17 + $0x388] ss:$16 sps:$4 sm:$0xff]   ;;  %v12550_v5 = vld [vmem:[%s15113_s17 + $0x3a4] ss:$16 sps:$4 sm:$0xff]  }
 0x257   : > { %9752 = vmatpush1.bf16.msra.mxu0 %v12462_v6  ;;  %10408 = vmatpush1.bf16.msra.mxu1 %v12463_v7  ;;  %v12553_v6 = vld [vmem:[%s15113_s17 + $0x3ac] ss:$16 sps:$4 sm:$0xff]   ;;  %v12548_v7 = vld [vmem:[%s15113_s17 + $0x3a0] ss:$16 sps:$4 sm:$0xff]  }
 0x258   : > { %9753 = vmatprep.subr.bf16.mxu0 %v12464_v8  ;;  %10409 = vmatprep.subr.bf16.mxu1 %v12466_v9  ;;  %v12551_v8 = vld [vmem:[%s15113_s17 + $0x3a8] ss:$16 sps:$4 sm:$0xff]   ;;  %v12556_v9 = vld [vmem:[%s15113_s17 + $0x3c4] ss:$16 sps:$4 sm:$0xff]  }
 0x25b   : > { %9754 = vmatpush1.bf16.msra.mxu0 %v12468_v11  ;;  %10410 = vmatpush1.bf16.msra.mxu1 %v12469_v12  ;;  %v12559_v11 = vld [vmem:[%s15113_s17 + $0x3cc] ss:$16 sps:$4 sm:$0xff]   ;;  %v4375_v12 = vcombine.high %v15109_v3, %v15109_v3  ;;  %v12568_v3 = vld [vmem:[%s15113_s17 + $0x404] ss:$16 sps:$4 sm:$0xff]  }
 0x25c   : > { %9764 = vmatprep.subr.bf16.mxu0 %v12472_v13  ;;  %10420 = vmatprep.subr.bf16.mxu1 %v12475_v15  ;;  %v12554_v13 = vld [vmem:[%s15113_s17 + $0x3c0] ss:$16 sps:$4 sm:$0xff]   ;;  %v12557_v15 = vld [vmem:[%s15113_s17 + $0x3c8] ss:$16 sps:$4 sm:$0xff]  }
 0x25e   : > { %9756 = vmatmul.mubr.bf16.vlgmr.msra.gmra.mrb[0].mxu0 %v15199_v18  ;;  %10412 = vmatmul.mubr.bf16.vlgmr.msra.gmra.mrb[0].mxu1 %v15199_v18 }
 0x25f   : > { %9765 = vmatpush1.bf16.msra.mxu0 %v12470_v16  ;;  %10421 = vmatpush1.bf16.msra.mxu1 %v12473_v17  ;;  %v12562_v16 = vld [vmem:[%s15113_s17 + $0x3e4] ss:$16 sps:$4 sm:$0xff]   ;;  %v12565_v17 = vld [vmem:[%s15113_s17 + $0x3ec] ss:$16 sps:$4 sm:$0xff]  }
 0x260   : > { %9766 = vmatprep.subr.bf16.mxu0 %v12478_v19  ;;  %10422 = vmatprep.subr.bf16.mxu1 %v12481_v20  ;;  %v15266_v19 = vrot.slane %v4375_v12, %v15120_v10  ;;  %v12560_v20 = vld [vmem:[%s15113_s17 + $0x3e0] ss:$16 sps:$4 sm:$0xff]   ;;  %v12641_v12 = vld [vmem:[%s15113_s17 + $0x588] ss:$16 sps:$4 sm:$0xff]  }
 0x261   : > { %9796 = vmatprep.mubr.bf16.mxu0 %v4422_v21  ;;  %10452 = vmatprep.mubr.bf16.mxu1 %v4422_v21  ;;  %v12563_v21 = vld [vmem:[%s15113_s17 + $0x3e8] ss:$16 sps:$4 sm:$0xff]  }
 0x263   : > { %9767 = vmatpush1.bf16.msra.mxu0 %v12476_v23  ;;  %10423 = vmatpush1.bf16.msra.mxu1 %v12479_v14  ;;  %v12571_v23 = vld [vmem:[%s15113_s17 + $0x40c] ss:$16 sps:$4 sm:$0xff]   ;;  %v4391_v14 = vcombine.high %v15266_v19, %v15266_v19 }
 0x264   : > { %9768 = vmatprep.subr.bf16.mxu0 %v12484_v24  ;;  %10424 = vmatprep.subr.bf16.mxu1 %v12487_v25  ;;  %v12566_v24 = vld [vmem:[%s15113_s17 + $0x400] ss:$16 sps:$4 sm:$0xff]   ;;  %v12569_v25 = vld [vmem:[%s15113_s17 + $0x408] ss:$16 sps:$4 sm:$0xff]  }
 0x267   : > { %9769 = vmatpush1.bf16.msra.mxu0 %v12482_v22  ;;  %10425 = vmatpush1.bf16.msra.mxu1 %v12485_v26  ;;  %v4420_v22 = vcombine.high %v15199_v18, %v15199_v18  ;;  %v12574_v26 = vld [vmem:[%s15113_s17 + $0x424] ss:$16 sps:$4 sm:$0xff]  }
 0x268   : > { %9770 = vmatprep.subr.bf16.mxu0 %v12490_v27  ;;  %10426 = vmatprep.subr.bf16.mxu1 %v12493_v28  ;;  %v12577_v27 = vld [vmem:[%s15113_s17 + $0x42c] ss:$16 sps:$4 sm:$0xff]   ;;  %v15281_v28 = vrot.slane %v4391_v14, %v15120_v10  ;;  %v12580_v18 = vld [vmem:[%s15113_s17 + $0x444] ss:$16 sps:$4 sm:$0xff]  }
 0x269   : > { %v12658_v14 = vld [vmem:[%s15113_s17 + $0x5e4] ss:$16 sps:$4 sm:$0xff]  }
 0x26b   : > { %9771 = vmatpush1.bf16.msra.mxu0 %v12488_v29  ;;  %10427 = vmatpush1.bf16.msra.mxu1 %v12491_v30  ;;  %v12572_v29 = vld [vmem:[%s15113_s17 + $0x420] ss:$16 sps:$4 sm:$0xff]   ;;  %v12575_v30 = vld [vmem:[%s15113_s17 + $0x428] ss:$16 sps:$4 sm:$0xff]  }
 0x26c   : > { %9772 = vmatprep.subr.bf16.mxu0 %v12496_v31  ;;  %10428 = vmatprep.subr.bf16.mxu1 %v12499_v32  ;;  %v12583_v31 = vld [vmem:[%s15113_s17 + $0x44c] ss:$16 sps:$4 sm:$0xff]   ;;  %v12578_v32 = vld [vmem:[%s15113_s17 + $0x440] ss:$16 sps:$4 sm:$0xff]  }
 0x26f   : > { %9773 = vmatpush1.bf16.msra.mxu0 %v12494_v33  ;;  %10429 = vmatpush1.bf16.msra.mxu1 %v12497_v34  ;;  %v12581_v33 = vld [vmem:[%s15113_s17 + $0x448] ss:$16 sps:$4 sm:$0xff]   ;;  %v12586_v34 = vld [vmem:[%s15113_s17 + $0x464] ss:$16 sps:$4 sm:$0xff]  }
 0x270   : > { %9774 = vmatprep.subr.bf16.mxu0 %v12502_v35  ;;  %10430 = vmatprep.subr.bf16.mxu1 %v12505_v36  ;;  %v12589_v35 = vld [vmem:[%s15113_s17 + $0x46c] ss:$16 sps:$4 sm:$0xff]   ;;  %v12584_v36 = vld [vmem:[%s15113_s17 + $0x460] ss:$16 sps:$4 sm:$0xff]  }
 0x273   : > { %9775 = vmatpush1.bf16.msra.mxu0 %v12500_v37  ;;  %10431 = vmatpush1.bf16.msra.mxu1 %v12503_v38  ;;  %v12587_v37 = vld [vmem:[%s15113_s17 + $0x468] ss:$16 sps:$4 sm:$0xff]   ;;  %v12592_v38 = vld [vmem:[%s15113_s17 + $0x484] ss:$16 sps:$4 sm:$0xff]  }
 0x274   : > { %9776 = vmatprep.subr.bf16.mxu0 %v12508_v39  ;;  %10432 = vmatprep.subr.bf16.mxu1 %v12511_v40  ;;  %v12595_v39 = vld [vmem:[%s15113_s17 + $0x48c] ss:$16 sps:$4 sm:$0xff]   ;;  %v12590_v40 = vld [vmem:[%s15113_s17 + $0x480] ss:$16 sps:$4 sm:$0xff]  }
 0x277   : > { %9777 = vmatpush1.bf16.msra.mxu0 %v12506_v41  ;;  %10433 = vmatpush1.bf16.msra.mxu1 %v12509_v42  ;;  %v12593_v41 = vld [vmem:[%s15113_s17 + $0x488] ss:$16 sps:$4 sm:$0xff]   ;;  %v12598_v42 = vld [vmem:[%s15113_s17 + $0x4a4] ss:$16 sps:$4 sm:$0xff]  }
 0x278   : > { %9778 = vmatprep.subr.bf16.mxu0 %v12514_v43  ;;  %10434 = vmatprep.subr.bf16.mxu1 %v12517_v44  ;;  %v12601_v43 = vld [vmem:[%s15113_s17 + $0x4ac] ss:$16 sps:$4 sm:$0xff]   ;;  %v12596_v44 = vld [vmem:[%s15113_s17 + $0x4a0] ss:$16 sps:$4 sm:$0xff]  }
 0x27b   : > { %9779 = vmatpush1.bf16.msra.mxu0 %v12512_v45  ;;  %10435 = vmatpush1.bf16.msra.mxu1 %v12515_v46  ;;  %v12599_v45 = vld [vmem:[%s15113_s17 + $0x4a8] ss:$16 sps:$4 sm:$0xff]   ;;  %v12604_v46 = vld [vmem:[%s15113_s17 + $0x4c4] ss:$16 sps:$4 sm:$0xff]  }
 0x27c   : > { %9780 = vmatprep.subr.bf16.mxu0 %v12520_v47  ;;  %10436 = vmatprep.subr.bf16.mxu1 %v12523_v48  ;;  %v12607_v47 = vld [vmem:[%s15113_s17 + $0x4cc] ss:$16 sps:$4 sm:$0xff]   ;;  %v12602_v48 = vld [vmem:[%s15113_s17 + $0x4c0] ss:$16 sps:$4 sm:$0xff]  }
 0x27f   : > { %9781 = vmatpush1.bf16.msra.mxu0 %v12518_v49  ;;  %10437 = vmatpush1.bf16.msra.mxu1 %v12521_v50  ;;  %v12605_v49 = vld [vmem:[%s15113_s17 + $0x4c8] ss:$16 sps:$4 sm:$0xff]   ;;  %v12610_v50 = vld [vmem:[%s15113_s17 + $0x4e4] ss:$16 sps:$4 sm:$0xff]  }
 0x280   : > { %9782 = vmatprep.subr.bf16.mxu0 %v12526_v51  ;;  %10438 = vmatprep.subr.bf16.mxu1 %v12529_v52  ;;  %v12613_v51 = vld [vmem:[%s15113_s17 + $0x4ec] ss:$16 sps:$4 sm:$0xff]   ;;  %v12608_v52 = vld [vmem:[%s15113_s17 + $0x4e0] ss:$16 sps:$4 sm:$0xff]  }
 0x283   : > { %9783 = vmatpush1.bf16.msra.mxu0 %v12524_v53  ;;  %10439 = vmatpush1.bf16.msra.mxu1 %v12527_v54  ;;  %v12611_v53 = vld [vmem:[%s15113_s17 + $0x4e8] ss:$16 sps:$4 sm:$0xff]   ;;  %v12616_v54 = vld [vmem:[%s15113_s17 + $0x504] ss:$16 sps:$4 sm:$0xff]  }
 0x284   : > { %9784 = vmatprep.subr.bf16.mxu0 %v12532_v55  ;;  %10440 = vmatprep.subr.bf16.mxu1 %v12535_v56  ;;  %v12619_v55 = vld [vmem:[%s15113_s17 + $0x50c] ss:$16 sps:$4 sm:$0xff]   ;;  %v12614_v56 = vld [vmem:[%s15113_s17 + $0x500] ss:$16 sps:$4 sm:$0xff]  }
 0x287   : > { %9785 = vmatpush1.bf16.msra.mxu0 %v12530_v57  ;;  %10441 = vmatpush1.bf16.msra.mxu1 %v12533_v58  ;;  %v12617_v57 = vld [vmem:[%s15113_s17 + $0x508] ss:$16 sps:$4 sm:$0xff]   ;;  %v12622_v58 = vld [vmem:[%s15113_s17 + $0x524] ss:$16 sps:$4 sm:$0xff]  }
 0x288   : > { %9786 = vmatprep.subr.bf16.mxu0 %v12538_v59  ;;  %10442 = vmatprep.subr.bf16.mxu1 %v12541_v60  ;;  %v12625_v59 = vld [vmem:[%s15113_s17 + $0x52c] ss:$16 sps:$4 sm:$0xff]   ;;  %v12620_v60 = vld [vmem:[%s15113_s17 + $0x520] ss:$16 sps:$4 sm:$0xff]  }
 0x28b   : > { %9787 = vmatpush1.bf16.msra.mxu0 %v12536_v61  ;;  %10443 = vmatpush1.bf16.msra.mxu1 %v12539_v62  ;;  %v12623_v61 = vld [vmem:[%s15113_s17 + $0x528] ss:$16 sps:$4 sm:$0xff]   ;;  %v12628_v62 = vld [vmem:[%s15113_s17 + $0x544] ss:$16 sps:$4 sm:$0xff]  }
 0x28c   : > { %9788 = vmatprep.subr.bf16.mxu0 %v12544_v63  ;;  %10444 = vmatprep.subr.bf16.mxu1 %v12547_v0  ;;  %v12631_v63 = vld [vmem:[%s15113_s17 + $0x54c] ss:$16 sps:$4 sm:$0xff]   ;;  %v12626_v0 = vld [vmem:[%s15113_s17 + $0x540] ss:$16 sps:$4 sm:$0xff]  }
 0x28f   : > { %9789 = vmatpush1.bf16.msra.mxu0 %v12542_v1  ;;  %10445 = vmatpush1.bf16.msra.mxu1 %v12545_v2  ;;  %v12629_v1 = vld [vmem:[%s15113_s17 + $0x548] ss:$16 sps:$4 sm:$0xff]   ;;  %v12634_v2 = vld [vmem:[%s15113_s17 + $0x564] ss:$16 sps:$4 sm:$0xff]  }
 0x290   : > { %9790 = vmatprep.subr.bf16.mxu0 %v12550_v5  ;;  %10446 = vmatprep.subr.bf16.mxu1 %v12553_v6  ;;  %v12637_v5 = vld [vmem:[%s15113_s17 + $0x56c] ss:$16 sps:$4 sm:$0xff]   ;;  %v12632_v6 = vld [vmem:[%s15113_s17 + $0x560] ss:$16 sps:$4 sm:$0xff]  }
 0x293   : > { %9791 = vmatpush1.bf16.msra.mxu0 %v12548_v7  ;;  %10447 = vmatpush1.bf16.msra.mxu1 %v12551_v8  ;;  %v12635_v7 = vld [vmem:[%s15113_s17 + $0x568] ss:$16 sps:$4 sm:$0xff]   ;;  %v12640_v8 = vld [vmem:[%s15113_s17 + $0x584] ss:$16 sps:$4 sm:$0xff]  }
 0x294   : > { %9792 = vmatprep.subr.bf16.mxu0 %v12556_v9  ;;  %10448 = vmatprep.subr.bf16.mxu1 %v12559_v11  ;;  %v12643_v9 = vld [vmem:[%s15113_s17 + $0x58c] ss:$16 sps:$4 sm:$0xff]   ;;  %v12638_v11 = vld [vmem:[%s15113_s17 + $0x580] ss:$16 sps:$4 sm:$0xff]  }
 0x297   : > { %9793 = vmatpush1.bf16.msra.mxu0 %v12554_v13  ;;  %10449 = vmatpush1.bf16.msra.mxu1 %v12557_v15  ;;  %v12646_v13 = vld [vmem:[%s15113_s17 + $0x5a4] ss:$16 sps:$4 sm:$0xff]   ;;  %v12649_v15 = vld [vmem:[%s15113_s17 + $0x5ac] ss:$16 sps:$4 sm:$0xff]  }
 0x298   : > { %9794 = vmatprep.subr.bf16.mxu0 %v12562_v16  ;;  %10450 = vmatprep.subr.bf16.mxu1 %v12565_v17  ;;  %v12644_v16 = vld [vmem:[%s15113_s17 + $0x5a0] ss:$16 sps:$4 sm:$0xff]   ;;  %v12647_v17 = vld [vmem:[%s15113_s17 + $0x5a8] ss:$16 sps:$4 sm:$0xff]  }
 0x29b   : > { %9795 = vmatpush1.bf16.msra.mxu0 %v12560_v20  ;;  %10451 = vmatpush1.bf16.msra.mxu1 %v12563_v21  ;;  %v12652_v20 = vld [vmem:[%s15113_s17 + $0x5c4] ss:$16 sps:$4 sm:$0xff]   ;;  %v12655_v21 = vld [vmem:[%s15113_s17 + $0x5cc] ss:$16 sps:$4 sm:$0xff]  }
 0x29c   : > { %9805 = vmatprep.subr.bf16.mxu0 %v12568_v3  ;;  %10461 = vmatprep.subr.bf16.mxu1 %v12571_v23  ;;  %v12650_v3 = vld [vmem:[%s15113_s17 + $0x5c0] ss:$16 sps:$4 sm:$0xff]   ;;  %v12653_v23 = vld [vmem:[%s15113_s17 + $0x5c8] ss:$16 sps:$4 sm:$0xff]  }
 0x29e   : > { %9797 = vmatmul.mubr.bf16.vlgmr.msra.gmra.mrb[0].mxu0 %v4420_v22  ;;  %10453 = vmatmul.mubr.bf16.vlgmr.msra.gmra.mrb[0].mxu1 %v4420_v22  ;;  %v12659_v22 = vld [vmem:[%s15113_s17 + $0x5e8] ss:$16 sps:$4 sm:$0xff]  }
 0x29f   : > { %9806 = vmatpush1.bf16.msra.mxu0 %v12566_v24  ;;  %10462 = vmatpush1.bf16.msra.mxu1 %v12569_v25  ;;  %v12661_v24 = vld [vmem:[%s15113_s17 + $0x5ec] ss:$16 sps:$4 sm:$0xff]   ;;  %v12656_v25 = vld [vmem:[%s15113_s17 + $0x5e0] ss:$16 sps:$4 sm:$0xff]  }
 0x2a0   : > { %9807 = vmatprep.subr.bf16.mxu0 %v12574_v26  ;;  %10463 = vmatprep.subr.bf16.mxu1 %v12577_v27  ;;  %v12665_v26 = vld [vmem:[%s15113_s17 + $0x604] ss:$16 sps:$4 sm:$0xff]   ;;  %v12668_v27 = vld [vmem:[%s15113_s17 + $0x60c] ss:$16 sps:$4 sm:$0xff]  }
 0x2a1   : > { %9837 = vmatprep.mubr.bf16.mxu0 %v15281_v28  ;;  %10493 = vmatprep.mubr.bf16.mxu1 %v15281_v28 }
 0x2a3   : > { %9808 = vmatpush1.bf16.msra.mxu0 %v12572_v29  ;;  %10464 = vmatpush1.bf16.msra.mxu1 %v12575_v30  ;;  %v12663_v29 = vld [vmem:[%s15113_s17 + $0x600] ss:$16 sps:$4 sm:$0xff]   ;;  %v12666_v30 = vld [vmem:[%s15113_s17 + $0x608] ss:$16 sps:$4 sm:$0xff]  }
 0x2a4   : > { %9809 = vmatprep.subr.bf16.mxu0 %v12580_v18  ;;  %10465 = vmatprep.subr.bf16.mxu1 %v12583_v31  ;;  %v15349_v18 = vrot.slane %v15266_v19, %v15120_v10  ;;  %v12671_v31 = vld [vmem:[%s15113_s17 + $0x624] ss:$16 sps:$4 sm:$0xff]   ;;  %v12672_v19 = vld [vmem:[%s15113_s17 + $0x628] ss:$16 sps:$4 sm:$0xff]  }
 0x2a7   : > { %9810 = vmatpush1.bf16.msra.mxu0 %v12578_v32  ;;  %10466 = vmatpush1.bf16.msra.mxu1 %v12581_v33  ;;  %v12674_v32 = vld [vmem:[%s15113_s17 + $0x62c] ss:$16 sps:$4 sm:$0xff]   ;;  %v4423_v33 = vcombine.high %v15281_v28, %v15281_v28  ;;  %v12675_v28 = vld [vmem:[%s15113_s17 + $0x640] ss:$16 sps:$4 sm:$0xff]  }
 0x2a8   : > { %9811 = vmatprep.subr.bf16.mxu0 %v12586_v34  ;;  %10467 = vmatprep.subr.bf16.mxu1 %v12589_v35  ;;  %v12669_v34 = vld [vmem:[%s15113_s17 + $0x620] ss:$16 sps:$4 sm:$0xff]   ;;  %v12677_v35 = vld [vmem:[%s15113_s17 + $0x644] ss:$16 sps:$4 sm:$0xff]  }
 0x2ab   : > { %9812 = vmatpush1.bf16.msra.mxu0 %v12584_v36  ;;  %10468 = vmatpush1.bf16.msra.mxu1 %v12587_v37  ;;  %v12680_v36 = vld [vmem:[%s15113_s17 + $0x64c] ss:$16 sps:$4 sm:$0xff]   ;;  %v12678_v37 = vld [vmem:[%s15113_s17 + $0x648] ss:$16 sps:$4 sm:$0xff]  }
 0x2ac   : > { %9813 = vmatprep.subr.bf16.mxu0 %v12592_v38  ;;  %10469 = vmatprep.subr.bf16.mxu1 %v12595_v39  ;;  %v12683_v38 = vld [vmem:[%s15113_s17 + $0x664] ss:$16 sps:$4 sm:$0xff]   ;;  %v12686_v39 = vld [vmem:[%s15113_s17 + $0x66c] ss:$16 sps:$4 sm:$0xff]  }
 0x2af   : > { %9814 = vmatpush1.bf16.msra.mxu0 %v12590_v40  ;;  %10470 = vmatpush1.bf16.msra.mxu1 %v12593_v41  ;;  %v12681_v40 = vld [vmem:[%s15113_s17 + $0x660] ss:$16 sps:$4 sm:$0xff]   ;;  %v12684_v41 = vld [vmem:[%s15113_s17 + $0x668] ss:$16 sps:$4 sm:$0xff]  }
 0x2b0   : > { %9815 = vmatprep.subr.bf16.mxu0 %v12598_v42  ;;  %10471 = vmatprep.subr.bf16.mxu1 %v12601_v43  ;;  %v12689_v42 = vld [vmem:[%s15113_s17 + $0x684] ss:$16 sps:$4 sm:$0xff]   ;;  %v12692_v43 = vld [vmem:[%s15113_s17 + $0x68c] ss:$16 sps:$4 sm:$0xff]  }
 0x2b3   : > { %9816 = vmatpush1.bf16.msra.mxu0 %v12596_v44  ;;  %10472 = vmatpush1.bf16.msra.mxu1 %v12599_v45  ;;  %v12687_v44 = vld [vmem:[%s15113_s17 + $0x680] ss:$16 sps:$4 sm:$0xff]   ;;  %v12690_v45 = vld [vmem:[%s15113_s17 + $0x688] ss:$16 sps:$4 sm:$0xff]  }
 0x2b4   : > { %9817 = vmatprep.subr.bf16.mxu0 %v12604_v46  ;;  %10473 = vmatprep.subr.bf16.mxu1 %v12607_v47  ;;  %v12695_v46 = vld [vmem:[%s15113_s17 + $0x6a4] ss:$16 sps:$4 sm:$0xff]   ;;  %v12698_v47 = vld [vmem:[%s15113_s17 + $0x6ac] ss:$16 sps:$4 sm:$0xff]  }
 0x2b7   : > { %9818 = vmatpush1.bf16.msra.mxu0 %v12602_v48  ;;  %10474 = vmatpush1.bf16.msra.mxu1 %v12605_v49  ;;  %v12693_v48 = vld [vmem:[%s15113_s17 + $0x6a0] ss:$16 sps:$4 sm:$0xff]   ;;  %v12696_v49 = vld [vmem:[%s15113_s17 + $0x6a8] ss:$16 sps:$4 sm:$0xff]  }
 0x2b8   : > { %9819 = vmatprep.subr.bf16.mxu0 %v12610_v50  ;;  %10475 = vmatprep.subr.bf16.mxu1 %v12613_v51  ;;  %v12701_v50 = vld [vmem:[%s15113_s17 + $0x6c4] ss:$16 sps:$4 sm:$0xff]   ;;  %v12704_v51 = vld [vmem:[%s15113_s17 + $0x6cc] ss:$16 sps:$4 sm:$0xff]  }
 0x2bb   : > { %9820 = vmatpush1.bf16.msra.mxu0 %v12608_v52  ;;  %10476 = vmatpush1.bf16.msra.mxu1 %v12611_v53  ;;  %v12699_v52 = vld [vmem:[%s15113_s17 + $0x6c0] ss:$16 sps:$4 sm:$0xff]   ;;  %v12702_v53 = vld [vmem:[%s15113_s17 + $0x6c8] ss:$16 sps:$4 sm:$0xff]  }
 0x2bc   : > { %9821 = vmatprep.subr.bf16.mxu0 %v12616_v54  ;;  %10477 = vmatprep.subr.bf16.mxu1 %v12619_v55  ;;  %v12707_v54 = vld [vmem:[%s15113_s17 + $0x6e4] ss:$16 sps:$4 sm:$0xff]   ;;  %v12710_v55 = vld [vmem:[%s15113_s17 + $0x6ec] ss:$16 sps:$4 sm:$0xff]  }
 0x2bf   : > { %9822 = vmatpush1.bf16.msra.mxu0 %v12614_v56  ;;  %10478 = vmatpush1.bf16.msra.mxu1 %v12617_v57  ;;  %v12705_v56 = vld [vmem:[%s15113_s17 + $0x6e0] ss:$16 sps:$4 sm:$0xff]   ;;  %v12708_v57 = vld [vmem:[%s15113_s17 + $0x6e8] ss:$16 sps:$4 sm:$0xff]  }
 0x2c0   : > { %9823 = vmatprep.subr.bf16.mxu0 %v12622_v58  ;;  %10479 = vmatprep.subr.bf16.mxu1 %v12625_v59  ;;  %v12713_v58 = vld [vmem:[%s15113_s17 + $0x704] ss:$16 sps:$4 sm:$0xff]   ;;  %v12716_v59 = vld [vmem:[%s15113_s17 + $0x70c] ss:$16 sps:$4 sm:$0xff]  }
 0x2c3   : > { %9824 = vmatpush1.bf16.msra.mxu0 %v12620_v60  ;;  %10480 = vmatpush1.bf16.msra.mxu1 %v12623_v61  ;;  %v12711_v60 = vld [vmem:[%s15113_s17 + $0x700] ss:$16 sps:$4 sm:$0xff]   ;;  %v12714_v61 = vld [vmem:[%s15113_s17 + $0x708] ss:$16 sps:$4 sm:$0xff]  }
 0x2c4   : > { %9825 = vmatprep.subr.bf16.mxu0 %v12628_v62  ;;  %10481 = vmatprep.subr.bf16.mxu1 %v12631_v63  ;;  %v12719_v62 = vld [vmem:[%s15113_s17 + $0x724] ss:$16 sps:$4 sm:$0xff]   ;;  %v12722_v63 = vld [vmem:[%s15113_s17 + $0x72c] ss:$16 sps:$4 sm:$0xff]  }
 0x2c7   : > { %9826 = vmatpush1.bf16.msra.mxu0 %v12626_v0  ;;  %10482 = vmatpush1.bf16.msra.mxu1 %v12629_v1  ;;  %v12717_v0 = vld [vmem:[%s15113_s17 + $0x720] ss:$16 sps:$4 sm:$0xff]   ;;  %v12720_v1 = vld [vmem:[%s15113_s17 + $0x728] ss:$16 sps:$4 sm:$0xff]  }
 0x2c8   : > { %9827 = vmatprep.subr.bf16.mxu0 %v12634_v2  ;;  %10483 = vmatprep.subr.bf16.mxu1 %v12637_v5  ;;  %v12725_v2 = vld [vmem:[%s15113_s17 + $0x744] ss:$16 sps:$4 sm:$0xff]   ;;  %v12728_v5 = vld [vmem:[%s15113_s17 + $0x74c] ss:$16 sps:$4 sm:$0xff]  }
 0x2cb   : > { %9828 = vmatpush1.bf16.msra.mxu0 %v12632_v6  ;;  %10484 = vmatpush1.bf16.msra.mxu1 %v12635_v7  ;;  %v12723_v6 = vld [vmem:[%s15113_s17 + $0x740] ss:$16 sps:$4 sm:$0xff]   ;;  %v12726_v7 = vld [vmem:[%s15113_s17 + $0x748] ss:$16 sps:$4 sm:$0xff]  }
 0x2cc   : > { %9829 = vmatprep.subr.bf16.mxu0 %v12640_v8  ;;  %10485 = vmatprep.subr.bf16.mxu1 %v12643_v9  ;;  %v12731_v8 = vld [vmem:[%s15113_s17 + $0x764] ss:$16 sps:$4 sm:$0xff]   ;;  %v12734_v9 = vld [vmem:[%s15113_s17 + $0x76c] ss:$16 sps:$4 sm:$0xff]  }
 0x2cf   : > { %9830 = vmatpush1.bf16.msra.mxu0 %v12638_v11  ;;  %10486 = vmatpush1.bf16.msra.mxu1 %v12641_v12  ;;  %v12729_v11 = vld [vmem:[%s15113_s17 + $0x760] ss:$16 sps:$4 sm:$0xff]   ;;  %v12732_v12 = vld [vmem:[%s15113_s17 + $0x768] ss:$16 sps:$4 sm:$0xff]  }
 0x2d0   : > { %9831 = vmatprep.subr.bf16.mxu0 %v12646_v13  ;;  %10487 = vmatprep.subr.bf16.mxu1 %v12649_v15  ;;  %v12737_v13 = vld [vmem:[%s15113_s17 + $0x784] ss:$16 sps:$4 sm:$0xff]   ;;  %v12740_v15 = vld [vmem:[%s15113_s17 + $0x78c] ss:$16 sps:$4 sm:$0xff]  }
 0x2d3   : > { %9832 = vmatpush1.bf16.msra.mxu0 %v12644_v16  ;;  %10488 = vmatpush1.bf16.msra.mxu1 %v12647_v17  ;;  %v12735_v16 = vld [vmem:[%s15113_s17 + $0x780] ss:$16 sps:$4 sm:$0xff]   ;;  %v12738_v17 = vld [vmem:[%s15113_s17 + $0x788] ss:$16 sps:$4 sm:$0xff]  }
 0x2d4   : > { %9833 = vmatprep.subr.bf16.mxu0 %v12652_v20  ;;  %10489 = vmatprep.subr.bf16.mxu1 %v12655_v21  ;;  %v12743_v20 = vld [vmem:[%s15113_s17 + $0x7a4] ss:$16 sps:$4 sm:$0xff]   ;;  %v12746_v21 = vld [vmem:[%s15113_s17 + $0x7ac] ss:$16 sps:$4 sm:$0xff]  }
 0x2d7   : > { %9834 = vmatpush1.bf16.msra.mxu0 %v12650_v3  ;;  %10490 = vmatpush1.bf16.msra.mxu1 %v12653_v23  ;;  %v12741_v3 = vld [vmem:[%s15113_s17 + $0x7a0] ss:$16 sps:$4 sm:$0xff]   ;;  %v12744_v23 = vld [vmem:[%s15113_s17 + $0x7a8] ss:$16 sps:$4 sm:$0xff]  }
 0x2d8   : > { %9835 = vmatprep.subr.bf16.mxu0 %v12658_v14  ;;  %10491 = vmatprep.subr.bf16.mxu1 %v12661_v24  ;;  %v12749_v14 = vld [vmem:[%s15113_s17 + $0x7c4] ss:$16 sps:$4 sm:$0xff]   ;;  %v12752_v24 = vld [vmem:[%s15113_s17 + $0x7cc] ss:$16 sps:$4 sm:$0xff]  }
 0x2db   : > { %9836 = vmatpush1.bf16.msra.mxu0 %v12656_v25  ;;  %10492 = vmatpush1.bf16.msra.mxu1 %v12659_v22  ;;  %v12747_v25 = vld [vmem:[%s15113_s17 + $0x7c0] ss:$16 sps:$4 sm:$0xff]   ;;  %v15413_v22 = vld.sshfl [vmem:[%s16353_s0 + $0x8] sm:$0xff pattern:$0x75316420] }
 0x2dc   : > { %9846 = vmatprep.subr.bf16.mxu0 %v12665_v26  ;;  %10502 = vmatprep.subr.bf16.mxu1 %v12668_v27  ;;  %v12750_v26 = vld [vmem:[%s15113_s17 + $0x7c8] ss:$16 sps:$4 sm:$0xff]   ;;  %v12755_v27 = vld [vmem:[%s15113_s17 + $0x7e4] ss:$16 sps:$4 sm:$0xff]  }
 0x2de   : > { %9838 = vmatmul.mubr.bf16.vlgmr.msra.gmra.mrb[0].mxu0 %v15349_v18  ;;  %10494 = vmatmul.mubr.bf16.vlgmr.msra.gmra.mrb[0].mxu1 %v15349_v18 }
 0x2df   : > { %9847 = vmatpush1.bf16.msra.mxu0 %v12663_v29  ;;  %10503 = vmatpush1.bf16.msra.mxu1 %v12666_v30  ;;  %v12758_v29 = vld [vmem:[%s15113_s17 + $0x7ec] ss:$16 sps:$4 sm:$0xff]   ;;  %v12753_v30 = vld [vmem:[%s15113_s17 + $0x7e0] ss:$16 sps:$4 sm:$0xff]  }
 0x2e0   : > { %9848 = vmatprep.subr.bf16.mxu0 %v12671_v31  ;;  %10504 = vmatprep.subr.bf16.mxu1 %v12674_v32  ;;  %v12756_v31 = vld [vmem:[%s15113_s17 + $0x7e8] ss:$16 sps:$4 sm:$0xff]   ;;  %v12761_v32 = vld [vmem:[%s15113_s17 + $0x804] ss:$16 sps:$4 sm:$0xff]  }
 0x2e1   : > { %9878 = vmatprep.mubr.bf16.mxu0 %v4423_v33  ;;  %10534 = vmatprep.mubr.bf16.mxu1 %v4423_v33  ;;  %v12764_v33 = vld [vmem:[%s15113_s17 + $0x80c] ss:$16 sps:$4 sm:$0xff]  }
 0x2e3   : > { %9849 = vmatpush1.bf16.msra.mxu0 %v12669_v34  ;;  %10505 = vmatpush1.bf16.msra.mxu1 %v12672_v19  ;;  %v4439_v34 = vcombine.high %v15413_v22, %v15413_v22  ;;  %v12759_v19 = vld [vmem:[%s15113_s17 + $0x800] ss:$16 sps:$4 sm:$0xff]  }
 0x2e4   : > { %9850 = vmatprep.subr.bf16.mxu0 %v12677_v35  ;;  %10506 = vmatprep.subr.bf16.mxu1 %v12680_v36  ;;  %v4421_v35 = vcombine.high %v15349_v18, %v15349_v18  ;;  %v12762_v36 = vld [vmem:[%s15113_s17 + $0x808] ss:$16 sps:$4 sm:$0xff]   ;;  %v12765_v18 = vld [vmem:[%s15113_s17 + $0x820] ss:$16 sps:$4 sm:$0xff]  }
 0x2e7   : > { %9851 = vmatpush1.bf16.msra.mxu0 %v12675_v28  ;;  %10507 = vmatpush1.bf16.msra.mxu1 %v12678_v37  ;;  %v12767_v28 = vld [vmem:[%s15113_s17 + $0x824] ss:$16 sps:$4 sm:$0xff]   ;;  %v12770_v37 = vld [vmem:[%s15113_s17 + $0x82c] ss:$16 sps:$4 sm:$0xff]  }
 0x2e8   : > { %9852 = vmatprep.subr.bf16.mxu0 %v12683_v38  ;;  %10508 = vmatprep.subr.bf16.mxu1 %v12686_v39  ;;  %v15431_v38 = vrot.slane %v4439_v34, %v15120_v10  ;;  %v12768_v39 = vld [vmem:[%s15113_s17 + $0x828] ss:$16 sps:$4 sm:$0xff]   ;;  %v12851_v34 = vld [vmem:[%s15113_s17 + $0x9e4] ss:$16 sps:$4 sm:$0xff]  }
 0x2eb   : > { %9853 = vmatpush1.bf16.msra.mxu0 %v12681_v40  ;;  %10509 = vmatpush1.bf16.msra.mxu1 %v12684_v41  ;;  %v12773_v40 = vld [vmem:[%s15113_s17 + $0x844] ss:$16 sps:$4 sm:$0xff]   ;;  %v12776_v41 = vld [vmem:[%s15113_s17 + $0x84c] ss:$16 sps:$4 sm:$0xff]  }
 0x2ec   : > { %9854 = vmatprep.subr.bf16.mxu0 %v12689_v42  ;;  %10510 = vmatprep.subr.bf16.mxu1 %v12692_v43  ;;  %v12771_v42 = vld [vmem:[%s15113_s17 + $0x840] ss:$16 sps:$4 sm:$0xff]   ;;  %v12774_v43 = vld [vmem:[%s15113_s17 + $0x848] ss:$16 sps:$4 sm:$0xff]  }
 0x2ef   : > { %9855 = vmatpush1.bf16.msra.mxu0 %v12687_v44  ;;  %10511 = vmatpush1.bf16.msra.mxu1 %v12690_v45  ;;  %v12779_v44 = vld [vmem:[%s15113_s17 + $0x864] ss:$16 sps:$4 sm:$0xff]   ;;  %v12782_v45 = vld [vmem:[%s15113_s17 + $0x86c] ss:$16 sps:$4 sm:$0xff]  }
 0x2f0   : > { %9856 = vmatprep.subr.bf16.mxu0 %v12695_v46  ;;  %10512 = vmatprep.subr.bf16.mxu1 %v12698_v47  ;;  %v12777_v46 = vld [vmem:[%s15113_s17 + $0x860] ss:$16 sps:$4 sm:$0xff]   ;;  %v12780_v47 = vld [vmem:[%s15113_s17 + $0x868] ss:$16 sps:$4 sm:$0xff]  }
 0x2f3   : > { %9857 = vmatpush1.bf16.msra.mxu0 %v12693_v48  ;;  %10513 = vmatpush1.bf16.msra.mxu1 %v12696_v49  ;;  %v12785_v48 = vld [vmem:[%s15113_s17 + $0x884] ss:$16 sps:$4 sm:$0xff]   ;;  %v12788_v49 = vld [vmem:[%s15113_s17 + $0x88c] ss:$16 sps:$4 sm:$0xff]  }
 0x2f4   : > { %9858 = vmatprep.subr.bf16.mxu0 %v12701_v50  ;;  %10514 = vmatprep.subr.bf16.mxu1 %v12704_v51  ;;  %v12783_v50 = vld [vmem:[%s15113_s17 + $0x880] ss:$16 sps:$4 sm:$0xff]   ;;  %v12786_v51 = vld [vmem:[%s15113_s17 + $0x888] ss:$16 sps:$4 sm:$0xff]  }
 0x2f7   : > { %9859 = vmatpush1.bf16.msra.mxu0 %v12699_v52  ;;  %10515 = vmatpush1.bf16.msra.mxu1 %v12702_v53  ;;  %v12791_v52 = vld [vmem:[%s15113_s17 + $0x8a4] ss:$16 sps:$4 sm:$0xff]   ;;  %v12794_v53 = vld [vmem:[%s15113_s17 + $0x8ac] ss:$16 sps:$4 sm:$0xff]  }
 0x2f8   : > { %9860 = vmatprep.subr.bf16.mxu0 %v12707_v54  ;;  %10516 = vmatprep.subr.bf16.mxu1 %v12710_v55  ;;  %v12789_v54 = vld [vmem:[%s15113_s17 + $0x8a0] ss:$16 sps:$4 sm:$0xff]   ;;  %v12792_v55 = vld [vmem:[%s15113_s17 + $0x8a8] ss:$16 sps:$4 sm:$0xff]  }
 0x2fb   : > { %9861 = vmatpush1.bf16.msra.mxu0 %v12705_v56  ;;  %10517 = vmatpush1.bf16.msra.mxu1 %v12708_v57  ;;  %v12797_v56 = vld [vmem:[%s15113_s17 + $0x8c4] ss:$16 sps:$4 sm:$0xff]   ;;  %v12800_v57 = vld [vmem:[%s15113_s17 + $0x8cc] ss:$16 sps:$4 sm:$0xff]  }
 0x2fc   : > { %9862 = vmatprep.subr.bf16.mxu0 %v12713_v58  ;;  %10518 = vmatprep.subr.bf16.mxu1 %v12716_v59  ;;  %v12795_v58 = vld [vmem:[%s15113_s17 + $0x8c0] ss:$16 sps:$4 sm:$0xff]   ;;  %v12798_v59 = vld [vmem:[%s15113_s17 + $0x8c8] ss:$16 sps:$4 sm:$0xff]  }
 0x2ff   : > { %9863 = vmatpush1.bf16.msra.mxu0 %v12711_v60  ;;  %10519 = vmatpush1.bf16.msra.mxu1 %v12714_v61  ;;  %v12803_v60 = vld [vmem:[%s15113_s17 + $0x8e4] ss:$16 sps:$4 sm:$0xff]   ;;  %v12806_v61 = vld [vmem:[%s15113_s17 + $0x8ec] ss:$16 sps:$4 sm:$0xff]  }
 0x300   : > { %9864 = vmatprep.subr.bf16.mxu0 %v12719_v62  ;;  %10520 = vmatprep.subr.bf16.mxu1 %v12722_v63  ;;  %v12801_v62 = vld [vmem:[%s15113_s17 + $0x8e0] ss:$16 sps:$4 sm:$0xff]   ;;  %v12804_v63 = vld [vmem:[%s15113_s17 + $0x8e8] ss:$16 sps:$4 sm:$0xff]  }
 0x303   : > { %9865 = vmatpush1.bf16.msra.mxu0 %v12717_v0  ;;  %10521 = vmatpush1.bf16.msra.mxu1 %v12720_v1  ;;  %v12809_v0 = vld [vmem:[%s15113_s17 + $0x904] ss:$16 sps:$4 sm:$0xff]   ;;  %v12812_v1 = vld [vmem:[%s15113_s17 + $0x90c] ss:$16 sps:$4 sm:$0xff]  }
 0x304   : > { %9866 = vmatprep.subr.bf16.mxu0 %v12725_v2  ;;  %10522 = vmatprep.subr.bf16.mxu1 %v12728_v5  ;;  %v12807_v2 = vld [vmem:[%s15113_s17 + $0x900] ss:$16 sps:$4 sm:$0xff]   ;;  %v12810_v5 = vld [vmem:[%s15113_s17 + $0x908] ss:$16 sps:$4 sm:$0xff]  }
 0x307   : > { %9867 = vmatpush1.bf16.msra.mxu0 %v12723_v6  ;;  %10523 = vmatpush1.bf16.msra.mxu1 %v12726_v7  ;;  %v12815_v6 = vld [vmem:[%s15113_s17 + $0x924] ss:$16 sps:$4 sm:$0xff]   ;;  %v12818_v7 = vld [vmem:[%s15113_s17 + $0x92c] ss:$16 sps:$4 sm:$0xff]  }
 0x308   : > { %9868 = vmatprep.subr.bf16.mxu0 %v12731_v8  ;;  %10524 = vmatprep.subr.bf16.mxu1 %v12734_v9  ;;  %v12813_v8 = vld [vmem:[%s15113_s17 + $0x920] ss:$16 sps:$4 sm:$0xff]   ;;  %v12816_v9 = vld [vmem:[%s15113_s17 + $0x928] ss:$16 sps:$4 sm:$0xff]  }
 0x30b   : > { %9869 = vmatpush1.bf16.msra.mxu0 %v12729_v11  ;;  %10525 = vmatpush1.bf16.msra.mxu1 %v12732_v12  ;;  %v12821_v11 = vld [vmem:[%s15113_s17 + $0x944] ss:$16 sps:$4 sm:$0xff]   ;;  %v12824_v12 = vld [vmem:[%s15113_s17 + $0x94c] ss:$16 sps:$4 sm:$0xff]  }
 0x30c   : > { %9870 = vmatprep.subr.bf16.mxu0 %v12737_v13  ;;  %10526 = vmatprep.subr.bf16.mxu1 %v12740_v15  ;;  %v12819_v13 = vld [vmem:[%s15113_s17 + $0x940] ss:$16 sps:$4 sm:$0xff]   ;;  %v12822_v15 = vld [vmem:[%s15113_s17 + $0x948] ss:$16 sps:$4 sm:$0xff]  }
 0x30f   : > { %9871 = vmatpush1.bf16.msra.mxu0 %v12735_v16  ;;  %10527 = vmatpush1.bf16.msra.mxu1 %v12738_v17  ;;  %v12827_v16 = vld [vmem:[%s15113_s17 + $0x964] ss:$16 sps:$4 sm:$0xff]   ;;  %v12830_v17 = vld [vmem:[%s15113_s17 + $0x96c] ss:$16 sps:$4 sm:$0xff]  }
 0x310   : > { %9872 = vmatprep.subr.bf16.mxu0 %v12743_v20  ;;  %10528 = vmatprep.subr.bf16.mxu1 %v12746_v21  ;;  %v12825_v20 = vld [vmem:[%s15113_s17 + $0x960] ss:$16 sps:$4 sm:$0xff]   ;;  %v12828_v21 = vld [vmem:[%s15113_s17 + $0x968] ss:$16 sps:$4 sm:$0xff]  }
 0x313   : > { %9873 = vmatpush1.bf16.msra.mxu0 %v12741_v3  ;;  %10529 = vmatpush1.bf16.msra.mxu1 %v12744_v23  ;;  %v12833_v3 = vld [vmem:[%s15113_s17 + $0x984] ss:$16 sps:$4 sm:$0xff]   ;;  %v12836_v23 = vld [vmem:[%s15113_s17 + $0x98c] ss:$16 sps:$4 sm:$0xff]  }
 0x314   : > { %9874 = vmatprep.subr.bf16.mxu0 %v12749_v14  ;;  %10530 = vmatprep.subr.bf16.mxu1 %v12752_v24  ;;  %v12831_v14 = vld [vmem:[%s15113_s17 + $0x980] ss:$16 sps:$4 sm:$0xff]   ;;  %v12834_v24 = vld [vmem:[%s15113_s17 + $0x988] ss:$16 sps:$4 sm:$0xff]  }
 0x317   : > { %9875 = vmatpush1.bf16.msra.mxu0 %v12747_v25  ;;  %10531 = vmatpush1.bf16.msra.mxu1 %v12750_v26  ;;  %v12839_v25 = vld [vmem:[%s15113_s17 + $0x9a4] ss:$16 sps:$4 sm:$0xff]   ;;  %v12842_v26 = vld [vmem:[%s15113_s17 + $0x9ac] ss:$16 sps:$4 sm:$0xff]  }
 0x318   : > { %9876 = vmatprep.subr.bf16.mxu0 %v12755_v27  ;;  %10532 = vmatprep.subr.bf16.mxu1 %v12758_v29  ;;  %v12837_v27 = vld [vmem:[%s15113_s17 + $0x9a0] ss:$16 sps:$4 sm:$0xff]   ;;  %v12840_v29 = vld [vmem:[%s15113_s17 + $0x9a8] ss:$16 sps:$4 sm:$0xff]  }
 0x31b   : > { %9877 = vmatpush1.bf16.msra.mxu0 %v12753_v30  ;;  %10533 = vmatpush1.bf16.msra.mxu1 %v12756_v31  ;;  %v12845_v30 = vld [vmem:[%s15113_s17 + $0x9c4] ss:$16 sps:$4 sm:$0xff]   ;;  %v12848_v31 = vld [vmem:[%s15113_s17 + $0x9cc] ss:$16 sps:$4 sm:$0xff]  }
 0x31c   : > { %9887 = vmatprep.subr.bf16.mxu0 %v12761_v32  ;;  %10543 = vmatprep.subr.bf16.mxu1 %v12764_v33  ;;  %v12843_v32 = vld [vmem:[%s15113_s17 + $0x9c0] ss:$16 sps:$4 sm:$0xff]   ;;  %v12846_v33 = vld [vmem:[%s15113_s17 + $0x9c8] ss:$16 sps:$4 sm:$0xff]  }
 0x31e   : > { %9879 = vmatmul.mubr.bf16.vlgmr.msra.gmra.mrb[0].mxu0 %v4421_v35  ;;  %10535 = vmatmul.mubr.bf16.vlgmr.msra.gmra.mrb[0].mxu1 %v4421_v35  ;;  %v12849_v35 = vld [vmem:[%s15113_s17 + $0x9e0] ss:$16 sps:$4 sm:$0xff]  }
 0x31f   : > { %9888 = vmatpush1.bf16.msra.mxu0 %v12759_v19  ;;  %10544 = vmatpush1.bf16.msra.mxu1 %v12762_v36  ;;  %v12854_v19 = vld [vmem:[%s15113_s17 + $0x9ec] ss:$16 sps:$4 sm:$0xff]   ;;  %v12852_v36 = vld [vmem:[%s15113_s17 + $0x9e8] ss:$16 sps:$4 sm:$0xff]  }
 0x320   : > { %9889 = vmatprep.subr.bf16.mxu0 %v12767_v28  ;;  %10545 = vmatprep.subr.bf16.mxu1 %v12770_v37  ;;  %v12857_v28 = vld [vmem:[%s15113_s17 + $0xa04] ss:$16 sps:$4 sm:$0xff]   ;;  %v12860_v37 = vld [vmem:[%s15113_s17 + $0xa0c] ss:$16 sps:$4 sm:$0xff]  }
 0x321   : > { %9919 = vmatprep.mubr.bf16.mxu0 %v15431_v38  ;;  %10575 = vmatprep.mubr.bf16.mxu1 %v15431_v38 }
 0x323   : > { %9890 = vmatpush1.bf16.msra.mxu0 %v12765_v18  ;;  %10546 = vmatpush1.bf16.msra.mxu1 %v12768_v39  ;;  %v15497_v18 = vrot.slane %v15413_v22, %v15120_v10  ;;  %v12855_v39 = vld [vmem:[%s15113_s17 + $0xa00] ss:$16 sps:$4 sm:$0xff]  }
 0x324   : > { %9891 = vmatprep.subr.bf16.mxu0 %v12773_v40  ;;  %10547 = vmatprep.subr.bf16.mxu1 %v12776_v41  ;;  %v12858_v40 = vld [vmem:[%s15113_s17 + $0xa08] ss:$16 sps:$4 sm:$0xff]   ;;  %v12863_v41 = vld [vmem:[%s15113_s17 + $0xa24] ss:$16 sps:$4 sm:$0xff]   ;;  %v12861_v22 = vld [vmem:[%s15113_s17 + $0xa20] ss:$16 sps:$4 sm:$0xff]  }
 0x327   : > { %9892 = vmatpush1.bf16.msra.mxu0 %v12771_v42  ;;  %10548 = vmatpush1.bf16.msra.mxu1 %v12774_v43  ;;  %v12866_v42 = vld [vmem:[%s15113_s17 + $0xa2c] ss:$16 sps:$4 sm:$0xff]   ;;  %v4471_v43 = vcombine.high %v15431_v38, %v15431_v38  ;;  %v12867_v38 = vld [vmem:[%s15113_s17 + $0xa40] ss:$16 sps:$4 sm:$0xff]  }
 0x328   : > { %9893 = vmatprep.subr.bf16.mxu0 %v12779_v44  ;;  %10549 = vmatprep.subr.bf16.mxu1 %v12782_v45  ;;  %v12864_v44 = vld [vmem:[%s15113_s17 + $0xa28] ss:$16 sps:$4 sm:$0xff]   ;;  %v12869_v45 = vld [vmem:[%s15113_s17 + $0xa44] ss:$16 sps:$4 sm:$0xff]  }
 0x32b   : > { %9894 = vmatpush1.bf16.msra.mxu0 %v12777_v46  ;;  %10550 = vmatpush1.bf16.msra.mxu1 %v12780_v47  ;;  %v12872_v46 = vld [vmem:[%s15113_s17 + $0xa4c] ss:$16 sps:$4 sm:$0xff]   ;;  %v12870_v47 = vld [vmem:[%s15113_s17 + $0xa48] ss:$16 sps:$4 sm:$0xff]  }
 0x32c   : > { %9895 = vmatprep.subr.bf16.mxu0 %v12785_v48  ;;  %10551 = vmatprep.subr.bf16.mxu1 %v12788_v49  ;;  %v12875_v48 = vld [vmem:[%s15113_s17 + $0xa64] ss:$16 sps:$4 sm:$0xff]   ;;  %v12878_v49 = vld [vmem:[%s15113_s17 + $0xa6c] ss:$16 sps:$4 sm:$0xff]  }
 0x32f   : > { %9896 = vmatpush1.bf16.msra.mxu0 %v12783_v50  ;;  %10552 = vmatpush1.bf16.msra.mxu1 %v12786_v51  ;;  %v12873_v50 = vld [vmem:[%s15113_s17 + $0xa60] ss:$16 sps:$4 sm:$0xff]   ;;  %v12876_v51 = vld [vmem:[%s15113_s17 + $0xa68] ss:$16 sps:$4 sm:$0xff]  }
 0x330   : > { %9897 = vmatprep.subr.bf16.mxu0 %v12791_v52  ;;  %10553 = vmatprep.subr.bf16.mxu1 %v12794_v53  ;;  %v12881_v52 = vld [vmem:[%s15113_s17 + $0xa84] ss:$16 sps:$4 sm:$0xff]   ;;  %v12884_v53 = vld [vmem:[%s15113_s17 + $0xa8c] ss:$16 sps:$4 sm:$0xff]  }
 0x333   : > { %9898 = vmatpush1.bf16.msra.mxu0 %v12789_v54  ;;  %10554 = vmatpush1.bf16.msra.mxu1 %v12792_v55  ;;  %v12879_v54 = vld [vmem:[%s15113_s17 + $0xa80] ss:$16 sps:$4 sm:$0xff]   ;;  %v12882_v55 = vld [vmem:[%s15113_s17 + $0xa88] ss:$16 sps:$4 sm:$0xff]  }
 0x334   : > { %9899 = vmatprep.subr.bf16.mxu0 %v12797_v56  ;;  %10555 = vmatprep.subr.bf16.mxu1 %v12800_v57  ;;  %v12887_v56 = vld [vmem:[%s15113_s17 + $0xaa4] ss:$16 sps:$4 sm:$0xff]   ;;  %v12890_v57 = vld [vmem:[%s15113_s17 + $0xaac] ss:$16 sps:$4 sm:$0xff]  }
 0x337   : > { %9900 = vmatpush1.bf16.msra.mxu0 %v12795_v58  ;;  %10556 = vmatpush1.bf16.msra.mxu1 %v12798_v59  ;;  %v12885_v58 = vld [vmem:[%s15113_s17 + $0xaa0] ss:$16 sps:$4 sm:$0xff]   ;;  %v12888_v59 = vld [vmem:[%s15113_s17 + $0xaa8] ss:$16 sps:$4 sm:$0xff]  }
 0x338   : > { %9901 = vmatprep.subr.bf16.mxu0 %v12803_v60  ;;  %10557 = vmatprep.subr.bf16.mxu1 %v12806_v61  ;;  %v12893_v60 = vld [vmem:[%s15113_s17 + $0xac4] ss:$16 sps:$4 sm:$0xff]   ;;  %v12896_v61 = vld [vmem:[%s15113_s17 + $0xacc] ss:$16 sps:$4 sm:$0xff]  }
 0x33b   : > { %9902 = vmatpush1.bf16.msra.mxu0 %v12801_v62  ;;  %10558 = vmatpush1.bf16.msra.mxu1 %v12804_v63  ;;  %v12891_v62 = vld [vmem:[%s15113_s17 + $0xac0] ss:$16 sps:$4 sm:$0xff]   ;;  %v12894_v63 = vld [vmem:[%s15113_s17 + $0xac8] ss:$16 sps:$4 sm:$0xff]  }
 0x33c   : > { %9903 = vmatprep.subr.bf16.mxu0 %v12809_v0  ;;  %10559 = vmatprep.subr.bf16.mxu1 %v12812_v1  ;;  %v12899_v0 = vld [vmem:[%s15113_s17 + $0xae4] ss:$16 sps:$4 sm:$0xff]   ;;  %v12902_v1 = vld [vmem:[%s15113_s17 + $0xaec] ss:$16 sps:$4 sm:$0xff]  }
 0x33f   : > { %9904 = vmatpush1.bf16.msra.mxu0 %v12807_v2  ;;  %10560 = vmatpush1.bf16.msra.mxu1 %v12810_v5  ;;  %v12897_v2 = vld [vmem:[%s15113_s17 + $0xae0] ss:$16 sps:$4 sm:$0xff]   ;;  %v12900_v5 = vld [vmem:[%s15113_s17 + $0xae8] ss:$16 sps:$4 sm:$0xff]  }
 0x340   : > { %9905 = vmatprep.subr.bf16.mxu0 %v12815_v6  ;;  %10561 = vmatprep.subr.bf16.mxu1 %v12818_v7  ;;  %v12905_v6 = vld [vmem:[%s15113_s17 + $0xb04] ss:$16 sps:$4 sm:$0xff]   ;;  %v12908_v7 = vld [vmem:[%s15113_s17 + $0xb0c] ss:$16 sps:$4 sm:$0xff]  }
 0x343   : > { %9906 = vmatpush1.bf16.msra.mxu0 %v12813_v8  ;;  %10562 = vmatpush1.bf16.msra.mxu1 %v12816_v9  ;;  %v12903_v8 = vld [vmem:[%s15113_s17 + $0xb00] ss:$16 sps:$4 sm:$0xff]   ;;  %v12906_v9 = vld [vmem:[%s15113_s17 + $0xb08] ss:$16 sps:$4 sm:$0xff]  }
 0x344   : > { %9907 = vmatprep.subr.bf16.mxu0 %v12821_v11  ;;  %10563 = vmatprep.subr.bf16.mxu1 %v12824_v12  ;;  %v12911_v11 = vld [vmem:[%s15113_s17 + $0xb24] ss:$16 sps:$4 sm:$0xff]   ;;  %v12914_v12 = vld [vmem:[%s15113_s17 + $0xb2c] ss:$16 sps:$4 sm:$0xff]  }
 0x347   : > { %9908 = vmatpush1.bf16.msra.mxu0 %v12819_v13  ;;  %10564 = vmatpush1.bf16.msra.mxu1 %v12822_v15  ;;  %v12909_v13 = vld [vmem:[%s15113_s17 + $0xb20] ss:$16 sps:$4 sm:$0xff]   ;;  %v12912_v15 = vld [vmem:[%s15113_s17 + $0xb28] ss:$16 sps:$4 sm:$0xff]  }
 0x348   : > { %9909 = vmatprep.subr.bf16.mxu0 %v12827_v16  ;;  %10565 = vmatprep.subr.bf16.mxu1 %v12830_v17  ;;  %v12917_v16 = vld [vmem:[%s15113_s17 + $0xb44] ss:$16 sps:$4 sm:$0xff]   ;;  %v12920_v17 = vld [vmem:[%s15113_s17 + $0xb4c] ss:$16 sps:$4 sm:$0xff]  }
 0x34b   : > { %9910 = vmatpush1.bf16.msra.mxu0 %v12825_v20  ;;  %10566 = vmatpush1.bf16.msra.mxu1 %v12828_v21  ;;  %v12915_v20 = vld [vmem:[%s15113_s17 + $0xb40] ss:$16 sps:$4 sm:$0xff]   ;;  %v12918_v21 = vld [vmem:[%s15113_s17 + $0xb48] ss:$16 sps:$4 sm:$0xff]  }
 0x34c   : > { %9911 = vmatprep.subr.bf16.mxu0 %v12833_v3  ;;  %10567 = vmatprep.subr.bf16.mxu1 %v12836_v23  ;;  %v12923_v3 = vld [vmem:[%s15113_s17 + $0xb64] ss:$16 sps:$4 sm:$0xff]   ;;  %v12926_v23 = vld [vmem:[%s15113_s17 + $0xb6c] ss:$16 sps:$4 sm:$0xff]  }
 0x34f   : > { %9912 = vmatpush1.bf16.msra.mxu0 %v12831_v14  ;;  %10568 = vmatpush1.bf16.msra.mxu1 %v12834_v24  ;;  %v12921_v14 = vld [vmem:[%s15113_s17 + $0xb60] ss:$16 sps:$4 sm:$0xff]   ;;  %v12924_v24 = vld [vmem:[%s15113_s17 + $0xb68] ss:$16 sps:$4 sm:$0xff]  }
 0x350   : > { %9913 = vmatprep.subr.bf16.mxu0 %v12839_v25  ;;  %10569 = vmatprep.subr.bf16.mxu1 %v12842_v26  ;;  %v12929_v25 = vld [vmem:[%s15113_s17 + $0xb84] ss:$16 sps:$4 sm:$0xff]   ;;  %v12932_v26 = vld [vmem:[%s15113_s17 + $0xb8c] ss:$16 sps:$4 sm:$0xff]  }
 0x353   : > { %9914 = vmatpush1.bf16.msra.mxu0 %v12837_v27  ;;  %10570 = vmatpush1.bf16.msra.mxu1 %v12840_v29  ;;  %v12927_v27 = vld [vmem:[%s15113_s17 + $0xb80] ss:$16 sps:$4 sm:$0xff]   ;;  %v12930_v29 = vld [vmem:[%s15113_s17 + $0xb88] ss:$16 sps:$4 sm:$0xff]  }
 0x354   : > { %9915 = vmatprep.subr.bf16.mxu0 %v12845_v30  ;;  %10571 = vmatprep.subr.bf16.mxu1 %v12848_v31  ;;  %v12935_v30 = vld [vmem:[%s15113_s17 + $0xba4] ss:$16 sps:$4 sm:$0xff]   ;;  %v12938_v31 = vld [vmem:[%s15113_s17 + $0xbac] ss:$16 sps:$4 sm:$0xff]  }
 0x357   : > { %9916 = vmatpush1.bf16.msra.mxu0 %v12843_v32  ;;  %10572 = vmatpush1.bf16.msra.mxu1 %v12846_v33  ;;  %v12933_v32 = vld [vmem:[%s15113_s17 + $0xba0] ss:$16 sps:$4 sm:$0xff]   ;;  %v12936_v33 = vld [vmem:[%s15113_s17 + $0xba8] ss:$16 sps:$4 sm:$0xff]  }
 0x358   : > { %9917 = vmatprep.subr.bf16.mxu0 %v12851_v34  ;;  %10573 = vmatprep.subr.bf16.mxu1 %v12854_v19  ;;  %v12941_v34 = vld [vmem:[%s15113_s17 + $0xbc4] ss:$16 sps:$4 sm:$0xff]   ;;  %v12944_v19 = vld [vmem:[%s15113_s17 + $0xbcc] ss:$16 sps:$4 sm:$0xff]  }
 0x35b   : > { %9918 = vmatpush1.bf16.msra.mxu0 %v12849_v35  ;;  %10574 = vmatpush1.bf16.msra.mxu1 %v12852_v36  ;;  %v13914_v35 = vld [vmem:[%s16353_s0 + $0x8] sm:$0xff] }
 0x35c   : > { %9928 = vmatprep.subr.bf16.mxu0 %v12857_v28  ;;  %10584 = vmatprep.subr.bf16.mxu1 %v12860_v37  ;;  %v4424_v36 = vcombine.high %v13914_v35, %v13914_v35  ;;  %v12939_v28 = vld [vmem:[%s15113_s17 + $0xbc0] ss:$16 sps:$4 sm:$0xff]   ;;  %v12942_v37 = vld [vmem:[%s15113_s17 + $0xbc8] ss:$16 sps:$4 sm:$0xff]  }
 0x35d   : > { %v13023_v35 = vld [vmem:[%s15113_s17 + $0xd80] ss:$16 sps:$4 sm:$0xff]  }
 0x35e   : > { %9920 = vmatmul.mubr.bf16.vlgmr.msra.gmra.mrb[0].mxu0 %v15497_v18  ;;  %10576 = vmatmul.mubr.bf16.vlgmr.msra.gmra.mrb[0].mxu1 %v15497_v18 }
 0x35f   : > { %9929 = vmatpush1.bf16.msra.mxu0 %v12855_v39  ;;  %10585 = vmatpush1.bf16.msra.mxu1 %v12858_v40  ;;  %v12947_v39 = vld [vmem:[%s15113_s17 + $0xbe4] ss:$16 sps:$4 sm:$0xff]   ;;  %v12950_v40 = vld [vmem:[%s15113_s17 + $0xbec] ss:$16 sps:$4 sm:$0xff]  }
 0x360   : > { %9930 = vmatprep.subr.bf16.mxu0 %v12863_v41  ;;  %10586 = vmatprep.subr.bf16.mxu1 %v12866_v42  ;;  %v15567_v41 = vrot.slane %v4424_v36, %v15120_v10  ;;  %v12945_v42 = vld [vmem:[%s15113_s17 + $0xbe0] ss:$16 sps:$4 sm:$0xff]   ;;  %v13026_v36 = vld [vmem:[%s15113_s17 + $0xd88] ss:$16 sps:$4 sm:$0xff]  }
 0x361   : > { %9960 = vmatprep.mubr.bf16.mxu0 %v4471_v43  ;;  %10616 = vmatprep.mubr.bf16.mxu1 %v4471_v43  ;;  %v12948_v43 = vld [vmem:[%s15113_s17 + $0xbe8] ss:$16 sps:$4 sm:$0xff]  }
 0x363   : > { %9931 = vmatpush1.bf16.msra.mxu0 %v12861_v22  ;;  %10587 = vmatpush1.bf16.msra.mxu1 %v12864_v44  ;;  %v12953_v22 = vld [vmem:[%s15113_s17 + $0xc04] ss:$16 sps:$4 sm:$0xff]   ;;  %v12956_v44 = vld [vmem:[%s15113_s17 + $0xc0c] ss:$16 sps:$4 sm:$0xff]  }
 0x364   : > { %9932 = vmatprep.subr.bf16.mxu0 %v12869_v45  ;;  %10588 = vmatprep.subr.bf16.mxu1 %v12872_v46  ;;  %v4440_v45 = vcombine.high %v15567_v41, %v15567_v41  ;;  %v4469_v46 = vcombine.high %v15497_v18, %v15497_v18  ;;  %v12957_v18 = vld [vmem:[%s15113_s17 + $0xc20] ss:$16 sps:$4 sm:$0xff]  }
 0x367   : > { %9933 = vmatpush1.bf16.msra.mxu0 %v12867_v38  ;;  %10589 = vmatpush1.bf16.msra.mxu1 %v12870_v47  ;;  %v12951_v38 = vld [vmem:[%s15113_s17 + $0xc00] ss:$16 sps:$4 sm:$0xff]   ;;  %v12954_v47 = vld [vmem:[%s15113_s17 + $0xc08] ss:$16 sps:$4 sm:$0xff]  }
 0x368   : > { %9934 = vmatprep.subr.bf16.mxu0 %v12875_v48  ;;  %10590 = vmatprep.subr.bf16.mxu1 %v12878_v49  ;;  %v12959_v48 = vld [vmem:[%s15113_s17 + $0xc24] ss:$16 sps:$4 sm:$0xff]   ;;  %v12962_v49 = vld [vmem:[%s15113_s17 + $0xc2c] ss:$16 sps:$4 sm:$0xff]  }
 0x36b   : > { %9935 = vmatpush1.bf16.msra.mxu0 %v12873_v50  ;;  %10591 = vmatpush1.bf16.msra.mxu1 %v12876_v51  ;;  %v15582_v50 = vrot.slane %v4440_v45, %v15120_v10  ;;  %v12960_v51 = vld [vmem:[%s15113_s17 + $0xc28] ss:$16 sps:$4 sm:$0xff]   ;;  %v13043_v45 = vld [vmem:[%s15113_s17 + $0xde4] ss:$16 sps:$4 sm:$0xff]  }
 0x36c   : > { %9936 = vmatprep.subr.bf16.mxu0 %v12881_v52  ;;  %10592 = vmatprep.subr.bf16.mxu1 %v12884_v53  ;;  %v12965_v52 = vld [vmem:[%s15113_s17 + $0xc44] ss:$16 sps:$4 sm:$0xff]   ;;  %v12968_v53 = vld [vmem:[%s15113_s17 + $0xc4c] ss:$16 sps:$4 sm:$0xff]  }
 0x36f   : > { %9937 = vmatpush1.bf16.msra.mxu0 %v12879_v54  ;;  %10593 = vmatpush1.bf16.msra.mxu1 %v12882_v55  ;;  %v12963_v54 = vld [vmem:[%s15113_s17 + $0xc40] ss:$16 sps:$4 sm:$0xff]   ;;  %v12966_v55 = vld [vmem:[%s15113_s17 + $0xc48] ss:$16 sps:$4 sm:$0xff]  }
 0x370   : > { %9938 = vmatprep.subr.bf16.mxu0 %v12887_v56  ;;  %10594 = vmatprep.subr.bf16.mxu1 %v12890_v57  ;;  %v12971_v56 = vld [vmem:[%s15113_s17 + $0xc64] ss:$16 sps:$4 sm:$0xff]   ;;  %v12974_v57 = vld [vmem:[%s15113_s17 + $0xc6c] ss:$16 sps:$4 sm:$0xff]  }
 0x373   : > { %9939 = vmatpush1.bf16.msra.mxu0 %v12885_v58  ;;  %10595 = vmatpush1.bf16.msra.mxu1 %v12888_v59  ;;  %v12969_v58 = vld [vmem:[%s15113_s17 + $0xc60] ss:$16 sps:$4 sm:$0xff]   ;;  %v12972_v59 = vld [vmem:[%s15113_s17 + $0xc68] ss:$16 sps:$4 sm:$0xff]  }
 0x374   : > { %9940 = vmatprep.subr.bf16.mxu0 %v12893_v60  ;;  %10596 = vmatprep.subr.bf16.mxu1 %v12896_v61  ;;  %v12977_v60 = vld [vmem:[%s15113_s17 + $0xc84] ss:$16 sps:$4 sm:$0xff]   ;;  %v12980_v61 = vld [vmem:[%s15113_s17 + $0xc8c] ss:$16 sps:$4 sm:$0xff]  }
 0x377   : > { %9941 = vmatpush1.bf16.msra.mxu0 %v12891_v62  ;;  %10597 = vmatpush1.bf16.msra.mxu1 %v12894_v63  ;;  %v12975_v62 = vld [vmem:[%s15113_s17 + $0xc80] ss:$16 sps:$4 sm:$0xff]   ;;  %v12978_v63 = vld [vmem:[%s15113_s17 + $0xc88] ss:$16 sps:$4 sm:$0xff]  }
 0x378   : > { %9942 = vmatprep.subr.bf16.mxu0 %v12899_v0  ;;  %10598 = vmatprep.subr.bf16.mxu1 %v12902_v1  ;;  %v12983_v0 = vld [vmem:[%s15113_s17 + $0xca4] ss:$16 sps:$4 sm:$0xff]   ;;  %v12986_v1 = vld [vmem:[%s15113_s17 + $0xcac] ss:$16 sps:$4 sm:$0xff]  }
 0x37b   : > { %9943 = vmatpush1.bf16.msra.mxu0 %v12897_v2  ;;  %10599 = vmatpush1.bf16.msra.mxu1 %v12900_v5  ;;  %v12981_v2 = vld [vmem:[%s15113_s17 + $0xca0] ss:$16 sps:$4 sm:$0xff]   ;;  %v12984_v5 = vld [vmem:[%s15113_s17 + $0xca8] ss:$16 sps:$4 sm:$0xff]  }
 0x37c   : > { %9944 = vmatprep.subr.bf16.mxu0 %v12905_v6  ;;  %10600 = vmatprep.subr.bf16.mxu1 %v12908_v7  ;;  %v12989_v6 = vld [vmem:[%s15113_s17 + $0xcc4] ss:$16 sps:$4 sm:$0xff]   ;;  %v12992_v7 = vld [vmem:[%s15113_s17 + $0xccc] ss:$16 sps:$4 sm:$0xff]  }
 0x37f   : > { %9945 = vmatpush1.bf16.msra.mxu0 %v12903_v8  ;;  %10601 = vmatpush1.bf16.msra.mxu1 %v12906_v9  ;;  %v12987_v8 = vld [vmem:[%s15113_s17 + $0xcc0] ss:$16 sps:$4 sm:$0xff]   ;;  %v12990_v9 = vld [vmem:[%s15113_s17 + $0xcc8] ss:$16 sps:$4 sm:$0xff]  }
 0x380   : > { %9946 = vmatprep.subr.bf16.mxu0 %v12911_v11  ;;  %10602 = vmatprep.subr.bf16.mxu1 %v12914_v12  ;;  %v12995_v11 = vld [vmem:[%s15113_s17 + $0xce4] ss:$16 sps:$4 sm:$0xff]   ;;  %v12998_v12 = vld [vmem:[%s15113_s17 + $0xcec] ss:$16 sps:$4 sm:$0xff]  }
 0x383   : > { %9947 = vmatpush1.bf16.msra.mxu0 %v12909_v13  ;;  %10603 = vmatpush1.bf16.msra.mxu1 %v12912_v15  ;;  %v12993_v13 = vld [vmem:[%s15113_s17 + $0xce0] ss:$16 sps:$4 sm:$0xff]   ;;  %v12996_v15 = vld [vmem:[%s15113_s17 + $0xce8] ss:$16 sps:$4 sm:$0xff]  }
 0x384   : > { %9948 = vmatprep.subr.bf16.mxu0 %v12917_v16  ;;  %10604 = vmatprep.subr.bf16.mxu1 %v12920_v17  ;;  %v13001_v16 = vld [vmem:[%s15113_s17 + $0xd04] ss:$16 sps:$4 sm:$0xff]   ;;  %v13004_v17 = vld [vmem:[%s15113_s17 + $0xd0c] ss:$16 sps:$4 sm:$0xff]  }
 0x387   : > { %9949 = vmatpush1.bf16.msra.mxu0 %v12915_v20  ;;  %10605 = vmatpush1.bf16.msra.mxu1 %v12918_v21  ;;  %v12999_v20 = vld [vmem:[%s15113_s17 + $0xd00] ss:$16 sps:$4 sm:$0xff]   ;;  %v13002_v21 = vld [vmem:[%s15113_s17 + $0xd08] ss:$16 sps:$4 sm:$0xff]  }
 0x388   : > { %9950 = vmatprep.subr.bf16.mxu0 %v12923_v3  ;;  %10606 = vmatprep.subr.bf16.mxu1 %v12926_v23  ;;  %v13007_v3 = vld [vmem:[%s15113_s17 + $0xd24] ss:$16 sps:$4 sm:$0xff]   ;;  %v13010_v23 = vld [vmem:[%s15113_s17 + $0xd2c] ss:$16 sps:$4 sm:$0xff]  }
 0x38b   : > { %9951 = vmatpush1.bf16.msra.mxu0 %v12921_v14  ;;  %10607 = vmatpush1.bf16.msra.mxu1 %v12924_v24  ;;  %v13005_v14 = vld [vmem:[%s15113_s17 + $0xd20] ss:$16 sps:$4 sm:$0xff]   ;;  %v13008_v24 = vld [vmem:[%s15113_s17 + $0xd28] ss:$16 sps:$4 sm:$0xff]  }
 0x38c   : > { %9952 = vmatprep.subr.bf16.mxu0 %v12929_v25  ;;  %10608 = vmatprep.subr.bf16.mxu1 %v12932_v26  ;;  %v13013_v25 = vld [vmem:[%s15113_s17 + $0xd44] ss:$16 sps:$4 sm:$0xff]   ;;  %v13016_v26 = vld [vmem:[%s15113_s17 + $0xd4c] ss:$16 sps:$4 sm:$0xff]  }
 0x38f   : > { %9953 = vmatpush1.bf16.msra.mxu0 %v12927_v27  ;;  %10609 = vmatpush1.bf16.msra.mxu1 %v12930_v29  ;;  %v13011_v27 = vld [vmem:[%s15113_s17 + $0xd40] ss:$16 sps:$4 sm:$0xff]   ;;  %v13014_v29 = vld [vmem:[%s15113_s17 + $0xd48] ss:$16 sps:$4 sm:$0xff]  }
 0x390   : > { %9954 = vmatprep.subr.bf16.mxu0 %v12935_v30  ;;  %10610 = vmatprep.subr.bf16.mxu1 %v12938_v31  ;;  %v13019_v30 = vld [vmem:[%s15113_s17 + $0xd64] ss:$16 sps:$4 sm:$0xff]   ;;  %v13022_v31 = vld [vmem:[%s15113_s17 + $0xd6c] ss:$16 sps:$4 sm:$0xff]  }
 0x393   : > { %9955 = vmatpush1.bf16.msra.mxu0 %v12933_v32  ;;  %10611 = vmatpush1.bf16.msra.mxu1 %v12936_v33  ;;  %v13017_v32 = vld [vmem:[%s15113_s17 + $0xd60] ss:$16 sps:$4 sm:$0xff]   ;;  %v13020_v33 = vld [vmem:[%s15113_s17 + $0xd68] ss:$16 sps:$4 sm:$0xff]  }
 0x394   : > { %9956 = vmatprep.subr.bf16.mxu0 %v12941_v34  ;;  %10612 = vmatprep.subr.bf16.mxu1 %v12944_v19  ;;  %v13025_v34 = vld [vmem:[%s15113_s17 + $0xd84] ss:$16 sps:$4 sm:$0xff]   ;;  %v13028_v19 = vld [vmem:[%s15113_s17 + $0xd8c] ss:$16 sps:$4 sm:$0xff]  }
 0x397   : > { %9957 = vmatpush1.bf16.msra.mxu0 %v12939_v28  ;;  %10613 = vmatpush1.bf16.msra.mxu1 %v12942_v37  ;;  %v13031_v28 = vld [vmem:[%s15113_s17 + $0xda4] ss:$16 sps:$4 sm:$0xff]   ;;  %v13034_v37 = vld [vmem:[%s15113_s17 + $0xdac] ss:$16 sps:$4 sm:$0xff]  }
 0x398   : > { %9958 = vmatprep.subr.bf16.mxu0 %v12947_v39  ;;  %10614 = vmatprep.subr.bf16.mxu1 %v12950_v40  ;;  %v13029_v39 = vld [vmem:[%s15113_s17 + $0xda0] ss:$16 sps:$4 sm:$0xff]   ;;  %v13032_v40 = vld [vmem:[%s15113_s17 + $0xda8] ss:$16 sps:$4 sm:$0xff]  }
 0x39b   : > { %9959 = vmatpush1.bf16.msra.mxu0 %v12945_v42  ;;  %10615 = vmatpush1.bf16.msra.mxu1 %v12948_v43  ;;  %v13037_v42 = vld [vmem:[%s15113_s17 + $0xdc4] ss:$16 sps:$4 sm:$0xff]   ;;  %v13040_v43 = vld [vmem:[%s15113_s17 + $0xdcc] ss:$16 sps:$4 sm:$0xff]  }
 0x39c   : > { %9969 = vmatprep.subr.bf16.mxu0 %v12953_v22  ;;  %10625 = vmatprep.subr.bf16.mxu1 %v12956_v44  ;;  %v13035_v22 = vld [vmem:[%s15113_s17 + $0xdc0] ss:$16 sps:$4 sm:$0xff]   ;;  %v13038_v44 = vld [vmem:[%s15113_s17 + $0xdc8] ss:$16 sps:$4 sm:$0xff]  }
 0x39e   : > { %9961 = vmatmul.mubr.bf16.vlgmr.msra.gmra.mrb[0].mxu0 %v4469_v46  ;;  %10617 = vmatmul.mubr.bf16.vlgmr.msra.gmra.mrb[0].mxu1 %v4469_v46  ;;  %v13046_v46 = vld [vmem:[%s15113_s17 + $0xdec] ss:$16 sps:$4 sm:$0xff]  }
 0x39f   : > { %9970 = vmatpush1.bf16.msra.mxu0 %v12951_v38  ;;  %10626 = vmatpush1.bf16.msra.mxu1 %v12954_v47  ;;  %v13041_v38 = vld [vmem:[%s15113_s17 + $0xde0] ss:$16 sps:$4 sm:$0xff]   ;;  %v13044_v47 = vld [vmem:[%s15113_s17 + $0xde8] ss:$16 sps:$4 sm:$0xff]  }
 0x3a0   : > { %9971 = vmatprep.subr.bf16.mxu0 %v12959_v48  ;;  %10627 = vmatprep.subr.bf16.mxu1 %v12962_v49  ;;  %v13050_v48 = vld [vmem:[%s15113_s17 + $0xe04] ss:$16 sps:$4 sm:$0xff]   ;;  %v13053_v49 = vld [vmem:[%s15113_s17 + $0xe0c] ss:$16 sps:$4 sm:$0xff]  }
 0x3a1   : > { %10001 = vmatprep.mubr.bf16.mxu0 %v15582_v50  ;;  %10657 = vmatprep.mubr.bf16.mxu1 %v15582_v50 }
 0x3a3   : > { %9972 = vmatpush1.bf16.msra.mxu0 %v12957_v18  ;;  %10628 = vmatpush1.bf16.msra.mxu1 %v12960_v51  ;;  %v15648_v18 = vrot.slane %v15567_v41, %v15120_v10  ;;  %v13048_v51 = vld [vmem:[%s15113_s17 + $0xe00] ss:$16 sps:$4 sm:$0xff]  }
 0x3a4   : > { %9973 = vmatprep.subr.bf16.mxu0 %v12965_v52  ;;  %10629 = vmatprep.subr.bf16.mxu1 %v12968_v53  ;;  %v13051_v52 = vld [vmem:[%s15113_s17 + $0xe08] ss:$16 sps:$4 sm:$0xff]   ;;  %v13056_v53 = vld [vmem:[%s15113_s17 + $0xe24] ss:$16 sps:$4 sm:$0xff]   ;;  %v13054_v41 = vld [vmem:[%s15113_s17 + $0xe20] ss:$16 sps:$4 sm:$0xff]  }
 0x3a7   : > { %9974 = vmatpush1.bf16.msra.mxu0 %v12963_v54  ;;  %10630 = vmatpush1.bf16.msra.mxu1 %v12966_v55  ;;  %v13059_v54 = vld [vmem:[%s15113_s17 + $0xe2c] ss:$16 sps:$4 sm:$0xff]   ;;  %v4472_v55 = vcombine.high %v15582_v50, %v15582_v50  ;;  %v13060_v50 = vld [vmem:[%s15113_s17 + $0xe40] ss:$16 sps:$4 sm:$0xff]  }
 0x3a8   : > { %9975 = vmatprep.subr.bf16.mxu0 %v12971_v56  ;;  %10631 = vmatprep.subr.bf16.mxu1 %v12974_v57  ;;  %v13057_v56 = vld [vmem:[%s15113_s17 + $0xe28] ss:$16 sps:$4 sm:$0xff]   ;;  %v13062_v57 = vld [vmem:[%s15113_s17 + $0xe44] ss:$16 sps:$4 sm:$0xff]  }
 0x3ab   : > { %9976 = vmatpush1.bf16.msra.mxu0 %v12969_v58  ;;  %10632 = vmatpush1.bf16.msra.mxu1 %v12972_v59  ;;  %v13065_v58 = vld [vmem:[%s15113_s17 + $0xe4c] ss:$16 sps:$4 sm:$0xff]   ;;  %v13063_v59 = vld [vmem:[%s15113_s17 + $0xe48] ss:$16 sps:$4 sm:$0xff]  }
 0x3ac   : > { %9977 = vmatprep.subr.bf16.mxu0 %v12977_v60  ;;  %10633 = vmatprep.subr.bf16.mxu1 %v12980_v61  ;;  %v13068_v60 = vld [vmem:[%s15113_s17 + $0xe64] ss:$16 sps:$4 sm:$0xff]   ;;  %v13071_v61 = vld [vmem:[%s15113_s17 + $0xe6c] ss:$16 sps:$4 sm:$0xff]  }
 0x3af   : > { %9978 = vmatpush1.bf16.msra.mxu0 %v12975_v62  ;;  %10634 = vmatpush1.bf16.msra.mxu1 %v12978_v63  ;;  %v13066_v62 = vld [vmem:[%s15113_s17 + $0xe60] ss:$16 sps:$4 sm:$0xff]   ;;  %v13069_v63 = vld [vmem:[%s15113_s17 + $0xe68] ss:$16 sps:$4 sm:$0xff]  }
 0x3b0   : > { %9979 = vmatprep.subr.bf16.mxu0 %v12983_v0  ;;  %10635 = vmatprep.subr.bf16.mxu1 %v12986_v1  ;;  %v13074_v0 = vld [vmem:[%s15113_s17 + $0xe84] ss:$16 sps:$4 sm:$0xff]   ;;  %v13077_v1 = vld [vmem:[%s15113_s17 + $0xe8c] ss:$16 sps:$4 sm:$0xff]  }
 0x3b3   : > { %9980 = vmatpush1.bf16.msra.mxu0 %v12981_v2  ;;  %10636 = vmatpush1.bf16.msra.mxu1 %v12984_v5  ;;  %v13072_v2 = vld [vmem:[%s15113_s17 + $0xe80] ss:$16 sps:$4 sm:$0xff]   ;;  %v13075_v5 = vld [vmem:[%s15113_s17 + $0xe88] ss:$16 sps:$4 sm:$0xff]  }
 0x3b4   : > { %9981 = vmatprep.subr.bf16.mxu0 %v12989_v6  ;;  %10637 = vmatprep.subr.bf16.mxu1 %v12992_v7  ;;  %v13080_v6 = vld [vmem:[%s15113_s17 + $0xea4] ss:$16 sps:$4 sm:$0xff]   ;;  %v13083_v7 = vld [vmem:[%s15113_s17 + $0xeac] ss:$16 sps:$4 sm:$0xff]  }
 0x3b7   : > { %9982 = vmatpush1.bf16.msra.mxu0 %v12987_v8  ;;  %10638 = vmatpush1.bf16.msra.mxu1 %v12990_v9  ;;  %v13078_v8 = vld [vmem:[%s15113_s17 + $0xea0] ss:$16 sps:$4 sm:$0xff]   ;;  %v13081_v9 = vld [vmem:[%s15113_s17 + $0xea8] ss:$16 sps:$4 sm:$0xff]  }
 0x3b8   : > { %9983 = vmatprep.subr.bf16.mxu0 %v12995_v11  ;;  %10639 = vmatprep.subr.bf16.mxu1 %v12998_v12  ;;  %v13086_v11 = vld [vmem:[%s15113_s17 + $0xec4] ss:$16 sps:$4 sm:$0xff]   ;;  %v13089_v12 = vld [vmem:[%s15113_s17 + $0xecc] ss:$16 sps:$4 sm:$0xff]  }
 0x3bb   : > { %9984 = vmatpush1.bf16.msra.mxu0 %v12993_v13  ;;  %10640 = vmatpush1.bf16.msra.mxu1 %v12996_v15  ;;  %v13084_v13 = vld [vmem:[%s15113_s17 + $0xec0] ss:$16 sps:$4 sm:$0xff]   ;;  %v13087_v15 = vld [vmem:[%s15113_s17 + $0xec8] ss:$16 sps:$4 sm:$0xff]  }
 0x3bc   : > { %9985 = vmatprep.subr.bf16.mxu0 %v13001_v16  ;;  %10641 = vmatprep.subr.bf16.mxu1 %v13004_v17  ;;  %v13092_v16 = vld [vmem:[%s15113_s17 + $0xee4] ss:$16 sps:$4 sm:$0xff]   ;;  %v13095_v17 = vld [vmem:[%s15113_s17 + $0xeec] ss:$16 sps:$4 sm:$0xff]  }
 0x3bf   : > { %9986 = vmatpush1.bf16.msra.mxu0 %v12999_v20  ;;  %10642 = vmatpush1.bf16.msra.mxu1 %v13002_v21  ;;  %v13090_v20 = vld [vmem:[%s15113_s17 + $0xee0] ss:$16 sps:$4 sm:$0xff]   ;;  %v13093_v21 = vld [vmem:[%s15113_s17 + $0xee8] ss:$16 sps:$4 sm:$0xff]  }
 0x3c0   : > { %9987 = vmatprep.subr.bf16.mxu0 %v13007_v3  ;;  %10643 = vmatprep.subr.bf16.mxu1 %v13010_v23  ;;  %v13098_v3 = vld [vmem:[%s15113_s17 + $0xf04] ss:$16 sps:$4 sm:$0xff]   ;;  %v13101_v23 = vld [vmem:[%s15113_s17 + $0xf0c] ss:$16 sps:$4 sm:$0xff]  }
 0x3c3   : > { %9988 = vmatpush1.bf16.msra.mxu0 %v13005_v14  ;;  %10644 = vmatpush1.bf16.msra.mxu1 %v13008_v24  ;;  %v13096_v14 = vld [vmem:[%s15113_s17 + $0xf00] ss:$16 sps:$4 sm:$0xff]   ;;  %v13099_v24 = vld [vmem:[%s15113_s17 + $0xf08] ss:$16 sps:$4 sm:$0xff]  }
 0x3c4   : > { %9989 = vmatprep.subr.bf16.mxu0 %v13013_v25  ;;  %10645 = vmatprep.subr.bf16.mxu1 %v13016_v26  ;;  %v13104_v25 = vld [vmem:[%s15113_s17 + $0xf24] ss:$16 sps:$4 sm:$0xff]   ;;  %v13107_v26 = vld [vmem:[%s15113_s17 + $0xf2c] ss:$16 sps:$4 sm:$0xff]  }
 0x3c7   : > { %9990 = vmatpush1.bf16.msra.mxu0 %v13011_v27  ;;  %10646 = vmatpush1.bf16.msra.mxu1 %v13014_v29  ;;  %v13102_v27 = vld [vmem:[%s15113_s17 + $0xf20] ss:$16 sps:$4 sm:$0xff]   ;;  %v13105_v29 = vld [vmem:[%s15113_s17 + $0xf28] ss:$16 sps:$4 sm:$0xff]  }
 0x3c8   : > { %9991 = vmatprep.subr.bf16.mxu0 %v13019_v30  ;;  %10647 = vmatprep.subr.bf16.mxu1 %v13022_v31  ;;  %v13110_v30 = vld [vmem:[%s15113_s17 + $0xf44] ss:$16 sps:$4 sm:$0xff]   ;;  %v13113_v31 = vld [vmem:[%s15113_s17 + $0xf4c] ss:$16 sps:$4 sm:$0xff]  }
 0x3cb   : > { %9992 = vmatpush1.bf16.msra.mxu0 %v13017_v32  ;;  %10648 = vmatpush1.bf16.msra.mxu1 %v13020_v33  ;;  %v13108_v32 = vld [vmem:[%s15113_s17 + $0xf40] ss:$16 sps:$4 sm:$0xff]   ;;  %v13111_v33 = vld [vmem:[%s15113_s17 + $0xf48] ss:$16 sps:$4 sm:$0xff]  }
 0x3cc   : > { %9993 = vmatprep.subr.bf16.mxu0 %v13025_v34  ;;  %10649 = vmatprep.subr.bf16.mxu1 %v13028_v19  ;;  %v13116_v34 = vld [vmem:[%s15113_s17 + $0xf64] ss:$16 sps:$4 sm:$0xff]   ;;  %v13119_v19 = vld [vmem:[%s15113_s17 + $0xf6c] ss:$16 sps:$4 sm:$0xff]  }
 0x3cf   : > { %9994 = vmatpush1.bf16.msra.mxu0 %v13023_v35  ;;  %10650 = vmatpush1.bf16.msra.mxu1 %v13026_v36  ;;  %v13114_v35 = vld [vmem:[%s15113_s17 + $0xf60] ss:$16 sps:$4 sm:$0xff]   ;;  %v13117_v36 = vld [vmem:[%s15113_s17 + $0xf68] ss:$16 sps:$4 sm:$0xff]  }
 0x3d0   : > { %9995 = vmatprep.subr.bf16.mxu0 %v13031_v28  ;;  %10651 = vmatprep.subr.bf16.mxu1 %v13034_v37  ;;  %v13122_v28 = vld [vmem:[%s15113_s17 + $0xf84] ss:$16 sps:$4 sm:$0xff]   ;;  %v13125_v37 = vld [vmem:[%s15113_s17 + $0xf8c] ss:$16 sps:$4 sm:$0xff]  }
 0x3d3   : > { %9996 = vmatpush1.bf16.msra.mxu0 %v13029_v39  ;;  %10652 = vmatpush1.bf16.msra.mxu1 %v13032_v40  ;;  %v13120_v39 = vld [vmem:[%s15113_s17 + $0xf80] ss:$16 sps:$4 sm:$0xff]   ;;  %v13123_v40 = vld [vmem:[%s15113_s17 + $0xf88] ss:$16 sps:$4 sm:$0xff]  }
 0x3d4   : > { %9997 = vmatprep.subr.bf16.mxu0 %v13037_v42  ;;  %10653 = vmatprep.subr.bf16.mxu1 %v13040_v43  ;;  %v13128_v42 = vld [vmem:[%s15113_s17 + $0xfa4] ss:$16 sps:$4 sm:$0xff]   ;;  %v13131_v43 = vld [vmem:[%s15113_s17 + $0xfac] ss:$16 sps:$4 sm:$0xff]  }
 0x3d7   : > { %9998 = vmatpush1.bf16.msra.mxu0 %v13035_v22  ;;  %10654 = vmatpush1.bf16.msra.mxu1 %v13038_v44  ;;  %v13126_v22 = vld [vmem:[%s15113_s17 + $0xfa0] ss:$16 sps:$4 sm:$0xff]   ;;  %v13129_v44 = vld [vmem:[%s15113_s17 + $0xfa8] ss:$16 sps:$4 sm:$0xff]  }
 0x3d8   : > { %9999 = vmatprep.subr.bf16.mxu0 %v13043_v45  ;;  %10655 = vmatprep.subr.bf16.mxu1 %v13046_v46  ;;  %v13134_v45 = vld [vmem:[%s15113_s17 + $0xfc4] ss:$16 sps:$4 sm:$0xff]   ;;  %v13137_v46 = vld [vmem:[%s15113_s17 + $0xfcc] ss:$16 sps:$4 sm:$0xff]  }
 0x3db   : > { %10000 = vmatpush1.bf16.msra.mxu0 %v13041_v38  ;;  %10656 = vmatpush1.bf16.msra.mxu1 %v13044_v47  ;;  %v15713_v38 = vld [vmem:[%s16353_s0 + $0x10] sm:$0xff] }
 0x3dc   : > { %10010 = vmatprep.subr.bf16.mxu0 %v13050_v48  ;;  %10666 = vmatprep.subr.bf16.mxu1 %v13053_v49  ;;  %v13132_v47 = vld [vmem:[%s15113_s17 + $0xfc0] ss:$16 sps:$4 sm:$0xff]   ;;  %v13135_v48 = vld [vmem:[%s15113_s17 + $0xfc8] ss:$16 sps:$4 sm:$0xff]   ;;  %v13140_v49 = vld [vmem:[%s15113_s17 + $0xfe4] ss:$16 sps:$4 sm:$0xff]  }
 0x3de   : > { %10002 = vmatmul.mubr.bf16.vlgmr.msra.gmra.mrb[0].mxu0 %v15648_v18  ;;  %10658 = vmatmul.mubr.bf16.vlgmr.msra.gmra.mrb[0].mxu1 %v15648_v18 }
 0x3df   : > { %10011 = vmatpush1.bf16.msra.mxu0 %v13048_v51  ;;  %10667 = vmatpush1.bf16.msra.mxu1 %v13051_v52  ;;  %v13143_v51 = vld [vmem:[%s15113_s17 + $0xfec] ss:$16 sps:$4 sm:$0xff]   ;;  %v15721_v52 = vrot.slane %v15713_v38, %v15120_v10 }
 0x3e0   : > { %10012 = vmatprep.subr.bf16.mxu0 %v13056_v53  ;;  %10668 = vmatprep.subr.bf16.mxu1 %v13059_v54  ;;  %v13138_v53 = vld [vmem:[%s15113_s17 + $0xfe0] ss:$16 sps:$4 sm:$0xff]   ;;  %v13141_v54 = vld [vmem:[%s15113_s17 + $0xfe8] ss:$16 sps:$4 sm:$0xff]  }
 0x3e1   : > { %10042 = vmatprep.mubr.bf16.mxu0 %v4472_v55  ;;  %10698 = vmatprep.mubr.bf16.mxu1 %v4472_v55  ;;  %v13146_v55 = vld [vmem:[%s15113_s17 + $0x1004] ss:$16 sps:$4 sm:$0xff]  }
 0x3e3   : > { %10013 = vmatpush1.bf16.msra.mxu0 %v13054_v41  ;;  %10669 = vmatpush1.bf16.msra.mxu1 %v13057_v56  ;;  %v13149_v41 = vld [vmem:[%s15113_s17 + $0x100c] ss:$16 sps:$4 sm:$0xff]   ;;  %v4488_v56 = vcombine.high %v15721_v52, %v15721_v52 }
 0x3e4   : > { %10014 = vmatprep.subr.bf16.mxu0 %v13062_v57  ;;  %10670 = vmatprep.subr.bf16.mxu1 %v13065_v58  ;;  %v4470_v57 = vcombine.high %v15648_v18, %v15648_v18  ;;  %v13144_v58 = vld [vmem:[%s15113_s17 + $0x1000] ss:$16 sps:$4 sm:$0xff]  }
 0x3e5   : > { %v13150_v18 = vld [vmem:[%s15113_s17 + $0x1020] ss:$16 sps:$4 sm:$0xff]  }
 0x3e7   : > { %10015 = vmatpush1.bf16.msra.mxu0 %v13060_v50  ;;  %10671 = vmatpush1.bf16.msra.mxu1 %v13063_v59  ;;  %v13147_v50 = vld [vmem:[%s15113_s17 + $0x1008] ss:$16 sps:$4 sm:$0xff]   ;;  %v13152_v59 = vld [vmem:[%s15113_s17 + $0x1024] ss:$16 sps:$4 sm:$0xff]  }
 0x3e8   : > { %10016 = vmatprep.subr.bf16.mxu0 %v13068_v60  ;;  %10672 = vmatprep.subr.bf16.mxu1 %v13071_v61  ;;  %v13155_v60 = vld [vmem:[%s15113_s17 + $0x102c] ss:$16 sps:$4 sm:$0xff]   ;;  %v15736_v61 = vrot.slane %v4488_v56, %v15120_v10  ;;  %v13231_v56 = vld [vmem:[%s15113_s17 + $0x11c8] ss:$16 sps:$4 sm:$0xff]  }
 0x3eb   : > { %10017 = vmatpush1.bf16.msra.mxu0 %v13066_v62  ;;  %10673 = vmatpush1.bf16.msra.mxu1 %v13069_v63  ;;  %v13153_v62 = vld [vmem:[%s15113_s17 + $0x1028] ss:$16 sps:$4 sm:$0xff]   ;;  %v13158_v63 = vld [vmem:[%s15113_s17 + $0x1044] ss:$16 sps:$4 sm:$0xff]  }
 0x3ec   : > { %10018 = vmatprep.subr.bf16.mxu0 %v13074_v0  ;;  %10674 = vmatprep.subr.bf16.mxu1 %v13077_v1  ;;  %v13161_v0 = vld [vmem:[%s15113_s17 + $0x104c] ss:$16 sps:$4 sm:$0xff]   ;;  %v13156_v1 = vld [vmem:[%s15113_s17 + $0x1040] ss:$16 sps:$4 sm:$0xff]  }
 0x3ef   : > { %10019 = vmatpush1.bf16.msra.mxu0 %v13072_v2  ;;  %10675 = vmatpush1.bf16.msra.mxu1 %v13075_v5  ;;  %v13159_v2 = vld [vmem:[%s15113_s17 + $0x1048] ss:$16 sps:$4 sm:$0xff]   ;;  %v13164_v5 = vld [vmem:[%s15113_s17 + $0x1064] ss:$16 sps:$4 sm:$0xff]  }
 0x3f0   : > { %10020 = vmatprep.subr.bf16.mxu0 %v13080_v6  ;;  %10676 = vmatprep.subr.bf16.mxu1 %v13083_v7  ;;  %v13167_v6 = vld [vmem:[%s15113_s17 + $0x106c] ss:$16 sps:$4 sm:$0xff]   ;;  %v13162_v7 = vld [vmem:[%s15113_s17 + $0x1060] ss:$16 sps:$4 sm:$0xff]  }
 0x3f3   : > { %10021 = vmatpush1.bf16.msra.mxu0 %v13078_v8  ;;  %10677 = vmatpush1.bf16.msra.mxu1 %v13081_v9  ;;  %v13165_v8 = vld [vmem:[%s15113_s17 + $0x1068] ss:$16 sps:$4 sm:$0xff]   ;;  %v13170_v9 = vld [vmem:[%s15113_s17 + $0x1084] ss:$16 sps:$4 sm:$0xff]  }
 0x3f4   : > { %10022 = vmatprep.subr.bf16.mxu0 %v13086_v11  ;;  %10678 = vmatprep.subr.bf16.mxu1 %v13089_v12  ;;  %v13173_v11 = vld [vmem:[%s15113_s17 + $0x108c] ss:$16 sps:$4 sm:$0xff]   ;;  %v13168_v12 = vld [vmem:[%s15113_s17 + $0x1080] ss:$16 sps:$4 sm:$0xff]  }
 0x3f7   : > { %10023 = vmatpush1.bf16.msra.mxu0 %v13084_v13  ;;  %10679 = vmatpush1.bf16.msra.mxu1 %v13087_v15  ;;  %v13171_v13 = vld [vmem:[%s15113_s17 + $0x1088] ss:$16 sps:$4 sm:$0xff]   ;;  %v13176_v15 = vld [vmem:[%s15113_s17 + $0x10a4] ss:$16 sps:$4 sm:$0xff]  }
 0x3f8   : > { %10024 = vmatprep.subr.bf16.mxu0 %v13092_v16  ;;  %10680 = vmatprep.subr.bf16.mxu1 %v13095_v17  ;;  %v13179_v16 = vld [vmem:[%s15113_s17 + $0x10ac] ss:$16 sps:$4 sm:$0xff]   ;;  %v13174_v17 = vld [vmem:[%s15113_s17 + $0x10a0] ss:$16 sps:$4 sm:$0xff]  }
 0x3fb   : > { %10025 = vmatpush1.bf16.msra.mxu0 %v13090_v20  ;;  %10681 = vmatpush1.bf16.msra.mxu1 %v13093_v21  ;;  %v13177_v20 = vld [vmem:[%s15113_s17 + $0x10a8] ss:$16 sps:$4 sm:$0xff]   ;;  %v13182_v21 = vld [vmem:[%s15113_s17 + $0x10c4] ss:$16 sps:$4 sm:$0xff]  }
 0x3fc   : > { %10026 = vmatprep.subr.bf16.mxu0 %v13098_v3  ;;  %10682 = vmatprep.subr.bf16.mxu1 %v13101_v23  ;;  %v13185_v3 = vld [vmem:[%s15113_s17 + $0x10cc] ss:$16 sps:$4 sm:$0xff]   ;;  %v13180_v23 = vld [vmem:[%s15113_s17 + $0x10c0] ss:$16 sps:$4 sm:$0xff]  }
 0x3ff   : > { %10027 = vmatpush1.bf16.msra.mxu0 %v13096_v14  ;;  %10683 = vmatpush1.bf16.msra.mxu1 %v13099_v24  ;;  %v13183_v14 = vld [vmem:[%s15113_s17 + $0x10c8] ss:$16 sps:$4 sm:$0xff]   ;;  %v13188_v24 = vld [vmem:[%s15113_s17 + $0x10e4] ss:$16 sps:$4 sm:$0xff]  }
 0x400   : > { %10028 = vmatprep.subr.bf16.mxu0 %v13104_v25  ;;  %10684 = vmatprep.subr.bf16.mxu1 %v13107_v26  ;;  %v13191_v25 = vld [vmem:[%s15113_s17 + $0x10ec] ss:$16 sps:$4 sm:$0xff]   ;;  %v13186_v26 = vld [vmem:[%s15113_s17 + $0x10e0] ss:$16 sps:$4 sm:$0xff]  }
 0x403   : > { %10029 = vmatpush1.bf16.msra.mxu0 %v13102_v27  ;;  %10685 = vmatpush1.bf16.msra.mxu1 %v13105_v29  ;;  %v13189_v27 = vld [vmem:[%s15113_s17 + $0x10e8] ss:$16 sps:$4 sm:$0xff]   ;;  %v13194_v29 = vld [vmem:[%s15113_s17 + $0x1104] ss:$16 sps:$4 sm:$0xff]  }
 0x404   : > { %10030 = vmatprep.subr.bf16.mxu0 %v13110_v30  ;;  %10686 = vmatprep.subr.bf16.mxu1 %v13113_v31  ;;  %v13197_v30 = vld [vmem:[%s15113_s17 + $0x110c] ss:$16 sps:$4 sm:$0xff]   ;;  %v13192_v31 = vld [vmem:[%s15113_s17 + $0x1100] ss:$16 sps:$4 sm:$0xff]  }
 0x407   : > { %10031 = vmatpush1.bf16.msra.mxu0 %v13108_v32  ;;  %10687 = vmatpush1.bf16.msra.mxu1 %v13111_v33  ;;  %v13195_v32 = vld [vmem:[%s15113_s17 + $0x1108] ss:$16 sps:$4 sm:$0xff]   ;;  %v13200_v33 = vld [vmem:[%s15113_s17 + $0x1124] ss:$16 sps:$4 sm:$0xff]  }
 0x408   : > { %10032 = vmatprep.subr.bf16.mxu0 %v13116_v34  ;;  %10688 = vmatprep.subr.bf16.mxu1 %v13119_v19  ;;  %v13203_v34 = vld [vmem:[%s15113_s17 + $0x112c] ss:$16 sps:$4 sm:$0xff]   ;;  %v13198_v19 = vld [vmem:[%s15113_s17 + $0x1120] ss:$16 sps:$4 sm:$0xff]  }
 0x40b   : > { %10033 = vmatpush1.bf16.msra.mxu0 %v13114_v35  ;;  %10689 = vmatpush1.bf16.msra.mxu1 %v13117_v36  ;;  %v13201_v35 = vld [vmem:[%s15113_s17 + $0x1128] ss:$16 sps:$4 sm:$0xff]   ;;  %v13206_v36 = vld [vmem:[%s15113_s17 + $0x1144] ss:$16 sps:$4 sm:$0xff]  }
 0x40c   : > { %10034 = vmatprep.subr.bf16.mxu0 %v13122_v28  ;;  %10690 = vmatprep.subr.bf16.mxu1 %v13125_v37  ;;  %v13209_v28 = vld [vmem:[%s15113_s17 + $0x114c] ss:$16 sps:$4 sm:$0xff]   ;;  %v13204_v37 = vld [vmem:[%s15113_s17 + $0x1140] ss:$16 sps:$4 sm:$0xff]  }
 0x40f   : > { %10035 = vmatpush1.bf16.msra.mxu0 %v13120_v39  ;;  %10691 = vmatpush1.bf16.msra.mxu1 %v13123_v40  ;;  %v13207_v39 = vld [vmem:[%s15113_s17 + $0x1148] ss:$16 sps:$4 sm:$0xff]   ;;  %v13212_v40 = vld [vmem:[%s15113_s17 + $0x1164] ss:$16 sps:$4 sm:$0xff]  }
 0x410   : > { %10036 = vmatprep.subr.bf16.mxu0 %v13128_v42  ;;  %10692 = vmatprep.subr.bf16.mxu1 %v13131_v43  ;;  %v13215_v42 = vld [vmem:[%s15113_s17 + $0x116c] ss:$16 sps:$4 sm:$0xff]   ;;  %v13210_v43 = vld [vmem:[%s15113_s17 + $0x1160] ss:$16 sps:$4 sm:$0xff]  }
 0x413   : > { %10037 = vmatpush1.bf16.msra.mxu0 %v13126_v22  ;;  %10693 = vmatpush1.bf16.msra.mxu1 %v13129_v44  ;;  %v13213_v22 = vld [vmem:[%s15113_s17 + $0x1168] ss:$16 sps:$4 sm:$0xff]   ;;  %v13218_v44 = vld [vmem:[%s15113_s17 + $0x1184] ss:$16 sps:$4 sm:$0xff]  }
 0x414   : > { %10038 = vmatprep.subr.bf16.mxu0 %v13134_v45  ;;  %10694 = vmatprep.subr.bf16.mxu1 %v13137_v46  ;;  %v13221_v45 = vld [vmem:[%s15113_s17 + $0x118c] ss:$16 sps:$4 sm:$0xff]   ;;  %v13216_v46 = vld [vmem:[%s15113_s17 + $0x1180] ss:$16 sps:$4 sm:$0xff]  }
 0x417   : > { %10039 = vmatpush1.bf16.msra.mxu0 %v13132_v47  ;;  %10695 = vmatpush1.bf16.msra.mxu1 %v13135_v48  ;;  %v13219_v47 = vld [vmem:[%s15113_s17 + $0x1188] ss:$16 sps:$4 sm:$0xff]   ;;  %v13224_v48 = vld [vmem:[%s15113_s17 + $0x11a4] ss:$16 sps:$4 sm:$0xff]  }
 0x418   : > { %10040 = vmatprep.subr.bf16.mxu0 %v13140_v49  ;;  %10696 = vmatprep.subr.bf16.mxu1 %v13143_v51  ;;  %v13227_v49 = vld [vmem:[%s15113_s17 + $0x11ac] ss:$16 sps:$4 sm:$0xff]   ;;  %v13222_v51 = vld [vmem:[%s15113_s17 + $0x11a0] ss:$16 sps:$4 sm:$0xff]  }
 0x41b   : > { %10041 = vmatpush1.bf16.msra.mxu0 %v13138_v53  ;;  %10697 = vmatpush1.bf16.msra.mxu1 %v13141_v54  ;;  %v13225_v53 = vld [vmem:[%s15113_s17 + $0x11a8] ss:$16 sps:$4 sm:$0xff]   ;;  %v13230_v54 = vld [vmem:[%s15113_s17 + $0x11c4] ss:$16 sps:$4 sm:$0xff]  }
 0x41c   : > { %10051 = vmatprep.subr.bf16.mxu0 %v13146_v55  ;;  %10707 = vmatprep.subr.bf16.mxu1 %v13149_v41  ;;  %v13233_v55 = vld [vmem:[%s15113_s17 + $0x11cc] ss:$16 sps:$4 sm:$0xff]   ;;  %v13228_v41 = vld [vmem:[%s15113_s17 + $0x11c0] ss:$16 sps:$4 sm:$0xff]  }
 0x41e   : > { %10043 = vmatmul.mubr.bf16.vlgmr.msra.gmra.mrb[0].mxu0 %v4470_v57  ;;  %10699 = vmatmul.mubr.bf16.vlgmr.msra.gmra.mrb[0].mxu1 %v4470_v57  ;;  %v13236_v57 = vld [vmem:[%s15113_s17 + $0x11e4] ss:$16 sps:$4 sm:$0xff]  }
 0x41f   : > { %10052 = vmatpush1.bf16.msra.mxu0 %v13144_v58  ;;  %10708 = vmatpush1.bf16.msra.mxu1 %v13147_v50  ;;  %v13239_v58 = vld [vmem:[%s15113_s17 + $0x11ec] ss:$16 sps:$4 sm:$0xff]   ;;  %v13234_v50 = vld [vmem:[%s15113_s17 + $0x11e0] ss:$16 sps:$4 sm:$0xff]  }
 0x420   : > { %10053 = vmatprep.subr.bf16.mxu0 %v13152_v59  ;;  %10709 = vmatprep.subr.bf16.mxu1 %v13155_v60  ;;  %v13237_v59 = vld [vmem:[%s15113_s17 + $0x11e8] ss:$16 sps:$4 sm:$0xff]   ;;  %v13242_v60 = vld [vmem:[%s15113_s17 + $0x1204] ss:$16 sps:$4 sm:$0xff]  }
 0x421   : > { %10083 = vmatprep.mubr.bf16.mxu0 %v15736_v61  ;;  %10739 = vmatprep.mubr.bf16.mxu1 %v15736_v61 }
 0x423   : > { %10054 = vmatpush1.bf16.msra.mxu0 %v13150_v18  ;;  %10710 = vmatpush1.bf16.msra.mxu1 %v13153_v62  ;;  %v13245_v18 = vld [vmem:[%s15113_s17 + $0x120c] ss:$16 sps:$4 sm:$0xff]   ;;  %v15802_v62 = vrot.slane %v15721_v52, %v15120_v10  ;;  %v13246_v52 = vld [vmem:[%s15113_s17 + $0x1220] ss:$16 sps:$4 sm:$0xff]  }
 0x424   : > { %10055 = vmatprep.subr.bf16.mxu0 %v13158_v63  ;;  %10711 = vmatprep.subr.bf16.mxu1 %v13161_v0  ;;  %v13240_v63 = vld [vmem:[%s15113_s17 + $0x1200] ss:$16 sps:$4 sm:$0xff]   ;;  %v13243_v0 = vld [vmem:[%s15113_s17 + $0x1208] ss:$16 sps:$4 sm:$0xff]  }
 0x427   : > { %10056 = vmatpush1.bf16.msra.mxu0 %v13156_v1  ;;  %10712 = vmatpush1.bf16.msra.mxu1 %v13159_v2  ;;  %v13248_v1 = vld [vmem:[%s15113_s17 + $0x1224] ss:$16 sps:$4 sm:$0xff]   ;;  %v13251_v2 = vld [vmem:[%s15113_s17 + $0x122c] ss:$16 sps:$4 sm:$0xff]  }
 0x428   : > { %10057 = vmatprep.subr.bf16.mxu0 %v13164_v5  ;;  %10713 = vmatprep.subr.bf16.mxu1 %v13167_v6  ;;  %v4520_v5 = vcombine.high %v15736_v61, %v15736_v61  ;;  %v13249_v6 = vld [vmem:[%s15113_s17 + $0x1228] ss:$16 sps:$4 sm:$0xff]   ;;  %v13252_v61 = vld [vmem:[%s15113_s17 + $0x1240] ss:$16 sps:$4 sm:$0xff]  }
 0x42b   : > { %10058 = vmatpush1.bf16.msra.mxu0 %v13162_v7  ;;  %10714 = vmatpush1.bf16.msra.mxu1 %v13165_v8  ;;  %v13254_v7 = vld [vmem:[%s15113_s17 + $0x1244] ss:$16 sps:$4 sm:$0xff]   ;;  %v13257_v8 = vld [vmem:[%s15113_s17 + $0x124c] ss:$16 sps:$4 sm:$0xff]  }
 0x42c   : > { %10059 = vmatprep.subr.bf16.mxu0 %v13170_v9  ;;  %10715 = vmatprep.subr.bf16.mxu1 %v13173_v11  ;;  %v13255_v9 = vld [vmem:[%s15113_s17 + $0x1248] ss:$16 sps:$4 sm:$0xff]   ;;  %v13260_v11 = vld [vmem:[%s15113_s17 + $0x1264] ss:$16 sps:$4 sm:$0xff]  }
 0x42f   : > { %10060 = vmatpush1.bf16.msra.mxu0 %v13168_v12  ;;  %10716 = vmatpush1.bf16.msra.mxu1 %v13171_v13  ;;  %v13263_v12 = vld [vmem:[%s15113_s17 + $0x126c] ss:$16 sps:$4 sm:$0xff]   ;;  %v13258_v13 = vld [vmem:[%s15113_s17 + $0x1260] ss:$16 sps:$4 sm:$0xff]  }
 0x430   : > { %10061 = vmatprep.subr.bf16.mxu0 %v13176_v15  ;;  %10717 = vmatprep.subr.bf16.mxu1 %v13179_v16  ;;  %v13261_v15 = vld [vmem:[%s15113_s17 + $0x1268] ss:$16 sps:$4 sm:$0xff]   ;;  %v13266_v16 = vld [vmem:[%s15113_s17 + $0x1284] ss:$16 sps:$4 sm:$0xff]  }
 0x433   : > { %10062 = vmatpush1.bf16.msra.mxu0 %v13174_v17  ;;  %10718 = vmatpush1.bf16.msra.mxu1 %v13177_v20  ;;  %v13269_v17 = vld [vmem:[%s15113_s17 + $0x128c] ss:$16 sps:$4 sm:$0xff]   ;;  %v13264_v20 = vld [vmem:[%s15113_s17 + $0x1280] ss:$16 sps:$4 sm:$0xff]  }
 0x434   : > { %10063 = vmatprep.subr.bf16.mxu0 %v13182_v21  ;;  %10719 = vmatprep.subr.bf16.mxu1 %v13185_v3  ;;  %v13267_v21 = vld [vmem:[%s15113_s17 + $0x1288] ss:$16 sps:$4 sm:$0xff]   ;;  %v13272_v3 = vld [vmem:[%s15113_s17 + $0x12a4] ss:$16 sps:$4 sm:$0xff]  }
 0x437   : > { %10064 = vmatpush1.bf16.msra.mxu0 %v13180_v23  ;;  %10720 = vmatpush1.bf16.msra.mxu1 %v13183_v14  ;;  %v13275_v23 = vld [vmem:[%s15113_s17 + $0x12ac] ss:$16 sps:$4 sm:$0xff]   ;;  %v13270_v14 = vld [vmem:[%s15113_s17 + $0x12a0] ss:$16 sps:$4 sm:$0xff]  }
 0x438   : > { %10065 = vmatprep.subr.bf16.mxu0 %v13188_v24  ;;  %10721 = vmatprep.subr.bf16.mxu1 %v13191_v25  ;;  %v13273_v24 = vld [vmem:[%s15113_s17 + $0x12a8] ss:$16 sps:$4 sm:$0xff]   ;;  %v13278_v25 = vld [vmem:[%s15113_s17 + $0x12c4] ss:$16 sps:$4 sm:$0xff]  }
 0x43b   : > { %10066 = vmatpush1.bf16.msra.mxu0 %v13186_v26  ;;  %10722 = vmatpush1.bf16.msra.mxu1 %v13189_v27  ;;  %v13281_v26 = vld [vmem:[%s15113_s17 + $0x12cc] ss:$16 sps:$4 sm:$0xff]   ;;  %v13276_v27 = vld [vmem:[%s15113_s17 + $0x12c0] ss:$16 sps:$4 sm:$0xff]  }
 0x43c   : > { %10067 = vmatprep.subr.bf16.mxu0 %v13194_v29  ;;  %10723 = vmatprep.subr.bf16.mxu1 %v13197_v30  ;;  %v13279_v29 = vld [vmem:[%s15113_s17 + $0x12c8] ss:$16 sps:$4 sm:$0xff]   ;;  %v13284_v30 = vld [vmem:[%s15113_s17 + $0x12e4] ss:$16 sps:$4 sm:$0xff]  }
 0x43f   : > { %10068 = vmatpush1.bf16.msra.mxu0 %v13192_v31  ;;  %10724 = vmatpush1.bf16.msra.mxu1 %v13195_v32  ;;  %v13287_v31 = vld [vmem:[%s15113_s17 + $0x12ec] ss:$16 sps:$4 sm:$0xff]   ;;  %v13282_v32 = vld [vmem:[%s15113_s17 + $0x12e0] ss:$16 sps:$4 sm:$0xff]  }
 0x440   : > { %10069 = vmatprep.subr.bf16.mxu0 %v13200_v33  ;;  %10725 = vmatprep.subr.bf16.mxu1 %v13203_v34  ;;  %v13285_v33 = vld [vmem:[%s15113_s17 + $0x12e8] ss:$16 sps:$4 sm:$0xff]   ;;  %v13290_v34 = vld [vmem:[%s15113_s17 + $0x1304] ss:$16 sps:$4 sm:$0xff]  }
 0x443   : > { %10070 = vmatpush1.bf16.msra.mxu0 %v13198_v19  ;;  %10726 = vmatpush1.bf16.msra.mxu1 %v13201_v35  ;;  %v13293_v19 = vld [vmem:[%s15113_s17 + $0x130c] ss:$16 sps:$4 sm:$0xff]   ;;  %v13288_v35 = vld [vmem:[%s15113_s17 + $0x1300] ss:$16 sps:$4 sm:$0xff]  }
 0x444   : > { %10071 = vmatprep.subr.bf16.mxu0 %v13206_v36  ;;  %10727 = vmatprep.subr.bf16.mxu1 %v13209_v28  ;;  %v13291_v36 = vld [vmem:[%s15113_s17 + $0x1308] ss:$16 sps:$4 sm:$0xff]   ;;  %v13296_v28 = vld [vmem:[%s15113_s17 + $0x1324] ss:$16 sps:$4 sm:$0xff]  }
 0x447   : > { %10072 = vmatpush1.bf16.msra.mxu0 %v13204_v37  ;;  %10728 = vmatpush1.bf16.msra.mxu1 %v13207_v39  ;;  %v13299_v37 = vld [vmem:[%s15113_s17 + $0x132c] ss:$16 sps:$4 sm:$0xff]   ;;  %v13294_v39 = vld [vmem:[%s15113_s17 + $0x1320] ss:$16 sps:$4 sm:$0xff]  }
 0x448   : > { %10073 = vmatprep.subr.bf16.mxu0 %v13212_v40  ;;  %10729 = vmatprep.subr.bf16.mxu1 %v13215_v42  ;;  %v13297_v40 = vld [vmem:[%s15113_s17 + $0x1328] ss:$16 sps:$4 sm:$0xff]   ;;  %v13302_v42 = vld [vmem:[%s15113_s17 + $0x1344] ss:$16 sps:$4 sm:$0xff]  }
 0x44b   : > { %10074 = vmatpush1.bf16.msra.mxu0 %v13210_v43  ;;  %10730 = vmatpush1.bf16.msra.mxu1 %v13213_v22  ;;  %v13305_v43 = vld [vmem:[%s15113_s17 + $0x134c] ss:$16 sps:$4 sm:$0xff]   ;;  %v13300_v22 = vld [vmem:[%s15113_s17 + $0x1340] ss:$16 sps:$4 sm:$0xff]  }
 0x44c   : > { %10075 = vmatprep.subr.bf16.mxu0 %v13218_v44  ;;  %10731 = vmatprep.subr.bf16.mxu1 %v13221_v45  ;;  %v13303_v44 = vld [vmem:[%s15113_s17 + $0x1348] ss:$16 sps:$4 sm:$0xff]   ;;  %v13308_v45 = vld [vmem:[%s15113_s17 + $0x1364] ss:$16 sps:$4 sm:$0xff]  }
 0x44f   : > { %10076 = vmatpush1.bf16.msra.mxu0 %v13216_v46  ;;  %10732 = vmatpush1.bf16.msra.mxu1 %v13219_v47  ;;  %v13311_v46 = vld [vmem:[%s15113_s17 + $0x136c] ss:$16 sps:$4 sm:$0xff]   ;;  %v13306_v47 = vld [vmem:[%s15113_s17 + $0x1360] ss:$16 sps:$4 sm:$0xff]  }
 0x450   : > { %10077 = vmatprep.subr.bf16.mxu0 %v13224_v48  ;;  %10733 = vmatprep.subr.bf16.mxu1 %v13227_v49  ;;  %v13309_v48 = vld [vmem:[%s15113_s17 + $0x1368] ss:$16 sps:$4 sm:$0xff]   ;;  %v13314_v49 = vld [vmem:[%s15113_s17 + $0x1384] ss:$16 sps:$4 sm:$0xff]  }
 0x453   : > { %10078 = vmatpush1.bf16.msra.mxu0 %v13222_v51  ;;  %10734 = vmatpush1.bf16.msra.mxu1 %v13225_v53  ;;  %v13317_v51 = vld [vmem:[%s15113_s17 + $0x138c] ss:$16 sps:$4 sm:$0xff]   ;;  %v13312_v53 = vld [vmem:[%s15113_s17 + $0x1380] ss:$16 sps:$4 sm:$0xff]  }
 0x454   : > { %10079 = vmatprep.subr.bf16.mxu0 %v13230_v54  ;;  %10735 = vmatprep.subr.bf16.mxu1 %v13233_v55  ;;  %v13315_v54 = vld [vmem:[%s15113_s17 + $0x1388] ss:$16 sps:$4 sm:$0xff]   ;;  %v13320_v55 = vld [vmem:[%s15113_s17 + $0x13a4] ss:$16 sps:$4 sm:$0xff]  }
 0x457   : > { %10080 = vmatpush1.bf16.msra.mxu0 %v13228_v41  ;;  %10736 = vmatpush1.bf16.msra.mxu1 %v13231_v56  ;;  %v13323_v41 = vld [vmem:[%s15113_s17 + $0x13ac] ss:$16 sps:$4 sm:$0xff]   ;;  %v13318_v56 = vld [vmem:[%s15113_s17 + $0x13a0] ss:$16 sps:$4 sm:$0xff]  }
 0x458   : > { %10081 = vmatprep.subr.bf16.mxu0 %v13236_v57  ;;  %10737 = vmatprep.subr.bf16.mxu1 %v13239_v58  ;;  %v13321_v57 = vld [vmem:[%s15113_s17 + $0x13a8] ss:$16 sps:$4 sm:$0xff]   ;;  %v13326_v58 = vld [vmem:[%s15113_s17 + $0x13c4] ss:$16 sps:$4 sm:$0xff]  }
 0x45b   : > { %10082 = vmatpush1.bf16.msra.mxu0 %v13234_v50  ;;  %10738 = vmatpush1.bf16.msra.mxu1 %v13237_v59  ;;  %v13329_v50 = vld [vmem:[%s15113_s17 + $0x13cc] ss:$16 sps:$4 sm:$0xff]   ;;  %v4473_v59 = vcombine.high %v15713_v38, %v15713_v38  ;;  %v13330_v38 = vld [vmem:[%s15113_s17 + $0x13e0] ss:$16 sps:$4 sm:$0xff]  }
 0x45c   : > { %10092 = vmatprep.subr.bf16.mxu0 %v13242_v60  ;;  %10748 = vmatprep.subr.bf16.mxu1 %v13245_v18  ;;  %v13324_v60 = vld [vmem:[%s15113_s17 + $0x13c0] ss:$16 sps:$4 sm:$0xff]   ;;  %v13327_v18 = vld [vmem:[%s15113_s17 + $0x13c8] ss:$16 sps:$4 sm:$0xff]  }
 0x45e   : > { %10084 = vmatmul.mubr.bf16.vlgmr.msra.gmra.mrb[0].mxu0 %v15802_v62  ;;  %10740 = vmatmul.mubr.bf16.vlgmr.msra.gmra.mrb[0].mxu1 %v15802_v62 }
 0x45f   : > { %10093 = vmatpush1.bf16.msra.mxu0 %v13240_v63  ;;  %10749 = vmatpush1.bf16.msra.mxu1 %v13243_v0  ;;  %v13332_v63 = vld [vmem:[%s15113_s17 + $0x13e4] ss:$16 sps:$4 sm:$0xff]   ;;  %v13335_v0 = vld [vmem:[%s15113_s17 + $0x13ec] ss:$16 sps:$4 sm:$0xff]  }
 0x460   : > { %10094 = vmatprep.subr.bf16.mxu0 %v13248_v1  ;;  %10750 = vmatprep.subr.bf16.mxu1 %v13251_v2  ;;  %v15871_v1 = vrot.slane %v4473_v59, %v15120_v10  ;;  %v13333_v2 = vld [vmem:[%s15113_s17 + $0x13e8] ss:$16 sps:$4 sm:$0xff]  }
 0x461   : > { %10124 = vmatprep.mubr.bf16.mxu0 %v4520_v5  ;;  %10780 = vmatprep.mubr.bf16.mxu1 %v4520_v5  ;;  %v13338_v5 = vld [vmem:[%s15113_s17 + $0x1404] ss:$16 sps:$4 sm:$0xff]   ;;  %v13411_v59 = vld [vmem:[%s15113_s17 + $0x1588] ss:$16 sps:$4 sm:$0xff]  }
 0x463   : > { %10095 = vmatpush1.bf16.msra.mxu0 %v13246_v52  ;;  %10751 = vmatpush1.bf16.msra.mxu1 %v13249_v6  ;;  %v13341_v52 = vld [vmem:[%s15113_s17 + $0x140c] ss:$16 sps:$4 sm:$0xff]   ;;  %v4489_v6 = vcombine.high %v15871_v1, %v15871_v1 }
 0x464   : > { %10096 = vmatprep.subr.bf16.mxu0 %v13254_v7  ;;  %10752 = vmatprep.subr.bf16.mxu1 %v13257_v8  ;;  %v4518_v7 = vcombine.high %v15802_v62, %v15802_v62  ;;  %v13336_v8 = vld [vmem:[%s15113_s17 + $0x1400] ss:$16 sps:$4 sm:$0xff]  }
 0x465   : > { %v13342_v62 = vld [vmem:[%s15113_s17 + $0x1420] ss:$16 sps:$4 sm:$0xff]  }
 0x467   : > { %10097 = vmatpush1.bf16.msra.mxu0 %v13252_v61  ;;  %10753 = vmatpush1.bf16.msra.mxu1 %v13255_v9  ;;  %v13339_v61 = vld [vmem:[%s15113_s17 + $0x1408] ss:$16 sps:$4 sm:$0xff]   ;;  %v13344_v9 = vld [vmem:[%s15113_s17 + $0x1424] ss:$16 sps:$4 sm:$0xff]  }
 0x468   : > { %10098 = vmatprep.subr.bf16.mxu0 %v13260_v11  ;;  %10754 = vmatprep.subr.bf16.mxu1 %v13263_v12  ;;  %v13347_v11 = vld [vmem:[%s15113_s17 + $0x142c] ss:$16 sps:$4 sm:$0xff]   ;;  %v15886_v12 = vrot.slane %v4489_v6, %v15120_v10  ;;  %v13428_v6 = vld [vmem:[%s15113_s17 + $0x15e4] ss:$16 sps:$4 sm:$0xff]  }
 0x46b   : > { %10099 = vmatpush1.bf16.msra.mxu0 %v13258_v13  ;;  %10755 = vmatpush1.bf16.msra.mxu1 %v13261_v15  ;;  %v13345_v13 = vld [vmem:[%s15113_s17 + $0x1428] ss:$16 sps:$4 sm:$0xff]   ;;  %v13350_v15 = vld [vmem:[%s15113_s17 + $0x1444] ss:$16 sps:$4 sm:$0xff]  }
 0x46c   : > { %10100 = vmatprep.subr.bf16.mxu0 %v13266_v16  ;;  %10756 = vmatprep.subr.bf16.mxu1 %v13269_v17  ;;  %v13353_v16 = vld [vmem:[%s15113_s17 + $0x144c] ss:$16 sps:$4 sm:$0xff]   ;;  %v13348_v17 = vld [vmem:[%s15113_s17 + $0x1440] ss:$16 sps:$4 sm:$0xff]  }
 0x46f   : > { %10101 = vmatpush1.bf16.msra.mxu0 %v13264_v20  ;;  %10757 = vmatpush1.bf16.msra.mxu1 %v13267_v21  ;;  %v13351_v20 = vld [vmem:[%s15113_s17 + $0x1448] ss:$16 sps:$4 sm:$0xff]   ;;  %v13356_v21 = vld [vmem:[%s15113_s17 + $0x1464] ss:$16 sps:$4 sm:$0xff]  }
 0x470   : > { %10102 = vmatprep.subr.bf16.mxu0 %v13272_v3  ;;  %10758 = vmatprep.subr.bf16.mxu1 %v13275_v23  ;;  %v13359_v3 = vld [vmem:[%s15113_s17 + $0x146c] ss:$16 sps:$4 sm:$0xff]   ;;  %v13354_v23 = vld [vmem:[%s15113_s17 + $0x1460] ss:$16 sps:$4 sm:$0xff]  }
 0x473   : > { %10103 = vmatpush1.bf16.msra.mxu0 %v13270_v14  ;;  %10759 = vmatpush1.bf16.msra.mxu1 %v13273_v24  ;;  %v13357_v14 = vld [vmem:[%s15113_s17 + $0x1468] ss:$16 sps:$4 sm:$0xff]   ;;  %v13362_v24 = vld [vmem:[%s15113_s17 + $0x1484] ss:$16 sps:$4 sm:$0xff]  }
 0x474   : > { %10104 = vmatprep.subr.bf16.mxu0 %v13278_v25  ;;  %10760 = vmatprep.subr.bf16.mxu1 %v13281_v26  ;;  %v13365_v25 = vld [vmem:[%s15113_s17 + $0x148c] ss:$16 sps:$4 sm:$0xff]   ;;  %v13360_v26 = vld [vmem:[%s15113_s17 + $0x1480] ss:$16 sps:$4 sm:$0xff]  }
 0x477   : > { %10105 = vmatpush1.bf16.msra.mxu0 %v13276_v27  ;;  %10761 = vmatpush1.bf16.msra.mxu1 %v13279_v29  ;;  %v13363_v27 = vld [vmem:[%s15113_s17 + $0x1488] ss:$16 sps:$4 sm:$0xff]   ;;  %v13368_v29 = vld [vmem:[%s15113_s17 + $0x14a4] ss:$16 sps:$4 sm:$0xff]  }
 0x478   : > { %10106 = vmatprep.subr.bf16.mxu0 %v13284_v30  ;;  %10762 = vmatprep.subr.bf16.mxu1 %v13287_v31  ;;  %v13371_v30 = vld [vmem:[%s15113_s17 + $0x14ac] ss:$16 sps:$4 sm:$0xff]   ;;  %v13366_v31 = vld [vmem:[%s15113_s17 + $0x14a0] ss:$16 sps:$4 sm:$0xff]  }
 0x47b   : > { %10107 = vmatpush1.bf16.msra.mxu0 %v13282_v32  ;;  %10763 = vmatpush1.bf16.msra.mxu1 %v13285_v33  ;;  %v13369_v32 = vld [vmem:[%s15113_s17 + $0x14a8] ss:$16 sps:$4 sm:$0xff]   ;;  %v13374_v33 = vld [vmem:[%s15113_s17 + $0x14c4] ss:$16 sps:$4 sm:$0xff]  }
 0x47c   : > { %10108 = vmatprep.subr.bf16.mxu0 %v13290_v34  ;;  %10764 = vmatprep.subr.bf16.mxu1 %v13293_v19  ;;  %v13377_v34 = vld [vmem:[%s15113_s17 + $0x14cc] ss:$16 sps:$4 sm:$0xff]   ;;  %v13372_v19 = vld [vmem:[%s15113_s17 + $0x14c0] ss:$16 sps:$4 sm:$0xff]  }
 0x47f   : > { %10109 = vmatpush1.bf16.msra.mxu0 %v13288_v35  ;;  %10765 = vmatpush1.bf16.msra.mxu1 %v13291_v36  ;;  %v13375_v35 = vld [vmem:[%s15113_s17 + $0x14c8] ss:$16 sps:$4 sm:$0xff]   ;;  %v13380_v36 = vld [vmem:[%s15113_s17 + $0x14e4] ss:$16 sps:$4 sm:$0xff]  }
 0x480   : > { %10110 = vmatprep.subr.bf16.mxu0 %v13296_v28  ;;  %10766 = vmatprep.subr.bf16.mxu1 %v13299_v37  ;;  %v13383_v28 = vld [vmem:[%s15113_s17 + $0x14ec] ss:$16 sps:$4 sm:$0xff]   ;;  %v13378_v37 = vld [vmem:[%s15113_s17 + $0x14e0] ss:$16 sps:$4 sm:$0xff]  }
 0x483   : > { %10111 = vmatpush1.bf16.msra.mxu0 %v13294_v39  ;;  %10767 = vmatpush1.bf16.msra.mxu1 %v13297_v40  ;;  %v13381_v39 = vld [vmem:[%s15113_s17 + $0x14e8] ss:$16 sps:$4 sm:$0xff]   ;;  %v13386_v40 = vld [vmem:[%s15113_s17 + $0x1504] ss:$16 sps:$4 sm:$0xff]  }
 0x484   : > { %10112 = vmatprep.subr.bf16.mxu0 %v13302_v42  ;;  %10768 = vmatprep.subr.bf16.mxu1 %v13305_v43  ;;  %v13389_v42 = vld [vmem:[%s15113_s17 + $0x150c] ss:$16 sps:$4 sm:$0xff]   ;;  %v13384_v43 = vld [vmem:[%s15113_s17 + $0x1500] ss:$16 sps:$4 sm:$0xff]  }
 0x487   : > { %10113 = vmatpush1.bf16.msra.mxu0 %v13300_v22  ;;  %10769 = vmatpush1.bf16.msra.mxu1 %v13303_v44  ;;  %v13387_v22 = vld [vmem:[%s15113_s17 + $0x1508] ss:$16 sps:$4 sm:$0xff]   ;;  %v13392_v44 = vld [vmem:[%s15113_s17 + $0x1524] ss:$16 sps:$4 sm:$0xff]  }
 0x488   : > { %10114 = vmatprep.subr.bf16.mxu0 %v13308_v45  ;;  %10770 = vmatprep.subr.bf16.mxu1 %v13311_v46  ;;  %v13395_v45 = vld [vmem:[%s15113_s17 + $0x152c] ss:$16 sps:$4 sm:$0xff]   ;;  %v13390_v46 = vld [vmem:[%s15113_s17 + $0x1520] ss:$16 sps:$4 sm:$0xff]  }
 0x48b   : > { %10115 = vmatpush1.bf16.msra.mxu0 %v13306_v47  ;;  %10771 = vmatpush1.bf16.msra.mxu1 %v13309_v48  ;;  %v13393_v47 = vld [vmem:[%s15113_s17 + $0x1528] ss:$16 sps:$4 sm:$0xff]   ;;  %v13398_v48 = vld [vmem:[%s15113_s17 + $0x1544] ss:$16 sps:$4 sm:$0xff]  }
 0x48c   : > { %10116 = vmatprep.subr.bf16.mxu0 %v13314_v49  ;;  %10772 = vmatprep.subr.bf16.mxu1 %v13317_v51  ;;  %v13401_v49 = vld [vmem:[%s15113_s17 + $0x154c] ss:$16 sps:$4 sm:$0xff]   ;;  %v13396_v51 = vld [vmem:[%s15113_s17 + $0x1540] ss:$16 sps:$4 sm:$0xff]  }
 0x48f   : > { %10117 = vmatpush1.bf16.msra.mxu0 %v13312_v53  ;;  %10773 = vmatpush1.bf16.msra.mxu1 %v13315_v54  ;;  %v13399_v53 = vld [vmem:[%s15113_s17 + $0x1548] ss:$16 sps:$4 sm:$0xff]   ;;  %v13404_v54 = vld [vmem:[%s15113_s17 + $0x1564] ss:$16 sps:$4 sm:$0xff]  }
 0x490   : > { %10118 = vmatprep.subr.bf16.mxu0 %v13320_v55  ;;  %10774 = vmatprep.subr.bf16.mxu1 %v13323_v41  ;;  %v13407_v55 = vld [vmem:[%s15113_s17 + $0x156c] ss:$16 sps:$4 sm:$0xff]   ;;  %v13402_v41 = vld [vmem:[%s15113_s17 + $0x1560] ss:$16 sps:$4 sm:$0xff]  }
 0x493   : > { %10119 = vmatpush1.bf16.msra.mxu0 %v13318_v56  ;;  %10775 = vmatpush1.bf16.msra.mxu1 %v13321_v57  ;;  %v13405_v56 = vld [vmem:[%s15113_s17 + $0x1568] ss:$16 sps:$4 sm:$0xff]   ;;  %v13410_v57 = vld [vmem:[%s15113_s17 + $0x1584] ss:$16 sps:$4 sm:$0xff]  }
 0x494   : > { %10120 = vmatprep.subr.bf16.mxu0 %v13326_v58  ;;  %10776 = vmatprep.subr.bf16.mxu1 %v13329_v50  ;;  %v13413_v58 = vld [vmem:[%s15113_s17 + $0x158c] ss:$16 sps:$4 sm:$0xff]   ;;  %v13408_v50 = vld [vmem:[%s15113_s17 + $0x1580] ss:$16 sps:$4 sm:$0xff]  }
 0x497   : > { %10121 = vmatpush1.bf16.msra.mxu0 %v13324_v60  ;;  %10777 = vmatpush1.bf16.msra.mxu1 %v13327_v18  ;;  %v13416_v60 = vld [vmem:[%s15113_s17 + $0x15a4] ss:$16 sps:$4 sm:$0xff]   ;;  %v13419_v18 = vld [vmem:[%s15113_s17 + $0x15ac] ss:$16 sps:$4 sm:$0xff]  }
 0x498   : > { %10122 = vmatprep.subr.bf16.mxu0 %v13332_v63  ;;  %10778 = vmatprep.subr.bf16.mxu1 %v13335_v0  ;;  %v13414_v63 = vld [vmem:[%s15113_s17 + $0x15a0] ss:$16 sps:$4 sm:$0xff]   ;;  %v13417_v0 = vld [vmem:[%s15113_s17 + $0x15a8] ss:$16 sps:$4 sm:$0xff]  }
 0x49b   : > { %10123 = vmatpush1.bf16.msra.mxu0 %v13330_v38  ;;  %10779 = vmatpush1.bf16.msra.mxu1 %v13333_v2  ;;  %v13422_v38 = vld [vmem:[%s15113_s17 + $0x15c4] ss:$16 sps:$4 sm:$0xff]   ;;  %v13425_v2 = vld [vmem:[%s15113_s17 + $0x15cc] ss:$16 sps:$4 sm:$0xff]  }
 0x49c   : > { %10133 = vmatprep.subr.bf16.mxu0 %v13338_v5  ;;  %10789 = vmatprep.subr.bf16.mxu1 %v13341_v52  ;;  %v13420_v5 = vld [vmem:[%s15113_s17 + $0x15c0] ss:$16 sps:$4 sm:$0xff]   ;;  %v13423_v52 = vld [vmem:[%s15113_s17 + $0x15c8] ss:$16 sps:$4 sm:$0xff]  }
 0x49e   : > { %10125 = vmatmul.mubr.bf16.vlgmr.msra.gmra.mrb[0].mxu0 %v4518_v7  ;;  %10781 = vmatmul.mubr.bf16.vlgmr.msra.gmra.mrb[0].mxu1 %v4518_v7  ;;  %v13431_v7 = vld [vmem:[%s15113_s17 + $0x15ec] ss:$16 sps:$4 sm:$0xff]  }
 0x49f   : > { %10134 = vmatpush1.bf16.msra.mxu0 %v13336_v8  ;;  %10790 = vmatpush1.bf16.msra.mxu1 %v13339_v61  ;;  %v13426_v8 = vld [vmem:[%s15113_s17 + $0x15e0] ss:$16 sps:$4 sm:$0xff]   ;;  %v13429_v61 = vld [vmem:[%s15113_s17 + $0x15e8] ss:$16 sps:$4 sm:$0xff]  }
 0x4a0   : > { %10135 = vmatprep.subr.bf16.mxu0 %v13344_v9  ;;  %10791 = vmatprep.subr.bf16.mxu1 %v13347_v11  ;;  %v13435_v9 = vld [vmem:[%s15113_s17 + $0x1604] ss:$16 sps:$4 sm:$0xff]   ;;  %v13438_v11 = vld [vmem:[%s15113_s17 + $0x160c] ss:$16 sps:$4 sm:$0xff]  }
 0x4a1   : > { %10165 = vmatprep.mubr.bf16.mxu0 %v15886_v12  ;;  %10821 = vmatprep.mubr.bf16.mxu1 %v15886_v12 }
 0x4a3   : > { %10136 = vmatpush1.bf16.msra.mxu0 %v13342_v62  ;;  %10792 = vmatpush1.bf16.msra.mxu1 %v13345_v13  ;;  %v15952_v62 = vrot.slane %v15871_v1, %v15120_v10  ;;  %v13433_v13 = vld [vmem:[%s15113_s17 + $0x1600] ss:$16 sps:$4 sm:$0xff]  }
 0x4a4   : > { %10137 = vmatprep.subr.bf16.mxu0 %v13350_v15  ;;  %10793 = vmatprep.subr.bf16.mxu1 %v13353_v16  ;;  %v13436_v15 = vld [vmem:[%s15113_s17 + $0x1608] ss:$16 sps:$4 sm:$0xff]   ;;  %v13441_v16 = vld [vmem:[%s15113_s17 + $0x1624] ss:$16 sps:$4 sm:$0xff]   ;;  %v13439_v1 = vld [vmem:[%s15113_s17 + $0x1620] ss:$16 sps:$4 sm:$0xff]  }
 0x4a7   : > { %10138 = vmatpush1.bf16.msra.mxu0 %v13348_v17  ;;  %10794 = vmatpush1.bf16.msra.mxu1 %v13351_v20  ;;  %v13444_v17 = vld [vmem:[%s15113_s17 + $0x162c] ss:$16 sps:$4 sm:$0xff]   ;;  %v4521_v20 = vcombine.high %v15886_v12, %v15886_v12  ;;  %v13445_v12 = vld [vmem:[%s15113_s17 + $0x1640] ss:$16 sps:$4 sm:$0xff]  }
 0x4a8   : > { %10139 = vmatprep.subr.bf16.mxu0 %v13356_v21  ;;  %10795 = vmatprep.subr.bf16.mxu1 %v13359_v3  ;;  %v13442_v21 = vld [vmem:[%s15113_s17 + $0x1628] ss:$16 sps:$4 sm:$0xff]   ;;  %v13447_v3 = vld [vmem:[%s15113_s17 + $0x1644] ss:$16 sps:$4 sm:$0xff]  }
 0x4ab   : > { %10140 = vmatpush1.bf16.msra.mxu0 %v13354_v23  ;;  %10796 = vmatpush1.bf16.msra.mxu1 %v13357_v14  ;;  %v13450_v23 = vld [vmem:[%s15113_s17 + $0x164c] ss:$16 sps:$4 sm:$0xff]   ;;  %v13448_v14 = vld [vmem:[%s15113_s17 + $0x1648] ss:$16 sps:$4 sm:$0xff]  }
 0x4ac   : > { %10141 = vmatprep.subr.bf16.mxu0 %v13362_v24  ;;  %10797 = vmatprep.subr.bf16.mxu1 %v13365_v25  ;;  %v13453_v24 = vld [vmem:[%s15113_s17 + $0x1664] ss:$16 sps:$4 sm:$0xff]   ;;  %v13456_v25 = vld [vmem:[%s15113_s17 + $0x166c] ss:$16 sps:$4 sm:$0xff]  }
 0x4af   : > { %10142 = vmatpush1.bf16.msra.mxu0 %v13360_v26  ;;  %10798 = vmatpush1.bf16.msra.mxu1 %v13363_v27  ;;  %v13451_v26 = vld [vmem:[%s15113_s17 + $0x1660] ss:$16 sps:$4 sm:$0xff]   ;;  %v13454_v27 = vld [vmem:[%s15113_s17 + $0x1668] ss:$16 sps:$4 sm:$0xff]  }
 0x4b0   : > { %10143 = vmatprep.subr.bf16.mxu0 %v13368_v29  ;;  %10799 = vmatprep.subr.bf16.mxu1 %v13371_v30  ;;  %v13459_v29 = vld [vmem:[%s15113_s17 + $0x1684] ss:$16 sps:$4 sm:$0xff]   ;;  %v13462_v30 = vld [vmem:[%s15113_s17 + $0x168c] ss:$16 sps:$4 sm:$0xff]  }
 0x4b3   : > { %10144 = vmatpush1.bf16.msra.mxu0 %v13366_v31  ;;  %10800 = vmatpush1.bf16.msra.mxu1 %v13369_v32  ;;  %v13457_v31 = vld [vmem:[%s15113_s17 + $0x1680] ss:$16 sps:$4 sm:$0xff]   ;;  %v13460_v32 = vld [vmem:[%s15113_s17 + $0x1688] ss:$16 sps:$4 sm:$0xff]  }
 0x4b4   : > { %10145 = vmatprep.subr.bf16.mxu0 %v13374_v33  ;;  %10801 = vmatprep.subr.bf16.mxu1 %v13377_v34  ;;  %v13465_v33 = vld [vmem:[%s15113_s17 + $0x16a4] ss:$16 sps:$4 sm:$0xff]   ;;  %v13468_v34 = vld [vmem:[%s15113_s17 + $0x16ac] ss:$16 sps:$4 sm:$0xff]  }
 0x4b7   : > { %10146 = vmatpush1.bf16.msra.mxu0 %v13372_v19  ;;  %10802 = vmatpush1.bf16.msra.mxu1 %v13375_v35  ;;  %v13463_v19 = vld [vmem:[%s15113_s17 + $0x16a0] ss:$16 sps:$4 sm:$0xff]   ;;  %v13466_v35 = vld [vmem:[%s15113_s17 + $0x16a8] ss:$16 sps:$4 sm:$0xff]  }
 0x4b8   : > { %10147 = vmatprep.subr.bf16.mxu0 %v13380_v36  ;;  %10803 = vmatprep.subr.bf16.mxu1 %v13383_v28  ;;  %v13471_v36 = vld [vmem:[%s15113_s17 + $0x16c4] ss:$16 sps:$4 sm:$0xff]   ;;  %v13474_v28 = vld [vmem:[%s15113_s17 + $0x16cc] ss:$16 sps:$4 sm:$0xff]  }
 0x4bb   : > { %10148 = vmatpush1.bf16.msra.mxu0 %v13378_v37  ;;  %10804 = vmatpush1.bf16.msra.mxu1 %v13381_v39  ;;  %v13469_v37 = vld [vmem:[%s15113_s17 + $0x16c0] ss:$16 sps:$4 sm:$0xff]   ;;  %v13472_v39 = vld [vmem:[%s15113_s17 + $0x16c8] ss:$16 sps:$4 sm:$0xff]  }
 0x4bc   : > { %10149 = vmatprep.subr.bf16.mxu0 %v13386_v40  ;;  %10805 = vmatprep.subr.bf16.mxu1 %v13389_v42  ;;  %v13477_v40 = vld [vmem:[%s15113_s17 + $0x16e4] ss:$16 sps:$4 sm:$0xff]   ;;  %v13480_v42 = vld [vmem:[%s15113_s17 + $0x16ec] ss:$16 sps:$4 sm:$0xff]  }
 0x4bf   : > { %10150 = vmatpush1.bf16.msra.mxu0 %v13384_v43  ;;  %10806 = vmatpush1.bf16.msra.mxu1 %v13387_v22  ;;  %v13475_v43 = vld [vmem:[%s15113_s17 + $0x16e0] ss:$16 sps:$4 sm:$0xff]   ;;  %v13478_v22 = vld [vmem:[%s15113_s17 + $0x16e8] ss:$16 sps:$4 sm:$0xff]  }
 0x4c0   : > { %10151 = vmatprep.subr.bf16.mxu0 %v13392_v44  ;;  %10807 = vmatprep.subr.bf16.mxu1 %v13395_v45  ;;  %v13483_v44 = vld [vmem:[%s15113_s17 + $0x1704] ss:$16 sps:$4 sm:$0xff]   ;;  %v13486_v45 = vld [vmem:[%s15113_s17 + $0x170c] ss:$16 sps:$4 sm:$0xff]  }
 0x4c3   : > { %10152 = vmatpush1.bf16.msra.mxu0 %v13390_v46  ;;  %10808 = vmatpush1.bf16.msra.mxu1 %v13393_v47  ;;  %v13481_v46 = vld [vmem:[%s15113_s17 + $0x1700] ss:$16 sps:$4 sm:$0xff]   ;;  %v13484_v47 = vld [vmem:[%s15113_s17 + $0x1708] ss:$16 sps:$4 sm:$0xff]  }
 0x4c4   : > { %10153 = vmatprep.subr.bf16.mxu0 %v13398_v48  ;;  %10809 = vmatprep.subr.bf16.mxu1 %v13401_v49  ;;  %v13489_v48 = vld [vmem:[%s15113_s17 + $0x1724] ss:$16 sps:$4 sm:$0xff]   ;;  %v13492_v49 = vld [vmem:[%s15113_s17 + $0x172c] ss:$16 sps:$4 sm:$0xff]  }
 0x4c7   : > { %10154 = vmatpush1.bf16.msra.mxu0 %v13396_v51  ;;  %10810 = vmatpush1.bf16.msra.mxu1 %v13399_v53  ;;  %v13487_v51 = vld [vmem:[%s15113_s17 + $0x1720] ss:$16 sps:$4 sm:$0xff]   ;;  %v13490_v53 = vld [vmem:[%s15113_s17 + $0x1728] ss:$16 sps:$4 sm:$0xff]  }
 0x4c8   : > { %10155 = vmatprep.subr.bf16.mxu0 %v13404_v54  ;;  %10811 = vmatprep.subr.bf16.mxu1 %v13407_v55  ;;  %v13495_v54 = vld [vmem:[%s15113_s17 + $0x1744] ss:$16 sps:$4 sm:$0xff]   ;;  %v13498_v55 = vld [vmem:[%s15113_s17 + $0x174c] ss:$16 sps:$4 sm:$0xff]  }
 0x4cb   : > { %10156 = vmatpush1.bf16.msra.mxu0 %v13402_v41  ;;  %10812 = vmatpush1.bf16.msra.mxu1 %v13405_v56  ;;  %v13493_v41 = vld [vmem:[%s15113_s17 + $0x1740] ss:$16 sps:$4 sm:$0xff]   ;;  %v13496_v56 = vld [vmem:[%s15113_s17 + $0x1748] ss:$16 sps:$4 sm:$0xff]  }
 0x4cc   : > { %10157 = vmatprep.subr.bf16.mxu0 %v13410_v57  ;;  %10813 = vmatprep.subr.bf16.mxu1 %v13413_v58  ;;  %v13501_v57 = vld [vmem:[%s15113_s17 + $0x1764] ss:$16 sps:$4 sm:$0xff]   ;;  %v13504_v58 = vld [vmem:[%s15113_s17 + $0x176c] ss:$16 sps:$4 sm:$0xff]  }
 0x4cf   : > { %10158 = vmatpush1.bf16.msra.mxu0 %v13408_v50  ;;  %10814 = vmatpush1.bf16.msra.mxu1 %v13411_v59  ;;  %v13499_v50 = vld [vmem:[%s15113_s17 + $0x1760] ss:$16 sps:$4 sm:$0xff]   ;;  %v13502_v59 = vld [vmem:[%s15113_s17 + $0x1768] ss:$16 sps:$4 sm:$0xff]  }
 0x4d0   : > { %10159 = vmatprep.subr.bf16.mxu0 %v13416_v60  ;;  %10815 = vmatprep.subr.bf16.mxu1 %v13419_v18  ;;  %v13507_v60 = vld [vmem:[%s15113_s17 + $0x1784] ss:$16 sps:$4 sm:$0xff]   ;;  %v13510_v18 = vld [vmem:[%s15113_s17 + $0x178c] ss:$16 sps:$4 sm:$0xff]  }
 0x4d3   : > { %10160 = vmatpush1.bf16.msra.mxu0 %v13414_v63  ;;  %10816 = vmatpush1.bf16.msra.mxu1 %v13417_v0  ;;  %v13505_v63 = vld [vmem:[%s15113_s17 + $0x1780] ss:$16 sps:$4 sm:$0xff]   ;;  %v13508_v0 = vld [vmem:[%s15113_s17 + $0x1788] ss:$16 sps:$4 sm:$0xff]  }
 0x4d4   : > { %10161 = vmatprep.subr.bf16.mxu0 %v13422_v38  ;;  %10817 = vmatprep.subr.bf16.mxu1 %v13425_v2  ;;  %v13513_v38 = vld [vmem:[%s15113_s17 + $0x17a4] ss:$16 sps:$4 sm:$0xff]   ;;  %v13516_v2 = vld [vmem:[%s15113_s17 + $0x17ac] ss:$16 sps:$4 sm:$0xff]  }
 0x4d7   : > { %10162 = vmatpush1.bf16.msra.mxu0 %v13420_v5  ;;  %10818 = vmatpush1.bf16.msra.mxu1 %v13423_v52  ;;  %v13511_v5 = vld [vmem:[%s15113_s17 + $0x17a0] ss:$16 sps:$4 sm:$0xff]   ;;  %v13514_v52 = vld [vmem:[%s15113_s17 + $0x17a8] ss:$16 sps:$4 sm:$0xff]  }
 0x4d8   : > { %10163 = vmatprep.subr.bf16.mxu0 %v13428_v6  ;;  %10819 = vmatprep.subr.bf16.mxu1 %v13431_v7  ;;  %v13519_v6 = vld [vmem:[%s15113_s17 + $0x17c4] ss:$16 sps:$4 sm:$0xff]   ;;  %v13522_v7 = vld [vmem:[%s15113_s17 + $0x17cc] ss:$16 sps:$4 sm:$0xff]  }
 0x4db   : > { %10164 = vmatpush1.bf16.msra.mxu0 %v13426_v8  ;;  %10820 = vmatpush1.bf16.msra.mxu1 %v13429_v61  ;;  %v16017_v8 = vld [vmem:[%s16353_s0 + $0x18] sm:$0xff]  ;;  %v13517_v61 = vld [vmem:[%s15113_s17 + $0x17c0] ss:$16 sps:$4 sm:$0xff]  }
 0x4dc   : > { %10174 = vmatprep.subr.bf16.mxu0 %v13435_v9  ;;  %10830 = vmatprep.subr.bf16.mxu1 %v13438_v11  ;;  %v13520_v9 = vld [vmem:[%s15113_s17 + $0x17c8] ss:$16 sps:$4 sm:$0xff]   ;;  %v13525_v11 = vld [vmem:[%s15113_s17 + $0x17e4] ss:$16 sps:$4 sm:$0xff]  }
 0x4de   : > { %10166 = vmatmul.mubr.bf16.vlgmr.msra.gmra.mrb[0].mxu0 %v15952_v62  ;;  %10822 = vmatmul.mubr.bf16.vlgmr.msra.gmra.mrb[0].mxu1 %v15952_v62 }
 0x4df   : > { %10175 = vmatpush1.bf16.msra.mxu0 %v13433_v13  ;;  %10831 = vmatpush1.bf16.msra.mxu1 %v13436_v15  ;;  %v13528_v13 = vld [vmem:[%s15113_s17 + $0x17ec] ss:$16 sps:$4 sm:$0xff]   ;;  %v16025_v15 = vrot.slane %v16017_v8, %v15120_v10 }
 0x4e0   : > { %10176 = vmatprep.subr.bf16.mxu0 %v13441_v16  ;;  %10832 = vmatprep.subr.bf16.mxu1 %v13444_v17  ;;  %v13523_v16 = vld [vmem:[%s15113_s17 + $0x17e0] ss:$16 sps:$4 sm:$0xff]   ;;  %v13526_v17 = vld [vmem:[%s15113_s17 + $0x17e8] ss:$16 sps:$4 sm:$0xff]  }
 0x4e1   : > { %10206 = vmatprep.mubr.bf16.mxu0 %v4521_v20  ;;  %10862 = vmatprep.mubr.bf16.mxu1 %v4521_v20  ;;  %v13531_v20 = vld [vmem:[%s15113_s17 + $0x1804] ss:$16 sps:$4 sm:$0xff]  }
 0x4e3   : > { %10177 = vmatpush1.bf16.msra.mxu0 %v13439_v1  ;;  %10833 = vmatpush1.bf16.msra.mxu1 %v13442_v21  ;;  %v13534_v1 = vld [vmem:[%s15113_s17 + $0x180c] ss:$16 sps:$4 sm:$0xff]   ;;  %v4537_v21 = vcombine.high %v16025_v15, %v16025_v15 }
 0x4e4   : > { %10178 = vmatprep.subr.bf16.mxu0 %v13447_v3  ;;  %10834 = vmatprep.subr.bf16.mxu1 %v13450_v23  ;;  %v4519_v3 = vcombine.high %v15952_v62, %v15952_v62  ;;  %v13529_v23 = vld [vmem:[%s15113_s17 + $0x1800] ss:$16 sps:$4 sm:$0xff]  }
 0x4e5   : > { %v13535_v62 = vld [vmem:[%s15113_s17 + $0x1820] ss:$16 sps:$4 sm:$0xff]  }
 0x4e7   : > { %10179 = vmatpush1.bf16.msra.mxu0 %v13445_v12  ;;  %10835 = vmatpush1.bf16.msra.mxu1 %v13448_v14  ;;  %v13532_v12 = vld [vmem:[%s15113_s17 + $0x1808] ss:$16 sps:$4 sm:$0xff]   ;;  %v13537_v14 = vld [vmem:[%s15113_s17 + $0x1824] ss:$16 sps:$4 sm:$0xff]  }
 0x4e8   : > { %10180 = vmatprep.subr.bf16.mxu0 %v13453_v24  ;;  %10836 = vmatprep.subr.bf16.mxu1 %v13456_v25  ;;  %v13540_v24 = vld [vmem:[%s15113_s17 + $0x182c] ss:$16 sps:$4 sm:$0xff]   ;;  %v16040_v25 = vrot.slane %v4537_v21, %v15120_v10  ;;  %v13616_v21 = vld [vmem:[%s15113_s17 + $0x19c8] ss:$16 sps:$4 sm:$0xff]  }
 0x4eb   : > { %10181 = vmatpush1.bf16.msra.mxu0 %v13451_v26  ;;  %10837 = vmatpush1.bf16.msra.mxu1 %v13454_v27  ;;  %v13538_v26 = vld [vmem:[%s15113_s17 + $0x1828] ss:$16 sps:$4 sm:$0xff]   ;;  %v13543_v27 = vld [vmem:[%s15113_s17 + $0x1844] ss:$16 sps:$4 sm:$0xff]  }
 0x4ec   : > { %10182 = vmatprep.subr.bf16.mxu0 %v13459_v29  ;;  %10838 = vmatprep.subr.bf16.mxu1 %v13462_v30  ;;  %v13546_v29 = vld [vmem:[%s15113_s17 + $0x184c] ss:$16 sps:$4 sm:$0xff]   ;;  %v13541_v30 = vld [vmem:[%s15113_s17 + $0x1840] ss:$16 sps:$4 sm:$0xff]  }
 0x4ef   : > { %10183 = vmatpush1.bf16.msra.mxu0 %v13457_v31  ;;  %10839 = vmatpush1.bf16.msra.mxu1 %v13460_v32  ;;  %v13544_v31 = vld [vmem:[%s15113_s17 + $0x1848] ss:$16 sps:$4 sm:$0xff]   ;;  %v13549_v32 = vld [vmem:[%s15113_s17 + $0x1864] ss:$16 sps:$4 sm:$0xff]  }
 0x4f0   : > { %10184 = vmatprep.subr.bf16.mxu0 %v13465_v33  ;;  %10840 = vmatprep.subr.bf16.mxu1 %v13468_v34  ;;  %v13552_v33 = vld [vmem:[%s15113_s17 + $0x186c] ss:$16 sps:$4 sm:$0xff]   ;;  %v13547_v34 = vld [vmem:[%s15113_s17 + $0x1860] ss:$16 sps:$4 sm:$0xff]  }
 0x4f3   : > { %10185 = vmatpush1.bf16.msra.mxu0 %v13463_v19  ;;  %10841 = vmatpush1.bf16.msra.mxu1 %v13466_v35  ;;  %v13550_v19 = vld [vmem:[%s15113_s17 + $0x1868] ss:$16 sps:$4 sm:$0xff]   ;;  %v13555_v35 = vld [vmem:[%s15113_s17 + $0x1884] ss:$16 sps:$4 sm:$0xff]  }
 0x4f4   : > { %10186 = vmatprep.subr.bf16.mxu0 %v13471_v36  ;;  %10842 = vmatprep.subr.bf16.mxu1 %v13474_v28  ;;  %v13558_v36 = vld [vmem:[%s15113_s17 + $0x188c] ss:$16 sps:$4 sm:$0xff]   ;;  %v13553_v28 = vld [vmem:[%s15113_s17 + $0x1880] ss:$16 sps:$4 sm:$0xff]  }
 0x4f7   : > { %10187 = vmatpush1.bf16.msra.mxu0 %v13469_v37  ;;  %10843 = vmatpush1.bf16.msra.mxu1 %v13472_v39  ;;  %v13556_v37 = vld [vmem:[%s15113_s17 + $0x1888] ss:$16 sps:$4 sm:$0xff]   ;;  %v13561_v39 = vld [vmem:[%s15113_s17 + $0x18a4] ss:$16 sps:$4 sm:$0xff]  }
 0x4f8   : > { %10188 = vmatprep.subr.bf16.mxu0 %v13477_v40  ;;  %10844 = vmatprep.subr.bf16.mxu1 %v13480_v42  ;;  %v13564_v40 = vld [vmem:[%s15113_s17 + $0x18ac] ss:$16 sps:$4 sm:$0xff]   ;;  %v13559_v42 = vld [vmem:[%s15113_s17 + $0x18a0] ss:$16 sps:$4 sm:$0xff]  }
 0x4fb   : > { %10189 = vmatpush1.bf16.msra.mxu0 %v13475_v43  ;;  %10845 = vmatpush1.bf16.msra.mxu1 %v13478_v22  ;;  %v13562_v43 = vld [vmem:[%s15113_s17 + $0x18a8] ss:$16 sps:$4 sm:$0xff]   ;;  %v13567_v22 = vld [vmem:[%s15113_s17 + $0x18c4] ss:$16 sps:$4 sm:$0xff]  }
 0x4fc   : > { %10190 = vmatprep.subr.bf16.mxu0 %v13483_v44  ;;  %10846 = vmatprep.subr.bf16.mxu1 %v13486_v45  ;;  %v13570_v44 = vld [vmem:[%s15113_s17 + $0x18cc] ss:$16 sps:$4 sm:$0xff]   ;;  %v13565_v45 = vld [vmem:[%s15113_s17 + $0x18c0] ss:$16 sps:$4 sm:$0xff]  }
 0x4ff   : > { %10191 = vmatpush1.bf16.msra.mxu0 %v13481_v46  ;;  %10847 = vmatpush1.bf16.msra.mxu1 %v13484_v47  ;;  %v13568_v46 = vld [vmem:[%s15113_s17 + $0x18c8] ss:$16 sps:$4 sm:$0xff]   ;;  %v13573_v47 = vld [vmem:[%s15113_s17 + $0x18e4] ss:$16 sps:$4 sm:$0xff]  }
 0x500   : > { %10192 = vmatprep.subr.bf16.mxu0 %v13489_v48  ;;  %10848 = vmatprep.subr.bf16.mxu1 %v13492_v49  ;;  %v13576_v48 = vld [vmem:[%s15113_s17 + $0x18ec] ss:$16 sps:$4 sm:$0xff]   ;;  %v13571_v49 = vld [vmem:[%s15113_s17 + $0x18e0] ss:$16 sps:$4 sm:$0xff]  }
 0x503   : > { %10193 = vmatpush1.bf16.msra.mxu0 %v13487_v51  ;;  %10849 = vmatpush1.bf16.msra.mxu1 %v13490_v53  ;;  %v13574_v51 = vld [vmem:[%s15113_s17 + $0x18e8] ss:$16 sps:$4 sm:$0xff]   ;;  %v13579_v53 = vld [vmem:[%s15113_s17 + $0x1904] ss:$16 sps:$4 sm:$0xff]  }
 0x504   : > { %10194 = vmatprep.subr.bf16.mxu0 %v13495_v54  ;;  %10850 = vmatprep.subr.bf16.mxu1 %v13498_v55  ;;  %v13582_v54 = vld [vmem:[%s15113_s17 + $0x190c] ss:$16 sps:$4 sm:$0xff]   ;;  %v13577_v55 = vld [vmem:[%s15113_s17 + $0x1900] ss:$16 sps:$4 sm:$0xff]  }
 0x507   : > { %10195 = vmatpush1.bf16.msra.mxu0 %v13493_v41  ;;  %10851 = vmatpush1.bf16.msra.mxu1 %v13496_v56  ;;  %v13580_v41 = vld [vmem:[%s15113_s17 + $0x1908] ss:$16 sps:$4 sm:$0xff]   ;;  %v13585_v56 = vld [vmem:[%s15113_s17 + $0x1924] ss:$16 sps:$4 sm:$0xff]  }
 0x508   : > { %10196 = vmatprep.subr.bf16.mxu0 %v13501_v57  ;;  %10852 = vmatprep.subr.bf16.mxu1 %v13504_v58  ;;  %v13588_v57 = vld [vmem:[%s15113_s17 + $0x192c] ss:$16 sps:$4 sm:$0xff]   ;;  %v13583_v58 = vld [vmem:[%s15113_s17 + $0x1920] ss:$16 sps:$4 sm:$0xff]  }
 0x50b   : > { %10197 = vmatpush1.bf16.msra.mxu0 %v13499_v50  ;;  %10853 = vmatpush1.bf16.msra.mxu1 %v13502_v59  ;;  %v13586_v50 = vld [vmem:[%s15113_s17 + $0x1928] ss:$16 sps:$4 sm:$0xff]   ;;  %v13591_v59 = vld [vmem:[%s15113_s17 + $0x1944] ss:$16 sps:$4 sm:$0xff]  }
 0x50c   : > { %10198 = vmatprep.subr.bf16.mxu0 %v13507_v60  ;;  %10854 = vmatprep.subr.bf16.mxu1 %v13510_v18  ;;  %v13594_v60 = vld [vmem:[%s15113_s17 + $0x194c] ss:$16 sps:$4 sm:$0xff]   ;;  %v13589_v18 = vld [vmem:[%s15113_s17 + $0x1940] ss:$16 sps:$4 sm:$0xff]  }
 0x50f   : > { %10199 = vmatpush1.bf16.msra.mxu0 %v13505_v63  ;;  %10855 = vmatpush1.bf16.msra.mxu1 %v13508_v0  ;;  %v13592_v63 = vld [vmem:[%s15113_s17 + $0x1948] ss:$16 sps:$4 sm:$0xff]   ;;  %v13597_v0 = vld [vmem:[%s15113_s17 + $0x1964] ss:$16 sps:$4 sm:$0xff]  }
 0x510   : > { %10200 = vmatprep.subr.bf16.mxu0 %v13513_v38  ;;  %10856 = vmatprep.subr.bf16.mxu1 %v13516_v2  ;;  %v13600_v38 = vld [vmem:[%s15113_s17 + $0x196c] ss:$16 sps:$4 sm:$0xff]   ;;  %v13595_v2 = vld [vmem:[%s15113_s17 + $0x1960] ss:$16 sps:$4 sm:$0xff]  }
 0x513   : > { %10201 = vmatpush1.bf16.msra.mxu0 %v13511_v5  ;;  %10857 = vmatpush1.bf16.msra.mxu1 %v13514_v52  ;;  %v13598_v5 = vld [vmem:[%s15113_s17 + $0x1968] ss:$16 sps:$4 sm:$0xff]   ;;  %v13603_v52 = vld [vmem:[%s15113_s17 + $0x1984] ss:$16 sps:$4 sm:$0xff]  }
 0x514   : > { %10202 = vmatprep.subr.bf16.mxu0 %v13519_v6  ;;  %10858 = vmatprep.subr.bf16.mxu1 %v13522_v7  ;;  %v13606_v6 = vld [vmem:[%s15113_s17 + $0x198c] ss:$16 sps:$4 sm:$0xff]   ;;  %v13601_v7 = vld [vmem:[%s15113_s17 + $0x1980] ss:$16 sps:$4 sm:$0xff]  }
 0x517   : > { %10203 = vmatpush1.bf16.msra.mxu0 %v13517_v61  ;;  %10859 = vmatpush1.bf16.msra.mxu1 %v13520_v9  ;;  %v13604_v61 = vld [vmem:[%s15113_s17 + $0x1988] ss:$16 sps:$4 sm:$0xff]   ;;  %v13609_v9 = vld [vmem:[%s15113_s17 + $0x19a4] ss:$16 sps:$4 sm:$0xff]  }
 0x518   : > { %10204 = vmatprep.subr.bf16.mxu0 %v13525_v11  ;;  %10860 = vmatprep.subr.bf16.mxu1 %v13528_v13  ;;  %v13612_v11 = vld [vmem:[%s15113_s17 + $0x19ac] ss:$16 sps:$4 sm:$0xff]   ;;  %v13607_v13 = vld [vmem:[%s15113_s17 + $0x19a0] ss:$16 sps:$4 sm:$0xff]  }
 0x51b   : > { %10205 = vmatpush1.bf16.msra.mxu0 %v13523_v16  ;;  %10861 = vmatpush1.bf16.msra.mxu1 %v13526_v17  ;;  %v13610_v16 = vld [vmem:[%s15113_s17 + $0x19a8] ss:$16 sps:$4 sm:$0xff]   ;;  %v13615_v17 = vld [vmem:[%s15113_s17 + $0x19c4] ss:$16 sps:$4 sm:$0xff]  }
 0x51c   : > { %10215 = vmatprep.subr.bf16.mxu0 %v13531_v20  ;;  %10871 = vmatprep.subr.bf16.mxu1 %v13534_v1  ;;  %v13618_v20 = vld [vmem:[%s15113_s17 + $0x19cc] ss:$16 sps:$4 sm:$0xff]   ;;  %v13613_v1 = vld [vmem:[%s15113_s17 + $0x19c0] ss:$16 sps:$4 sm:$0xff]  }
 0x51e   : > { %10207 = vmatmul.mubr.bf16.vlgmr.msra.gmra.mrb[0].mxu0 %v4519_v3  ;;  %10863 = vmatmul.mubr.bf16.vlgmr.msra.gmra.mrb[0].mxu1 %v4519_v3  ;;  %v13621_v3 = vld [vmem:[%s15113_s17 + $0x19e4] ss:$16 sps:$4 sm:$0xff]  }
 0x51f   : > { %10216 = vmatpush1.bf16.msra.mxu0 %v13529_v23  ;;  %10872 = vmatpush1.bf16.msra.mxu1 %v13532_v12  ;;  %v13624_v23 = vld [vmem:[%s15113_s17 + $0x19ec] ss:$16 sps:$4 sm:$0xff]   ;;  %v13619_v12 = vld [vmem:[%s15113_s17 + $0x19e0] ss:$16 sps:$4 sm:$0xff]  }
 0x520   : > { %10217 = vmatprep.subr.bf16.mxu0 %v13537_v14  ;;  %10873 = vmatprep.subr.bf16.mxu1 %v13540_v24  ;;  %v13622_v14 = vld [vmem:[%s15113_s17 + $0x19e8] ss:$16 sps:$4 sm:$0xff]   ;;  %v13627_v24 = vld [vmem:[%s15113_s17 + $0x1a04] ss:$16 sps:$4 sm:$0xff]  }
 0x521   : > { %10247 = vmatprep.mubr.bf16.mxu0 %v16040_v25  ;;  %10903 = vmatprep.mubr.bf16.mxu1 %v16040_v25 }
 0x523   : > { %10218 = vmatpush1.bf16.msra.mxu0 %v13535_v62  ;;  %10874 = vmatpush1.bf16.msra.mxu1 %v13538_v26  ;;  %v13630_v62 = vld [vmem:[%s15113_s17 + $0x1a0c] ss:$16 sps:$4 sm:$0xff]   ;;  %v16106_v26 = vrot.slane %v16025_v15, %v15120_v10  ;;  %v13631_v15 = vld [vmem:[%s15113_s17 + $0x1a20] ss:$16 sps:$4 sm:$0xff]  }
 0x524   : > { %10219 = vmatprep.subr.bf16.mxu0 %v13543_v27  ;;  %10875 = vmatprep.subr.bf16.mxu1 %v13546_v29  ;;  %v13625_v27 = vld [vmem:[%s15113_s17 + $0x1a00] ss:$16 sps:$4 sm:$0xff]   ;;  %v13628_v29 = vld [vmem:[%s15113_s17 + $0x1a08] ss:$16 sps:$4 sm:$0xff]  }
 0x527   : > { %10220 = vmatpush1.bf16.msra.mxu0 %v13541_v30  ;;  %10876 = vmatpush1.bf16.msra.mxu1 %v13544_v31  ;;  %v13633_v30 = vld [vmem:[%s15113_s17 + $0x1a24] ss:$16 sps:$4 sm:$0xff]   ;;  %v13636_v31 = vld [vmem:[%s15113_s17 + $0x1a2c] ss:$16 sps:$4 sm:$0xff]  }
 0x528   : > { %10221 = vmatprep.subr.bf16.mxu0 %v13549_v32  ;;  %10877 = vmatprep.subr.bf16.mxu1 %v13552_v33  ;;  %v4569_v32 = vcombine.high %v16040_v25, %v16040_v25  ;;  %v13634_v33 = vld [vmem:[%s15113_s17 + $0x1a28] ss:$16 sps:$4 sm:$0xff]   ;;  %v13637_v25 = vld [vmem:[%s15113_s17 + $0x1a40] ss:$16 sps:$4 sm:$0xff]  }
 0x52b   : > { %10222 = vmatpush1.bf16.msra.mxu0 %v13547_v34  ;;  %10878 = vmatpush1.bf16.msra.mxu1 %v13550_v19  ;;  %v13639_v34 = vld [vmem:[%s15113_s17 + $0x1a44] ss:$16 sps:$4 sm:$0xff]   ;;  %v13642_v19 = vld [vmem:[%s15113_s17 + $0x1a4c] ss:$16 sps:$4 sm:$0xff]  }
 0x52c   : > { %10223 = vmatprep.subr.bf16.mxu0 %v13555_v35  ;;  %10879 = vmatprep.subr.bf16.mxu1 %v13558_v36  ;;  %v13640_v35 = vld [vmem:[%s15113_s17 + $0x1a48] ss:$16 sps:$4 sm:$0xff]   ;;  %v13645_v36 = vld [vmem:[%s15113_s17 + $0x1a64] ss:$16 sps:$4 sm:$0xff]  }
 0x52f   : > { %10224 = vmatpush1.bf16.msra.mxu0 %v13553_v28  ;;  %10880 = vmatpush1.bf16.msra.mxu1 %v13556_v37  ;;  %v13648_v28 = vld [vmem:[%s15113_s17 + $0x1a6c] ss:$16 sps:$4 sm:$0xff]   ;;  %v13643_v37 = vld [vmem:[%s15113_s17 + $0x1a60] ss:$16 sps:$4 sm:$0xff]  }
 0x530   : > { %10225 = vmatprep.subr.bf16.mxu0 %v13561_v39  ;;  %10881 = vmatprep.subr.bf16.mxu1 %v13564_v40  ;;  %v13646_v39 = vld [vmem:[%s15113_s17 + $0x1a68] ss:$16 sps:$4 sm:$0xff]   ;;  %v13651_v40 = vld [vmem:[%s15113_s17 + $0x1a84] ss:$16 sps:$4 sm:$0xff]  }
 0x533   : > { %10226 = vmatpush1.bf16.msra.mxu0 %v13559_v42  ;;  %10882 = vmatpush1.bf16.msra.mxu1 %v13562_v43  ;;  %v13654_v42 = vld [vmem:[%s15113_s17 + $0x1a8c] ss:$16 sps:$4 sm:$0xff]   ;;  %v13649_v43 = vld [vmem:[%s15113_s17 + $0x1a80] ss:$16 sps:$4 sm:$0xff]  }
 0x534   : > { %10227 = vmatprep.subr.bf16.mxu0 %v13567_v22  ;;  %10883 = vmatprep.subr.bf16.mxu1 %v13570_v44  ;;  %v13652_v22 = vld [vmem:[%s15113_s17 + $0x1a88] ss:$16 sps:$4 sm:$0xff]   ;;  %v13657_v44 = vld [vmem:[%s15113_s17 + $0x1aa4] ss:$16 sps:$4 sm:$0xff]  }
 0x537   : > { %10228 = vmatpush1.bf16.msra.mxu0 %v13565_v45  ;;  %10884 = vmatpush1.bf16.msra.mxu1 %v13568_v46  ;;  %v13660_v45 = vld [vmem:[%s15113_s17 + $0x1aac] ss:$16 sps:$4 sm:$0xff]   ;;  %v13655_v46 = vld [vmem:[%s15113_s17 + $0x1aa0] ss:$16 sps:$4 sm:$0xff]  }
 0x538   : > { %10229 = vmatprep.subr.bf16.mxu0 %v13573_v47  ;;  %10885 = vmatprep.subr.bf16.mxu1 %v13576_v48  ;;  %v13658_v47 = vld [vmem:[%s15113_s17 + $0x1aa8] ss:$16 sps:$4 sm:$0xff]   ;;  %v13663_v48 = vld [vmem:[%s15113_s17 + $0x1ac4] ss:$16 sps:$4 sm:$0xff]  }
 0x53b   : > { %10230 = vmatpush1.bf16.msra.mxu0 %v13571_v49  ;;  %10886 = vmatpush1.bf16.msra.mxu1 %v13574_v51  ;;  %v13666_v49 = vld [vmem:[%s15113_s17 + $0x1acc] ss:$16 sps:$4 sm:$0xff]   ;;  %v13661_v51 = vld [vmem:[%s15113_s17 + $0x1ac0] ss:$16 sps:$4 sm:$0xff]  }
 0x53c   : > { %10231 = vmatprep.subr.bf16.mxu0 %v13579_v53  ;;  %10887 = vmatprep.subr.bf16.mxu1 %v13582_v54  ;;  %v13664_v53 = vld [vmem:[%s15113_s17 + $0x1ac8] ss:$16 sps:$4 sm:$0xff]   ;;  %v13669_v54 = vld [vmem:[%s15113_s17 + $0x1ae4] ss:$16 sps:$4 sm:$0xff]  }
 0x53f   : > { %10232 = vmatpush1.bf16.msra.mxu0 %v13577_v55  ;;  %10888 = vmatpush1.bf16.msra.mxu1 %v13580_v41  ;;  %v13672_v55 = vld [vmem:[%s15113_s17 + $0x1aec] ss:$16 sps:$4 sm:$0xff]   ;;  %v13667_v41 = vld [vmem:[%s15113_s17 + $0x1ae0] ss:$16 sps:$4 sm:$0xff]  }
 0x540   : > { %10233 = vmatprep.subr.bf16.mxu0 %v13585_v56  ;;  %10889 = vmatprep.subr.bf16.mxu1 %v13588_v57  ;;  %v13670_v56 = vld [vmem:[%s15113_s17 + $0x1ae8] ss:$16 sps:$4 sm:$0xff]   ;;  %v13675_v57 = vld [vmem:[%s15113_s17 + $0x1b04] ss:$16 sps:$4 sm:$0xff]  }
 0x543   : > { %10234 = vmatpush1.bf16.msra.mxu0 %v13583_v58  ;;  %10890 = vmatpush1.bf16.msra.mxu1 %v13586_v50  ;;  %v13678_v58 = vld [vmem:[%s15113_s17 + $0x1b0c] ss:$16 sps:$4 sm:$0xff]   ;;  %v13673_v50 = vld [vmem:[%s15113_s17 + $0x1b00] ss:$16 sps:$4 sm:$0xff]  }
 0x544   : > { %10235 = vmatprep.subr.bf16.mxu0 %v13591_v59  ;;  %10891 = vmatprep.subr.bf16.mxu1 %v13594_v60  ;;  %v13676_v59 = vld [vmem:[%s15113_s17 + $0x1b08] ss:$16 sps:$4 sm:$0xff]   ;;  %v13681_v60 = vld [vmem:[%s15113_s17 + $0x1b24] ss:$16 sps:$4 sm:$0xff]  }
 0x547   : > { %10236 = vmatpush1.bf16.msra.mxu0 %v13589_v18  ;;  %10892 = vmatpush1.bf16.msra.mxu1 %v13592_v63  ;;  %v13684_v18 = vld [vmem:[%s15113_s17 + $0x1b2c] ss:$16 sps:$4 sm:$0xff]   ;;  %v13679_v63 = vld [vmem:[%s15113_s17 + $0x1b20] ss:$16 sps:$4 sm:$0xff]  }
 0x548   : > { %10237 = vmatprep.subr.bf16.mxu0 %v13597_v0  ;;  %10893 = vmatprep.subr.bf16.mxu1 %v13600_v38  ;;  %v13682_v0 = vld [vmem:[%s15113_s17 + $0x1b28] ss:$16 sps:$4 sm:$0xff]   ;;  %v13687_v38 = vld [vmem:[%s15113_s17 + $0x1b44] ss:$16 sps:$4 sm:$0xff]  }
 0x54b   : > { %10238 = vmatpush1.bf16.msra.mxu0 %v13595_v2  ;;  %10894 = vmatpush1.bf16.msra.mxu1 %v13598_v5  ;;  %v13690_v2 = vld [vmem:[%s15113_s17 + $0x1b4c] ss:$16 sps:$4 sm:$0xff]   ;;  %v13685_v5 = vld [vmem:[%s15113_s17 + $0x1b40] ss:$16 sps:$4 sm:$0xff]  }
 0x54c   : > { %10239 = vmatprep.subr.bf16.mxu0 %v13603_v52  ;;  %10895 = vmatprep.subr.bf16.mxu1 %v13606_v6  ;;  %v13688_v52 = vld [vmem:[%s15113_s17 + $0x1b48] ss:$16 sps:$4 sm:$0xff]   ;;  %v13693_v6 = vld [vmem:[%s15113_s17 + $0x1b64] ss:$16 sps:$4 sm:$0xff]  }
 0x54f   : > { %10240 = vmatpush1.bf16.msra.mxu0 %v13601_v7  ;;  %10896 = vmatpush1.bf16.msra.mxu1 %v13604_v61  ;;  %v13696_v7 = vld [vmem:[%s15113_s17 + $0x1b6c] ss:$16 sps:$4 sm:$0xff]   ;;  %v13691_v61 = vld [vmem:[%s15113_s17 + $0x1b60] ss:$16 sps:$4 sm:$0xff]  }
 0x550   : > { %10241 = vmatprep.subr.bf16.mxu0 %v13609_v9  ;;  %10897 = vmatprep.subr.bf16.mxu1 %v13612_v11  ;;  %v13694_v9 = vld [vmem:[%s15113_s17 + $0x1b68] ss:$16 sps:$4 sm:$0xff]   ;;  %v13699_v11 = vld [vmem:[%s15113_s17 + $0x1b84] ss:$16 sps:$4 sm:$0xff]  }
 0x553   : > { %10242 = vmatpush1.bf16.msra.mxu0 %v13607_v13  ;;  %10898 = vmatpush1.bf16.msra.mxu1 %v13610_v16  ;;  %v13702_v13 = vld [vmem:[%s15113_s17 + $0x1b8c] ss:$16 sps:$4 sm:$0xff]   ;;  %v13697_v16 = vld [vmem:[%s15113_s17 + $0x1b80] ss:$16 sps:$4 sm:$0xff]  }
 0x554   : > { %10243 = vmatprep.subr.bf16.mxu0 %v13615_v17  ;;  %10899 = vmatprep.subr.bf16.mxu1 %v13618_v20  ;;  %v13700_v17 = vld [vmem:[%s15113_s17 + $0x1b88] ss:$16 sps:$4 sm:$0xff]   ;;  %v13705_v20 = vld [vmem:[%s15113_s17 + $0x1ba4] ss:$16 sps:$4 sm:$0xff]  }
 0x557   : > { %10244 = vmatpush1.bf16.msra.mxu0 %v13613_v1  ;;  %10900 = vmatpush1.bf16.msra.mxu1 %v13616_v21  ;;  %v13708_v1 = vld [vmem:[%s15113_s17 + $0x1bac] ss:$16 sps:$4 sm:$0xff]   ;;  %v13703_v21 = vld [vmem:[%s15113_s17 + $0x1ba0] ss:$16 sps:$4 sm:$0xff]  }
 0x558   : > { %10245 = vmatprep.subr.bf16.mxu0 %v13621_v3  ;;  %10901 = vmatprep.subr.bf16.mxu1 %v13624_v23  ;;  %v13706_v3 = vld [vmem:[%s15113_s17 + $0x1ba8] ss:$16 sps:$4 sm:$0xff]   ;;  %v13711_v23 = vld [vmem:[%s15113_s17 + $0x1bc4] ss:$16 sps:$4 sm:$0xff]  }
 0x55b   : > { %10246 = vmatpush1.bf16.msra.mxu0 %v13619_v12  ;;  %10902 = vmatpush1.bf16.msra.mxu1 %v13622_v14  ;;  %v13714_v12 = vld [vmem:[%s15113_s17 + $0x1bcc] ss:$16 sps:$4 sm:$0xff]   ;;  %v4522_v14 = vcombine.high %v16017_v8, %v16017_v8  ;;  %v13715_v8 = vld [vmem:[%s15113_s17 + $0x1be0] ss:$16 sps:$4 sm:$0xff]  }
 0x55c   : > { %10256 = vmatprep.subr.bf16.mxu0 %v13627_v24  ;;  %10912 = vmatprep.subr.bf16.mxu1 %v13630_v62  ;;  %v13709_v24 = vld [vmem:[%s15113_s17 + $0x1bc0] ss:$16 sps:$4 sm:$0xff]   ;;  %v13712_v62 = vld [vmem:[%s15113_s17 + $0x1bc8] ss:$16 sps:$4 sm:$0xff]  }
 0x55e   : > { %10248 = vmatmul.mubr.bf16.vlgmr.msra.gmra.mrb[0].mxu0 %v16106_v26  ;;  %10904 = vmatmul.mubr.bf16.vlgmr.msra.gmra.mrb[0].mxu1 %v16106_v26 }
 0x55f   : > { %10257 = vmatpush1.bf16.msra.mxu0 %v13625_v27  ;;  %10913 = vmatpush1.bf16.msra.mxu1 %v13628_v29  ;;  %v13717_v27 = vld [vmem:[%s15113_s17 + $0x1be4] ss:$16 sps:$4 sm:$0xff]   ;;  %v13720_v29 = vld [vmem:[%s15113_s17 + $0x1bec] ss:$16 sps:$4 sm:$0xff]  }
 0x560   : > { %10258 = vmatprep.subr.bf16.mxu0 %v13633_v30  ;;  %10914 = vmatprep.subr.bf16.mxu1 %v13636_v31  ;;  %v16175_v30 = vrot.slane %v4522_v14, %v15120_v10  ;;  %v13718_v31 = vld [vmem:[%s15113_s17 + $0x1be8] ss:$16 sps:$4 sm:$0xff]  }
 0x561   : > { %10288 = vmatprep.mubr.bf16.mxu0 %v4569_v32  ;;  %10944 = vmatprep.mubr.bf16.mxu1 %v4569_v32  ;;  %v13723_v32 = vld [vmem:[%s15113_s17 + $0x1c04] ss:$16 sps:$4 sm:$0xff]   ;;  %v13796_v14 = vld [vmem:[%s15113_s17 + $0x1d88] ss:$16 sps:$4 sm:$0xff]  }
 0x563   : > { %10259 = vmatpush1.bf16.msra.mxu0 %v13631_v15  ;;  %10915 = vmatpush1.bf16.msra.mxu1 %v13634_v33  ;;  %v13726_v15 = vld [vmem:[%s15113_s17 + $0x1c0c] ss:$16 sps:$4 sm:$0xff]   ;;  %v4538_v33 = vcombine.high %v16175_v30, %v16175_v30 }
 0x564   : > { %10260 = vmatprep.subr.bf16.mxu0 %v13639_v34  ;;  %10916 = vmatprep.subr.bf16.mxu1 %v13642_v19  ;;  %v4567_v34 = vcombine.high %v16106_v26, %v16106_v26  ;;  %v13721_v19 = vld [vmem:[%s15113_s17 + $0x1c00] ss:$16 sps:$4 sm:$0xff]  }
 0x565   : > { %v13727_v26 = vld [vmem:[%s15113_s17 + $0x1c20] ss:$16 sps:$4 sm:$0xff]  }
 0x567   : > { %10261 = vmatpush1.bf16.msra.mxu0 %v13637_v25  ;;  %10917 = vmatpush1.bf16.msra.mxu1 %v13640_v35  ;;  %v13724_v25 = vld [vmem:[%s15113_s17 + $0x1c08] ss:$16 sps:$4 sm:$0xff]   ;;  %v13729_v35 = vld [vmem:[%s15113_s17 + $0x1c24] ss:$16 sps:$4 sm:$0xff]  }
 0x568   : > { %10262 = vmatprep.subr.bf16.mxu0 %v13645_v36  ;;  %10918 = vmatprep.subr.bf16.mxu1 %v13648_v28  ;;  %v13732_v36 = vld [vmem:[%s15113_s17 + $0x1c2c] ss:$16 sps:$4 sm:$0xff]   ;;  %v16190_v28 = vrot.slane %v4538_v33, %v15120_v10  ;;  %v13813_v33 = vld [vmem:[%s15113_s17 + $0x1de4] ss:$16 sps:$4 sm:$0xff]  }
 0x56b   : > { %10263 = vmatpush1.bf16.msra.mxu0 %v13643_v37  ;;  %10919 = vmatpush1.bf16.msra.mxu1 %v13646_v39  ;;  %v13730_v37 = vld [vmem:[%s15113_s17 + $0x1c28] ss:$16 sps:$4 sm:$0xff]   ;;  %v13735_v39 = vld [vmem:[%s15113_s17 + $0x1c44] ss:$16 sps:$4 sm:$0xff]  }
 0x56c   : > { %10264 = vmatprep.subr.bf16.mxu0 %v13651_v40  ;;  %10920 = vmatprep.subr.bf16.mxu1 %v13654_v42  ;;  %v13738_v40 = vld [vmem:[%s15113_s17 + $0x1c4c] ss:$16 sps:$4 sm:$0xff]   ;;  %v13733_v42 = vld [vmem:[%s15113_s17 + $0x1c40] ss:$16 sps:$4 sm:$0xff]  }
 0x56f   : > { %10265 = vmatpush1.bf16.msra.mxu0 %v13649_v43  ;;  %10921 = vmatpush1.bf16.msra.mxu1 %v13652_v22  ;;  %v13736_v43 = vld [vmem:[%s15113_s17 + $0x1c48] ss:$16 sps:$4 sm:$0xff]   ;;  %v13741_v22 = vld [vmem:[%s15113_s17 + $0x1c64] ss:$16 sps:$4 sm:$0xff]  }
 0x570   : > { %10266 = vmatprep.subr.bf16.mxu0 %v13657_v44  ;;  %10922 = vmatprep.subr.bf16.mxu1 %v13660_v45  ;;  %v13744_v44 = vld [vmem:[%s15113_s17 + $0x1c6c] ss:$16 sps:$4 sm:$0xff]   ;;  %v13739_v45 = vld [vmem:[%s15113_s17 + $0x1c60] ss:$16 sps:$4 sm:$0xff]  }
 0x573   : > { %10267 = vmatpush1.bf16.msra.mxu0 %v13655_v46  ;;  %10923 = vmatpush1.bf16.msra.mxu1 %v13658_v47  ;;  %v13742_v46 = vld [vmem:[%s15113_s17 + $0x1c68] ss:$16 sps:$4 sm:$0xff]   ;;  %v13747_v47 = vld [vmem:[%s15113_s17 + $0x1c84] ss:$16 sps:$4 sm:$0xff]  }
 0x574   : > { %10268 = vmatprep.subr.bf16.mxu0 %v13663_v48  ;;  %10924 = vmatprep.subr.bf16.mxu1 %v13666_v49  ;;  %v13750_v48 = vld [vmem:[%s15113_s17 + $0x1c8c] ss:$16 sps:$4 sm:$0xff]   ;;  %v13745_v49 = vld [vmem:[%s15113_s17 + $0x1c80] ss:$16 sps:$4 sm:$0xff]  }
 0x577   : > { %10269 = vmatpush1.bf16.msra.mxu0 %v13661_v51  ;;  %10925 = vmatpush1.bf16.msra.mxu1 %v13664_v53  ;;  %v13748_v51 = vld [vmem:[%s15113_s17 + $0x1c88] ss:$16 sps:$4 sm:$0xff]   ;;  %v13753_v53 = vld [vmem:[%s15113_s17 + $0x1ca4] ss:$16 sps:$4 sm:$0xff]  }
 0x578   : > { %10270 = vmatprep.subr.bf16.mxu0 %v13669_v54  ;;  %10926 = vmatprep.subr.bf16.mxu1 %v13672_v55  ;;  %v13756_v54 = vld [vmem:[%s15113_s17 + $0x1cac] ss:$16 sps:$4 sm:$0xff]   ;;  %v13751_v55 = vld [vmem:[%s15113_s17 + $0x1ca0] ss:$16 sps:$4 sm:$0xff]  }
 0x57b   : > { %10271 = vmatpush1.bf16.msra.mxu0 %v13667_v41  ;;  %10927 = vmatpush1.bf16.msra.mxu1 %v13670_v56  ;;  %v13754_v41 = vld [vmem:[%s15113_s17 + $0x1ca8] ss:$16 sps:$4 sm:$0xff]   ;;  %v13759_v56 = vld [vmem:[%s15113_s17 + $0x1cc4] ss:$16 sps:$4 sm:$0xff]  }
 0x57c   : > { %10272 = vmatprep.subr.bf16.mxu0 %v13675_v57  ;;  %10928 = vmatprep.subr.bf16.mxu1 %v13678_v58  ;;  %v13762_v57 = vld [vmem:[%s15113_s17 + $0x1ccc] ss:$16 sps:$4 sm:$0xff]   ;;  %v13757_v58 = vld [vmem:[%s15113_s17 + $0x1cc0] ss:$16 sps:$4 sm:$0xff]  }
 0x57f   : > { %10273 = vmatpush1.bf16.msra.mxu0 %v13673_v50  ;;  %10929 = vmatpush1.bf16.msra.mxu1 %v13676_v59  ;;  %v13760_v50 = vld [vmem:[%s15113_s17 + $0x1cc8] ss:$16 sps:$4 sm:$0xff]   ;;  %v13765_v59 = vld [vmem:[%s15113_s17 + $0x1ce4] ss:$16 sps:$4 sm:$0xff]  }
 0x580   : > { %10274 = vmatprep.subr.bf16.mxu0 %v13681_v60  ;;  %10930 = vmatprep.subr.bf16.mxu1 %v13684_v18  ;;  %v13768_v60 = vld [vmem:[%s15113_s17 + $0x1cec] ss:$16 sps:$4 sm:$0xff]   ;;  %v13763_v18 = vld [vmem:[%s15113_s17 + $0x1ce0] ss:$16 sps:$4 sm:$0xff]  }
 0x583   : > { %10275 = vmatpush1.bf16.msra.mxu0 %v13679_v63  ;;  %10931 = vmatpush1.bf16.msra.mxu1 %v13682_v0  ;;  %v13766_v63 = vld [vmem:[%s15113_s17 + $0x1ce8] ss:$16 sps:$4 sm:$0xff]   ;;  %v13771_v0 = vld [vmem:[%s15113_s17 + $0x1d04] ss:$16 sps:$4 sm:$0xff]  }
 0x584   : > { %10276 = vmatprep.subr.bf16.mxu0 %v13687_v38  ;;  %10932 = vmatprep.subr.bf16.mxu1 %v13690_v2  ;;  %v13774_v38 = vld [vmem:[%s15113_s17 + $0x1d0c] ss:$16 sps:$4 sm:$0xff]   ;;  %v13769_v2 = vld [vmem:[%s15113_s17 + $0x1d00] ss:$16 sps:$4 sm:$0xff]  }
 0x587   : > { %10277 = vmatpush1.bf16.msra.mxu0 %v13685_v5  ;;  %10933 = vmatpush1.bf16.msra.mxu1 %v13688_v52  ;;  %v13772_v5 = vld [vmem:[%s15113_s17 + $0x1d08] ss:$16 sps:$4 sm:$0xff]   ;;  %v13777_v52 = vld [vmem:[%s15113_s17 + $0x1d24] ss:$16 sps:$4 sm:$0xff]  }
 0x588   : > { %10278 = vmatprep.subr.bf16.mxu0 %v13693_v6  ;;  %10934 = vmatprep.subr.bf16.mxu1 %v13696_v7  ;;  %v13780_v6 = vld [vmem:[%s15113_s17 + $0x1d2c] ss:$16 sps:$4 sm:$0xff]   ;;  %v13775_v7 = vld [vmem:[%s15113_s17 + $0x1d20] ss:$16 sps:$4 sm:$0xff]  }
 0x58b   : > { %10279 = vmatpush1.bf16.msra.mxu0 %v13691_v61  ;;  %10935 = vmatpush1.bf16.msra.mxu1 %v13694_v9  ;;  %v13778_v61 = vld [vmem:[%s15113_s17 + $0x1d28] ss:$16 sps:$4 sm:$0xff]   ;;  %v13783_v9 = vld [vmem:[%s15113_s17 + $0x1d44] ss:$16 sps:$4 sm:$0xff]  }
 0x58c   : > { %10280 = vmatprep.subr.bf16.mxu0 %v13699_v11  ;;  %10936 = vmatprep.subr.bf16.mxu1 %v13702_v13  ;;  %v13786_v11 = vld [vmem:[%s15113_s17 + $0x1d4c] ss:$16 sps:$4 sm:$0xff]   ;;  %v13781_v13 = vld [vmem:[%s15113_s17 + $0x1d40] ss:$16 sps:$4 sm:$0xff]  }
 0x58f   : > { %10281 = vmatpush1.bf16.msra.mxu0 %v13697_v16  ;;  %10937 = vmatpush1.bf16.msra.mxu1 %v13700_v17  ;;  %v13784_v16 = vld [vmem:[%s15113_s17 + $0x1d48] ss:$16 sps:$4 sm:$0xff]   ;;  %v13789_v17 = vld [vmem:[%s15113_s17 + $0x1d64] ss:$16 sps:$4 sm:$0xff]  }
 0x590   : > { %10282 = vmatprep.subr.bf16.mxu0 %v13705_v20  ;;  %10938 = vmatprep.subr.bf16.mxu1 %v13708_v1  ;;  %v13792_v20 = vld [vmem:[%s15113_s17 + $0x1d6c] ss:$16 sps:$4 sm:$0xff]   ;;  %v13787_v1 = vld [vmem:[%s15113_s17 + $0x1d60] ss:$16 sps:$4 sm:$0xff]  }
 0x593   : > { %10283 = vmatpush1.bf16.msra.mxu0 %v13703_v21  ;;  %10939 = vmatpush1.bf16.msra.mxu1 %v13706_v3  ;;  %v13790_v21 = vld [vmem:[%s15113_s17 + $0x1d68] ss:$16 sps:$4 sm:$0xff]   ;;  %v13795_v3 = vld [vmem:[%s15113_s17 + $0x1d84] ss:$16 sps:$4 sm:$0xff]  }
 0x594   : > { %10284 = vmatprep.subr.bf16.mxu0 %v13711_v23  ;;  %10940 = vmatprep.subr.bf16.mxu1 %v13714_v12  ;;  %v13798_v23 = vld [vmem:[%s15113_s17 + $0x1d8c] ss:$16 sps:$4 sm:$0xff]   ;;  %v13793_v12 = vld [vmem:[%s15113_s17 + $0x1d80] ss:$16 sps:$4 sm:$0xff]  }
 0x597   : > { %10285 = vmatpush1.bf16.msra.mxu0 %v13709_v24  ;;  %10941 = vmatpush1.bf16.msra.mxu1 %v13712_v62  ;;  %v13801_v24 = vld [vmem:[%s15113_s17 + $0x1da4] ss:$16 sps:$4 sm:$0xff]   ;;  %v13804_v62 = vld [vmem:[%s15113_s17 + $0x1dac] ss:$16 sps:$4 sm:$0xff]  }
 0x598   : > { %10286 = vmatprep.subr.bf16.mxu0 %v13717_v27  ;;  %10942 = vmatprep.subr.bf16.mxu1 %v13720_v29  ;;  %v13799_v27 = vld [vmem:[%s15113_s17 + $0x1da0] ss:$16 sps:$4 sm:$0xff]   ;;  %v13802_v29 = vld [vmem:[%s15113_s17 + $0x1da8] ss:$16 sps:$4 sm:$0xff]  }
 0x59b   : > { %10287 = vmatpush1.bf16.msra.mxu0 %v13715_v8  ;;  %10943 = vmatpush1.bf16.msra.mxu1 %v13718_v31  ;;  %v13807_v8 = vld [vmem:[%s15113_s17 + $0x1dc4] ss:$16 sps:$4 sm:$0xff]   ;;  %v13810_v31 = vld [vmem:[%s15113_s17 + $0x1dcc] ss:$16 sps:$4 sm:$0xff]  }
 0x59c   : > { %10297 = vmatprep.subr.bf16.mxu0 %v13723_v32  ;;  %10953 = vmatprep.subr.bf16.mxu1 %v13726_v15  ;;  %v13805_v32 = vld [vmem:[%s15113_s17 + $0x1dc0] ss:$16 sps:$4 sm:$0xff]   ;;  %v13808_v15 = vld [vmem:[%s15113_s17 + $0x1dc8] ss:$16 sps:$4 sm:$0xff]  }
 0x59e   : > { %10289 = vmatmul.mubr.bf16.vlgmr.msra.gmra.mrb[0].mxu0 %v4567_v34  ;;  %10945 = vmatmul.mubr.bf16.vlgmr.msra.gmra.mrb[0].mxu1 %v4567_v34  ;;  %v13816_v34 = vld [vmem:[%s15113_s17 + $0x1dec] ss:$16 sps:$4 sm:$0xff]  }
 0x59f   : > { %10298 = vmatpush1.bf16.msra.mxu0 %v13721_v19  ;;  %10954 = vmatpush1.bf16.msra.mxu1 %v13724_v25  ;;  %v13811_v19 = vld [vmem:[%s15113_s17 + $0x1de0] ss:$16 sps:$4 sm:$0xff]   ;;  %v13814_v25 = vld [vmem:[%s15113_s17 + $0x1de8] ss:$16 sps:$4 sm:$0xff]  }
 0x5a0   : > { %10299 = vmatprep.subr.bf16.mxu0 %v13729_v35  ;;  %10955 = vmatprep.subr.bf16.mxu1 %v13732_v36  ;;  %v13820_v35 = vld [vmem:[%s15113_s17 + $0x1e04] ss:$16 sps:$4 sm:$0xff]   ;;  %v13823_v36 = vld [vmem:[%s15113_s17 + $0x1e0c] ss:$16 sps:$4 sm:$0xff]  }
 0x5a1   : > { %10329 = vmatprep.mubr.bf16.mxu0 %v16190_v28  ;;  %10985 = vmatprep.mubr.bf16.mxu1 %v16190_v28 }
 0x5a3   : > { %10300 = vmatpush1.bf16.msra.mxu0 %v13727_v26  ;;  %10956 = vmatpush1.bf16.msra.mxu1 %v13730_v37  ;;  %v16256_v26 = vrot.slane %v16175_v30, %v15120_v10  ;;  %v13818_v37 = vld [vmem:[%s15113_s17 + $0x1e00] ss:$16 sps:$4 sm:$0xff]   ;;  %v13827_v30 = vld [vmem:[%s15113_s17 + $0x1e28] ss:$16 sps:$4 sm:$0xff]  }
 0x5a4   : > { %10301 = vmatprep.subr.bf16.mxu0 %v13735_v39  ;;  %10957 = vmatprep.subr.bf16.mxu1 %v13738_v40  ;;  %v13821_v39 = vld [vmem:[%s15113_s17 + $0x1e08] ss:$16 sps:$4 sm:$0xff]   ;;  %v13826_v40 = vld [vmem:[%s15113_s17 + $0x1e24] ss:$16 sps:$4 sm:$0xff]   ;;  %v13824_v10 = vld [vmem:[%s15113_s17 + $0x1e20] ss:$16 sps:$4 sm:$0xff]  }
 0x5a7   : > { %10302 = vmatpush1.bf16.msra.mxu0 %v13733_v42  ;;  %10958 = vmatpush1.bf16.msra.mxu1 %v13736_v43  ;;  %v13829_v42 = vld [vmem:[%s15113_s17 + $0x1e2c] ss:$16 sps:$4 sm:$0xff]   ;;  %v4570_v43 = vcombine.high %v16190_v28, %v16190_v28  ;;  %v13830_v28 = vld [vmem:[%s15113_s17 + $0x1e40] ss:$16 sps:$4 sm:$0xff]  }
 0x5a8   : > { %10303 = vmatprep.subr.bf16.mxu0 %v13741_v22  ;;  %10959 = vmatprep.subr.bf16.mxu1 %v13744_v44  ;;  %v13832_v22 = vld [vmem:[%s15113_s17 + $0x1e44] ss:$16 sps:$4 sm:$0xff]   ;;  %v13835_v44 = vld [vmem:[%s15113_s17 + $0x1e4c] ss:$16 sps:$4 sm:$0xff]  }
 0x5ab   : > { %10304 = vmatpush1.bf16.msra.mxu0 %v13739_v45  ;;  %10960 = vmatpush1.bf16.msra.mxu1 %v13742_v46  ;;  %v13833_v45 = vld [vmem:[%s15113_s17 + $0x1e48] ss:$16 sps:$4 sm:$0xff]   ;;  %v13838_v46 = vld [vmem:[%s15113_s17 + $0x1e64] ss:$16 sps:$4 sm:$0xff]  }
 0x5ac   : > { %10305 = vmatprep.subr.bf16.mxu0 %v13747_v47  ;;  %10961 = vmatprep.subr.bf16.mxu1 %v13750_v48  ;;  %v13841_v47 = vld [vmem:[%s15113_s17 + $0x1e6c] ss:$16 sps:$4 sm:$0xff]   ;;  %v13836_v48 = vld [vmem:[%s15113_s17 + $0x1e60] ss:$16 sps:$4 sm:$0xff]  }
 0x5af   : > { %10306 = vmatpush1.bf16.msra.mxu0 %v13745_v49  ;;  %10962 = vmatpush1.bf16.msra.mxu1 %v13748_v51  ;;  %v13839_v49 = vld [vmem:[%s15113_s17 + $0x1e68] ss:$16 sps:$4 sm:$0xff]   ;;  %v13844_v51 = vld [vmem:[%s15113_s17 + $0x1e84] ss:$16 sps:$4 sm:$0xff]  }
 0x5b0   : > { %10307 = vmatprep.subr.bf16.mxu0 %v13753_v53  ;;  %10963 = vmatprep.subr.bf16.mxu1 %v13756_v54  ;;  %v13847_v53 = vld [vmem:[%s15113_s17 + $0x1e8c] ss:$16 sps:$4 sm:$0xff]   ;;  %v13842_v54 = vld [vmem:[%s15113_s17 + $0x1e80] ss:$16 sps:$4 sm:$0xff]  }
 0x5b3   : > { %10308 = vmatpush1.bf16.msra.mxu0 %v13751_v55  ;;  %10964 = vmatpush1.bf16.msra.mxu1 %v13754_v41  ;;  %v13845_v55 = vld [vmem:[%s15113_s17 + $0x1e88] ss:$16 sps:$4 sm:$0xff]   ;;  %v13850_v41 = vld [vmem:[%s15113_s17 + $0x1ea4] ss:$16 sps:$4 sm:$0xff]  }
 0x5b4   : > { %10309 = vmatprep.subr.bf16.mxu0 %v13759_v56  ;;  %10965 = vmatprep.subr.bf16.mxu1 %v13762_v57  ;;  %v13853_v56 = vld [vmem:[%s15113_s17 + $0x1eac] ss:$16 sps:$4 sm:$0xff]   ;;  %v13848_v57 = vld [vmem:[%s15113_s17 + $0x1ea0] ss:$16 sps:$4 sm:$0xff]  }
 0x5b7   : > { %10310 = vmatpush1.bf16.msra.mxu0 %v13757_v58  ;;  %10966 = vmatpush1.bf16.msra.mxu1 %v13760_v50  ;;  %v13851_v58 = vld [vmem:[%s15113_s17 + $0x1ea8] ss:$16 sps:$4 sm:$0xff]   ;;  %v13856_v50 = vld [vmem:[%s15113_s17 + $0x1ec4] ss:$16 sps:$4 sm:$0xff]  }
 0x5b8   : > { %10311 = vmatprep.subr.bf16.mxu0 %v13765_v59  ;;  %10967 = vmatprep.subr.bf16.mxu1 %v13768_v60  ;;  %v13859_v59 = vld [vmem:[%s15113_s17 + $0x1ecc] ss:$16 sps:$4 sm:$0xff]   ;;  %v13854_v60 = vld [vmem:[%s15113_s17 + $0x1ec0] ss:$16 sps:$4 sm:$0xff]  }
 0x5bb   : > { %10312 = vmatpush1.bf16.msra.mxu0 %v13763_v18  ;;  %10968 = vmatpush1.bf16.msra.mxu1 %v13766_v63  ;;  %v13857_v18 = vld [vmem:[%s15113_s17 + $0x1ec8] ss:$16 sps:$4 sm:$0xff]   ;;  %v13862_v63 = vld [vmem:[%s15113_s17 + $0x1ee4] ss:$16 sps:$4 sm:$0xff]  }
 0x5bc   : > { %10313 = vmatprep.subr.bf16.mxu0 %v13771_v0  ;;  %10969 = vmatprep.subr.bf16.mxu1 %v13774_v38  ;;  %v13865_v0 = vld [vmem:[%s15113_s17 + $0x1eec] ss:$16 sps:$4 sm:$0xff]   ;;  %v13860_v38 = vld [vmem:[%s15113_s17 + $0x1ee0] ss:$16 sps:$4 sm:$0xff]  }
 0x5bf   : > { %10314 = vmatpush1.bf16.msra.mxu0 %v13769_v2  ;;  %10970 = vmatpush1.bf16.msra.mxu1 %v13772_v5  ;;  %v13863_v2 = vld [vmem:[%s15113_s17 + $0x1ee8] ss:$16 sps:$4 sm:$0xff]   ;;  %v13868_v5 = vld [vmem:[%s15113_s17 + $0x1f04] ss:$16 sps:$4 sm:$0xff]  }
 0x5c0   : > { %10315 = vmatprep.subr.bf16.mxu0 %v13777_v52  ;;  %10971 = vmatprep.subr.bf16.mxu1 %v13780_v6  ;;  %v13871_v52 = vld [vmem:[%s15113_s17 + $0x1f0c] ss:$16 sps:$4 sm:$0xff]   ;;  %v13866_v6 = vld [vmem:[%s15113_s17 + $0x1f00] ss:$16 sps:$4 sm:$0xff]  }
 0x5c3   : > { %10316 = vmatpush1.bf16.msra.mxu0 %v13775_v7  ;;  %10972 = vmatpush1.bf16.msra.mxu1 %v13778_v61  ;;  %v13869_v7 = vld [vmem:[%s15113_s17 + $0x1f08] ss:$16 sps:$4 sm:$0xff]   ;;  %v13874_v61 = vld [vmem:[%s15113_s17 + $0x1f24] ss:$16 sps:$4 sm:$0xff]  }
 0x5c4   : > { %10317 = vmatprep.subr.bf16.mxu0 %v13783_v9  ;;  %10973 = vmatprep.subr.bf16.mxu1 %v13786_v11  ;;  %v13877_v9 = vld [vmem:[%s15113_s17 + $0x1f2c] ss:$16 sps:$4 sm:$0xff]   ;;  %v13872_v11 = vld [vmem:[%s15113_s17 + $0x1f20] ss:$16 sps:$4 sm:$0xff]  }
 0x5c7   : > { %10318 = vmatpush1.bf16.msra.mxu0 %v13781_v13  ;;  %10974 = vmatpush1.bf16.msra.mxu1 %v13784_v16  ;;  %v13875_v13 = vld [vmem:[%s15113_s17 + $0x1f28] ss:$16 sps:$4 sm:$0xff]   ;;  %v13880_v16 = vld [vmem:[%s15113_s17 + $0x1f44] ss:$16 sps:$4 sm:$0xff]  }
 0x5c8   : > { %10319 = vmatprep.subr.bf16.mxu0 %v13789_v17  ;;  %10975 = vmatprep.subr.bf16.mxu1 %v13792_v20  ;;  %v13883_v17 = vld [vmem:[%s15113_s17 + $0x1f4c] ss:$16 sps:$4 sm:$0xff]   ;;  %v13878_v20 = vld [vmem:[%s15113_s17 + $0x1f40] ss:$16 sps:$4 sm:$0xff]  }
 0x5cb   : > { %10320 = vmatpush1.bf16.msra.mxu0 %v13787_v1  ;;  %10976 = vmatpush1.bf16.msra.mxu1 %v13790_v21  ;;  %v13881_v1 = vld [vmem:[%s15113_s17 + $0x1f48] ss:$16 sps:$4 sm:$0xff]   ;;  %v13886_v21 = vld [vmem:[%s15113_s17 + $0x1f64] ss:$16 sps:$4 sm:$0xff]  }
 0x5cc   : > { %10321 = vmatprep.subr.bf16.mxu0 %v13795_v3  ;;  %10977 = vmatprep.subr.bf16.mxu1 %v13798_v23  ;;  %v13889_v3 = vld [vmem:[%s15113_s17 + $0x1f6c] ss:$16 sps:$4 sm:$0xff]   ;;  %v13884_v23 = vld [vmem:[%s15113_s17 + $0x1f60] ss:$16 sps:$4 sm:$0xff]  }
 0x5cf   : > { %10322 = vmatpush1.bf16.msra.mxu0 %v13793_v12  ;;  %10978 = vmatpush1.bf16.msra.mxu1 %v13796_v14  ;;  %v13887_v12 = vld [vmem:[%s15113_s17 + $0x1f68] ss:$16 sps:$4 sm:$0xff]   ;;  %v13892_v14 = vld [vmem:[%s15113_s17 + $0x1f84] ss:$16 sps:$4 sm:$0xff]  }
 0x5d0   : > { %10323 = vmatprep.subr.bf16.mxu0 %v13801_v24  ;;  %10979 = vmatprep.subr.bf16.mxu1 %v13804_v62  ;;  %v13895_v24 = vld [vmem:[%s15113_s17 + $0x1f8c] ss:$16 sps:$4 sm:$0xff]   ;;  %v13890_v62 = vld [vmem:[%s15113_s17 + $0x1f80] ss:$16 sps:$4 sm:$0xff]  }
 0x5d3   : > { %10324 = vmatpush1.bf16.msra.mxu0 %v13799_v27  ;;  %10980 = vmatpush1.bf16.msra.mxu1 %v13802_v29  ;;  %v13893_v27 = vld [vmem:[%s15113_s17 + $0x1f88] ss:$16 sps:$4 sm:$0xff]   ;;  %v13898_v29 = vld [vmem:[%s15113_s17 + $0x1fa4] ss:$16 sps:$4 sm:$0xff]  }
 0x5d4   : > { %10325 = vmatprep.subr.bf16.mxu0 %v13807_v8  ;;  %10981 = vmatprep.subr.bf16.mxu1 %v13810_v31  ;;  %v13901_v8 = vld [vmem:[%s15113_s17 + $0x1fac] ss:$16 sps:$4 sm:$0xff]   ;;  %v13896_v31 = vld [vmem:[%s15113_s17 + $0x1fa0] ss:$16 sps:$4 sm:$0xff]  }
 0x5d7   : > { %10326 = vmatpush1.bf16.msra.mxu0 %v13805_v32  ;;  %10982 = vmatpush1.bf16.msra.mxu1 %v13808_v15  ;;  %v13899_v32 = vld [vmem:[%s15113_s17 + $0x1fa8] ss:$16 sps:$4 sm:$0xff]   ;;  %v13904_v15 = vld [vmem:[%s15113_s17 + $0x1fc4] ss:$16 sps:$4 sm:$0xff]  }
 0x5d8   : > { %10327 = vmatprep.subr.bf16.mxu0 %v13813_v33  ;;  %10983 = vmatprep.subr.bf16.mxu1 %v13816_v34  ;;  %v13907_v33 = vld [vmem:[%s15113_s17 + $0x1fcc] ss:$16 sps:$4 sm:$0xff]   ;;  %v13902_v34 = vld [vmem:[%s15113_s17 + $0x1fc0] ss:$16 sps:$4 sm:$0xff]  }
 0x5db   : > { %10328 = vmatpush1.bf16.msra.mxu0 %v13811_v19  ;;  %10984 = vmatpush1.bf16.msra.mxu1 %v13814_v25  ;;  %v13905_v19 = vld [vmem:[%s15113_s17 + $0x1fc8] ss:$16 sps:$4 sm:$0xff]   ;;  %v13910_v25 = vld [vmem:[%s15113_s17 + $0x1fe4] ss:$16 sps:$4 sm:$0xff]  }
 0x5dc   : > { %10338 = vmatprep.subr.bf16.mxu0 %v13820_v35  ;;  %10994 = vmatprep.subr.bf16.mxu1 %v13823_v36  ;;  %v13913_v35 = vld [vmem:[%s15113_s17 + $0x1fec] ss:$16 sps:$4 sm:$0xff]   ;;  %v13908_v36 = vld [vmem:[%s15113_s17 + $0x1fe0] ss:$16 sps:$4 sm:$0xff]  }
 0x5de   : > { %10330 = vmatmul.mubr.bf16.vlgmr.msra.gmra.mrb[0].mxu0 %v16256_v26  ;;  %10986 = vmatmul.mubr.bf16.vlgmr.msra.gmra.mrb[0].mxu1 %v16256_v26 }
 0x5df   : > { %10339 = vmatpush1.bf16.msra.mxu0 %v13818_v37  ;;  %10995 = vmatpush1.bf16.msra.mxu1 %v13821_v39  ;;  %v13911_v37 = vld [vmem:[%s15113_s17 + $0x1fe8] ss:$16 sps:$4 sm:$0xff]   ;;  %v4568_v39 = vcombine.high %v16256_v26, %v16256_v26  ;;  %v4357_v26 = vsub.s32 1, %v15111_v4 }
 0x5e0   : > { %10340 = vmatprep.subr.bf16.mxu0 %v13826_v40  ;;  %10996 = vmatprep.subr.bf16.mxu1 %v13829_v42  ;;  %v4353_v40 = vsub.s32 0, %v15111_v4  ;;  %v4361_v42 = vsub.s32 2, %v15111_v4 }
 0x5e1   : > { %10370 = vmatprep.mubr.bf16.mxu0 %v4570_v43  ;;  %11026 = vmatprep.mubr.bf16.mxu1 %v4570_v43  ;;  %v4349_v43 = vld [vmem:[%s3313_s29] sm:$0xf] }
 0x5e3   : > { %10341 = vmatpush1.bf16.msra.mxu0 %v13824_v10  ;;  %10997 = vmatpush1.bf16.msra.mxu1 %v13827_v30  ;;  %v4365_v10 = vsub.s32 3, %v15111_v4  ;;  %v13973_v30 = vmov 1983009808  }
 0x5e4   : > { %10342 = vmatprep.subr.bf16.mxu0 %v13832_v22  ;;  %10998 = vmatprep.subr.bf16.mxu1 %v13835_v44  ;;  %v11046_v22 = vunpack.c.l.s4 %v13973_v30  ;;  %v4354_v44 = vrot.slane %v4349_v43, %v4353_v40 }
 0x5e7   : > { %10343 = vmatpush1.bf16.msra.mxu0 %v13830_v28  ;;  %10999 = vmatpush1.bf16.msra.mxu1 %v13833_v45  ;;  %v4362_v28 = vrot.slane %v4349_v43, %v4361_v42  ;;  %v4358_v45 = vrot.slane %v4349_v43, %v4357_v26 }
 0x5e8   : > { %10344 = vmatprep.subr.bf16.mxu0 %v13838_v46  ;;  %11000 = vmatprep.subr.bf16.mxu1 %v13841_v47  ;;  %v4366_v46 = vrot.slane %v4349_v43, %v4365_v10 }
 0x5eb   : > { %10345 = vmatpush1.bf16.msra.mxu0 %v13836_v48  ;;  %11001 = vmatpush1.bf16.msra.mxu1 %v13839_v49  ;;  %v11047_v49 = vunpack.c.0.s8 %v11046_v22 }
 0x5ec   : > { %10346 = vmatprep.subr.bf16.mxu0 %v13844_v51  ;;  %11002 = vmatprep.subr.bf16.mxu1 %v13847_v53 }
 0x5ef   : > { %10347 = vmatpush1.bf16.msra.mxu0 %v13842_v54  ;;  %11003 = vmatpush1.bf16.msra.mxu1 %v13845_v55 }
 0x5f0   : > { %10348 = vmatprep.subr.bf16.mxu0 %v13850_v41  ;;  %11004 = vmatprep.subr.bf16.mxu1 %v13853_v56 }
 0x5f3   : > { %10349 = vmatpush1.bf16.msra.mxu0 %v13848_v57  ;;  %11005 = vmatpush1.bf16.msra.mxu1 %v13851_v58 }
 0x5f4   : > { %10350 = vmatprep.subr.bf16.mxu0 %v13856_v50  ;;  %11006 = vmatprep.subr.bf16.mxu1 %v13859_v59 }
 0x5f7   : > { %10351 = vmatpush1.bf16.msra.mxu0 %v13854_v60  ;;  %11007 = vmatpush1.bf16.msra.mxu1 %v13857_v18 }
 0x5f8   : > { %10352 = vmatprep.subr.bf16.mxu0 %v13862_v63  ;;  %11008 = vmatprep.subr.bf16.mxu1 %v13865_v0  ;;  %v11050_v0 = vsub.s32 %v11047_v49, %v15111_v4 }
 0x5fb   : > { %10353 = vmatpush1.bf16.msra.mxu0 %v13860_v38  ;;  %11009 = vmatpush1.bf16.msra.mxu1 %v13863_v2 }
 0x5fc   : > { %10354 = vmatprep.subr.bf16.mxu0 %v13868_v5  ;;  %11010 = vmatprep.subr.bf16.mxu1 %v13871_v52 }
 0x5ff   : > { %10355 = vmatpush1.bf16.msra.mxu0 %v13866_v6  ;;  %11011 = vmatpush1.bf16.msra.mxu1 %v13869_v7 }
 0x600   : > { %10356 = vmatprep.subr.bf16.mxu0 %v13874_v61  ;;  %11012 = vmatprep.subr.bf16.mxu1 %v13877_v9 }
 0x603   : > { %10357 = vmatpush1.bf16.msra.mxu0 %v13872_v11  ;;  %11013 = vmatpush1.bf16.msra.mxu1 %v13875_v13 }
 0x604   : > { %10358 = vmatprep.subr.bf16.mxu0 %v13880_v16  ;;  %11014 = vmatprep.subr.bf16.mxu1 %v13883_v17 }
 0x607   : > { %10359 = vmatpush1.bf16.msra.mxu0 %v13878_v20  ;;  %11015 = vmatpush1.bf16.msra.mxu1 %v13881_v1 }
 0x608   : > { %10360 = vmatprep.subr.bf16.mxu0 %v13886_v21  ;;  %11016 = vmatprep.subr.bf16.mxu1 %v13889_v3 }
 0x60b   : > { %10361 = vmatpush1.bf16.msra.mxu0 %v13884_v23  ;;  %11017 = vmatpush1.bf16.msra.mxu1 %v13887_v12 }
 0x60c   : > { %10362 = vmatprep.subr.bf16.mxu0 %v13892_v14  ;;  %11018 = vmatprep.subr.bf16.mxu1 %v13895_v24 }
 0x60f   : > { %10363 = vmatpush1.bf16.msra.mxu0 %v13890_v62  ;;  %11019 = vmatpush1.bf16.msra.mxu1 %v13893_v27 }
 0x610   : > { %10364 = vmatprep.subr.bf16.mxu0 %v13898_v29  ;;  %11020 = vmatprep.subr.bf16.mxu1 %v13901_v8 }
 0x613   : > { %10365 = vmatpush1.bf16.msra.mxu0 %v13896_v31  ;;  %11021 = vmatpush1.bf16.msra.mxu1 %v13899_v32 }
 0x614   : > { %10366 = vmatprep.subr.bf16.mxu0 %v13904_v15  ;;  %11022 = vmatprep.subr.bf16.mxu1 %v13907_v33 }
 0x617   : > { %10367 = vmatpush1.bf16.msra.mxu0 %v13902_v34  ;;  %11023 = vmatpush1.bf16.msra.mxu1 %v13905_v19 }
 0x618   : > { %10368 = vmatprep.subr.bf16.mxu0 %v13910_v25  ;;  %11024 = vmatprep.subr.bf16.mxu1 %v13913_v35 }
 0x61b   : > { %10369 = vmatpush1.bf16.msra.mxu0 %v13908_v36  ;;  %11025 = vmatpush1.bf16.msra.mxu1 %v13911_v37 }
 0x61e   : > { %10371 = vmatmul.mubr.bf16.vlgmr.msra.gmra.mrb[0].mxu0 %v4568_v39  ;;  %11027 = vmatmul.mubr.bf16.vlgmr.msra.gmra.mrb[0].mxu1 %v4568_v39 }
 0x6f1   : > { %v10372_v47 = vpop.f32.mrb[0].mxu0  ;;  %v11028_v48 = vpop.f32.mrb[0].mxu1 }
 0x6f2   : > { %v12192_v51 = vadd.f32 %v10372_v47, %v4354_v44  ;;  %v12194_v53 = vadd.f32 %v11028_v48, %v4362_v28  ;;  %v10374_v54 = vpop.f32.mrb[1].mxu0  ;;  %v11030_v55 = vpop.f32.mrb[1].mxu1 }
 0x6f3   : > { %v12193_v41 = vadd.f32 %v10374_v54, %v4358_v45  ;;  %v12195_v56 = vadd.f32 %v11030_v55, %v4366_v46  ;;  %v10376_v57 = vpop.f32.mrb[2].mxu0  ;;  %v11032_v58 = vpop.f32.mrb[2].mxu1 }
 0x6f4   : > { %v11035_v50 = vmax.f32 %v12192_v51, 0.0  ;;  %v11037_v59 = vmax.f32 %v12194_v53, 0.0  ;;  %v10377_v60 = vpop.f32.mrb[3].mxu0  ;;  %v11033_v18 = vpop.f32.mrb[3].mxu1 }
 0x6f5   : > { %v11036_v63 = vmax.f32 %v12193_v41, 0.0  ;;  %v11038_v38 = vmax.f32 %v12195_v56, 0.0 }
 0x6f7   : > { %v11043_v2 = vcombine.low %v11035_v50, %v11036_v63  ;;  %v11044_v5 = vcombine.low %v11037_v59, %v11038_v38 }
 0x6f9   : > { %v11051_v52 = vrot.slane %v11043_v2, %v11050_v0  ;;  %v11058_v6 = vrot.slane %v11044_v5, %v11050_v0 }
 0x6fb   : > { %v11059_v7 = vcombine.low %v11051_v52, %v11058_v6 }
 0x6fd   : > { %11061 = vst [vmem:[%s3319_s4] sm:$0xff] %v11059_v7 }
 0x6fe PF: > { %p10_p11 = scmp.ge.s32.totalorder %s14011_s16, 6   ;;  %s16362_s12 = smov %s13950_s13 }
 0x6ff   : > { %s16363_s13 = smov %s14020_s19  ;;  %s16364_s14 = smov %s14011_s16 }
 0x700   :  { %12 = sbr.rel (!%p10_p11) target bundleno = 2 (0x2), region = 120 }

</bundles_post_ra>
